<compile_context>
chip_gen: v5e
topology: v5e:2x2
jax: 0.10.0
libtpu: 0.0.40
codegen_flags: <defaults>
</compile_context>

<pallas_src>
import functools

import jax
import jax.numpy as jnp
from jax.experimental import pallas as pl
from jax.experimental.pallas import tpu as pltpu


def _encoder_lstm_kernel(*refs, seq_len, batch, hidden_dim, num_layers):
    """Fused 3-layer LSTM forward, single invocation (no grid).

    refs layout:
      refs[0]                      : x_ref   (T, B, F)
      refs[1 + 3*l + 0]            : wih_ref (4, D_in_l, H)   per-gate input weights
      refs[1 + 3*l + 1]            : whh_ref (4, H, H)        per-gate recurrent weights
      refs[1 + 3*l + 2]            : b_ref   (4, 1, H)        per-gate bias (b_ih + b_hh)
      refs[1 + 3*num_layers + 0]   : y_ref   (T, B, H)        last-layer outputs (time-major)
      refs[1 + 3*num_layers + 1]   : h_ref   (L, B, H)        final hidden per layer
      refs[1 + 3*num_layers + 2]   : c_ref   (L, B, H)        final cell per layer
    """
    T, B, H = seq_len, batch, hidden_dim
    f32 = jnp.float32

    x_ref = refs[0]
    w_refs = refs[1:1 + 3 * num_layers]
    y_ref, h_ref, c_ref = refs[1 + 3 * num_layers:]

    # Per-timestep inputs of the current layer as (B, D_in) values
    # (static leading-dim indexing of the VMEM ref; no per-step DMA).
    xs = [x_ref[t] for t in range(T)]

    for l in range(num_layers):
        wih_ref = w_refs[3 * l + 0]
        whh_ref = w_refs[3 * l + 1]
        b_ref = w_refs[3 * l + 2]

        # Per-gate weights (tiny; live in vregs / spill to VMEM as needed).
        wih = [wih_ref[g] for g in range(4)]   # (D_in, H)
        whh = [whh_ref[g] for g in range(4)]   # (H, H)
        bias = [b_ref[g] for g in range(4)]    # (1, H)

        # Hoisted input projections: no time dependence -> computed for all
        # timesteps up front, off the recurrent critical path.
        gx = [[jnp.dot(xs[t], wih[g], preferred_element_type=f32) + bias[g]
               for g in range(4)]
              for t in range(T)]

        h = jnp.zeros((B, H), f32)
        c = jnp.zeros((B, H), f32)
        ys = []
        for t in range(T):  # fully unrolled recurrence
            gi = gx[t][0] + jnp.dot(h, whh[0], preferred_element_type=f32)
            gf = gx[t][1] + jnp.dot(h, whh[1], preferred_element_type=f32)
            gg = gx[t][2] + jnp.dot(h, whh[2], preferred_element_type=f32)
            go = gx[t][3] + jnp.dot(h, whh[3], preferred_element_type=f32)

            i_t = jax.nn.sigmoid(gi)
            f_t = jax.nn.sigmoid(gf)
            g_t = jnp.tanh(gg)
            o_t = jax.nn.sigmoid(go)

            c = f_t * c + i_t * g_t
            h = o_t * jnp.tanh(c)
            ys.append(h)

        # Final (h, c) of this layer written exactly once.
        h_ref[l] = h
        c_ref[l] = c

        xs = ys  # next layer's per-timestep inputs
        # TODO(synk): training-mode inter-layer dropout (p=0.35) omitted.

    # Single bulk store of the last layer's outputs (one HBM writeback DMA).
    y_ref[...] = jnp.stack(xs, axis=0)


def encoder_pallas(x_tm, params, hidden_dim):
    """x_tm: (T, B, F) f32, params: list of (wih (4,D_in,H), whh (4,H,H), b (4,1,H))."""
    T, B, F = x_tm.shape
    H = hidden_dim
    L = len(params)

    kernel = functools.partial(
        _encoder_lstm_kernel,
        seq_len=T, batch=B, hidden_dim=H, num_layers=L)

    flat_inputs = [x_tm]
    for (wih, whh, b) in params:
        flat_inputs += [wih, whh, b]

    vmem_spec = lambda: pl.BlockSpec(memory_space=pltpu.MemorySpace.VMEM)

    y_tm, h_last, c_last = pl.pallas_call(
        kernel,
        out_shape=(
            jax.ShapeDtypeStruct((T, B, H), jnp.float32),
            jax.ShapeDtypeStruct((L, B, H), jnp.float32),
            jax.ShapeDtypeStruct((L, B, H), jnp.float32),
        ),
        in_specs=[vmem_spec() for _ in flat_inputs],
        out_specs=(vmem_spec(), vmem_spec(), vmem_spec()),
    )(*flat_inputs)
    return y_tm, h_last, c_last


def encoder_forward(x, params, seq_len, n_features, hidden_dim, num_layers=3):
    """Mirrors Encoder.forward (eval semantics).

    x: any shape reshapeable to (-1, seq_len, n_features), batch-first.
    Returns (outputs (B, T, H), hidden (L, B, H), cell (L, B, H)).
    """
    del num_layers  # implied by len(params)
    x = x.reshape((-1, seq_len, n_features)).astype(jnp.float32)  # (B, T, F)
    x_tm = jnp.transpose(x, (1, 0, 2))                            # (T, B, F)
    y_tm, hidden, cell = encoder_pallas(x_tm, params, hidden_dim)
    outputs = jnp.transpose(y_tm, (1, 0, 2))                      # (B, T, H)
    return outputs, hidden, cell


def to_kernel_layout(w_ih, w_hh, b_ih, b_hh, hidden_dim):
    """Convert PyTorch-layout LSTM weights to the kernel's per-gate layout.

    PyTorch: w_ih (4H, D_in), w_hh (4H, H), b_ih/b_hh (4H,), gate order i,f,g,o.
    Kernel : wih (4, D_in, H), whh (4, H, H), bias (4, 1, H) with bias = b_ih + b_hh.
    """
    H = hidden_dim
    d_in = w_ih.shape[1]
    wih = jnp.transpose(w_ih.reshape(4, H, d_in), (0, 2, 1))
    whh = jnp.transpose(w_hh.reshape(4, H, H), (0, 2, 1))
    bias = (b_ih + b_hh).reshape(4, 1, H)
    return wih, whh, bias


def init_params(key, n_features, hidden_dim, num_layers=3):
    """PyTorch-style uniform(-1/sqrt(H), 1/sqrt(H)) init, converted to kernel layout."""
    params = []
    bound = 1.0 / float(jnp.sqrt(jnp.float32(hidden_dim)))
    for l in range(num_layers):
        d_in = n_features if l == 0 else hidden_dim
        key, k1, k2, k3, k4 = jax.random.split(key, 5)
        w_ih = jax.random.uniform(k1, (4 * hidden_dim, d_in), jnp.float32, -bound, bound)
        w_hh = jax.random.uniform(k2, (4 * hidden_dim, hidden_dim), jnp.float32, -bound, bound)
        b_ih = jax.random.uniform(k3, (4 * hidden_dim,), jnp.float32, -bound, bound)
        b_hh = jax.random.uniform(k4, (4 * hidden_dim,), jnp.float32, -bound, bound)
        params.append(to_kernel_layout(w_ih, w_hh, b_ih, b_hh, hidden_dim))
    return params


def encoder_reference(x, params, seq_len, n_features, hidden_dim):
    """Pure-JAX reference (same math, HIGHEST-precision dots) for validation."""
    hp = jax.lax.Precision.HIGHEST
    x = x.reshape((-1, seq_len, n_features)).astype(jnp.float32)  # (B, T, F)
    B, H = x.shape[0], hidden_dim
    layer_in = x
    hiddens, cells = [], []
    for (wih, whh, bias) in params:
        h = jnp.zeros((B, H), jnp.float32)
        c = jnp.zeros((B, H), jnp.float32)
        outs = []
        for t in range(seq_len):
            x_t = layer_in[:, t, :]
            g = [jnp.dot(x_t, wih[k], precision=hp)
                 + jnp.dot(h, whh[k], precision=hp) + bias[k] for k in range(4)]
            i_t = jax.nn.sigmoid(g[0])
            f_t = jax.nn.sigmoid(g[1])
            g_t = jnp.tanh(g[2])
            o_t = jax.nn.sigmoid(g[3])
            c = f_t * c + i_t * g_t
            h = o_t * jnp.tanh(c)
            outs.append(h)
        layer_in = jnp.stack(outs, axis=1)  # (B, T, H)
        hiddens.append(h)
        cells.append(c)
    return layer_in, jnp.stack(hiddens, 0), jnp.stack(cells, 0)


if __name__ == "__main__":
    SEQ_LEN = 8
    N_FEATURES = 4
    EMBEDDING_DIM = 32   # hidden_dim == embedding_dim in the module
    BATCH = 2
    NUM_LAYERS = 3

    key = jax.random.PRNGKey(0)
    key, kx = jax.random.split(key)
    x = jax.random.normal(kx, (BATCH, SEQ_LEN, N_FEATURES), jnp.float32)
    params = init_params(key, N_FEATURES, EMBEDDING_DIM, num_layers=NUM_LAYERS)

    fwd = jax.jit(encoder_forward, static_argnums=(2, 3, 4, 5))
    outputs, hidden, cell = fwd(x, params, SEQ_LEN, N_FEATURES, EMBEDDING_DIM, NUM_LAYERS)
    jax.block_until_ready((outputs, hidden, cell))

    assert outputs.shape == (BATCH, SEQ_LEN, EMBEDDING_DIM)
    assert hidden.shape == (NUM_LAYERS, BATCH, EMBEDDING_DIM)
    assert cell.shape == (NUM_LAYERS, BATCH, EMBEDDING_DIM)

    # Numerical check against pure-JAX reference.
    ref_y, ref_h, ref_c = encoder_reference(x, params, SEQ_LEN, N_FEATURES, EMBEDDING_DIM)
    assert jnp.allclose(outputs, ref_y, atol=1e-4, rtol=1e-4)
    assert jnp.allclose(hidden, ref_h, atol=1e-4, rtol=1e-4)
    assert jnp.allclose(cell, ref_c, atol=1e-4, rtol=1e-4)

    print("KERNEL_OK")
</pallas_src>

<mosaic_0001>
module attributes {stable_mosaic.version = 11 : i64} {
  func.func @_encoder_lstm_kernel(%arg0: memref<8x2x4xf32, #tpu.memory_space<vmem>>, %arg1: memref<4x4x32xf32, #tpu.memory_space<vmem>>, %arg2: memref<4x32x32xf32, #tpu.memory_space<vmem>>, %arg3: memref<4x1x32xf32, #tpu.memory_space<vmem>>, %arg4: memref<4x32x32xf32, #tpu.memory_space<vmem>>, %arg5: memref<4x32x32xf32, #tpu.memory_space<vmem>>, %arg6: memref<4x1x32xf32, #tpu.memory_space<vmem>>, %arg7: memref<4x32x32xf32, #tpu.memory_space<vmem>>, %arg8: memref<4x32x32xf32, #tpu.memory_space<vmem>>, %arg9: memref<4x1x32xf32, #tpu.memory_space<vmem>>, %arg10: memref<8x2x32xf32, #tpu.memory_space<vmem>>, %arg11: memref<3x2x32xf32, #tpu.memory_space<vmem>>, %arg12: memref<3x2x32xf32, #tpu.memory_space<vmem>>) attributes {dimension_semantics = [], scalar_prefetch = 0 : i64, scratch_operands = 0 : i64, tpu.core_type = #tpu.core_type<tc>} {
    %c0 = arith.constant 0 : index
    %c0_0 = arith.constant 0 : index
    %c0_1 = arith.constant 0 : index
    %0 = vector.load %arg0[%c0, %c0_0, %c0_1] : memref<8x2x4xf32, #tpu.memory_space<vmem>>, vector<1x2x4xf32>
    %1 = vector.shape_cast %0 : vector<1x2x4xf32> to vector<2x4xf32>
    %c1 = arith.constant 1 : index
    %c0_2 = arith.constant 0 : index
    %c0_3 = arith.constant 0 : index
    %2 = vector.load %arg0[%c1, %c0_2, %c0_3] : memref<8x2x4xf32, #tpu.memory_space<vmem>>, vector<1x2x4xf32>
    %3 = vector.shape_cast %2 : vector<1x2x4xf32> to vector<2x4xf32>
    %c2 = arith.constant 2 : index
    %c0_4 = arith.constant 0 : index
    %c0_5 = arith.constant 0 : index
    %4 = vector.load %arg0[%c2, %c0_4, %c0_5] : memref<8x2x4xf32, #tpu.memory_space<vmem>>, vector<1x2x4xf32>
    %5 = vector.shape_cast %4 : vector<1x2x4xf32> to vector<2x4xf32>
    %c3 = arith.constant 3 : index
    %c0_6 = arith.constant 0 : index
    %c0_7 = arith.constant 0 : index
    %6 = vector.load %arg0[%c3, %c0_6, %c0_7] : memref<8x2x4xf32, #tpu.memory_space<vmem>>, vector<1x2x4xf32>
    %7 = vector.shape_cast %6 : vector<1x2x4xf32> to vector<2x4xf32>
    %c4 = arith.constant 4 : index
    %c0_8 = arith.constant 0 : index
    %c0_9 = arith.constant 0 : index
    %8 = vector.load %arg0[%c4, %c0_8, %c0_9] : memref<8x2x4xf32, #tpu.memory_space<vmem>>, vector<1x2x4xf32>
    %9 = vector.shape_cast %8 : vector<1x2x4xf32> to vector<2x4xf32>
    %c5 = arith.constant 5 : index
    %c0_10 = arith.constant 0 : index
    %c0_11 = arith.constant 0 : index
    %10 = vector.load %arg0[%c5, %c0_10, %c0_11] : memref<8x2x4xf32, #tpu.memory_space<vmem>>, vector<1x2x4xf32>
    %11 = vector.shape_cast %10 : vector<1x2x4xf32> to vector<2x4xf32>
    %c6 = arith.constant 6 : index
    %c0_12 = arith.constant 0 : index
    %c0_13 = arith.constant 0 : index
    %12 = vector.load %arg0[%c6, %c0_12, %c0_13] : memref<8x2x4xf32, #tpu.memory_space<vmem>>, vector<1x2x4xf32>
    %13 = vector.shape_cast %12 : vector<1x2x4xf32> to vector<2x4xf32>
    %c7 = arith.constant 7 : index
    %c0_14 = arith.constant 0 : index
    %c0_15 = arith.constant 0 : index
    %14 = vector.load %arg0[%c7, %c0_14, %c0_15] : memref<8x2x4xf32, #tpu.memory_space<vmem>>, vector<1x2x4xf32>
    %15 = vector.shape_cast %14 : vector<1x2x4xf32> to vector<2x4xf32>
    %c0_16 = arith.constant 0 : index
    %c0_17 = arith.constant 0 : index
    %c0_18 = arith.constant 0 : index
    %16 = vector.load %arg1[%c0_16, %c0_17, %c0_18] : memref<4x4x32xf32, #tpu.memory_space<vmem>>, vector<1x4x32xf32>
    %17 = vector.shape_cast %16 : vector<1x4x32xf32> to vector<4x32xf32>
    %c1_19 = arith.constant 1 : index
    %c0_20 = arith.constant 0 : index
    %c0_21 = arith.constant 0 : index
    %18 = vector.load %arg1[%c1_19, %c0_20, %c0_21] : memref<4x4x32xf32, #tpu.memory_space<vmem>>, vector<1x4x32xf32>
    %19 = vector.shape_cast %18 : vector<1x4x32xf32> to vector<4x32xf32>
    %c2_22 = arith.constant 2 : index
    %c0_23 = arith.constant 0 : index
    %c0_24 = arith.constant 0 : index
    %20 = vector.load %arg1[%c2_22, %c0_23, %c0_24] : memref<4x4x32xf32, #tpu.memory_space<vmem>>, vector<1x4x32xf32>
    %21 = vector.shape_cast %20 : vector<1x4x32xf32> to vector<4x32xf32>
    %c3_25 = arith.constant 3 : index
    %c0_26 = arith.constant 0 : index
    %c0_27 = arith.constant 0 : index
    %22 = vector.load %arg1[%c3_25, %c0_26, %c0_27] : memref<4x4x32xf32, #tpu.memory_space<vmem>>, vector<1x4x32xf32>
    %23 = vector.shape_cast %22 : vector<1x4x32xf32> to vector<4x32xf32>
    %c0_28 = arith.constant 0 : index
    %c0_29 = arith.constant 0 : index
    %c0_30 = arith.constant 0 : index
    %24 = vector.load %arg2[%c0_28, %c0_29, %c0_30] : memref<4x32x32xf32, #tpu.memory_space<vmem>>, vector<1x32x32xf32>
    %25 = vector.shape_cast %24 : vector<1x32x32xf32> to vector<32x32xf32>
    %c1_31 = arith.constant 1 : index
    %c0_32 = arith.constant 0 : index
    %c0_33 = arith.constant 0 : index
    %26 = vector.load %arg2[%c1_31, %c0_32, %c0_33] : memref<4x32x32xf32, #tpu.memory_space<vmem>>, vector<1x32x32xf32>
    %27 = vector.shape_cast %26 : vector<1x32x32xf32> to vector<32x32xf32>
    %c2_34 = arith.constant 2 : index
    %c0_35 = arith.constant 0 : index
    %c0_36 = arith.constant 0 : index
    %28 = vector.load %arg2[%c2_34, %c0_35, %c0_36] : memref<4x32x32xf32, #tpu.memory_space<vmem>>, vector<1x32x32xf32>
    %29 = vector.shape_cast %28 : vector<1x32x32xf32> to vector<32x32xf32>
    %c3_37 = arith.constant 3 : index
    %c0_38 = arith.constant 0 : index
    %c0_39 = arith.constant 0 : index
    %30 = vector.load %arg2[%c3_37, %c0_38, %c0_39] : memref<4x32x32xf32, #tpu.memory_space<vmem>>, vector<1x32x32xf32>
    %31 = vector.shape_cast %30 : vector<1x32x32xf32> to vector<32x32xf32>
    %c0_40 = arith.constant 0 : index
    %c0_41 = arith.constant 0 : index
    %c0_42 = arith.constant 0 : index
    %32 = vector.load %arg3[%c0_40, %c0_41, %c0_42] : memref<4x1x32xf32, #tpu.memory_space<vmem>>, vector<1x1x32xf32>
    %33 = vector.shape_cast %32 : vector<1x1x32xf32> to vector<1x32xf32>
    %c1_43 = arith.constant 1 : index
    %c0_44 = arith.constant 0 : index
    %c0_45 = arith.constant 0 : index
    %34 = vector.load %arg3[%c1_43, %c0_44, %c0_45] : memref<4x1x32xf32, #tpu.memory_space<vmem>>, vector<1x1x32xf32>
    %35 = vector.shape_cast %34 : vector<1x1x32xf32> to vector<1x32xf32>
    %c2_46 = arith.constant 2 : index
    %c0_47 = arith.constant 0 : index
    %c0_48 = arith.constant 0 : index
    %36 = vector.load %arg3[%c2_46, %c0_47, %c0_48] : memref<4x1x32xf32, #tpu.memory_space<vmem>>, vector<1x1x32xf32>
    %37 = vector.shape_cast %36 : vector<1x1x32xf32> to vector<1x32xf32>
    %c3_49 = arith.constant 3 : index
    %c0_50 = arith.constant 0 : index
    %c0_51 = arith.constant 0 : index
    %38 = vector.load %arg3[%c3_49, %c0_50, %c0_51] : memref<4x1x32xf32, #tpu.memory_space<vmem>>, vector<1x1x32xf32>
    %39 = vector.shape_cast %38 : vector<1x1x32xf32> to vector<1x32xf32>
    %cst = arith.constant dense<0.000000e+00> : vector<2x32xf32>
    %40 = tpu.matmul %1, %17, %cst {dimension_numbers = #tpu.dot_dimension_numbers<[1], [0], [0], [1], [0, 0, 1, 1], [], []>} : vector<2x4xf32>, vector<4x32xf32>, vector<2x32xf32> -> vector<2x32xf32>
    %41 = vector.broadcast %33 : vector<1x32xf32> to vector<2x32xf32>
    %42 = arith.addf %40, %41 : vector<2x32xf32>
    %cst_52 = arith.constant dense<0.000000e+00> : vector<2x32xf32>
    %43 = tpu.matmul %1, %19, %cst_52 {dimension_numbers = #tpu.dot_dimension_numbers<[1], [0], [0], [1], [0, 0, 1, 1], [], []>} : vector<2x4xf32>, vector<4x32xf32>, vector<2x32xf32> -> vector<2x32xf32>
    %44 = vector.broadcast %35 : vector<1x32xf32> to vector<2x32xf32>
    %45 = arith.addf %43, %44 : vector<2x32xf32>
    %cst_53 = arith.constant dense<0.000000e+00> : vector<2x32xf32>
    %46 = tpu.matmul %1, %21, %cst_53 {dimension_numbers = #tpu.dot_dimension_numbers<[1], [0], [0], [1], [0, 0, 1, 1], [], []>} : vector<2x4xf32>, vector<4x32xf32>, vector<2x32xf32> -> vector<2x32xf32>
    %47 = vector.broadcast %37 : vector<1x32xf32> to vector<2x32xf32>
    %48 = arith.addf %46, %47 : vector<2x32xf32>
    %cst_54 = arith.constant dense<0.000000e+00> : vector<2x32xf32>
    %49 = tpu.matmul %1, %23, %cst_54 {dimension_numbers = #tpu.dot_dimension_numbers<[1], [0], [0], [1], [0, 0, 1, 1], [], []>} : vector<2x4xf32>, vector<4x32xf32>, vector<2x32xf32> -> vector<2x32xf32>
    %50 = vector.broadcast %39 : vector<1x32xf32> to vector<2x32xf32>
    %51 = arith.addf %49, %50 : vector<2x32xf32>
    %cst_55 = arith.constant dense<0.000000e+00> : vector<2x32xf32>
    %52 = tpu.matmul %3, %17, %cst_55 {dimension_numbers = #tpu.dot_dimension_numbers<[1], [0], [0], [1], [0, 0, 1, 1], [], []>} : vector<2x4xf32>, vector<4x32xf32>, vector<2x32xf32> -> vector<2x32xf32>
    %53 = vector.broadcast %33 : vector<1x32xf32> to vector<2x32xf32>
    %54 = arith.addf %52, %53 : vector<2x32xf32>
    %cst_56 = arith.constant dense<0.000000e+00> : vector<2x32xf32>
    %55 = tpu.matmul %3, %19, %cst_56 {dimension_numbers = #tpu.dot_dimension_numbers<[1], [0], [0], [1], [0, 0, 1, 1], [], []>} : vector<2x4xf32>, vector<4x32xf32>, vector<2x32xf32> -> vector<2x32xf32>
    %56 = vector.broadcast %35 : vector<1x32xf32> to vector<2x32xf32>
    %57 = arith.addf %55, %56 : vector<2x32xf32>
    %cst_57 = arith.constant dense<0.000000e+00> : vector<2x32xf32>
    %58 = tpu.matmul %3, %21, %cst_57 {dimension_numbers = #tpu.dot_dimension_numbers<[1], [0], [0], [1], [0, 0, 1, 1], [], []>} : vector<2x4xf32>, vector<4x32xf32>, vector<2x32xf32> -> vector<2x32xf32>
    %59 = vector.broadcast %37 : vector<1x32xf32> to vector<2x32xf32>
    %60 = arith.addf %58, %59 : vector<2x32xf32>
    %cst_58 = arith.constant dense<0.000000e+00> : vector<2x32xf32>
    %61 = tpu.matmul %3, %23, %cst_58 {dimension_numbers = #tpu.dot_dimension_numbers<[1], [0], [0], [1], [0, 0, 1, 1], [], []>} : vector<2x4xf32>, vector<4x32xf32>, vector<2x32xf32> -> vector<2x32xf32>
    %62 = vector.broadcast %39 : vector<1x32xf32> to vector<2x32xf32>
    %63 = arith.addf %61, %62 : vector<2x32xf32>
    %cst_59 = arith.constant dense<0.000000e+00> : vector<2x32xf32>
    %64 = tpu.matmul %5, %17, %cst_59 {dimension_numbers = #tpu.dot_dimension_numbers<[1], [0], [0], [1], [0, 0, 1, 1], [], []>} : vector<2x4xf32>, vector<4x32xf32>, vector<2x32xf32> -> vector<2x32xf32>
    %65 = vector.broadcast %33 : vector<1x32xf32> to vector<2x32xf32>
    %66 = arith.addf %64, %65 : vector<2x32xf32>
    %cst_60 = arith.constant dense<0.000000e+00> : vector<2x32xf32>
    %67 = tpu.matmul %5, %19, %cst_60 {dimension_numbers = #tpu.dot_dimension_numbers<[1], [0], [0], [1], [0, 0, 1, 1], [], []>} : vector<2x4xf32>, vector<4x32xf32>, vector<2x32xf32> -> vector<2x32xf32>
    %68 = vector.broadcast %35 : vector<1x32xf32> to vector<2x32xf32>
    %69 = arith.addf %67, %68 : vector<2x32xf32>
    %cst_61 = arith.constant dense<0.000000e+00> : vector<2x32xf32>
    %70 = tpu.matmul %5, %21, %cst_61 {dimension_numbers = #tpu.dot_dimension_numbers<[1], [0], [0], [1], [0, 0, 1, 1], [], []>} : vector<2x4xf32>, vector<4x32xf32>, vector<2x32xf32> -> vector<2x32xf32>
    %71 = vector.broadcast %37 : vector<1x32xf32> to vector<2x32xf32>
    %72 = arith.addf %70, %71 : vector<2x32xf32>
    %cst_62 = arith.constant dense<0.000000e+00> : vector<2x32xf32>
    %73 = tpu.matmul %5, %23, %cst_62 {dimension_numbers = #tpu.dot_dimension_numbers<[1], [0], [0], [1], [0, 0, 1, 1], [], []>} : vector<2x4xf32>, vector<4x32xf32>, vector<2x32xf32> -> vector<2x32xf32>
    %74 = vector.broadcast %39 : vector<1x32xf32> to vector<2x32xf32>
    %75 = arith.addf %73, %74 : vector<2x32xf32>
    %cst_63 = arith.constant dense<0.000000e+00> : vector<2x32xf32>
    %76 = tpu.matmul %7, %17, %cst_63 {dimension_numbers = #tpu.dot_dimension_numbers<[1], [0], [0], [1], [0, 0, 1, 1], [], []>} : vector<2x4xf32>, vector<4x32xf32>, vector<2x32xf32> -> vector<2x32xf32>
    %77 = vector.broadcast %33 : vector<1x32xf32> to vector<2x32xf32>
    %78 = arith.addf %76, %77 : vector<2x32xf32>
    %cst_64 = arith.constant dense<0.000000e+00> : vector<2x32xf32>
    %79 = tpu.matmul %7, %19, %cst_64 {dimension_numbers = #tpu.dot_dimension_numbers<[1], [0], [0], [1], [0, 0, 1, 1], [], []>} : vector<2x4xf32>, vector<4x32xf32>, vector<2x32xf32> -> vector<2x32xf32>
    %80 = vector.broadcast %35 : vector<1x32xf32> to vector<2x32xf32>
    %81 = arith.addf %79, %80 : vector<2x32xf32>
    %cst_65 = arith.constant dense<0.000000e+00> : vector<2x32xf32>
    %82 = tpu.matmul %7, %21, %cst_65 {dimension_numbers = #tpu.dot_dimension_numbers<[1], [0], [0], [1], [0, 0, 1, 1], [], []>} : vector<2x4xf32>, vector<4x32xf32>, vector<2x32xf32> -> vector<2x32xf32>
    %83 = vector.broadcast %37 : vector<1x32xf32> to vector<2x32xf32>
    %84 = arith.addf %82, %83 : vector<2x32xf32>
    %cst_66 = arith.constant dense<0.000000e+00> : vector<2x32xf32>
    %85 = tpu.matmul %7, %23, %cst_66 {dimension_numbers = #tpu.dot_dimension_numbers<[1], [0], [0], [1], [0, 0, 1, 1], [], []>} : vector<2x4xf32>, vector<4x32xf32>, vector<2x32xf32> -> vector<2x32xf32>
    %86 = vector.broadcast %39 : vector<1x32xf32> to vector<2x32xf32>
    %87 = arith.addf %85, %86 : vector<2x32xf32>
    %cst_67 = arith.constant dense<0.000000e+00> : vector<2x32xf32>
    %88 = tpu.matmul %9, %17, %cst_67 {dimension_numbers = #tpu.dot_dimension_numbers<[1], [0], [0], [1], [0, 0, 1, 1], [], []>} : vector<2x4xf32>, vector<4x32xf32>, vector<2x32xf32> -> vector<2x32xf32>
    %89 = vector.broadcast %33 : vector<1x32xf32> to vector<2x32xf32>
    %90 = arith.addf %88, %89 : vector<2x32xf32>
    %cst_68 = arith.constant dense<0.000000e+00> : vector<2x32xf32>
    %91 = tpu.matmul %9, %19, %cst_68 {dimension_numbers = #tpu.dot_dimension_numbers<[1], [0], [0], [1], [0, 0, 1, 1], [], []>} : vector<2x4xf32>, vector<4x32xf32>, vector<2x32xf32> -> vector<2x32xf32>
    %92 = vector.broadcast %35 : vector<1x32xf32> to vector<2x32xf32>
    %93 = arith.addf %91, %92 : vector<2x32xf32>
    %cst_69 = arith.constant dense<0.000000e+00> : vector<2x32xf32>
    %94 = tpu.matmul %9, %21, %cst_69 {dimension_numbers = #tpu.dot_dimension_numbers<[1], [0], [0], [1], [0, 0, 1, 1], [], []>} : vector<2x4xf32>, vector<4x32xf32>, vector<2x32xf32> -> vector<2x32xf32>
    %95 = vector.broadcast %37 : vector<1x32xf32> to vector<2x32xf32>
    %96 = arith.addf %94, %95 : vector<2x32xf32>
    %cst_70 = arith.constant dense<0.000000e+00> : vector<2x32xf32>
    %97 = tpu.matmul %9, %23, %cst_70 {dimension_numbers = #tpu.dot_dimension_numbers<[1], [0], [0], [1], [0, 0, 1, 1], [], []>} : vector<2x4xf32>, vector<4x32xf32>, vector<2x32xf32> -> vector<2x32xf32>
    %98 = vector.broadcast %39 : vector<1x32xf32> to vector<2x32xf32>
    %99 = arith.addf %97, %98 : vector<2x32xf32>
    %cst_71 = arith.constant dense<0.000000e+00> : vector<2x32xf32>
    %100 = tpu.matmul %11, %17, %cst_71 {dimension_numbers = #tpu.dot_dimension_numbers<[1], [0], [0], [1], [0, 0, 1, 1], [], []>} : vector<2x4xf32>, vector<4x32xf32>, vector<2x32xf32> -> vector<2x32xf32>
    %101 = vector.broadcast %33 : vector<1x32xf32> to vector<2x32xf32>
    %102 = arith.addf %100, %101 : vector<2x32xf32>
    %cst_72 = arith.constant dense<0.000000e+00> : vector<2x32xf32>
    %103 = tpu.matmul %11, %19, %cst_72 {dimension_numbers = #tpu.dot_dimension_numbers<[1], [0], [0], [1], [0, 0, 1, 1], [], []>} : vector<2x4xf32>, vector<4x32xf32>, vector<2x32xf32> -> vector<2x32xf32>
    %104 = vector.broadcast %35 : vector<1x32xf32> to vector<2x32xf32>
    %105 = arith.addf %103, %104 : vector<2x32xf32>
    %cst_73 = arith.constant dense<0.000000e+00> : vector<2x32xf32>
    %106 = tpu.matmul %11, %21, %cst_73 {dimension_numbers = #tpu.dot_dimension_numbers<[1], [0], [0], [1], [0, 0, 1, 1], [], []>} : vector<2x4xf32>, vector<4x32xf32>, vector<2x32xf32> -> vector<2x32xf32>
    %107 = vector.broadcast %37 : vector<1x32xf32> to vector<2x32xf32>
    %108 = arith.addf %106, %107 : vector<2x32xf32>
    %cst_74 = arith.constant dense<0.000000e+00> : vector<2x32xf32>
    %109 = tpu.matmul %11, %23, %cst_74 {dimension_numbers = #tpu.dot_dimension_numbers<[1], [0], [0], [1], [0, 0, 1, 1], [], []>} : vector<2x4xf32>, vector<4x32xf32>, vector<2x32xf32> -> vector<2x32xf32>
    %110 = vector.broadcast %39 : vector<1x32xf32> to vector<2x32xf32>
    %111 = arith.addf %109, %110 : vector<2x32xf32>
    %cst_75 = arith.constant dense<0.000000e+00> : vector<2x32xf32>
    %112 = tpu.matmul %13, %17, %cst_75 {dimension_numbers = #tpu.dot_dimension_numbers<[1], [0], [0], [1], [0, 0, 1, 1], [], []>} : vector<2x4xf32>, vector<4x32xf32>, vector<2x32xf32> -> vector<2x32xf32>
    %113 = vector.broadcast %33 : vector<1x32xf32> to vector<2x32xf32>
    %114 = arith.addf %112, %113 : vector<2x32xf32>
    %cst_76 = arith.constant dense<0.000000e+00> : vector<2x32xf32>
    %115 = tpu.matmul %13, %19, %cst_76 {dimension_numbers = #tpu.dot_dimension_numbers<[1], [0], [0], [1], [0, 0, 1, 1], [], []>} : vector<2x4xf32>, vector<4x32xf32>, vector<2x32xf32> -> vector<2x32xf32>
    %116 = vector.broadcast %35 : vector<1x32xf32> to vector<2x32xf32>
    %117 = arith.addf %115, %116 : vector<2x32xf32>
    %cst_77 = arith.constant dense<0.000000e+00> : vector<2x32xf32>
    %118 = tpu.matmul %13, %21, %cst_77 {dimension_numbers = #tpu.dot_dimension_numbers<[1], [0], [0], [1], [0, 0, 1, 1], [], []>} : vector<2x4xf32>, vector<4x32xf32>, vector<2x32xf32> -> vector<2x32xf32>
    %119 = vector.broadcast %37 : vector<1x32xf32> to vector<2x32xf32>
    %120 = arith.addf %118, %119 : vector<2x32xf32>
    %cst_78 = arith.constant dense<0.000000e+00> : vector<2x32xf32>
    %121 = tpu.matmul %13, %23, %cst_78 {dimension_numbers = #tpu.dot_dimension_numbers<[1], [0], [0], [1], [0, 0, 1, 1], [], []>} : vector<2x4xf32>, vector<4x32xf32>, vector<2x32xf32> -> vector<2x32xf32>
    %122 = vector.broadcast %39 : vector<1x32xf32> to vector<2x32xf32>
    %123 = arith.addf %121, %122 : vector<2x32xf32>
    %cst_79 = arith.constant dense<0.000000e+00> : vector<2x32xf32>
    %124 = tpu.matmul %15, %17, %cst_79 {dimension_numbers = #tpu.dot_dimension_numbers<[1], [0], [0], [1], [0, 0, 1, 1], [], []>} : vector<2x4xf32>, vector<4x32xf32>, vector<2x32xf32> -> vector<2x32xf32>
    %125 = vector.broadcast %33 : vector<1x32xf32> to vector<2x32xf32>
    %126 = arith.addf %124, %125 : vector<2x32xf32>
    %cst_80 = arith.constant dense<0.000000e+00> : vector<2x32xf32>
    %127 = tpu.matmul %15, %19, %cst_80 {dimension_numbers = #tpu.dot_dimension_numbers<[1], [0], [0], [1], [0, 0, 1, 1], [], []>} : vector<2x4xf32>, vector<4x32xf32>, vector<2x32xf32> -> vector<2x32xf32>
    %128 = vector.broadcast %35 : vector<1x32xf32> to vector<2x32xf32>
    %129 = arith.addf %127, %128 : vector<2x32xf32>
    %cst_81 = arith.constant dense<0.000000e+00> : vector<2x32xf32>
    %130 = tpu.matmul %15, %21, %cst_81 {dimension_numbers = #tpu.dot_dimension_numbers<[1], [0], [0], [1], [0, 0, 1, 1], [], []>} : vector<2x4xf32>, vector<4x32xf32>, vector<2x32xf32> -> vector<2x32xf32>
    %131 = vector.broadcast %37 : vector<1x32xf32> to vector<2x32xf32>
    %132 = arith.addf %130, %131 : vector<2x32xf32>
    %cst_82 = arith.constant dense<0.000000e+00> : vector<2x32xf32>
    %133 = tpu.matmul %15, %23, %cst_82 {dimension_numbers = #tpu.dot_dimension_numbers<[1], [0], [0], [1], [0, 0, 1, 1], [], []>} : vector<2x4xf32>, vector<4x32xf32>, vector<2x32xf32> -> vector<2x32xf32>
    %134 = vector.broadcast %39 : vector<1x32xf32> to vector<2x32xf32>
    %135 = arith.addf %133, %134 : vector<2x32xf32>
    %cst_83 = arith.constant 0.000000e+00 : f32
    %136 = vector.broadcast %cst_83 : f32 to vector<2x32xf32>
    %cst_84 = arith.constant 0.000000e+00 : f32
    %137 = vector.broadcast %cst_84 : f32 to vector<2x32xf32>
    %cst_85 = arith.constant dense<0.000000e+00> : vector<2x32xf32>
    %138 = tpu.matmul %136, %25, %cst_85 {dimension_numbers = #tpu.dot_dimension_numbers<[1], [0], [0], [1], [0, 0, 1, 1], [], []>} : vector<2x32xf32>, vector<32x32xf32>, vector<2x32xf32> -> vector<2x32xf32>
    %139 = arith.addf %42, %138 : vector<2x32xf32>
    %cst_86 = arith.constant dense<0.000000e+00> : vector<2x32xf32>
    %140 = tpu.matmul %136, %27, %cst_86 {dimension_numbers = #tpu.dot_dimension_numbers<[1], [0], [0], [1], [0, 0, 1, 1], [], []>} : vector<2x32xf32>, vector<32x32xf32>, vector<2x32xf32> -> vector<2x32xf32>
    %141 = arith.addf %45, %140 : vector<2x32xf32>
    %cst_87 = arith.constant dense<0.000000e+00> : vector<2x32xf32>
    %142 = tpu.matmul %136, %29, %cst_87 {dimension_numbers = #tpu.dot_dimension_numbers<[1], [0], [0], [1], [0, 0, 1, 1], [], []>} : vector<2x32xf32>, vector<32x32xf32>, vector<2x32xf32> -> vector<2x32xf32>
    %143 = arith.addf %48, %142 : vector<2x32xf32>
    %cst_88 = arith.constant dense<0.000000e+00> : vector<2x32xf32>
    %144 = tpu.matmul %136, %31, %cst_88 {dimension_numbers = #tpu.dot_dimension_numbers<[1], [0], [0], [1], [0, 0, 1, 1], [], []>} : vector<2x32xf32>, vector<32x32xf32>, vector<2x32xf32> -> vector<2x32xf32>
    %145 = arith.addf %51, %144 : vector<2x32xf32>
    %146 = arith.negf %139 : vector<2x32xf32>
    %147 = math.exp %146 : vector<2x32xf32>
    %cst_89 = arith.constant 1.000000e+00 : f32
    %148 = vector.broadcast %cst_89 : f32 to vector<2x32xf32>
    %149 = arith.addf %148, %147 : vector<2x32xf32>
    %150 = arith.divf %148, %149 : vector<2x32xf32>
    %151 = arith.negf %141 : vector<2x32xf32>
    %152 = math.exp %151 : vector<2x32xf32>
    %cst_90 = arith.constant 1.000000e+00 : f32
    %153 = vector.broadcast %cst_90 : f32 to vector<2x32xf32>
    %154 = arith.addf %153, %152 : vector<2x32xf32>
    %155 = arith.divf %153, %154 : vector<2x32xf32>
    %156 = math.tanh %143 : vector<2x32xf32>
    %157 = arith.negf %145 : vector<2x32xf32>
    %158 = math.exp %157 : vector<2x32xf32>
    %cst_91 = arith.constant 1.000000e+00 : f32
    %159 = vector.broadcast %cst_91 : f32 to vector<2x32xf32>
    %160 = arith.addf %159, %158 : vector<2x32xf32>
    %161 = arith.divf %159, %160 : vector<2x32xf32>
    %162 = arith.mulf %155, %137 : vector<2x32xf32>
    %163 = arith.mulf %150, %156 : vector<2x32xf32>
    %164 = arith.addf %162, %163 : vector<2x32xf32>
    %165 = math.tanh %164 : vector<2x32xf32>
    %166 = arith.mulf %161, %165 : vector<2x32xf32>
    %cst_92 = arith.constant dense<0.000000e+00> : vector<2x32xf32>
    %167 = tpu.matmul %166, %25, %cst_92 {dimension_numbers = #tpu.dot_dimension_numbers<[1], [0], [0], [1], [0, 0, 1, 1], [], []>} : vector<2x32xf32>, vector<32x32xf32>, vector<2x32xf32> -> vector<2x32xf32>
    %168 = arith.addf %54, %167 : vector<2x32xf32>
    %cst_93 = arith.constant dense<0.000000e+00> : vector<2x32xf32>
    %169 = tpu.matmul %166, %27, %cst_93 {dimension_numbers = #tpu.dot_dimension_numbers<[1], [0], [0], [1], [0, 0, 1, 1], [], []>} : vector<2x32xf32>, vector<32x32xf32>, vector<2x32xf32> -> vector<2x32xf32>
    %170 = arith.addf %57, %169 : vector<2x32xf32>
    %cst_94 = arith.constant dense<0.000000e+00> : vector<2x32xf32>
    %171 = tpu.matmul %166, %29, %cst_94 {dimension_numbers = #tpu.dot_dimension_numbers<[1], [0], [0], [1], [0, 0, 1, 1], [], []>} : vector<2x32xf32>, vector<32x32xf32>, vector<2x32xf32> -> vector<2x32xf32>
    %172 = arith.addf %60, %171 : vector<2x32xf32>
    %cst_95 = arith.constant dense<0.000000e+00> : vector<2x32xf32>
    %173 = tpu.matmul %166, %31, %cst_95 {dimension_numbers = #tpu.dot_dimension_numbers<[1], [0], [0], [1], [0, 0, 1, 1], [], []>} : vector<2x32xf32>, vector<32x32xf32>, vector<2x32xf32> -> vector<2x32xf32>
    %174 = arith.addf %63, %173 : vector<2x32xf32>
    %175 = arith.negf %168 : vector<2x32xf32>
    %176 = math.exp %175 : vector<2x32xf32>
    %cst_96 = arith.constant 1.000000e+00 : f32
    %177 = vector.broadcast %cst_96 : f32 to vector<2x32xf32>
    %178 = arith.addf %177, %176 : vector<2x32xf32>
    %179 = arith.divf %177, %178 : vector<2x32xf32>
    %180 = arith.negf %170 : vector<2x32xf32>
    %181 = math.exp %180 : vector<2x32xf32>
    %cst_97 = arith.constant 1.000000e+00 : f32
    %182 = vector.broadcast %cst_97 : f32 to vector<2x32xf32>
    %183 = arith.addf %182, %181 : vector<2x32xf32>
    %184 = arith.divf %182, %183 : vector<2x32xf32>
    %185 = math.tanh %172 : vector<2x32xf32>
    %186 = arith.negf %174 : vector<2x32xf32>
    %187 = math.exp %186 : vector<2x32xf32>
    %cst_98 = arith.constant 1.000000e+00 : f32
    %188 = vector.broadcast %cst_98 : f32 to vector<2x32xf32>
    %189 = arith.addf %188, %187 : vector<2x32xf32>
    %190 = arith.divf %188, %189 : vector<2x32xf32>
    %191 = arith.mulf %184, %164 : vector<2x32xf32>
    %192 = arith.mulf %179, %185 : vector<2x32xf32>
    %193 = arith.addf %191, %192 : vector<2x32xf32>
    %194 = math.tanh %193 : vector<2x32xf32>
    %195 = arith.mulf %190, %194 : vector<2x32xf32>
    %cst_99 = arith.constant dense<0.000000e+00> : vector<2x32xf32>
    %196 = tpu.matmul %195, %25, %cst_99 {dimension_numbers = #tpu.dot_dimension_numbers<[1], [0], [0], [1], [0, 0, 1, 1], [], []>} : vector<2x32xf32>, vector<32x32xf32>, vector<2x32xf32> -> vector<2x32xf32>
    %197 = arith.addf %66, %196 : vector<2x32xf32>
    %cst_100 = arith.constant dense<0.000000e+00> : vector<2x32xf32>
    %198 = tpu.matmul %195, %27, %cst_100 {dimension_numbers = #tpu.dot_dimension_numbers<[1], [0], [0], [1], [0, 0, 1, 1], [], []>} : vector<2x32xf32>, vector<32x32xf32>, vector<2x32xf32> -> vector<2x32xf32>
    %199 = arith.addf %69, %198 : vector<2x32xf32>
    %cst_101 = arith.constant dense<0.000000e+00> : vector<2x32xf32>
    %200 = tpu.matmul %195, %29, %cst_101 {dimension_numbers = #tpu.dot_dimension_numbers<[1], [0], [0], [1], [0, 0, 1, 1], [], []>} : vector<2x32xf32>, vector<32x32xf32>, vector<2x32xf32> -> vector<2x32xf32>
    %201 = arith.addf %72, %200 : vector<2x32xf32>
    %cst_102 = arith.constant dense<0.000000e+00> : vector<2x32xf32>
    %202 = tpu.matmul %195, %31, %cst_102 {dimension_numbers = #tpu.dot_dimension_numbers<[1], [0], [0], [1], [0, 0, 1, 1], [], []>} : vector<2x32xf32>, vector<32x32xf32>, vector<2x32xf32> -> vector<2x32xf32>
    %203 = arith.addf %75, %202 : vector<2x32xf32>
    %204 = arith.negf %197 : vector<2x32xf32>
    %205 = math.exp %204 : vector<2x32xf32>
    %cst_103 = arith.constant 1.000000e+00 : f32
    %206 = vector.broadcast %cst_103 : f32 to vector<2x32xf32>
    %207 = arith.addf %206, %205 : vector<2x32xf32>
    %208 = arith.divf %206, %207 : vector<2x32xf32>
    %209 = arith.negf %199 : vector<2x32xf32>
    %210 = math.exp %209 : vector<2x32xf32>
    %cst_104 = arith.constant 1.000000e+00 : f32
    %211 = vector.broadcast %cst_104 : f32 to vector<2x32xf32>
    %212 = arith.addf %211, %210 : vector<2x32xf32>
    %213 = arith.divf %211, %212 : vector<2x32xf32>
    %214 = math.tanh %201 : vector<2x32xf32>
    %215 = arith.negf %203 : vector<2x32xf32>
    %216 = math.exp %215 : vector<2x32xf32>
    %cst_105 = arith.constant 1.000000e+00 : f32
    %217 = vector.broadcast %cst_105 : f32 to vector<2x32xf32>
    %218 = arith.addf %217, %216 : vector<2x32xf32>
    %219 = arith.divf %217, %218 : vector<2x32xf32>
    %220 = arith.mulf %213, %193 : vector<2x32xf32>
    %221 = arith.mulf %208, %214 : vector<2x32xf32>
    %222 = arith.addf %220, %221 : vector<2x32xf32>
    %223 = math.tanh %222 : vector<2x32xf32>
    %224 = arith.mulf %219, %223 : vector<2x32xf32>
    %cst_106 = arith.constant dense<0.000000e+00> : vector<2x32xf32>
    %225 = tpu.matmul %224, %25, %cst_106 {dimension_numbers = #tpu.dot_dimension_numbers<[1], [0], [0], [1], [0, 0, 1, 1], [], []>} : vector<2x32xf32>, vector<32x32xf32>, vector<2x32xf32> -> vector<2x32xf32>
    %226 = arith.addf %78, %225 : vector<2x32xf32>
    %cst_107 = arith.constant dense<0.000000e+00> : vector<2x32xf32>
    %227 = tpu.matmul %224, %27, %cst_107 {dimension_numbers = #tpu.dot_dimension_numbers<[1], [0], [0], [1], [0, 0, 1, 1], [], []>} : vector<2x32xf32>, vector<32x32xf32>, vector<2x32xf32> -> vector<2x32xf32>
    %228 = arith.addf %81, %227 : vector<2x32xf32>
    %cst_108 = arith.constant dense<0.000000e+00> : vector<2x32xf32>
    %229 = tpu.matmul %224, %29, %cst_108 {dimension_numbers = #tpu.dot_dimension_numbers<[1], [0], [0], [1], [0, 0, 1, 1], [], []>} : vector<2x32xf32>, vector<32x32xf32>, vector<2x32xf32> -> vector<2x32xf32>
    %230 = arith.addf %84, %229 : vector<2x32xf32>
    %cst_109 = arith.constant dense<0.000000e+00> : vector<2x32xf32>
    %231 = tpu.matmul %224, %31, %cst_109 {dimension_numbers = #tpu.dot_dimension_numbers<[1], [0], [0], [1], [0, 0, 1, 1], [], []>} : vector<2x32xf32>, vector<32x32xf32>, vector<2x32xf32> -> vector<2x32xf32>
    %232 = arith.addf %87, %231 : vector<2x32xf32>
    %233 = arith.negf %226 : vector<2x32xf32>
    %234 = math.exp %233 : vector<2x32xf32>
    %cst_110 = arith.constant 1.000000e+00 : f32
    %235 = vector.broadcast %cst_110 : f32 to vector<2x32xf32>
    %236 = arith.addf %235, %234 : vector<2x32xf32>
    %237 = arith.divf %235, %236 : vector<2x32xf32>
    %238 = arith.negf %228 : vector<2x32xf32>
    %239 = math.exp %238 : vector<2x32xf32>
    %cst_111 = arith.constant 1.000000e+00 : f32
    %240 = vector.broadcast %cst_111 : f32 to vector<2x32xf32>
    %241 = arith.addf %240, %239 : vector<2x32xf32>
    %242 = arith.divf %240, %241 : vector<2x32xf32>
    %243 = math.tanh %230 : vector<2x32xf32>
    %244 = arith.negf %232 : vector<2x32xf32>
    %245 = math.exp %244 : vector<2x32xf32>
    %cst_112 = arith.constant 1.000000e+00 : f32
    %246 = vector.broadcast %cst_112 : f32 to vector<2x32xf32>
    %247 = arith.addf %246, %245 : vector<2x32xf32>
    %248 = arith.divf %246, %247 : vector<2x32xf32>
    %249 = arith.mulf %242, %222 : vector<2x32xf32>
    %250 = arith.mulf %237, %243 : vector<2x32xf32>
    %251 = arith.addf %249, %250 : vector<2x32xf32>
    %252 = math.tanh %251 : vector<2x32xf32>
    %253 = arith.mulf %248, %252 : vector<2x32xf32>
    %cst_113 = arith.constant dense<0.000000e+00> : vector<2x32xf32>
    %254 = tpu.matmul %253, %25, %cst_113 {dimension_numbers = #tpu.dot_dimension_numbers<[1], [0], [0], [1], [0, 0, 1, 1], [], []>} : vector<2x32xf32>, vector<32x32xf32>, vector<2x32xf32> -> vector<2x32xf32>
    %255 = arith.addf %90, %254 : vector<2x32xf32>
    %cst_114 = arith.constant dense<0.000000e+00> : vector<2x32xf32>
    %256 = tpu.matmul %253, %27, %cst_114 {dimension_numbers = #tpu.dot_dimension_numbers<[1], [0], [0], [1], [0, 0, 1, 1], [], []>} : vector<2x32xf32>, vector<32x32xf32>, vector<2x32xf32> -> vector<2x32xf32>
    %257 = arith.addf %93, %256 : vector<2x32xf32>
    %cst_115 = arith.constant dense<0.000000e+00> : vector<2x32xf32>
    %258 = tpu.matmul %253, %29, %cst_115 {dimension_numbers = #tpu.dot_dimension_numbers<[1], [0], [0], [1], [0, 0, 1, 1], [], []>} : vector<2x32xf32>, vector<32x32xf32>, vector<2x32xf32> -> vector<2x32xf32>
    %259 = arith.addf %96, %258 : vector<2x32xf32>
    %cst_116 = arith.constant dense<0.000000e+00> : vector<2x32xf32>
    %260 = tpu.matmul %253, %31, %cst_116 {dimension_numbers = #tpu.dot_dimension_numbers<[1], [0], [0], [1], [0, 0, 1, 1], [], []>} : vector<2x32xf32>, vector<32x32xf32>, vector<2x32xf32> -> vector<2x32xf32>
    %261 = arith.addf %99, %260 : vector<2x32xf32>
    %262 = arith.negf %255 : vector<2x32xf32>
    %263 = math.exp %262 : vector<2x32xf32>
    %cst_117 = arith.constant 1.000000e+00 : f32
    %264 = vector.broadcast %cst_117 : f32 to vector<2x32xf32>
    %265 = arith.addf %264, %263 : vector<2x32xf32>
    %266 = arith.divf %264, %265 : vector<2x32xf32>
    %267 = arith.negf %257 : vector<2x32xf32>
    %268 = math.exp %267 : vector<2x32xf32>
    %cst_118 = arith.constant 1.000000e+00 : f32
    %269 = vector.broadcast %cst_118 : f32 to vector<2x32xf32>
    %270 = arith.addf %269, %268 : vector<2x32xf32>
    %271 = arith.divf %269, %270 : vector<2x32xf32>
    %272 = math.tanh %259 : vector<2x32xf32>
    %273 = arith.negf %261 : vector<2x32xf32>
    %274 = math.exp %273 : vector<2x32xf32>
    %cst_119 = arith.constant 1.000000e+00 : f32
    %275 = vector.broadcast %cst_119 : f32 to vector<2x32xf32>
    %276 = arith.addf %275, %274 : vector<2x32xf32>
    %277 = arith.divf %275, %276 : vector<2x32xf32>
    %278 = arith.mulf %271, %251 : vector<2x32xf32>
    %279 = arith.mulf %266, %272 : vector<2x32xf32>
    %280 = arith.addf %278, %279 : vector<2x32xf32>
    %281 = math.tanh %280 : vector<2x32xf32>
    %282 = arith.mulf %277, %281 : vector<2x32xf32>
    %cst_120 = arith.constant dense<0.000000e+00> : vector<2x32xf32>
    %283 = tpu.matmul %282, %25, %cst_120 {dimension_numbers = #tpu.dot_dimension_numbers<[1], [0], [0], [1], [0, 0, 1, 1], [], []>} : vector<2x32xf32>, vector<32x32xf32>, vector<2x32xf32> -> vector<2x32xf32>
    %284 = arith.addf %102, %283 : vector<2x32xf32>
    %cst_121 = arith.constant dense<0.000000e+00> : vector<2x32xf32>
    %285 = tpu.matmul %282, %27, %cst_121 {dimension_numbers = #tpu.dot_dimension_numbers<[1], [0], [0], [1], [0, 0, 1, 1], [], []>} : vector<2x32xf32>, vector<32x32xf32>, vector<2x32xf32> -> vector<2x32xf32>
    %286 = arith.addf %105, %285 : vector<2x32xf32>
    %cst_122 = arith.constant dense<0.000000e+00> : vector<2x32xf32>
    %287 = tpu.matmul %282, %29, %cst_122 {dimension_numbers = #tpu.dot_dimension_numbers<[1], [0], [0], [1], [0, 0, 1, 1], [], []>} : vector<2x32xf32>, vector<32x32xf32>, vector<2x32xf32> -> vector<2x32xf32>
    %288 = arith.addf %108, %287 : vector<2x32xf32>
    %cst_123 = arith.constant dense<0.000000e+00> : vector<2x32xf32>
    %289 = tpu.matmul %282, %31, %cst_123 {dimension_numbers = #tpu.dot_dimension_numbers<[1], [0], [0], [1], [0, 0, 1, 1], [], []>} : vector<2x32xf32>, vector<32x32xf32>, vector<2x32xf32> -> vector<2x32xf32>
    %290 = arith.addf %111, %289 : vector<2x32xf32>
    %291 = arith.negf %284 : vector<2x32xf32>
    %292 = math.exp %291 : vector<2x32xf32>
    %cst_124 = arith.constant 1.000000e+00 : f32
    %293 = vector.broadcast %cst_124 : f32 to vector<2x32xf32>
    %294 = arith.addf %293, %292 : vector<2x32xf32>
    %295 = arith.divf %293, %294 : vector<2x32xf32>
    %296 = arith.negf %286 : vector<2x32xf32>
    %297 = math.exp %296 : vector<2x32xf32>
    %cst_125 = arith.constant 1.000000e+00 : f32
    %298 = vector.broadcast %cst_125 : f32 to vector<2x32xf32>
    %299 = arith.addf %298, %297 : vector<2x32xf32>
    %300 = arith.divf %298, %299 : vector<2x32xf32>
    %301 = math.tanh %288 : vector<2x32xf32>
    %302 = arith.negf %290 : vector<2x32xf32>
    %303 = math.exp %302 : vector<2x32xf32>
    %cst_126 = arith.constant 1.000000e+00 : f32
    %304 = vector.broadcast %cst_126 : f32 to vector<2x32xf32>
    %305 = arith.addf %304, %303 : vector<2x32xf32>
    %306 = arith.divf %304, %305 : vector<2x32xf32>
    %307 = arith.mulf %300, %280 : vector<2x32xf32>
    %308 = arith.mulf %295, %301 : vector<2x32xf32>
    %309 = arith.addf %307, %308 : vector<2x32xf32>
    %310 = math.tanh %309 : vector<2x32xf32>
    %311 = arith.mulf %306, %310 : vector<2x32xf32>
    %cst_127 = arith.constant dense<0.000000e+00> : vector<2x32xf32>
    %312 = tpu.matmul %311, %25, %cst_127 {dimension_numbers = #tpu.dot_dimension_numbers<[1], [0], [0], [1], [0, 0, 1, 1], [], []>} : vector<2x32xf32>, vector<32x32xf32>, vector<2x32xf32> -> vector<2x32xf32>
    %313 = arith.addf %114, %312 : vector<2x32xf32>
    %cst_128 = arith.constant dense<0.000000e+00> : vector<2x32xf32>
    %314 = tpu.matmul %311, %27, %cst_128 {dimension_numbers = #tpu.dot_dimension_numbers<[1], [0], [0], [1], [0, 0, 1, 1], [], []>} : vector<2x32xf32>, vector<32x32xf32>, vector<2x32xf32> -> vector<2x32xf32>
    %315 = arith.addf %117, %314 : vector<2x32xf32>
    %cst_129 = arith.constant dense<0.000000e+00> : vector<2x32xf32>
    %316 = tpu.matmul %311, %29, %cst_129 {dimension_numbers = #tpu.dot_dimension_numbers<[1], [0], [0], [1], [0, 0, 1, 1], [], []>} : vector<2x32xf32>, vector<32x32xf32>, vector<2x32xf32> -> vector<2x32xf32>
    %317 = arith.addf %120, %316 : vector<2x32xf32>
    %cst_130 = arith.constant dense<0.000000e+00> : vector<2x32xf32>
    %318 = tpu.matmul %311, %31, %cst_130 {dimension_numbers = #tpu.dot_dimension_numbers<[1], [0], [0], [1], [0, 0, 1, 1], [], []>} : vector<2x32xf32>, vector<32x32xf32>, vector<2x32xf32> -> vector<2x32xf32>
    %319 = arith.addf %123, %318 : vector<2x32xf32>
    %320 = arith.negf %313 : vector<2x32xf32>
    %321 = math.exp %320 : vector<2x32xf32>
    %cst_131 = arith.constant 1.000000e+00 : f32
    %322 = vector.broadcast %cst_131 : f32 to vector<2x32xf32>
    %323 = arith.addf %322, %321 : vector<2x32xf32>
    %324 = arith.divf %322, %323 : vector<2x32xf32>
    %325 = arith.negf %315 : vector<2x32xf32>
    %326 = math.exp %325 : vector<2x32xf32>
    %cst_132 = arith.constant 1.000000e+00 : f32
    %327 = vector.broadcast %cst_132 : f32 to vector<2x32xf32>
    %328 = arith.addf %327, %326 : vector<2x32xf32>
    %329 = arith.divf %327, %328 : vector<2x32xf32>
    %330 = math.tanh %317 : vector<2x32xf32>
    %331 = arith.negf %319 : vector<2x32xf32>
    %332 = math.exp %331 : vector<2x32xf32>
    %cst_133 = arith.constant 1.000000e+00 : f32
    %333 = vector.broadcast %cst_133 : f32 to vector<2x32xf32>
    %334 = arith.addf %333, %332 : vector<2x32xf32>
    %335 = arith.divf %333, %334 : vector<2x32xf32>
    %336 = arith.mulf %329, %309 : vector<2x32xf32>
    %337 = arith.mulf %324, %330 : vector<2x32xf32>
    %338 = arith.addf %336, %337 : vector<2x32xf32>
    %339 = math.tanh %338 : vector<2x32xf32>
    %340 = arith.mulf %335, %339 : vector<2x32xf32>
    %cst_134 = arith.constant dense<0.000000e+00> : vector<2x32xf32>
    %341 = tpu.matmul %340, %25, %cst_134 {dimension_numbers = #tpu.dot_dimension_numbers<[1], [0], [0], [1], [0, 0, 1, 1], [], []>} : vector<2x32xf32>, vector<32x32xf32>, vector<2x32xf32> -> vector<2x32xf32>
    %342 = arith.addf %126, %341 : vector<2x32xf32>
    %cst_135 = arith.constant dense<0.000000e+00> : vector<2x32xf32>
    %343 = tpu.matmul %340, %27, %cst_135 {dimension_numbers = #tpu.dot_dimension_numbers<[1], [0], [0], [1], [0, 0, 1, 1], [], []>} : vector<2x32xf32>, vector<32x32xf32>, vector<2x32xf32> -> vector<2x32xf32>
    %344 = arith.addf %129, %343 : vector<2x32xf32>
    %cst_136 = arith.constant dense<0.000000e+00> : vector<2x32xf32>
    %345 = tpu.matmul %340, %29, %cst_136 {dimension_numbers = #tpu.dot_dimension_numbers<[1], [0], [0], [1], [0, 0, 1, 1], [], []>} : vector<2x32xf32>, vector<32x32xf32>, vector<2x32xf32> -> vector<2x32xf32>
    %346 = arith.addf %132, %345 : vector<2x32xf32>
    %cst_137 = arith.constant dense<0.000000e+00> : vector<2x32xf32>
    %347 = tpu.matmul %340, %31, %cst_137 {dimension_numbers = #tpu.dot_dimension_numbers<[1], [0], [0], [1], [0, 0, 1, 1], [], []>} : vector<2x32xf32>, vector<32x32xf32>, vector<2x32xf32> -> vector<2x32xf32>
    %348 = arith.addf %135, %347 : vector<2x32xf32>
    %349 = arith.negf %342 : vector<2x32xf32>
    %350 = math.exp %349 : vector<2x32xf32>
    %cst_138 = arith.constant 1.000000e+00 : f32
    %351 = vector.broadcast %cst_138 : f32 to vector<2x32xf32>
    %352 = arith.addf %351, %350 : vector<2x32xf32>
    %353 = arith.divf %351, %352 : vector<2x32xf32>
    %354 = arith.negf %344 : vector<2x32xf32>
    %355 = math.exp %354 : vector<2x32xf32>
    %cst_139 = arith.constant 1.000000e+00 : f32
    %356 = vector.broadcast %cst_139 : f32 to vector<2x32xf32>
    %357 = arith.addf %356, %355 : vector<2x32xf32>
    %358 = arith.divf %356, %357 : vector<2x32xf32>
    %359 = math.tanh %346 : vector<2x32xf32>
    %360 = arith.negf %348 : vector<2x32xf32>
    %361 = math.exp %360 : vector<2x32xf32>
    %cst_140 = arith.constant 1.000000e+00 : f32
    %362 = vector.broadcast %cst_140 : f32 to vector<2x32xf32>
    %363 = arith.addf %362, %361 : vector<2x32xf32>
    %364 = arith.divf %362, %363 : vector<2x32xf32>
    %365 = arith.mulf %358, %338 : vector<2x32xf32>
    %366 = arith.mulf %353, %359 : vector<2x32xf32>
    %367 = arith.addf %365, %366 : vector<2x32xf32>
    %368 = math.tanh %367 : vector<2x32xf32>
    %369 = arith.mulf %364, %368 : vector<2x32xf32>
    %c0_141 = arith.constant 0 : index
    %c0_142 = arith.constant 0 : index
    %c0_143 = arith.constant 0 : index
    %370 = vector.load %arg11[%c0_141, %c0_142, %c0_143] : memref<3x2x32xf32, #tpu.memory_space<vmem>>, vector<1x2x32xf32>
    %371 = vector.shape_cast %370 : vector<1x2x32xf32> to vector<2x32xf32>
    %372 = vector.shape_cast %369 : vector<2x32xf32> to vector<1x2x32xf32>
    tpu.vector_store %arg11[%c0_141, %c0_142, %c0_143], %372 {strides = array<i32>} : memref<3x2x32xf32, #tpu.memory_space<vmem>>, vector<1x2x32xf32>,
    %c0_144 = arith.constant 0 : index
    %c0_145 = arith.constant 0 : index
    %c0_146 = arith.constant 0 : index
    %373 = vector.load %arg12[%c0_144, %c0_145, %c0_146] : memref<3x2x32xf32, #tpu.memory_space<vmem>>, vector<1x2x32xf32>
    %374 = vector.shape_cast %373 : vector<1x2x32xf32> to vector<2x32xf32>
    %375 = vector.shape_cast %367 : vector<2x32xf32> to vector<1x2x32xf32>
    tpu.vector_store %arg12[%c0_144, %c0_145, %c0_146], %375 {strides = array<i32>} : memref<3x2x32xf32, #tpu.memory_space<vmem>>, vector<1x2x32xf32>,
    %c0_147 = arith.constant 0 : index
    %c0_148 = arith.constant 0 : index
    %c0_149 = arith.constant 0 : index
    %376 = vector.load %arg4[%c0_147, %c0_148, %c0_149] : memref<4x32x32xf32, #tpu.memory_space<vmem>>, vector<1x32x32xf32>
    %377 = vector.shape_cast %376 : vector<1x32x32xf32> to vector<32x32xf32>
    %c1_150 = arith.constant 1 : index
    %c0_151 = arith.constant 0 : index
    %c0_152 = arith.constant 0 : index
    %378 = vector.load %arg4[%c1_150, %c0_151, %c0_152] : memref<4x32x32xf32, #tpu.memory_space<vmem>>, vector<1x32x32xf32>
    %379 = vector.shape_cast %378 : vector<1x32x32xf32> to vector<32x32xf32>
    %c2_153 = arith.constant 2 : index
    %c0_154 = arith.constant 0 : index
    %c0_155 = arith.constant 0 : index
    %380 = vector.load %arg4[%c2_153, %c0_154, %c0_155] : memref<4x32x32xf32, #tpu.memory_space<vmem>>, vector<1x32x32xf32>
    %381 = vector.shape_cast %380 : vector<1x32x32xf32> to vector<32x32xf32>
    %c3_156 = arith.constant 3 : index
    %c0_157 = arith.constant 0 : index
    %c0_158 = arith.constant 0 : index
    %382 = vector.load %arg4[%c3_156, %c0_157, %c0_158] : memref<4x32x32xf32, #tpu.memory_space<vmem>>, vector<1x32x32xf32>
    %383 = vector.shape_cast %382 : vector<1x32x32xf32> to vector<32x32xf32>
    %c0_159 = arith.constant 0 : index
    %c0_160 = arith.constant 0 : index
    %c0_161 = arith.constant 0 : index
    %384 = vector.load %arg5[%c0_159, %c0_160, %c0_161] : memref<4x32x32xf32, #tpu.memory_space<vmem>>, vector<1x32x32xf32>
    %385 = vector.shape_cast %384 : vector<1x32x32xf32> to vector<32x32xf32>
    %c1_162 = arith.constant 1 : index
    %c0_163 = arith.constant 0 : index
    %c0_164 = arith.constant 0 : index
    %386 = vector.load %arg5[%c1_162, %c0_163, %c0_164] : memref<4x32x32xf32, #tpu.memory_space<vmem>>, vector<1x32x32xf32>
    %387 = vector.shape_cast %386 : vector<1x32x32xf32> to vector<32x32xf32>
    %c2_165 = arith.constant 2 : index
    %c0_166 = arith.constant 0 : index
    %c0_167 = arith.constant 0 : index
    %388 = vector.load %arg5[%c2_165, %c0_166, %c0_167] : memref<4x32x32xf32, #tpu.memory_space<vmem>>, vector<1x32x32xf32>
    %389 = vector.shape_cast %388 : vector<1x32x32xf32> to vector<32x32xf32>
    %c3_168 = arith.constant 3 : index
    %c0_169 = arith.constant 0 : index
    %c0_170 = arith.constant 0 : index
    %390 = vector.load %arg5[%c3_168, %c0_169, %c0_170] : memref<4x32x32xf32, #tpu.memory_space<vmem>>, vector<1x32x32xf32>
    %391 = vector.shape_cast %390 : vector<1x32x32xf32> to vector<32x32xf32>
    %c0_171 = arith.constant 0 : index
    %c0_172 = arith.constant 0 : index
    %c0_173 = arith.constant 0 : index
    %392 = vector.load %arg6[%c0_171, %c0_172, %c0_173] : memref<4x1x32xf32, #tpu.memory_space<vmem>>, vector<1x1x32xf32>
    %393 = vector.shape_cast %392 : vector<1x1x32xf32> to vector<1x32xf32>
    %c1_174 = arith.constant 1 : index
    %c0_175 = arith.constant 0 : index
    %c0_176 = arith.constant 0 : index
    %394 = vector.load %arg6[%c1_174, %c0_175, %c0_176] : memref<4x1x32xf32, #tpu.memory_space<vmem>>, vector<1x1x32xf32>
    %395 = vector.shape_cast %394 : vector<1x1x32xf32> to vector<1x32xf32>
    %c2_177 = arith.constant 2 : index
    %c0_178 = arith.constant 0 : index
    %c0_179 = arith.constant 0 : index
    %396 = vector.load %arg6[%c2_177, %c0_178, %c0_179] : memref<4x1x32xf32, #tpu.memory_space<vmem>>, vector<1x1x32xf32>
    %397 = vector.shape_cast %396 : vector<1x1x32xf32> to vector<1x32xf32>
    %c3_180 = arith.constant 3 : index
    %c0_181 = arith.constant 0 : index
    %c0_182 = arith.constant 0 : index
    %398 = vector.load %arg6[%c3_180, %c0_181, %c0_182] : memref<4x1x32xf32, #tpu.memory_space<vmem>>, vector<1x1x32xf32>
    %399 = vector.shape_cast %398 : vector<1x1x32xf32> to vector<1x32xf32>
    %cst_183 = arith.constant dense<0.000000e+00> : vector<2x32xf32>
    %400 = tpu.matmul %166, %377, %cst_183 {dimension_numbers = #tpu.dot_dimension_numbers<[1], [0], [0], [1], [0, 0, 1, 1], [], []>} : vector<2x32xf32>, vector<32x32xf32>, vector<2x32xf32> -> vector<2x32xf32>
    %401 = vector.broadcast %393 : vector<1x32xf32> to vector<2x32xf32>
    %402 = arith.addf %400, %401 : vector<2x32xf32>
    %cst_184 = arith.constant dense<0.000000e+00> : vector<2x32xf32>
    %403 = tpu.matmul %166, %379, %cst_184 {dimension_numbers = #tpu.dot_dimension_numbers<[1], [0], [0], [1], [0, 0, 1, 1], [], []>} : vector<2x32xf32>, vector<32x32xf32>, vector<2x32xf32> -> vector<2x32xf32>
    %404 = vector.broadcast %395 : vector<1x32xf32> to vector<2x32xf32>
    %405 = arith.addf %403, %404 : vector<2x32xf32>
    %cst_185 = arith.constant dense<0.000000e+00> : vector<2x32xf32>
    %406 = tpu.matmul %166, %381, %cst_185 {dimension_numbers = #tpu.dot_dimension_numbers<[1], [0], [0], [1], [0, 0, 1, 1], [], []>} : vector<2x32xf32>, vector<32x32xf32>, vector<2x32xf32> -> vector<2x32xf32>
    %407 = vector.broadcast %397 : vector<1x32xf32> to vector<2x32xf32>
    %408 = arith.addf %406, %407 : vector<2x32xf32>
    %cst_186 = arith.constant dense<0.000000e+00> : vector<2x32xf32>
    %409 = tpu.matmul %166, %383, %cst_186 {dimension_numbers = #tpu.dot_dimension_numbers<[1], [0], [0], [1], [0, 0, 1, 1], [], []>} : vector<2x32xf32>, vector<32x32xf32>, vector<2x32xf32> -> vector<2x32xf32>
    %410 = vector.broadcast %399 : vector<1x32xf32> to vector<2x32xf32>
    %411 = arith.addf %409, %410 : vector<2x32xf32>
    %cst_187 = arith.constant dense<0.000000e+00> : vector<2x32xf32>
    %412 = tpu.matmul %195, %377, %cst_187 {dimension_numbers = #tpu.dot_dimension_numbers<[1], [0], [0], [1], [0, 0, 1, 1], [], []>} : vector<2x32xf32>, vector<32x32xf32>, vector<2x32xf32> -> vector<2x32xf32>
    %413 = vector.broadcast %393 : vector<1x32xf32> to vector<2x32xf32>
    %414 = arith.addf %412, %413 : vector<2x32xf32>
    %cst_188 = arith.constant dense<0.000000e+00> : vector<2x32xf32>
    %415 = tpu.matmul %195, %379, %cst_188 {dimension_numbers = #tpu.dot_dimension_numbers<[1], [0], [0], [1], [0, 0, 1, 1], [], []>} : vector<2x32xf32>, vector<32x32xf32>, vector<2x32xf32> -> vector<2x32xf32>
    %416 = vector.broadcast %395 : vector<1x32xf32> to vector<2x32xf32>
    %417 = arith.addf %415, %416 : vector<2x32xf32>
    %cst_189 = arith.constant dense<0.000000e+00> : vector<2x32xf32>
    %418 = tpu.matmul %195, %381, %cst_189 {dimension_numbers = #tpu.dot_dimension_numbers<[1], [0], [0], [1], [0, 0, 1, 1], [], []>} : vector<2x32xf32>, vector<32x32xf32>, vector<2x32xf32> -> vector<2x32xf32>
    %419 = vector.broadcast %397 : vector<1x32xf32> to vector<2x32xf32>
    %420 = arith.addf %418, %419 : vector<2x32xf32>
    %cst_190 = arith.constant dense<0.000000e+00> : vector<2x32xf32>
    %421 = tpu.matmul %195, %383, %cst_190 {dimension_numbers = #tpu.dot_dimension_numbers<[1], [0], [0], [1], [0, 0, 1, 1], [], []>} : vector<2x32xf32>, vector<32x32xf32>, vector<2x32xf32> -> vector<2x32xf32>
    %422 = vector.broadcast %399 : vector<1x32xf32> to vector<2x32xf32>
    %423 = arith.addf %421, %422 : vector<2x32xf32>
    %cst_191 = arith.constant dense<0.000000e+00> : vector<2x32xf32>
    %424 = tpu.matmul %224, %377, %cst_191 {dimension_numbers = #tpu.dot_dimension_numbers<[1], [0], [0], [1], [0, 0, 1, 1], [], []>} : vector<2x32xf32>, vector<32x32xf32>, vector<2x32xf32> -> vector<2x32xf32>
    %425 = vector.broadcast %393 : vector<1x32xf32> to vector<2x32xf32>
    %426 = arith.addf %424, %425 : vector<2x32xf32>
    %cst_192 = arith.constant dense<0.000000e+00> : vector<2x32xf32>
    %427 = tpu.matmul %224, %379, %cst_192 {dimension_numbers = #tpu.dot_dimension_numbers<[1], [0], [0], [1], [0, 0, 1, 1], [], []>} : vector<2x32xf32>, vector<32x32xf32>, vector<2x32xf32> -> vector<2x32xf32>
    %428 = vector.broadcast %395 : vector<1x32xf32> to vector<2x32xf32>
    %429 = arith.addf %427, %428 : vector<2x32xf32>
    %cst_193 = arith.constant dense<0.000000e+00> : vector<2x32xf32>
    %430 = tpu.matmul %224, %381, %cst_193 {dimension_numbers = #tpu.dot_dimension_numbers<[1], [0], [0], [1], [0, 0, 1, 1], [], []>} : vector<2x32xf32>, vector<32x32xf32>, vector<2x32xf32> -> vector<2x32xf32>
    %431 = vector.broadcast %397 : vector<1x32xf32> to vector<2x32xf32>
    %432 = arith.addf %430, %431 : vector<2x32xf32>
    %cst_194 = arith.constant dense<0.000000e+00> : vector<2x32xf32>
    %433 = tpu.matmul %224, %383, %cst_194 {dimension_numbers = #tpu.dot_dimension_numbers<[1], [0], [0], [1], [0, 0, 1, 1], [], []>} : vector<2x32xf32>, vector<32x32xf32>, vector<2x32xf32> -> vector<2x32xf32>
    %434 = vector.broadcast %399 : vector<1x32xf32> to vector<2x32xf32>
    %435 = arith.addf %433, %434 : vector<2x32xf32>
    %cst_195 = arith.constant dense<0.000000e+00> : vector<2x32xf32>
    %436 = tpu.matmul %253, %377, %cst_195 {dimension_numbers = #tpu.dot_dimension_numbers<[1], [0], [0], [1], [0, 0, 1, 1], [], []>} : vector<2x32xf32>, vector<32x32xf32>, vector<2x32xf32> -> vector<2x32xf32>
    %437 = vector.broadcast %393 : vector<1x32xf32> to vector<2x32xf32>
    %438 = arith.addf %436, %437 : vector<2x32xf32>
    %cst_196 = arith.constant dense<0.000000e+00> : vector<2x32xf32>
    %439 = tpu.matmul %253, %379, %cst_196 {dimension_numbers = #tpu.dot_dimension_numbers<[1], [0], [0], [1], [0, 0, 1, 1], [], []>} : vector<2x32xf32>, vector<32x32xf32>, vector<2x32xf32> -> vector<2x32xf32>
    %440 = vector.broadcast %395 : vector<1x32xf32> to vector<2x32xf32>
    %441 = arith.addf %439, %440 : vector<2x32xf32>
    %cst_197 = arith.constant dense<0.000000e+00> : vector<2x32xf32>
    %442 = tpu.matmul %253, %381, %cst_197 {dimension_numbers = #tpu.dot_dimension_numbers<[1], [0], [0], [1], [0, 0, 1, 1], [], []>} : vector<2x32xf32>, vector<32x32xf32>, vector<2x32xf32> -> vector<2x32xf32>
    %443 = vector.broadcast %397 : vector<1x32xf32> to vector<2x32xf32>
    %444 = arith.addf %442, %443 : vector<2x32xf32>
    %cst_198 = arith.constant dense<0.000000e+00> : vector<2x32xf32>
    %445 = tpu.matmul %253, %383, %cst_198 {dimension_numbers = #tpu.dot_dimension_numbers<[1], [0], [0], [1], [0, 0, 1, 1], [], []>} : vector<2x32xf32>, vector<32x32xf32>, vector<2x32xf32> -> vector<2x32xf32>
    %446 = vector.broadcast %399 : vector<1x32xf32> to vector<2x32xf32>
    %447 = arith.addf %445, %446 : vector<2x32xf32>
    %cst_199 = arith.constant dense<0.000000e+00> : vector<2x32xf32>
    %448 = tpu.matmul %282, %377, %cst_199 {dimension_numbers = #tpu.dot_dimension_numbers<[1], [0], [0], [1], [0, 0, 1, 1], [], []>} : vector<2x32xf32>, vector<32x32xf32>, vector<2x32xf32> -> vector<2x32xf32>
    %449 = vector.broadcast %393 : vector<1x32xf32> to vector<2x32xf32>
    %450 = arith.addf %448, %449 : vector<2x32xf32>
    %cst_200 = arith.constant dense<0.000000e+00> : vector<2x32xf32>
    %451 = tpu.matmul %282, %379, %cst_200 {dimension_numbers = #tpu.dot_dimension_numbers<[1], [0], [0], [1], [0, 0, 1, 1], [], []>} : vector<2x32xf32>, vector<32x32xf32>, vector<2x32xf32> -> vector<2x32xf32>
    %452 = vector.broadcast %395 : vector<1x32xf32> to vector<2x32xf32>
    %453 = arith.addf %451, %452 : vector<2x32xf32>
    %cst_201 = arith.constant dense<0.000000e+00> : vector<2x32xf32>
    %454 = tpu.matmul %282, %381, %cst_201 {dimension_numbers = #tpu.dot_dimension_numbers<[1], [0], [0], [1], [0, 0, 1, 1], [], []>} : vector<2x32xf32>, vector<32x32xf32>, vector<2x32xf32> -> vector<2x32xf32>
    %455 = vector.broadcast %397 : vector<1x32xf32> to vector<2x32xf32>
    %456 = arith.addf %454, %455 : vector<2x32xf32>
    %cst_202 = arith.constant dense<0.000000e+00> : vector<2x32xf32>
    %457 = tpu.matmul %282, %383, %cst_202 {dimension_numbers = #tpu.dot_dimension_numbers<[1], [0], [0], [1], [0, 0, 1, 1], [], []>} : vector<2x32xf32>, vector<32x32xf32>, vector<2x32xf32> -> vector<2x32xf32>
    %458 = vector.broadcast %399 : vector<1x32xf32> to vector<2x32xf32>
    %459 = arith.addf %457, %458 : vector<2x32xf32>
    %cst_203 = arith.constant dense<0.000000e+00> : vector<2x32xf32>
    %460 = tpu.matmul %311, %377, %cst_203 {dimension_numbers = #tpu.dot_dimension_numbers<[1], [0], [0], [1], [0, 0, 1, 1], [], []>} : vector<2x32xf32>, vector<32x32xf32>, vector<2x32xf32> -> vector<2x32xf32>
    %461 = vector.broadcast %393 : vector<1x32xf32> to vector<2x32xf32>
    %462 = arith.addf %460, %461 : vector<2x32xf32>
    %cst_204 = arith.constant dense<0.000000e+00> : vector<2x32xf32>
    %463 = tpu.matmul %311, %379, %cst_204 {dimension_numbers = #tpu.dot_dimension_numbers<[1], [0], [0], [1], [0, 0, 1, 1], [], []>} : vector<2x32xf32>, vector<32x32xf32>, vector<2x32xf32> -> vector<2x32xf32>
    %464 = vector.broadcast %395 : vector<1x32xf32> to vector<2x32xf32>
    %465 = arith.addf %463, %464 : vector<2x32xf32>
    %cst_205 = arith.constant dense<0.000000e+00> : vector<2x32xf32>
    %466 = tpu.matmul %311, %381, %cst_205 {dimension_numbers = #tpu.dot_dimension_numbers<[1], [0], [0], [1], [0, 0, 1, 1], [], []>} : vector<2x32xf32>, vector<32x32xf32>, vector<2x32xf32> -> vector<2x32xf32>
    %467 = vector.broadcast %397 : vector<1x32xf32> to vector<2x32xf32>
    %468 = arith.addf %466, %467 : vector<2x32xf32>
    %cst_206 = arith.constant dense<0.000000e+00> : vector<2x32xf32>
    %469 = tpu.matmul %311, %383, %cst_206 {dimension_numbers = #tpu.dot_dimension_numbers<[1], [0], [0], [1], [0, 0, 1, 1], [], []>} : vector<2x32xf32>, vector<32x32xf32>, vector<2x32xf32> -> vector<2x32xf32>
    %470 = vector.broadcast %399 : vector<1x32xf32> to vector<2x32xf32>
    %471 = arith.addf %469, %470 : vector<2x32xf32>
    %cst_207 = arith.constant dense<0.000000e+00> : vector<2x32xf32>
    %472 = tpu.matmul %340, %377, %cst_207 {dimension_numbers = #tpu.dot_dimension_numbers<[1], [0], [0], [1], [0, 0, 1, 1], [], []>} : vector<2x32xf32>, vector<32x32xf32>, vector<2x32xf32> -> vector<2x32xf32>
    %473 = vector.broadcast %393 : vector<1x32xf32> to vector<2x32xf32>
    %474 = arith.addf %472, %473 : vector<2x32xf32>
    %cst_208 = arith.constant dense<0.000000e+00> : vector<2x32xf32>
    %475 = tpu.matmul %340, %379, %cst_208 {dimension_numbers = #tpu.dot_dimension_numbers<[1], [0], [0], [1], [0, 0, 1, 1], [], []>} : vector<2x32xf32>, vector<32x32xf32>, vector<2x32xf32> -> vector<2x32xf32>
    %476 = vector.broadcast %395 : vector<1x32xf32> to vector<2x32xf32>
    %477 = arith.addf %475, %476 : vector<2x32xf32>
    %cst_209 = arith.constant dense<0.000000e+00> : vector<2x32xf32>
    %478 = tpu.matmul %340, %381, %cst_209 {dimension_numbers = #tpu.dot_dimension_numbers<[1], [0], [0], [1], [0, 0, 1, 1], [], []>} : vector<2x32xf32>, vector<32x32xf32>, vector<2x32xf32> -> vector<2x32xf32>
    %479 = vector.broadcast %397 : vector<1x32xf32> to vector<2x32xf32>
    %480 = arith.addf %478, %479 : vector<2x32xf32>
    %cst_210 = arith.constant dense<0.000000e+00> : vector<2x32xf32>
    %481 = tpu.matmul %340, %383, %cst_210 {dimension_numbers = #tpu.dot_dimension_numbers<[1], [0], [0], [1], [0, 0, 1, 1], [], []>} : vector<2x32xf32>, vector<32x32xf32>, vector<2x32xf32> -> vector<2x32xf32>
    %482 = vector.broadcast %399 : vector<1x32xf32> to vector<2x32xf32>
    %483 = arith.addf %481, %482 : vector<2x32xf32>
    %cst_211 = arith.constant dense<0.000000e+00> : vector<2x32xf32>
    %484 = tpu.matmul %369, %377, %cst_211 {dimension_numbers = #tpu.dot_dimension_numbers<[1], [0], [0], [1], [0, 0, 1, 1], [], []>} : vector<2x32xf32>, vector<32x32xf32>, vector<2x32xf32> -> vector<2x32xf32>
    %485 = vector.broadcast %393 : vector<1x32xf32> to vector<2x32xf32>
    %486 = arith.addf %484, %485 : vector<2x32xf32>
    %cst_212 = arith.constant dense<0.000000e+00> : vector<2x32xf32>
    %487 = tpu.matmul %369, %379, %cst_212 {dimension_numbers = #tpu.dot_dimension_numbers<[1], [0], [0], [1], [0, 0, 1, 1], [], []>} : vector<2x32xf32>, vector<32x32xf32>, vector<2x32xf32> -> vector<2x32xf32>
    %488 = vector.broadcast %395 : vector<1x32xf32> to vector<2x32xf32>
    %489 = arith.addf %487, %488 : vector<2x32xf32>
    %cst_213 = arith.constant dense<0.000000e+00> : vector<2x32xf32>
    %490 = tpu.matmul %369, %381, %cst_213 {dimension_numbers = #tpu.dot_dimension_numbers<[1], [0], [0], [1], [0, 0, 1, 1], [], []>} : vector<2x32xf32>, vector<32x32xf32>, vector<2x32xf32> -> vector<2x32xf32>
    %491 = vector.broadcast %397 : vector<1x32xf32> to vector<2x32xf32>
    %492 = arith.addf %490, %491 : vector<2x32xf32>
    %cst_214 = arith.constant dense<0.000000e+00> : vector<2x32xf32>
    %493 = tpu.matmul %369, %383, %cst_214 {dimension_numbers = #tpu.dot_dimension_numbers<[1], [0], [0], [1], [0, 0, 1, 1], [], []>} : vector<2x32xf32>, vector<32x32xf32>, vector<2x32xf32> -> vector<2x32xf32>
    %494 = vector.broadcast %399 : vector<1x32xf32> to vector<2x32xf32>
    %495 = arith.addf %493, %494 : vector<2x32xf32>
    %cst_215 = arith.constant 0.000000e+00 : f32
    %496 = vector.broadcast %cst_215 : f32 to vector<2x32xf32>
    %cst_216 = arith.constant 0.000000e+00 : f32
    %497 = vector.broadcast %cst_216 : f32 to vector<2x32xf32>
    %cst_217 = arith.constant dense<0.000000e+00> : vector<2x32xf32>
    %498 = tpu.matmul %496, %385, %cst_217 {dimension_numbers = #tpu.dot_dimension_numbers<[1], [0], [0], [1], [0, 0, 1, 1], [], []>} : vector<2x32xf32>, vector<32x32xf32>, vector<2x32xf32> -> vector<2x32xf32>
    %499 = arith.addf %402, %498 : vector<2x32xf32>
    %cst_218 = arith.constant dense<0.000000e+00> : vector<2x32xf32>
    %500 = tpu.matmul %496, %387, %cst_218 {dimension_numbers = #tpu.dot_dimension_numbers<[1], [0], [0], [1], [0, 0, 1, 1], [], []>} : vector<2x32xf32>, vector<32x32xf32>, vector<2x32xf32> -> vector<2x32xf32>
    %501 = arith.addf %405, %500 : vector<2x32xf32>
    %cst_219 = arith.constant dense<0.000000e+00> : vector<2x32xf32>
    %502 = tpu.matmul %496, %389, %cst_219 {dimension_numbers = #tpu.dot_dimension_numbers<[1], [0], [0], [1], [0, 0, 1, 1], [], []>} : vector<2x32xf32>, vector<32x32xf32>, vector<2x32xf32> -> vector<2x32xf32>
    %503 = arith.addf %408, %502 : vector<2x32xf32>
    %cst_220 = arith.constant dense<0.000000e+00> : vector<2x32xf32>
    %504 = tpu.matmul %496, %391, %cst_220 {dimension_numbers = #tpu.dot_dimension_numbers<[1], [0], [0], [1], [0, 0, 1, 1], [], []>} : vector<2x32xf32>, vector<32x32xf32>, vector<2x32xf32> -> vector<2x32xf32>
    %505 = arith.addf %411, %504 : vector<2x32xf32>
    %506 = arith.negf %499 : vector<2x32xf32>
    %507 = math.exp %506 : vector<2x32xf32>
    %cst_221 = arith.constant 1.000000e+00 : f32
    %508 = vector.broadcast %cst_221 : f32 to vector<2x32xf32>
    %509 = arith.addf %508, %507 : vector<2x32xf32>
    %510 = arith.divf %508, %509 : vector<2x32xf32>
    %511 = arith.negf %501 : vector<2x32xf32>
    %512 = math.exp %511 : vector<2x32xf32>
    %cst_222 = arith.constant 1.000000e+00 : f32
    %513 = vector.broadcast %cst_222 : f32 to vector<2x32xf32>
    %514 = arith.addf %513, %512 : vector<2x32xf32>
    %515 = arith.divf %513, %514 : vector<2x32xf32>
    %516 = math.tanh %503 : vector<2x32xf32>
    %517 = arith.negf %505 : vector<2x32xf32>
    %518 = math.exp %517 : vector<2x32xf32>
    %cst_223 = arith.constant 1.000000e+00 : f32
    %519 = vector.broadcast %cst_223 : f32 to vector<2x32xf32>
    %520 = arith.addf %519, %518 : vector<2x32xf32>
    %521 = arith.divf %519, %520 : vector<2x32xf32>
    %522 = arith.mulf %515, %497 : vector<2x32xf32>
    %523 = arith.mulf %510, %516 : vector<2x32xf32>
    %524 = arith.addf %522, %523 : vector<2x32xf32>
    %525 = math.tanh %524 : vector<2x32xf32>
    %526 = arith.mulf %521, %525 : vector<2x32xf32>
    %cst_224 = arith.constant dense<0.000000e+00> : vector<2x32xf32>
    %527 = tpu.matmul %526, %385, %cst_224 {dimension_numbers = #tpu.dot_dimension_numbers<[1], [0], [0], [1], [0, 0, 1, 1], [], []>} : vector<2x32xf32>, vector<32x32xf32>, vector<2x32xf32> -> vector<2x32xf32>
    %528 = arith.addf %414, %527 : vector<2x32xf32>
    %cst_225 = arith.constant dense<0.000000e+00> : vector<2x32xf32>
    %529 = tpu.matmul %526, %387, %cst_225 {dimension_numbers = #tpu.dot_dimension_numbers<[1], [0], [0], [1], [0, 0, 1, 1], [], []>} : vector<2x32xf32>, vector<32x32xf32>, vector<2x32xf32> -> vector<2x32xf32>
    %530 = arith.addf %417, %529 : vector<2x32xf32>
    %cst_226 = arith.constant dense<0.000000e+00> : vector<2x32xf32>
    %531 = tpu.matmul %526, %389, %cst_226 {dimension_numbers = #tpu.dot_dimension_numbers<[1], [0], [0], [1], [0, 0, 1, 1], [], []>} : vector<2x32xf32>, vector<32x32xf32>, vector<2x32xf32> -> vector<2x32xf32>
    %532 = arith.addf %420, %531 : vector<2x32xf32>
    %cst_227 = arith.constant dense<0.000000e+00> : vector<2x32xf32>
    %533 = tpu.matmul %526, %391, %cst_227 {dimension_numbers = #tpu.dot_dimension_numbers<[1], [0], [0], [1], [0, 0, 1, 1], [], []>} : vector<2x32xf32>, vector<32x32xf32>, vector<2x32xf32> -> vector<2x32xf32>
    %534 = arith.addf %423, %533 : vector<2x32xf32>
    %535 = arith.negf %528 : vector<2x32xf32>
    %536 = math.exp %535 : vector<2x32xf32>
    %cst_228 = arith.constant 1.000000e+00 : f32
    %537 = vector.broadcast %cst_228 : f32 to vector<2x32xf32>
    %538 = arith.addf %537, %536 : vector<2x32xf32>
    %539 = arith.divf %537, %538 : vector<2x32xf32>
    %540 = arith.negf %530 : vector<2x32xf32>
    %541 = math.exp %540 : vector<2x32xf32>
    %cst_229 = arith.constant 1.000000e+00 : f32
    %542 = vector.broadcast %cst_229 : f32 to vector<2x32xf32>
    %543 = arith.addf %542, %541 : vector<2x32xf32>
    %544 = arith.divf %542, %543 : vector<2x32xf32>
    %545 = math.tanh %532 : vector<2x32xf32>
    %546 = arith.negf %534 : vector<2x32xf32>
    %547 = math.exp %546 : vector<2x32xf32>
    %cst_230 = arith.constant 1.000000e+00 : f32
    %548 = vector.broadcast %cst_230 : f32 to vector<2x32xf32>
    %549 = arith.addf %548, %547 : vector<2x32xf32>
    %550 = arith.divf %548, %549 : vector<2x32xf32>
    %551 = arith.mulf %544, %524 : vector<2x32xf32>
    %552 = arith.mulf %539, %545 : vector<2x32xf32>
    %553 = arith.addf %551, %552 : vector<2x32xf32>
    %554 = math.tanh %553 : vector<2x32xf32>
    %555 = arith.mulf %550, %554 : vector<2x32xf32>
    %cst_231 = arith.constant dense<0.000000e+00> : vector<2x32xf32>
    %556 = tpu.matmul %555, %385, %cst_231 {dimension_numbers = #tpu.dot_dimension_numbers<[1], [0], [0], [1], [0, 0, 1, 1], [], []>} : vector<2x32xf32>, vector<32x32xf32>, vector<2x32xf32> -> vector<2x32xf32>
    %557 = arith.addf %426, %556 : vector<2x32xf32>
    %cst_232 = arith.constant dense<0.000000e+00> : vector<2x32xf32>
    %558 = tpu.matmul %555, %387, %cst_232 {dimension_numbers = #tpu.dot_dimension_numbers<[1], [0], [0], [1], [0, 0, 1, 1], [], []>} : vector<2x32xf32>, vector<32x32xf32>, vector<2x32xf32> -> vector<2x32xf32>
    %559 = arith.addf %429, %558 : vector<2x32xf32>
    %cst_233 = arith.constant dense<0.000000e+00> : vector<2x32xf32>
    %560 = tpu.matmul %555, %389, %cst_233 {dimension_numbers = #tpu.dot_dimension_numbers<[1], [0], [0], [1], [0, 0, 1, 1], [], []>} : vector<2x32xf32>, vector<32x32xf32>, vector<2x32xf32> -> vector<2x32xf32>
    %561 = arith.addf %432, %560 : vector<2x32xf32>
    %cst_234 = arith.constant dense<0.000000e+00> : vector<2x32xf32>
    %562 = tpu.matmul %555, %391, %cst_234 {dimension_numbers = #tpu.dot_dimension_numbers<[1], [0], [0], [1], [0, 0, 1, 1], [], []>} : vector<2x32xf32>, vector<32x32xf32>, vector<2x32xf32> -> vector<2x32xf32>
    %563 = arith.addf %435, %562 : vector<2x32xf32>
    %564 = arith.negf %557 : vector<2x32xf32>
    %565 = math.exp %564 : vector<2x32xf32>
    %cst_235 = arith.constant 1.000000e+00 : f32
    %566 = vector.broadcast %cst_235 : f32 to vector<2x32xf32>
    %567 = arith.addf %566, %565 : vector<2x32xf32>
    %568 = arith.divf %566, %567 : vector<2x32xf32>
    %569 = arith.negf %559 : vector<2x32xf32>
    %570 = math.exp %569 : vector<2x32xf32>
    %cst_236 = arith.constant 1.000000e+00 : f32
    %571 = vector.broadcast %cst_236 : f32 to vector<2x32xf32>
    %572 = arith.addf %571, %570 : vector<2x32xf32>
    %573 = arith.divf %571, %572 : vector<2x32xf32>
    %574 = math.tanh %561 : vector<2x32xf32>
    %575 = arith.negf %563 : vector<2x32xf32>
    %576 = math.exp %575 : vector<2x32xf32>
    %cst_237 = arith.constant 1.000000e+00 : f32
    %577 = vector.broadcast %cst_237 : f32 to vector<2x32xf32>
    %578 = arith.addf %577, %576 : vector<2x32xf32>
    %579 = arith.divf %577, %578 : vector<2x32xf32>
    %580 = arith.mulf %573, %553 : vector<2x32xf32>
    %581 = arith.mulf %568, %574 : vector<2x32xf32>
    %582 = arith.addf %580, %581 : vector<2x32xf32>
    %583 = math.tanh %582 : vector<2x32xf32>
    %584 = arith.mulf %579, %583 : vector<2x32xf32>
    %cst_238 = arith.constant dense<0.000000e+00> : vector<2x32xf32>
    %585 = tpu.matmul %584, %385, %cst_238 {dimension_numbers = #tpu.dot_dimension_numbers<[1], [0], [0], [1], [0, 0, 1, 1], [], []>} : vector<2x32xf32>, vector<32x32xf32>, vector<2x32xf32> -> vector<2x32xf32>
    %586 = arith.addf %438, %585 : vector<2x32xf32>
    %cst_239 = arith.constant dense<0.000000e+00> : vector<2x32xf32>
    %587 = tpu.matmul %584, %387, %cst_239 {dimension_numbers = #tpu.dot_dimension_numbers<[1], [0], [0], [1], [0, 0, 1, 1], [], []>} : vector<2x32xf32>, vector<32x32xf32>, vector<2x32xf32> -> vector<2x32xf32>
    %588 = arith.addf %441, %587 : vector<2x32xf32>
    %cst_240 = arith.constant dense<0.000000e+00> : vector<2x32xf32>
    %589 = tpu.matmul %584, %389, %cst_240 {dimension_numbers = #tpu.dot_dimension_numbers<[1], [0], [0], [1], [0, 0, 1, 1], [], []>} : vector<2x32xf32>, vector<32x32xf32>, vector<2x32xf32> -> vector<2x32xf32>
    %590 = arith.addf %444, %589 : vector<2x32xf32>
    %cst_241 = arith.constant dense<0.000000e+00> : vector<2x32xf32>
    %591 = tpu.matmul %584, %391, %cst_241 {dimension_numbers = #tpu.dot_dimension_numbers<[1], [0], [0], [1], [0, 0, 1, 1], [], []>} : vector<2x32xf32>, vector<32x32xf32>, vector<2x32xf32> -> vector<2x32xf32>
    %592 = arith.addf %447, %591 : vector<2x32xf32>
    %593 = arith.negf %586 : vector<2x32xf32>
    %594 = math.exp %593 : vector<2x32xf32>
    %cst_242 = arith.constant 1.000000e+00 : f32
    %595 = vector.broadcast %cst_242 : f32 to vector<2x32xf32>
    %596 = arith.addf %595, %594 : vector<2x32xf32>
    %597 = arith.divf %595, %596 : vector<2x32xf32>
    %598 = arith.negf %588 : vector<2x32xf32>
    %599 = math.exp %598 : vector<2x32xf32>
    %cst_243 = arith.constant 1.000000e+00 : f32
    %600 = vector.broadcast %cst_243 : f32 to vector<2x32xf32>
    %601 = arith.addf %600, %599 : vector<2x32xf32>
    %602 = arith.divf %600, %601 : vector<2x32xf32>
    %603 = math.tanh %590 : vector<2x32xf32>
    %604 = arith.negf %592 : vector<2x32xf32>
    %605 = math.exp %604 : vector<2x32xf32>
    %cst_244 = arith.constant 1.000000e+00 : f32
    %606 = vector.broadcast %cst_244 : f32 to vector<2x32xf32>
    %607 = arith.addf %606, %605 : vector<2x32xf32>
    %608 = arith.divf %606, %607 : vector<2x32xf32>
    %609 = arith.mulf %602, %582 : vector<2x32xf32>
    %610 = arith.mulf %597, %603 : vector<2x32xf32>
    %611 = arith.addf %609, %610 : vector<2x32xf32>
    %612 = math.tanh %611 : vector<2x32xf32>
    %613 = arith.mulf %608, %612 : vector<2x32xf32>
    %cst_245 = arith.constant dense<0.000000e+00> : vector<2x32xf32>
    %614 = tpu.matmul %613, %385, %cst_245 {dimension_numbers = #tpu.dot_dimension_numbers<[1], [0], [0], [1], [0, 0, 1, 1], [], []>} : vector<2x32xf32>, vector<32x32xf32>, vector<2x32xf32> -> vector<2x32xf32>
    %615 = arith.addf %450, %614 : vector<2x32xf32>
    %cst_246 = arith.constant dense<0.000000e+00> : vector<2x32xf32>
    %616 = tpu.matmul %613, %387, %cst_246 {dimension_numbers = #tpu.dot_dimension_numbers<[1], [0], [0], [1], [0, 0, 1, 1], [], []>} : vector<2x32xf32>, vector<32x32xf32>, vector<2x32xf32> -> vector<2x32xf32>
    %617 = arith.addf %453, %616 : vector<2x32xf32>
    %cst_247 = arith.constant dense<0.000000e+00> : vector<2x32xf32>
    %618 = tpu.matmul %613, %389, %cst_247 {dimension_numbers = #tpu.dot_dimension_numbers<[1], [0], [0], [1], [0, 0, 1, 1], [], []>} : vector<2x32xf32>, vector<32x32xf32>, vector<2x32xf32> -> vector<2x32xf32>
    %619 = arith.addf %456, %618 : vector<2x32xf32>
    %cst_248 = arith.constant dense<0.000000e+00> : vector<2x32xf32>
    %620 = tpu.matmul %613, %391, %cst_248 {dimension_numbers = #tpu.dot_dimension_numbers<[1], [0], [0], [1], [0, 0, 1, 1], [], []>} : vector<2x32xf32>, vector<32x32xf32>, vector<2x32xf32> -> vector<2x32xf32>
    %621 = arith.addf %459, %620 : vector<2x32xf32>
    %622 = arith.negf %615 : vector<2x32xf32>
    %623 = math.exp %622 : vector<2x32xf32>
    %cst_249 = arith.constant 1.000000e+00 : f32
    %624 = vector.broadcast %cst_249 : f32 to vector<2x32xf32>
    %625 = arith.addf %624, %623 : vector<2x32xf32>
    %626 = arith.divf %624, %625 : vector<2x32xf32>
    %627 = arith.negf %617 : vector<2x32xf32>
    %628 = math.exp %627 : vector<2x32xf32>
    %cst_250 = arith.constant 1.000000e+00 : f32
    %629 = vector.broadcast %cst_250 : f32 to vector<2x32xf32>
    %630 = arith.addf %629, %628 : vector<2x32xf32>
    %631 = arith.divf %629, %630 : vector<2x32xf32>
    %632 = math.tanh %619 : vector<2x32xf32>
    %633 = arith.negf %621 : vector<2x32xf32>
    %634 = math.exp %633 : vector<2x32xf32>
    %cst_251 = arith.constant 1.000000e+00 : f32
    %635 = vector.broadcast %cst_251 : f32 to vector<2x32xf32>
    %636 = arith.addf %635, %634 : vector<2x32xf32>
    %637 = arith.divf %635, %636 : vector<2x32xf32>
    %638 = arith.mulf %631, %611 : vector<2x32xf32>
    %639 = arith.mulf %626, %632 : vector<2x32xf32>
    %640 = arith.addf %638, %639 : vector<2x32xf32>
    %641 = math.tanh %640 : vector<2x32xf32>
    %642 = arith.mulf %637, %641 : vector<2x32xf32>
    %cst_252 = arith.constant dense<0.000000e+00> : vector<2x32xf32>
    %643 = tpu.matmul %642, %385, %cst_252 {dimension_numbers = #tpu.dot_dimension_numbers<[1], [0], [0], [1], [0, 0, 1, 1], [], []>} : vector<2x32xf32>, vector<32x32xf32>, vector<2x32xf32> -> vector<2x32xf32>
    %644 = arith.addf %462, %643 : vector<2x32xf32>
    %cst_253 = arith.constant dense<0.000000e+00> : vector<2x32xf32>
    %645 = tpu.matmul %642, %387, %cst_253 {dimension_numbers = #tpu.dot_dimension_numbers<[1], [0], [0], [1], [0, 0, 1, 1], [], []>} : vector<2x32xf32>, vector<32x32xf32>, vector<2x32xf32> -> vector<2x32xf32>
    %646 = arith.addf %465, %645 : vector<2x32xf32>
    %cst_254 = arith.constant dense<0.000000e+00> : vector<2x32xf32>
    %647 = tpu.matmul %642, %389, %cst_254 {dimension_numbers = #tpu.dot_dimension_numbers<[1], [0], [0], [1], [0, 0, 1, 1], [], []>} : vector<2x32xf32>, vector<32x32xf32>, vector<2x32xf32> -> vector<2x32xf32>
    %648 = arith.addf %468, %647 : vector<2x32xf32>
    %cst_255 = arith.constant dense<0.000000e+00> : vector<2x32xf32>
    %649 = tpu.matmul %642, %391, %cst_255 {dimension_numbers = #tpu.dot_dimension_numbers<[1], [0], [0], [1], [0, 0, 1, 1], [], []>} : vector<2x32xf32>, vector<32x32xf32>, vector<2x32xf32> -> vector<2x32xf32>
    %650 = arith.addf %471, %649 : vector<2x32xf32>
    %651 = arith.negf %644 : vector<2x32xf32>
    %652 = math.exp %651 : vector<2x32xf32>
    %cst_256 = arith.constant 1.000000e+00 : f32
    %653 = vector.broadcast %cst_256 : f32 to vector<2x32xf32>
    %654 = arith.addf %653, %652 : vector<2x32xf32>
    %655 = arith.divf %653, %654 : vector<2x32xf32>
    %656 = arith.negf %646 : vector<2x32xf32>
    %657 = math.exp %656 : vector<2x32xf32>
    %cst_257 = arith.constant 1.000000e+00 : f32
    %658 = vector.broadcast %cst_257 : f32 to vector<2x32xf32>
    %659 = arith.addf %658, %657 : vector<2x32xf32>
    %660 = arith.divf %658, %659 : vector<2x32xf32>
    %661 = math.tanh %648 : vector<2x32xf32>
    %662 = arith.negf %650 : vector<2x32xf32>
    %663 = math.exp %662 : vector<2x32xf32>
    %cst_258 = arith.constant 1.000000e+00 : f32
    %664 = vector.broadcast %cst_258 : f32 to vector<2x32xf32>
    %665 = arith.addf %664, %663 : vector<2x32xf32>
    %666 = arith.divf %664, %665 : vector<2x32xf32>
    %667 = arith.mulf %660, %640 : vector<2x32xf32>
    %668 = arith.mulf %655, %661 : vector<2x32xf32>
    %669 = arith.addf %667, %668 : vector<2x32xf32>
    %670 = math.tanh %669 : vector<2x32xf32>
    %671 = arith.mulf %666, %670 : vector<2x32xf32>
    %cst_259 = arith.constant dense<0.000000e+00> : vector<2x32xf32>
    %672 = tpu.matmul %671, %385, %cst_259 {dimension_numbers = #tpu.dot_dimension_numbers<[1], [0], [0], [1], [0, 0, 1, 1], [], []>} : vector<2x32xf32>, vector<32x32xf32>, vector<2x32xf32> -> vector<2x32xf32>
    %673 = arith.addf %474, %672 : vector<2x32xf32>
    %cst_260 = arith.constant dense<0.000000e+00> : vector<2x32xf32>
    %674 = tpu.matmul %671, %387, %cst_260 {dimension_numbers = #tpu.dot_dimension_numbers<[1], [0], [0], [1], [0, 0, 1, 1], [], []>} : vector<2x32xf32>, vector<32x32xf32>, vector<2x32xf32> -> vector<2x32xf32>
    %675 = arith.addf %477, %674 : vector<2x32xf32>
    %cst_261 = arith.constant dense<0.000000e+00> : vector<2x32xf32>
    %676 = tpu.matmul %671, %389, %cst_261 {dimension_numbers = #tpu.dot_dimension_numbers<[1], [0], [0], [1], [0, 0, 1, 1], [], []>} : vector<2x32xf32>, vector<32x32xf32>, vector<2x32xf32> -> vector<2x32xf32>
    %677 = arith.addf %480, %676 : vector<2x32xf32>
    %cst_262 = arith.constant dense<0.000000e+00> : vector<2x32xf32>
    %678 = tpu.matmul %671, %391, %cst_262 {dimension_numbers = #tpu.dot_dimension_numbers<[1], [0], [0], [1], [0, 0, 1, 1], [], []>} : vector<2x32xf32>, vector<32x32xf32>, vector<2x32xf32> -> vector<2x32xf32>
    %679 = arith.addf %483, %678 : vector<2x32xf32>
    %680 = arith.negf %673 : vector<2x32xf32>
    %681 = math.exp %680 : vector<2x32xf32>
    %cst_263 = arith.constant 1.000000e+00 : f32
    %682 = vector.broadcast %cst_263 : f32 to vector<2x32xf32>
    %683 = arith.addf %682, %681 : vector<2x32xf32>
    %684 = arith.divf %682, %683 : vector<2x32xf32>
    %685 = arith.negf %675 : vector<2x32xf32>
    %686 = math.exp %685 : vector<2x32xf32>
    %cst_264 = arith.constant 1.000000e+00 : f32
    %687 = vector.broadcast %cst_264 : f32 to vector<2x32xf32>
    %688 = arith.addf %687, %686 : vector<2x32xf32>
    %689 = arith.divf %687, %688 : vector<2x32xf32>
    %690 = math.tanh %677 : vector<2x32xf32>
    %691 = arith.negf %679 : vector<2x32xf32>
    %692 = math.exp %691 : vector<2x32xf32>
    %cst_265 = arith.constant 1.000000e+00 : f32
    %693 = vector.broadcast %cst_265 : f32 to vector<2x32xf32>
    %694 = arith.addf %693, %692 : vector<2x32xf32>
    %695 = arith.divf %693, %694 : vector<2x32xf32>
    %696 = arith.mulf %689, %669 : vector<2x32xf32>
    %697 = arith.mulf %684, %690 : vector<2x32xf32>
    %698 = arith.addf %696, %697 : vector<2x32xf32>
    %699 = math.tanh %698 : vector<2x32xf32>
    %700 = arith.mulf %695, %699 : vector<2x32xf32>
    %cst_266 = arith.constant dense<0.000000e+00> : vector<2x32xf32>
    %701 = tpu.matmul %700, %385, %cst_266 {dimension_numbers = #tpu.dot_dimension_numbers<[1], [0], [0], [1], [0, 0, 1, 1], [], []>} : vector<2x32xf32>, vector<32x32xf32>, vector<2x32xf32> -> vector<2x32xf32>
    %702 = arith.addf %486, %701 : vector<2x32xf32>
    %cst_267 = arith.constant dense<0.000000e+00> : vector<2x32xf32>
    %703 = tpu.matmul %700, %387, %cst_267 {dimension_numbers = #tpu.dot_dimension_numbers<[1], [0], [0], [1], [0, 0, 1, 1], [], []>} : vector<2x32xf32>, vector<32x32xf32>, vector<2x32xf32> -> vector<2x32xf32>
    %704 = arith.addf %489, %703 : vector<2x32xf32>
    %cst_268 = arith.constant dense<0.000000e+00> : vector<2x32xf32>
    %705 = tpu.matmul %700, %389, %cst_268 {dimension_numbers = #tpu.dot_dimension_numbers<[1], [0], [0], [1], [0, 0, 1, 1], [], []>} : vector<2x32xf32>, vector<32x32xf32>, vector<2x32xf32> -> vector<2x32xf32>
    %706 = arith.addf %492, %705 : vector<2x32xf32>
    %cst_269 = arith.constant dense<0.000000e+00> : vector<2x32xf32>
    %707 = tpu.matmul %700, %391, %cst_269 {dimension_numbers = #tpu.dot_dimension_numbers<[1], [0], [0], [1], [0, 0, 1, 1], [], []>} : vector<2x32xf32>, vector<32x32xf32>, vector<2x32xf32> -> vector<2x32xf32>
    %708 = arith.addf %495, %707 : vector<2x32xf32>
    %709 = arith.negf %702 : vector<2x32xf32>
    %710 = math.exp %709 : vector<2x32xf32>
    %cst_270 = arith.constant 1.000000e+00 : f32
    %711 = vector.broadcast %cst_270 : f32 to vector<2x32xf32>
    %712 = arith.addf %711, %710 : vector<2x32xf32>
    %713 = arith.divf %711, %712 : vector<2x32xf32>
    %714 = arith.negf %704 : vector<2x32xf32>
    %715 = math.exp %714 : vector<2x32xf32>
    %cst_271 = arith.constant 1.000000e+00 : f32
    %716 = vector.broadcast %cst_271 : f32 to vector<2x32xf32>
    %717 = arith.addf %716, %715 : vector<2x32xf32>
    %718 = arith.divf %716, %717 : vector<2x32xf32>
    %719 = math.tanh %706 : vector<2x32xf32>
    %720 = arith.negf %708 : vector<2x32xf32>
    %721 = math.exp %720 : vector<2x32xf32>
    %cst_272 = arith.constant 1.000000e+00 : f32
    %722 = vector.broadcast %cst_272 : f32 to vector<2x32xf32>
    %723 = arith.addf %722, %721 : vector<2x32xf32>
    %724 = arith.divf %722, %723 : vector<2x32xf32>
    %725 = arith.mulf %718, %698 : vector<2x32xf32>
    %726 = arith.mulf %713, %719 : vector<2x32xf32>
    %727 = arith.addf %725, %726 : vector<2x32xf32>
    %728 = math.tanh %727 : vector<2x32xf32>
    %729 = arith.mulf %724, %728 : vector<2x32xf32>
    %c1_273 = arith.constant 1 : index
    %c0_274 = arith.constant 0 : index
    %c0_275 = arith.constant 0 : index
    %730 = vector.load %arg11[%c1_273, %c0_274, %c0_275] : memref<3x2x32xf32, #tpu.memory_space<vmem>>, vector<1x2x32xf32>
    %731 = vector.shape_cast %730 : vector<1x2x32xf32> to vector<2x32xf32>
    %732 = vector.shape_cast %729 : vector<2x32xf32> to vector<1x2x32xf32>
    tpu.vector_store %arg11[%c1_273, %c0_274, %c0_275], %732 {strides = array<i32>} : memref<3x2x32xf32, #tpu.memory_space<vmem>>, vector<1x2x32xf32>,
    %c1_276 = arith.constant 1 : index
    %c0_277 = arith.constant 0 : index
    %c0_278 = arith.constant 0 : index
    %733 = vector.load %arg12[%c1_276, %c0_277, %c0_278] : memref<3x2x32xf32, #tpu.memory_space<vmem>>, vector<1x2x32xf32>
    %734 = vector.shape_cast %733 : vector<1x2x32xf32> to vector<2x32xf32>
    %735 = vector.shape_cast %727 : vector<2x32xf32> to vector<1x2x32xf32>
    tpu.vector_store %arg12[%c1_276, %c0_277, %c0_278], %735 {strides = array<i32>} : memref<3x2x32xf32, #tpu.memory_space<vmem>>, vector<1x2x32xf32>,
    %c0_279 = arith.constant 0 : index
    %c0_280 = arith.constant 0 : index
    %c0_281 = arith.constant 0 : index
    %736 = vector.load %arg7[%c0_279, %c0_280, %c0_281] : memref<4x32x32xf32, #tpu.memory_space<vmem>>, vector<1x32x32xf32>
    %737 = vector.shape_cast %736 : vector<1x32x32xf32> to vector<32x32xf32>
    %c1_282 = arith.constant 1 : index
    %c0_283 = arith.constant 0 : index
    %c0_284 = arith.constant 0 : index
    %738 = vector.load %arg7[%c1_282, %c0_283, %c0_284] : memref<4x32x32xf32, #tpu.memory_space<vmem>>, vector<1x32x32xf32>
    %739 = vector.shape_cast %738 : vector<1x32x32xf32> to vector<32x32xf32>
    %c2_285 = arith.constant 2 : index
    %c0_286 = arith.constant 0 : index
    %c0_287 = arith.constant 0 : index
    %740 = vector.load %arg7[%c2_285, %c0_286, %c0_287] : memref<4x32x32xf32, #tpu.memory_space<vmem>>, vector<1x32x32xf32>
    %741 = vector.shape_cast %740 : vector<1x32x32xf32> to vector<32x32xf32>
    %c3_288 = arith.constant 3 : index
    %c0_289 = arith.constant 0 : index
    %c0_290 = arith.constant 0 : index
    %742 = vector.load %arg7[%c3_288, %c0_289, %c0_290] : memref<4x32x32xf32, #tpu.memory_space<vmem>>, vector<1x32x32xf32>
    %743 = vector.shape_cast %742 : vector<1x32x32xf32> to vector<32x32xf32>
    %c0_291 = arith.constant 0 : index
    %c0_292 = arith.constant 0 : index
    %c0_293 = arith.constant 0 : index
    %744 = vector.load %arg8[%c0_291, %c0_292, %c0_293] : memref<4x32x32xf32, #tpu.memory_space<vmem>>, vector<1x32x32xf32>
    %745 = vector.shape_cast %744 : vector<1x32x32xf32> to vector<32x32xf32>
    %c1_294 = arith.constant 1 : index
    %c0_295 = arith.constant 0 : index
    %c0_296 = arith.constant 0 : index
    %746 = vector.load %arg8[%c1_294, %c0_295, %c0_296] : memref<4x32x32xf32, #tpu.memory_space<vmem>>, vector<1x32x32xf32>
    %747 = vector.shape_cast %746 : vector<1x32x32xf32> to vector<32x32xf32>
    %c2_297 = arith.constant 2 : index
    %c0_298 = arith.constant 0 : index
    %c0_299 = arith.constant 0 : index
    %748 = vector.load %arg8[%c2_297, %c0_298, %c0_299] : memref<4x32x32xf32, #tpu.memory_space<vmem>>, vector<1x32x32xf32>
    %749 = vector.shape_cast %748 : vector<1x32x32xf32> to vector<32x32xf32>
    %c3_300 = arith.constant 3 : index
    %c0_301 = arith.constant 0 : index
    %c0_302 = arith.constant 0 : index
    %750 = vector.load %arg8[%c3_300, %c0_301, %c0_302] : memref<4x32x32xf32, #tpu.memory_space<vmem>>, vector<1x32x32xf32>
    %751 = vector.shape_cast %750 : vector<1x32x32xf32> to vector<32x32xf32>
    %c0_303 = arith.constant 0 : index
    %c0_304 = arith.constant 0 : index
    %c0_305 = arith.constant 0 : index
    %752 = vector.load %arg9[%c0_303, %c0_304, %c0_305] : memref<4x1x32xf32, #tpu.memory_space<vmem>>, vector<1x1x32xf32>
    %753 = vector.shape_cast %752 : vector<1x1x32xf32> to vector<1x32xf32>
    %c1_306 = arith.constant 1 : index
    %c0_307 = arith.constant 0 : index
    %c0_308 = arith.constant 0 : index
    %754 = vector.load %arg9[%c1_306, %c0_307, %c0_308] : memref<4x1x32xf32, #tpu.memory_space<vmem>>, vector<1x1x32xf32>
    %755 = vector.shape_cast %754 : vector<1x1x32xf32> to vector<1x32xf32>
    %c2_309 = arith.constant 2 : index
    %c0_310 = arith.constant 0 : index
    %c0_311 = arith.constant 0 : index
    %756 = vector.load %arg9[%c2_309, %c0_310, %c0_311] : memref<4x1x32xf32, #tpu.memory_space<vmem>>, vector<1x1x32xf32>
    %757 = vector.shape_cast %756 : vector<1x1x32xf32> to vector<1x32xf32>
    %c3_312 = arith.constant 3 : index
    %c0_313 = arith.constant 0 : index
    %c0_314 = arith.constant 0 : index
    %758 = vector.load %arg9[%c3_312, %c0_313, %c0_314] : memref<4x1x32xf32, #tpu.memory_space<vmem>>, vector<1x1x32xf32>
    %759 = vector.shape_cast %758 : vector<1x1x32xf32> to vector<1x32xf32>
    %cst_315 = arith.constant dense<0.000000e+00> : vector<2x32xf32>
    %760 = tpu.matmul %526, %737, %cst_315 {dimension_numbers = #tpu.dot_dimension_numbers<[1], [0], [0], [1], [0, 0, 1, 1], [], []>} : vector<2x32xf32>, vector<32x32xf32>, vector<2x32xf32> -> vector<2x32xf32>
    %761 = vector.broadcast %753 : vector<1x32xf32> to vector<2x32xf32>
    %762 = arith.addf %760, %761 : vector<2x32xf32>
    %cst_316 = arith.constant dense<0.000000e+00> : vector<2x32xf32>
    %763 = tpu.matmul %526, %739, %cst_316 {dimension_numbers = #tpu.dot_dimension_numbers<[1], [0], [0], [1], [0, 0, 1, 1], [], []>} : vector<2x32xf32>, vector<32x32xf32>, vector<2x32xf32> -> vector<2x32xf32>
    %764 = vector.broadcast %755 : vector<1x32xf32> to vector<2x32xf32>
    %765 = arith.addf %763, %764 : vector<2x32xf32>
    %cst_317 = arith.constant dense<0.000000e+00> : vector<2x32xf32>
    %766 = tpu.matmul %526, %741, %cst_317 {dimension_numbers = #tpu.dot_dimension_numbers<[1], [0], [0], [1], [0, 0, 1, 1], [], []>} : vector<2x32xf32>, vector<32x32xf32>, vector<2x32xf32> -> vector<2x32xf32>
    %767 = vector.broadcast %757 : vector<1x32xf32> to vector<2x32xf32>
    %768 = arith.addf %766, %767 : vector<2x32xf32>
    %cst_318 = arith.constant dense<0.000000e+00> : vector<2x32xf32>
    %769 = tpu.matmul %526, %743, %cst_318 {dimension_numbers = #tpu.dot_dimension_numbers<[1], [0], [0], [1], [0, 0, 1, 1], [], []>} : vector<2x32xf32>, vector<32x32xf32>, vector<2x32xf32> -> vector<2x32xf32>
    %770 = vector.broadcast %759 : vector<1x32xf32> to vector<2x32xf32>
    %771 = arith.addf %769, %770 : vector<2x32xf32>
    %cst_319 = arith.constant dense<0.000000e+00> : vector<2x32xf32>
    %772 = tpu.matmul %555, %737, %cst_319 {dimension_numbers = #tpu.dot_dimension_numbers<[1], [0], [0], [1], [0, 0, 1, 1], [], []>} : vector<2x32xf32>, vector<32x32xf32>, vector<2x32xf32> -> vector<2x32xf32>
    %773 = vector.broadcast %753 : vector<1x32xf32> to vector<2x32xf32>
    %774 = arith.addf %772, %773 : vector<2x32xf32>
    %cst_320 = arith.constant dense<0.000000e+00> : vector<2x32xf32>
    %775 = tpu.matmul %555, %739, %cst_320 {dimension_numbers = #tpu.dot_dimension_numbers<[1], [0], [0], [1], [0, 0, 1, 1], [], []>} : vector<2x32xf32>, vector<32x32xf32>, vector<2x32xf32> -> vector<2x32xf32>
    %776 = vector.broadcast %755 : vector<1x32xf32> to vector<2x32xf32>
    %777 = arith.addf %775, %776 : vector<2x32xf32>
    %cst_321 = arith.constant dense<0.000000e+00> : vector<2x32xf32>
    %778 = tpu.matmul %555, %741, %cst_321 {dimension_numbers = #tpu.dot_dimension_numbers<[1], [0], [0], [1], [0, 0, 1, 1], [], []>} : vector<2x32xf32>, vector<32x32xf32>, vector<2x32xf32> -> vector<2x32xf32>
    %779 = vector.broadcast %757 : vector<1x32xf32> to vector<2x32xf32>
    %780 = arith.addf %778, %779 : vector<2x32xf32>
    %cst_322 = arith.constant dense<0.000000e+00> : vector<2x32xf32>
    %781 = tpu.matmul %555, %743, %cst_322 {dimension_numbers = #tpu.dot_dimension_numbers<[1], [0], [0], [1], [0, 0, 1, 1], [], []>} : vector<2x32xf32>, vector<32x32xf32>, vector<2x32xf32> -> vector<2x32xf32>
    %782 = vector.broadcast %759 : vector<1x32xf32> to vector<2x32xf32>
    %783 = arith.addf %781, %782 : vector<2x32xf32>
    %cst_323 = arith.constant dense<0.000000e+00> : vector<2x32xf32>
    %784 = tpu.matmul %584, %737, %cst_323 {dimension_numbers = #tpu.dot_dimension_numbers<[1], [0], [0], [1], [0, 0, 1, 1], [], []>} : vector<2x32xf32>, vector<32x32xf32>, vector<2x32xf32> -> vector<2x32xf32>
    %785 = vector.broadcast %753 : vector<1x32xf32> to vector<2x32xf32>
    %786 = arith.addf %784, %785 : vector<2x32xf32>
    %cst_324 = arith.constant dense<0.000000e+00> : vector<2x32xf32>
    %787 = tpu.matmul %584, %739, %cst_324 {dimension_numbers = #tpu.dot_dimension_numbers<[1], [0], [0], [1], [0, 0, 1, 1], [], []>} : vector<2x32xf32>, vector<32x32xf32>, vector<2x32xf32> -> vector<2x32xf32>
    %788 = vector.broadcast %755 : vector<1x32xf32> to vector<2x32xf32>
    %789 = arith.addf %787, %788 : vector<2x32xf32>
    %cst_325 = arith.constant dense<0.000000e+00> : vector<2x32xf32>
    %790 = tpu.matmul %584, %741, %cst_325 {dimension_numbers = #tpu.dot_dimension_numbers<[1], [0], [0], [1], [0, 0, 1, 1], [], []>} : vector<2x32xf32>, vector<32x32xf32>, vector<2x32xf32> -> vector<2x32xf32>
    %791 = vector.broadcast %757 : vector<1x32xf32> to vector<2x32xf32>
    %792 = arith.addf %790, %791 : vector<2x32xf32>
    %cst_326 = arith.constant dense<0.000000e+00> : vector<2x32xf32>
    %793 = tpu.matmul %584, %743, %cst_326 {dimension_numbers = #tpu.dot_dimension_numbers<[1], [0], [0], [1], [0, 0, 1, 1], [], []>} : vector<2x32xf32>, vector<32x32xf32>, vector<2x32xf32> -> vector<2x32xf32>
    %794 = vector.broadcast %759 : vector<1x32xf32> to vector<2x32xf32>
    %795 = arith.addf %793, %794 : vector<2x32xf32>
    %cst_327 = arith.constant dense<0.000000e+00> : vector<2x32xf32>
    %796 = tpu.matmul %613, %737, %cst_327 {dimension_numbers = #tpu.dot_dimension_numbers<[1], [0], [0], [1], [0, 0, 1, 1], [], []>} : vector<2x32xf32>, vector<32x32xf32>, vector<2x32xf32> -> vector<2x32xf32>
    %797 = vector.broadcast %753 : vector<1x32xf32> to vector<2x32xf32>
    %798 = arith.addf %796, %797 : vector<2x32xf32>
    %cst_328 = arith.constant dense<0.000000e+00> : vector<2x32xf32>
    %799 = tpu.matmul %613, %739, %cst_328 {dimension_numbers = #tpu.dot_dimension_numbers<[1], [0], [0], [1], [0, 0, 1, 1], [], []>} : vector<2x32xf32>, vector<32x32xf32>, vector<2x32xf32> -> vector<2x32xf32>
    %800 = vector.broadcast %755 : vector<1x32xf32> to vector<2x32xf32>
    %801 = arith.addf %799, %800 : vector<2x32xf32>
    %cst_329 = arith.constant dense<0.000000e+00> : vector<2x32xf32>
    %802 = tpu.matmul %613, %741, %cst_329 {dimension_numbers = #tpu.dot_dimension_numbers<[1], [0], [0], [1], [0, 0, 1, 1], [], []>} : vector<2x32xf32>, vector<32x32xf32>, vector<2x32xf32> -> vector<2x32xf32>
    %803 = vector.broadcast %757 : vector<1x32xf32> to vector<2x32xf32>
    %804 = arith.addf %802, %803 : vector<2x32xf32>
    %cst_330 = arith.constant dense<0.000000e+00> : vector<2x32xf32>
    %805 = tpu.matmul %613, %743, %cst_330 {dimension_numbers = #tpu.dot_dimension_numbers<[1], [0], [0], [1], [0, 0, 1, 1], [], []>} : vector<2x32xf32>, vector<32x32xf32>, vector<2x32xf32> -> vector<2x32xf32>
    %806 = vector.broadcast %759 : vector<1x32xf32> to vector<2x32xf32>
    %807 = arith.addf %805, %806 : vector<2x32xf32>
    %cst_331 = arith.constant dense<0.000000e+00> : vector<2x32xf32>
    %808 = tpu.matmul %642, %737, %cst_331 {dimension_numbers = #tpu.dot_dimension_numbers<[1], [0], [0], [1], [0, 0, 1, 1], [], []>} : vector<2x32xf32>, vector<32x32xf32>, vector<2x32xf32> -> vector<2x32xf32>
    %809 = vector.broadcast %753 : vector<1x32xf32> to vector<2x32xf32>
    %810 = arith.addf %808, %809 : vector<2x32xf32>
    %cst_332 = arith.constant dense<0.000000e+00> : vector<2x32xf32>
    %811 = tpu.matmul %642, %739, %cst_332 {dimension_numbers = #tpu.dot_dimension_numbers<[1], [0], [0], [1], [0, 0, 1, 1], [], []>} : vector<2x32xf32>, vector<32x32xf32>, vector<2x32xf32> -> vector<2x32xf32>
    %812 = vector.broadcast %755 : vector<1x32xf32> to vector<2x32xf32>
    %813 = arith.addf %811, %812 : vector<2x32xf32>
    %cst_333 = arith.constant dense<0.000000e+00> : vector<2x32xf32>
    %814 = tpu.matmul %642, %741, %cst_333 {dimension_numbers = #tpu.dot_dimension_numbers<[1], [0], [0], [1], [0, 0, 1, 1], [], []>} : vector<2x32xf32>, vector<32x32xf32>, vector<2x32xf32> -> vector<2x32xf32>
    %815 = vector.broadcast %757 : vector<1x32xf32> to vector<2x32xf32>
    %816 = arith.addf %814, %815 : vector<2x32xf32>
    %cst_334 = arith.constant dense<0.000000e+00> : vector<2x32xf32>
    %817 = tpu.matmul %642, %743, %cst_334 {dimension_numbers = #tpu.dot_dimension_numbers<[1], [0], [0], [1], [0, 0, 1, 1], [], []>} : vector<2x32xf32>, vector<32x32xf32>, vector<2x32xf32> -> vector<2x32xf32>
    %818 = vector.broadcast %759 : vector<1x32xf32> to vector<2x32xf32>
    %819 = arith.addf %817, %818 : vector<2x32xf32>
    %cst_335 = arith.constant dense<0.000000e+00> : vector<2x32xf32>
    %820 = tpu.matmul %671, %737, %cst_335 {dimension_numbers = #tpu.dot_dimension_numbers<[1], [0], [0], [1], [0, 0, 1, 1], [], []>} : vector<2x32xf32>, vector<32x32xf32>, vector<2x32xf32> -> vector<2x32xf32>
    %821 = vector.broadcast %753 : vector<1x32xf32> to vector<2x32xf32>
    %822 = arith.addf %820, %821 : vector<2x32xf32>
    %cst_336 = arith.constant dense<0.000000e+00> : vector<2x32xf32>
    %823 = tpu.matmul %671, %739, %cst_336 {dimension_numbers = #tpu.dot_dimension_numbers<[1], [0], [0], [1], [0, 0, 1, 1], [], []>} : vector<2x32xf32>, vector<32x32xf32>, vector<2x32xf32> -> vector<2x32xf32>
    %824 = vector.broadcast %755 : vector<1x32xf32> to vector<2x32xf32>
    %825 = arith.addf %823, %824 : vector<2x32xf32>
    %cst_337 = arith.constant dense<0.000000e+00> : vector<2x32xf32>
    %826 = tpu.matmul %671, %741, %cst_337 {dimension_numbers = #tpu.dot_dimension_numbers<[1], [0], [0], [1], [0, 0, 1, 1], [], []>} : vector<2x32xf32>, vector<32x32xf32>, vector<2x32xf32> -> vector<2x32xf32>
    %827 = vector.broadcast %757 : vector<1x32xf32> to vector<2x32xf32>
    %828 = arith.addf %826, %827 : vector<2x32xf32>
    %cst_338 = arith.constant dense<0.000000e+00> : vector<2x32xf32>
    %829 = tpu.matmul %671, %743, %cst_338 {dimension_numbers = #tpu.dot_dimension_numbers<[1], [0], [0], [1], [0, 0, 1, 1], [], []>} : vector<2x32xf32>, vector<32x32xf32>, vector<2x32xf32> -> vector<2x32xf32>
    %830 = vector.broadcast %759 : vector<1x32xf32> to vector<2x32xf32>
    %831 = arith.addf %829, %830 : vector<2x32xf32>
    %cst_339 = arith.constant dense<0.000000e+00> : vector<2x32xf32>
    %832 = tpu.matmul %700, %737, %cst_339 {dimension_numbers = #tpu.dot_dimension_numbers<[1], [0], [0], [1], [0, 0, 1, 1], [], []>} : vector<2x32xf32>, vector<32x32xf32>, vector<2x32xf32> -> vector<2x32xf32>
    %833 = vector.broadcast %753 : vector<1x32xf32> to vector<2x32xf32>
    %834 = arith.addf %832, %833 : vector<2x32xf32>
    %cst_340 = arith.constant dense<0.000000e+00> : vector<2x32xf32>
    %835 = tpu.matmul %700, %739, %cst_340 {dimension_numbers = #tpu.dot_dimension_numbers<[1], [0], [0], [1], [0, 0, 1, 1], [], []>} : vector<2x32xf32>, vector<32x32xf32>, vector<2x32xf32> -> vector<2x32xf32>
    %836 = vector.broadcast %755 : vector<1x32xf32> to vector<2x32xf32>
    %837 = arith.addf %835, %836 : vector<2x32xf32>
    %cst_341 = arith.constant dense<0.000000e+00> : vector<2x32xf32>
    %838 = tpu.matmul %700, %741, %cst_341 {dimension_numbers = #tpu.dot_dimension_numbers<[1], [0], [0], [1], [0, 0, 1, 1], [], []>} : vector<2x32xf32>, vector<32x32xf32>, vector<2x32xf32> -> vector<2x32xf32>
    %839 = vector.broadcast %757 : vector<1x32xf32> to vector<2x32xf32>
    %840 = arith.addf %838, %839 : vector<2x32xf32>
    %cst_342 = arith.constant dense<0.000000e+00> : vector<2x32xf32>
    %841 = tpu.matmul %700, %743, %cst_342 {dimension_numbers = #tpu.dot_dimension_numbers<[1], [0], [0], [1], [0, 0, 1, 1], [], []>} : vector<2x32xf32>, vector<32x32xf32>, vector<2x32xf32> -> vector<2x32xf32>
    %842 = vector.broadcast %759 : vector<1x32xf32> to vector<2x32xf32>
    %843 = arith.addf %841, %842 : vector<2x32xf32>
    %cst_343 = arith.constant dense<0.000000e+00> : vector<2x32xf32>
    %844 = tpu.matmul %729, %737, %cst_343 {dimension_numbers = #tpu.dot_dimension_numbers<[1], [0], [0], [1], [0, 0, 1, 1], [], []>} : vector<2x32xf32>, vector<32x32xf32>, vector<2x32xf32> -> vector<2x32xf32>
    %845 = vector.broadcast %753 : vector<1x32xf32> to vector<2x32xf32>
    %846 = arith.addf %844, %845 : vector<2x32xf32>
    %cst_344 = arith.constant dense<0.000000e+00> : vector<2x32xf32>
    %847 = tpu.matmul %729, %739, %cst_344 {dimension_numbers = #tpu.dot_dimension_numbers<[1], [0], [0], [1], [0, 0, 1, 1], [], []>} : vector<2x32xf32>, vector<32x32xf32>, vector<2x32xf32> -> vector<2x32xf32>
    %848 = vector.broadcast %755 : vector<1x32xf32> to vector<2x32xf32>
    %849 = arith.addf %847, %848 : vector<2x32xf32>
    %cst_345 = arith.constant dense<0.000000e+00> : vector<2x32xf32>
    %850 = tpu.matmul %729, %741, %cst_345 {dimension_numbers = #tpu.dot_dimension_numbers<[1], [0], [0], [1], [0, 0, 1, 1], [], []>} : vector<2x32xf32>, vector<32x32xf32>, vector<2x32xf32> -> vector<2x32xf32>
    %851 = vector.broadcast %757 : vector<1x32xf32> to vector<2x32xf32>
    %852 = arith.addf %850, %851 : vector<2x32xf32>
    %cst_346 = arith.constant dense<0.000000e+00> : vector<2x32xf32>
    %853 = tpu.matmul %729, %743, %cst_346 {dimension_numbers = #tpu.dot_dimension_numbers<[1], [0], [0], [1], [0, 0, 1, 1], [], []>} : vector<2x32xf32>, vector<32x32xf32>, vector<2x32xf32> -> vector<2x32xf32>
    %854 = vector.broadcast %759 : vector<1x32xf32> to vector<2x32xf32>
    %855 = arith.addf %853, %854 : vector<2x32xf32>
    %cst_347 = arith.constant 0.000000e+00 : f32
    %856 = vector.broadcast %cst_347 : f32 to vector<2x32xf32>
    %cst_348 = arith.constant 0.000000e+00 : f32
    %857 = vector.broadcast %cst_348 : f32 to vector<2x32xf32>
    %cst_349 = arith.constant dense<0.000000e+00> : vector<2x32xf32>
    %858 = tpu.matmul %856, %745, %cst_349 {dimension_numbers = #tpu.dot_dimension_numbers<[1], [0], [0], [1], [0, 0, 1, 1], [], []>} : vector<2x32xf32>, vector<32x32xf32>, vector<2x32xf32> -> vector<2x32xf32>
    %859 = arith.addf %762, %858 : vector<2x32xf32>
    %cst_350 = arith.constant dense<0.000000e+00> : vector<2x32xf32>
    %860 = tpu.matmul %856, %747, %cst_350 {dimension_numbers = #tpu.dot_dimension_numbers<[1], [0], [0], [1], [0, 0, 1, 1], [], []>} : vector<2x32xf32>, vector<32x32xf32>, vector<2x32xf32> -> vector<2x32xf32>
    %861 = arith.addf %765, %860 : vector<2x32xf32>
    %cst_351 = arith.constant dense<0.000000e+00> : vector<2x32xf32>
    %862 = tpu.matmul %856, %749, %cst_351 {dimension_numbers = #tpu.dot_dimension_numbers<[1], [0], [0], [1], [0, 0, 1, 1], [], []>} : vector<2x32xf32>, vector<32x32xf32>, vector<2x32xf32> -> vector<2x32xf32>
    %863 = arith.addf %768, %862 : vector<2x32xf32>
    %cst_352 = arith.constant dense<0.000000e+00> : vector<2x32xf32>
    %864 = tpu.matmul %856, %751, %cst_352 {dimension_numbers = #tpu.dot_dimension_numbers<[1], [0], [0], [1], [0, 0, 1, 1], [], []>} : vector<2x32xf32>, vector<32x32xf32>, vector<2x32xf32> -> vector<2x32xf32>
    %865 = arith.addf %771, %864 : vector<2x32xf32>
    %866 = arith.negf %859 : vector<2x32xf32>
    %867 = math.exp %866 : vector<2x32xf32>
    %cst_353 = arith.constant 1.000000e+00 : f32
    %868 = vector.broadcast %cst_353 : f32 to vector<2x32xf32>
    %869 = arith.addf %868, %867 : vector<2x32xf32>
    %870 = arith.divf %868, %869 : vector<2x32xf32>
    %871 = arith.negf %861 : vector<2x32xf32>
    %872 = math.exp %871 : vector<2x32xf32>
    %cst_354 = arith.constant 1.000000e+00 : f32
    %873 = vector.broadcast %cst_354 : f32 to vector<2x32xf32>
    %874 = arith.addf %873, %872 : vector<2x32xf32>
    %875 = arith.divf %873, %874 : vector<2x32xf32>
    %876 = math.tanh %863 : vector<2x32xf32>
    %877 = arith.negf %865 : vector<2x32xf32>
    %878 = math.exp %877 : vector<2x32xf32>
    %cst_355 = arith.constant 1.000000e+00 : f32
    %879 = vector.broadcast %cst_355 : f32 to vector<2x32xf32>
    %880 = arith.addf %879, %878 : vector<2x32xf32>
    %881 = arith.divf %879, %880 : vector<2x32xf32>
    %882 = arith.mulf %875, %857 : vector<2x32xf32>
    %883 = arith.mulf %870, %876 : vector<2x32xf32>
    %884 = arith.addf %882, %883 : vector<2x32xf32>
    %885 = math.tanh %884 : vector<2x32xf32>
    %886 = arith.mulf %881, %885 : vector<2x32xf32>
    %cst_356 = arith.constant dense<0.000000e+00> : vector<2x32xf32>
    %887 = tpu.matmul %886, %745, %cst_356 {dimension_numbers = #tpu.dot_dimension_numbers<[1], [0], [0], [1], [0, 0, 1, 1], [], []>} : vector<2x32xf32>, vector<32x32xf32>, vector<2x32xf32> -> vector<2x32xf32>
    %888 = arith.addf %774, %887 : vector<2x32xf32>
    %cst_357 = arith.constant dense<0.000000e+00> : vector<2x32xf32>
    %889 = tpu.matmul %886, %747, %cst_357 {dimension_numbers = #tpu.dot_dimension_numbers<[1], [0], [0], [1], [0, 0, 1, 1], [], []>} : vector<2x32xf32>, vector<32x32xf32>, vector<2x32xf32> -> vector<2x32xf32>
    %890 = arith.addf %777, %889 : vector<2x32xf32>
    %cst_358 = arith.constant dense<0.000000e+00> : vector<2x32xf32>
    %891 = tpu.matmul %886, %749, %cst_358 {dimension_numbers = #tpu.dot_dimension_numbers<[1], [0], [0], [1], [0, 0, 1, 1], [], []>} : vector<2x32xf32>, vector<32x32xf32>, vector<2x32xf32> -> vector<2x32xf32>
    %892 = arith.addf %780, %891 : vector<2x32xf32>
    %cst_359 = arith.constant dense<0.000000e+00> : vector<2x32xf32>
    %893 = tpu.matmul %886, %751, %cst_359 {dimension_numbers = #tpu.dot_dimension_numbers<[1], [0], [0], [1], [0, 0, 1, 1], [], []>} : vector<2x32xf32>, vector<32x32xf32>, vector<2x32xf32> -> vector<2x32xf32>
    %894 = arith.addf %783, %893 : vector<2x32xf32>
    %895 = arith.negf %888 : vector<2x32xf32>
    %896 = math.exp %895 : vector<2x32xf32>
    %cst_360 = arith.constant 1.000000e+00 : f32
    %897 = vector.broadcast %cst_360 : f32 to vector<2x32xf32>
    %898 = arith.addf %897, %896 : vector<2x32xf32>
    %899 = arith.divf %897, %898 : vector<2x32xf32>
    %900 = arith.negf %890 : vector<2x32xf32>
    %901 = math.exp %900 : vector<2x32xf32>
    %cst_361 = arith.constant 1.000000e+00 : f32
    %902 = vector.broadcast %cst_361 : f32 to vector<2x32xf32>
    %903 = arith.addf %902, %901 : vector<2x32xf32>
    %904 = arith.divf %902, %903 : vector<2x32xf32>
    %905 = math.tanh %892 : vector<2x32xf32>
    %906 = arith.negf %894 : vector<2x32xf32>
    %907 = math.exp %906 : vector<2x32xf32>
    %cst_362 = arith.constant 1.000000e+00 : f32
    %908 = vector.broadcast %cst_362 : f32 to vector<2x32xf32>
    %909 = arith.addf %908, %907 : vector<2x32xf32>
    %910 = arith.divf %908, %909 : vector<2x32xf32>
    %911 = arith.mulf %904, %884 : vector<2x32xf32>
    %912 = arith.mulf %899, %905 : vector<2x32xf32>
    %913 = arith.addf %911, %912 : vector<2x32xf32>
    %914 = math.tanh %913 : vector<2x32xf32>
    %915 = arith.mulf %910, %914 : vector<2x32xf32>
    %cst_363 = arith.constant dense<0.000000e+00> : vector<2x32xf32>
    %916 = tpu.matmul %915, %745, %cst_363 {dimension_numbers = #tpu.dot_dimension_numbers<[1], [0], [0], [1], [0, 0, 1, 1], [], []>} : vector<2x32xf32>, vector<32x32xf32>, vector<2x32xf32> -> vector<2x32xf32>
    %917 = arith.addf %786, %916 : vector<2x32xf32>
    %cst_364 = arith.constant dense<0.000000e+00> : vector<2x32xf32>
    %918 = tpu.matmul %915, %747, %cst_364 {dimension_numbers = #tpu.dot_dimension_numbers<[1], [0], [0], [1], [0, 0, 1, 1], [], []>} : vector<2x32xf32>, vector<32x32xf32>, vector<2x32xf32> -> vector<2x32xf32>
    %919 = arith.addf %789, %918 : vector<2x32xf32>
    %cst_365 = arith.constant dense<0.000000e+00> : vector<2x32xf32>
    %920 = tpu.matmul %915, %749, %cst_365 {dimension_numbers = #tpu.dot_dimension_numbers<[1], [0], [0], [1], [0, 0, 1, 1], [], []>} : vector<2x32xf32>, vector<32x32xf32>, vector<2x32xf32> -> vector<2x32xf32>
    %921 = arith.addf %792, %920 : vector<2x32xf32>
    %cst_366 = arith.constant dense<0.000000e+00> : vector<2x32xf32>
    %922 = tpu.matmul %915, %751, %cst_366 {dimension_numbers = #tpu.dot_dimension_numbers<[1], [0], [0], [1], [0, 0, 1, 1], [], []>} : vector<2x32xf32>, vector<32x32xf32>, vector<2x32xf32> -> vector<2x32xf32>
    %923 = arith.addf %795, %922 : vector<2x32xf32>
    %924 = arith.negf %917 : vector<2x32xf32>
    %925 = math.exp %924 : vector<2x32xf32>
    %cst_367 = arith.constant 1.000000e+00 : f32
    %926 = vector.broadcast %cst_367 : f32 to vector<2x32xf32>
    %927 = arith.addf %926, %925 : vector<2x32xf32>
    %928 = arith.divf %926, %927 : vector<2x32xf32>
    %929 = arith.negf %919 : vector<2x32xf32>
    %930 = math.exp %929 : vector<2x32xf32>
    %cst_368 = arith.constant 1.000000e+00 : f32
    %931 = vector.broadcast %cst_368 : f32 to vector<2x32xf32>
    %932 = arith.addf %931, %930 : vector<2x32xf32>
    %933 = arith.divf %931, %932 : vector<2x32xf32>
    %934 = math.tanh %921 : vector<2x32xf32>
    %935 = arith.negf %923 : vector<2x32xf32>
    %936 = math.exp %935 : vector<2x32xf32>
    %cst_369 = arith.constant 1.000000e+00 : f32
    %937 = vector.broadcast %cst_369 : f32 to vector<2x32xf32>
    %938 = arith.addf %937, %936 : vector<2x32xf32>
    %939 = arith.divf %937, %938 : vector<2x32xf32>
    %940 = arith.mulf %933, %913 : vector<2x32xf32>
    %941 = arith.mulf %928, %934 : vector<2x32xf32>
    %942 = arith.addf %940, %941 : vector<2x32xf32>
    %943 = math.tanh %942 : vector<2x32xf32>
    %944 = arith.mulf %939, %943 : vector<2x32xf32>
    %cst_370 = arith.constant dense<0.000000e+00> : vector<2x32xf32>
    %945 = tpu.matmul %944, %745, %cst_370 {dimension_numbers = #tpu.dot_dimension_numbers<[1], [0], [0], [1], [0, 0, 1, 1], [], []>} : vector<2x32xf32>, vector<32x32xf32>, vector<2x32xf32> -> vector<2x32xf32>
    %946 = arith.addf %798, %945 : vector<2x32xf32>
    %cst_371 = arith.constant dense<0.000000e+00> : vector<2x32xf32>
    %947 = tpu.matmul %944, %747, %cst_371 {dimension_numbers = #tpu.dot_dimension_numbers<[1], [0], [0], [1], [0, 0, 1, 1], [], []>} : vector<2x32xf32>, vector<32x32xf32>, vector<2x32xf32> -> vector<2x32xf32>
    %948 = arith.addf %801, %947 : vector<2x32xf32>
    %cst_372 = arith.constant dense<0.000000e+00> : vector<2x32xf32>
    %949 = tpu.matmul %944, %749, %cst_372 {dimension_numbers = #tpu.dot_dimension_numbers<[1], [0], [0], [1], [0, 0, 1, 1], [], []>} : vector<2x32xf32>, vector<32x32xf32>, vector<2x32xf32> -> vector<2x32xf32>
    %950 = arith.addf %804, %949 : vector<2x32xf32>
    %cst_373 = arith.constant dense<0.000000e+00> : vector<2x32xf32>
    %951 = tpu.matmul %944, %751, %cst_373 {dimension_numbers = #tpu.dot_dimension_numbers<[1], [0], [0], [1], [0, 0, 1, 1], [], []>} : vector<2x32xf32>, vector<32x32xf32>, vector<2x32xf32> -> vector<2x32xf32>
    %952 = arith.addf %807, %951 : vector<2x32xf32>
    %953 = arith.negf %946 : vector<2x32xf32>
    %954 = math.exp %953 : vector<2x32xf32>
    %cst_374 = arith.constant 1.000000e+00 : f32
    %955 = vector.broadcast %cst_374 : f32 to vector<2x32xf32>
    %956 = arith.addf %955, %954 : vector<2x32xf32>
    %957 = arith.divf %955, %956 : vector<2x32xf32>
    %958 = arith.negf %948 : vector<2x32xf32>
    %959 = math.exp %958 : vector<2x32xf32>
    %cst_375 = arith.constant 1.000000e+00 : f32
    %960 = vector.broadcast %cst_375 : f32 to vector<2x32xf32>
    %961 = arith.addf %960, %959 : vector<2x32xf32>
    %962 = arith.divf %960, %961 : vector<2x32xf32>
    %963 = math.tanh %950 : vector<2x32xf32>
    %964 = arith.negf %952 : vector<2x32xf32>
    %965 = math.exp %964 : vector<2x32xf32>
    %cst_376 = arith.constant 1.000000e+00 : f32
    %966 = vector.broadcast %cst_376 : f32 to vector<2x32xf32>
    %967 = arith.addf %966, %965 : vector<2x32xf32>
    %968 = arith.divf %966, %967 : vector<2x32xf32>
    %969 = arith.mulf %962, %942 : vector<2x32xf32>
    %970 = arith.mulf %957, %963 : vector<2x32xf32>
    %971 = arith.addf %969, %970 : vector<2x32xf32>
    %972 = math.tanh %971 : vector<2x32xf32>
    %973 = arith.mulf %968, %972 : vector<2x32xf32>
    %cst_377 = arith.constant dense<0.000000e+00> : vector<2x32xf32>
    %974 = tpu.matmul %973, %745, %cst_377 {dimension_numbers = #tpu.dot_dimension_numbers<[1], [0], [0], [1], [0, 0, 1, 1], [], []>} : vector<2x32xf32>, vector<32x32xf32>, vector<2x32xf32> -> vector<2x32xf32>
    %975 = arith.addf %810, %974 : vector<2x32xf32>
    %cst_378 = arith.constant dense<0.000000e+00> : vector<2x32xf32>
    %976 = tpu.matmul %973, %747, %cst_378 {dimension_numbers = #tpu.dot_dimension_numbers<[1], [0], [0], [1], [0, 0, 1, 1], [], []>} : vector<2x32xf32>, vector<32x32xf32>, vector<2x32xf32> -> vector<2x32xf32>
    %977 = arith.addf %813, %976 : vector<2x32xf32>
    %cst_379 = arith.constant dense<0.000000e+00> : vector<2x32xf32>
    %978 = tpu.matmul %973, %749, %cst_379 {dimension_numbers = #tpu.dot_dimension_numbers<[1], [0], [0], [1], [0, 0, 1, 1], [], []>} : vector<2x32xf32>, vector<32x32xf32>, vector<2x32xf32> -> vector<2x32xf32>
    %979 = arith.addf %816, %978 : vector<2x32xf32>
    %cst_380 = arith.constant dense<0.000000e+00> : vector<2x32xf32>
    %980 = tpu.matmul %973, %751, %cst_380 {dimension_numbers = #tpu.dot_dimension_numbers<[1], [0], [0], [1], [0, 0, 1, 1], [], []>} : vector<2x32xf32>, vector<32x32xf32>, vector<2x32xf32> -> vector<2x32xf32>
    %981 = arith.addf %819, %980 : vector<2x32xf32>
    %982 = arith.negf %975 : vector<2x32xf32>
    %983 = math.exp %982 : vector<2x32xf32>
    %cst_381 = arith.constant 1.000000e+00 : f32
    %984 = vector.broadcast %cst_381 : f32 to vector<2x32xf32>
    %985 = arith.addf %984, %983 : vector<2x32xf32>
    %986 = arith.divf %984, %985 : vector<2x32xf32>
    %987 = arith.negf %977 : vector<2x32xf32>
    %988 = math.exp %987 : vector<2x32xf32>
    %cst_382 = arith.constant 1.000000e+00 : f32
    %989 = vector.broadcast %cst_382 : f32 to vector<2x32xf32>
    %990 = arith.addf %989, %988 : vector<2x32xf32>
    %991 = arith.divf %989, %990 : vector<2x32xf32>
    %992 = math.tanh %979 : vector<2x32xf32>
    %993 = arith.negf %981 : vector<2x32xf32>
    %994 = math.exp %993 : vector<2x32xf32>
    %cst_383 = arith.constant 1.000000e+00 : f32
    %995 = vector.broadcast %cst_383 : f32 to vector<2x32xf32>
    %996 = arith.addf %995, %994 : vector<2x32xf32>
    %997 = arith.divf %995, %996 : vector<2x32xf32>
    %998 = arith.mulf %991, %971 : vector<2x32xf32>
    %999 = arith.mulf %986, %992 : vector<2x32xf32>
    %1000 = arith.addf %998, %999 : vector<2x32xf32>
    %1001 = math.tanh %1000 : vector<2x32xf32>
    %1002 = arith.mulf %997, %1001 : vector<2x32xf32>
    %cst_384 = arith.constant dense<0.000000e+00> : vector<2x32xf32>
    %1003 = tpu.matmul %1002, %745, %cst_384 {dimension_numbers = #tpu.dot_dimension_numbers<[1], [0], [0], [1], [0, 0, 1, 1], [], []>} : vector<2x32xf32>, vector<32x32xf32>, vector<2x32xf32> -> vector<2x32xf32>
    %1004 = arith.addf %822, %1003 : vector<2x32xf32>
    %cst_385 = arith.constant dense<0.000000e+00> : vector<2x32xf32>
    %1005 = tpu.matmul %1002, %747, %cst_385 {dimension_numbers = #tpu.dot_dimension_numbers<[1], [0], [0], [1], [0, 0, 1, 1], [], []>} : vector<2x32xf32>, vector<32x32xf32>, vector<2x32xf32> -> vector<2x32xf32>
    %1006 = arith.addf %825, %1005 : vector<2x32xf32>
    %cst_386 = arith.constant dense<0.000000e+00> : vector<2x32xf32>
    %1007 = tpu.matmul %1002, %749, %cst_386 {dimension_numbers = #tpu.dot_dimension_numbers<[1], [0], [0], [1], [0, 0, 1, 1], [], []>} : vector<2x32xf32>, vector<32x32xf32>, vector<2x32xf32> -> vector<2x32xf32>
    %1008 = arith.addf %828, %1007 : vector<2x32xf32>
    %cst_387 = arith.constant dense<0.000000e+00> : vector<2x32xf32>
    %1009 = tpu.matmul %1002, %751, %cst_387 {dimension_numbers = #tpu.dot_dimension_numbers<[1], [0], [0], [1], [0, 0, 1, 1], [], []>} : vector<2x32xf32>, vector<32x32xf32>, vector<2x32xf32> -> vector<2x32xf32>
    %1010 = arith.addf %831, %1009 : vector<2x32xf32>
    %1011 = arith.negf %1004 : vector<2x32xf32>
    %1012 = math.exp %1011 : vector<2x32xf32>
    %cst_388 = arith.constant 1.000000e+00 : f32
    %1013 = vector.broadcast %cst_388 : f32 to vector<2x32xf32>
    %1014 = arith.addf %1013, %1012 : vector<2x32xf32>
    %1015 = arith.divf %1013, %1014 : vector<2x32xf32>
    %1016 = arith.negf %1006 : vector<2x32xf32>
    %1017 = math.exp %1016 : vector<2x32xf32>
    %cst_389 = arith.constant 1.000000e+00 : f32
    %1018 = vector.broadcast %cst_389 : f32 to vector<2x32xf32>
    %1019 = arith.addf %1018, %1017 : vector<2x32xf32>
    %1020 = arith.divf %1018, %1019 : vector<2x32xf32>
    %1021 = math.tanh %1008 : vector<2x32xf32>
    %1022 = arith.negf %1010 : vector<2x32xf32>
    %1023 = math.exp %1022 : vector<2x32xf32>
    %cst_390 = arith.constant 1.000000e+00 : f32
    %1024 = vector.broadcast %cst_390 : f32 to vector<2x32xf32>
    %1025 = arith.addf %1024, %1023 : vector<2x32xf32>
    %1026 = arith.divf %1024, %1025 : vector<2x32xf32>
    %1027 = arith.mulf %1020, %1000 : vector<2x32xf32>
    %1028 = arith.mulf %1015, %1021 : vector<2x32xf32>
    %1029 = arith.addf %1027, %1028 : vector<2x32xf32>
    %1030 = math.tanh %1029 : vector<2x32xf32>
    %1031 = arith.mulf %1026, %1030 : vector<2x32xf32>
    %cst_391 = arith.constant dense<0.000000e+00> : vector<2x32xf32>
    %1032 = tpu.matmul %1031, %745, %cst_391 {dimension_numbers = #tpu.dot_dimension_numbers<[1], [0], [0], [1], [0, 0, 1, 1], [], []>} : vector<2x32xf32>, vector<32x32xf32>, vector<2x32xf32> -> vector<2x32xf32>
    %1033 = arith.addf %834, %1032 : vector<2x32xf32>
    %cst_392 = arith.constant dense<0.000000e+00> : vector<2x32xf32>
    %1034 = tpu.matmul %1031, %747, %cst_392 {dimension_numbers = #tpu.dot_dimension_numbers<[1], [0], [0], [1], [0, 0, 1, 1], [], []>} : vector<2x32xf32>, vector<32x32xf32>, vector<2x32xf32> -> vector<2x32xf32>
    %1035 = arith.addf %837, %1034 : vector<2x32xf32>
    %cst_393 = arith.constant dense<0.000000e+00> : vector<2x32xf32>
    %1036 = tpu.matmul %1031, %749, %cst_393 {dimension_numbers = #tpu.dot_dimension_numbers<[1], [0], [0], [1], [0, 0, 1, 1], [], []>} : vector<2x32xf32>, vector<32x32xf32>, vector<2x32xf32> -> vector<2x32xf32>
    %1037 = arith.addf %840, %1036 : vector<2x32xf32>
    %cst_394 = arith.constant dense<0.000000e+00> : vector<2x32xf32>
    %1038 = tpu.matmul %1031, %751, %cst_394 {dimension_numbers = #tpu.dot_dimension_numbers<[1], [0], [0], [1], [0, 0, 1, 1], [], []>} : vector<2x32xf32>, vector<32x32xf32>, vector<2x32xf32> -> vector<2x32xf32>
    %1039 = arith.addf %843, %1038 : vector<2x32xf32>
    %1040 = arith.negf %1033 : vector<2x32xf32>
    %1041 = math.exp %1040 : vector<2x32xf32>
    %cst_395 = arith.constant 1.000000e+00 : f32
    %1042 = vector.broadcast %cst_395 : f32 to vector<2x32xf32>
    %1043 = arith.addf %1042, %1041 : vector<2x32xf32>
    %1044 = arith.divf %1042, %1043 : vector<2x32xf32>
    %1045 = arith.negf %1035 : vector<2x32xf32>
    %1046 = math.exp %1045 : vector<2x32xf32>
    %cst_396 = arith.constant 1.000000e+00 : f32
    %1047 = vector.broadcast %cst_396 : f32 to vector<2x32xf32>
    %1048 = arith.addf %1047, %1046 : vector<2x32xf32>
    %1049 = arith.divf %1047, %1048 : vector<2x32xf32>
    %1050 = math.tanh %1037 : vector<2x32xf32>
    %1051 = arith.negf %1039 : vector<2x32xf32>
    %1052 = math.exp %1051 : vector<2x32xf32>
    %cst_397 = arith.constant 1.000000e+00 : f32
    %1053 = vector.broadcast %cst_397 : f32 to vector<2x32xf32>
    %1054 = arith.addf %1053, %1052 : vector<2x32xf32>
    %1055 = arith.divf %1053, %1054 : vector<2x32xf32>
    %1056 = arith.mulf %1049, %1029 : vector<2x32xf32>
    %1057 = arith.mulf %1044, %1050 : vector<2x32xf32>
    %1058 = arith.addf %1056, %1057 : vector<2x32xf32>
    %1059 = math.tanh %1058 : vector<2x32xf32>
    %1060 = arith.mulf %1055, %1059 : vector<2x32xf32>
    %cst_398 = arith.constant dense<0.000000e+00> : vector<2x32xf32>
    %1061 = tpu.matmul %1060, %745, %cst_398 {dimension_numbers = #tpu.dot_dimension_numbers<[1], [0], [0], [1], [0, 0, 1, 1], [], []>} : vector<2x32xf32>, vector<32x32xf32>, vector<2x32xf32> -> vector<2x32xf32>
    %1062 = arith.addf %846, %1061 : vector<2x32xf32>
    %cst_399 = arith.constant dense<0.000000e+00> : vector<2x32xf32>
    %1063 = tpu.matmul %1060, %747, %cst_399 {dimension_numbers = #tpu.dot_dimension_numbers<[1], [0], [0], [1], [0, 0, 1, 1], [], []>} : vector<2x32xf32>, vector<32x32xf32>, vector<2x32xf32> -> vector<2x32xf32>
    %1064 = arith.addf %849, %1063 : vector<2x32xf32>
    %cst_400 = arith.constant dense<0.000000e+00> : vector<2x32xf32>
    %1065 = tpu.matmul %1060, %749, %cst_400 {dimension_numbers = #tpu.dot_dimension_numbers<[1], [0], [0], [1], [0, 0, 1, 1], [], []>} : vector<2x32xf32>, vector<32x32xf32>, vector<2x32xf32> -> vector<2x32xf32>
    %1066 = arith.addf %852, %1065 : vector<2x32xf32>
    %cst_401 = arith.constant dense<0.000000e+00> : vector<2x32xf32>
    %1067 = tpu.matmul %1060, %751, %cst_401 {dimension_numbers = #tpu.dot_dimension_numbers<[1], [0], [0], [1], [0, 0, 1, 1], [], []>} : vector<2x32xf32>, vector<32x32xf32>, vector<2x32xf32> -> vector<2x32xf32>
    %1068 = arith.addf %855, %1067 : vector<2x32xf32>
    %1069 = arith.negf %1062 : vector<2x32xf32>
    %1070 = math.exp %1069 : vector<2x32xf32>
    %cst_402 = arith.constant 1.000000e+00 : f32
    %1071 = vector.broadcast %cst_402 : f32 to vector<2x32xf32>
    %1072 = arith.addf %1071, %1070 : vector<2x32xf32>
    %1073 = arith.divf %1071, %1072 : vector<2x32xf32>
    %1074 = arith.negf %1064 : vector<2x32xf32>
    %1075 = math.exp %1074 : vector<2x32xf32>
    %cst_403 = arith.constant 1.000000e+00 : f32
    %1076 = vector.broadcast %cst_403 : f32 to vector<2x32xf32>
    %1077 = arith.addf %1076, %1075 : vector<2x32xf32>
    %1078 = arith.divf %1076, %1077 : vector<2x32xf32>
    %1079 = math.tanh %1066 : vector<2x32xf32>
    %1080 = arith.negf %1068 : vector<2x32xf32>
    %1081 = math.exp %1080 : vector<2x32xf32>
    %cst_404 = arith.constant 1.000000e+00 : f32
    %1082 = vector.broadcast %cst_404 : f32 to vector<2x32xf32>
    %1083 = arith.addf %1082, %1081 : vector<2x32xf32>
    %1084 = arith.divf %1082, %1083 : vector<2x32xf32>
    %1085 = arith.mulf %1078, %1058 : vector<2x32xf32>
    %1086 = arith.mulf %1073, %1079 : vector<2x32xf32>
    %1087 = arith.addf %1085, %1086 : vector<2x32xf32>
    %1088 = math.tanh %1087 : vector<2x32xf32>
    %1089 = arith.mulf %1084, %1088 : vector<2x32xf32>
    %c2_405 = arith.constant 2 : index
    %c0_406 = arith.constant 0 : index
    %c0_407 = arith.constant 0 : index
    %1090 = vector.load %arg11[%c2_405, %c0_406, %c0_407] : memref<3x2x32xf32, #tpu.memory_space<vmem>>, vector<1x2x32xf32>
    %1091 = vector.shape_cast %1090 : vector<1x2x32xf32> to vector<2x32xf32>
    %1092 = vector.shape_cast %1089 : vector<2x32xf32> to vector<1x2x32xf32>
    tpu.vector_store %arg11[%c2_405, %c0_406, %c0_407], %1092 {strides = array<i32>} : memref<3x2x32xf32, #tpu.memory_space<vmem>>, vector<1x2x32xf32>,
    %c2_408 = arith.constant 2 : index
    %c0_409 = arith.constant 0 : index
    %c0_410 = arith.constant 0 : index
    %1093 = vector.load %arg12[%c2_408, %c0_409, %c0_410] : memref<3x2x32xf32, #tpu.memory_space<vmem>>, vector<1x2x32xf32>
    %1094 = vector.shape_cast %1093 : vector<1x2x32xf32> to vector<2x32xf32>
    %1095 = vector.shape_cast %1087 : vector<2x32xf32> to vector<1x2x32xf32>
    tpu.vector_store %arg12[%c2_408, %c0_409, %c0_410], %1095 {strides = array<i32>} : memref<3x2x32xf32, #tpu.memory_space<vmem>>, vector<1x2x32xf32>,
    %1096 = vector.shape_cast %886 : vector<2x32xf32> to vector<1x2x32xf32>
    %1097 = vector.shape_cast %915 : vector<2x32xf32> to vector<1x2x32xf32>
    %1098 = vector.shape_cast %944 : vector<2x32xf32> to vector<1x2x32xf32>
    %1099 = vector.shape_cast %973 : vector<2x32xf32> to vector<1x2x32xf32>
    %1100 = vector.shape_cast %1002 : vector<2x32xf32> to vector<1x2x32xf32>
    %1101 = vector.shape_cast %1031 : vector<2x32xf32> to vector<1x2x32xf32>
    %1102 = vector.shape_cast %1060 : vector<2x32xf32> to vector<1x2x32xf32>
    %1103 = vector.shape_cast %1089 : vector<2x32xf32> to vector<1x2x32xf32>
    %1104 = tpu.concatenate %1096, %1097, %1098, %1099, %1100, %1101, %1102, %1103 in 0 : vector<1x2x32xf32>, vector<1x2x32xf32>, vector<1x2x32xf32>, vector<1x2x32xf32>, vector<1x2x32xf32>, vector<1x2x32xf32>, vector<1x2x32xf32>, vector<1x2x32xf32> -> vector<8x2x32xf32>
    %c0_411 = arith.constant 0 : index
    %c0_412 = arith.constant 0 : index
    %c0_413 = arith.constant 0 : index
    %1105 = vector.load %arg10[%c0_411, %c0_412, %c0_413] : memref<8x2x32xf32, #tpu.memory_space<vmem>>, vector<8x2x32xf32>
    tpu.vector_store %arg10[%c0_411, %c0_412, %c0_413], %1104 {strides = array<i32>} : memref<8x2x32xf32, #tpu.memory_space<vmem>>, vector<8x2x32xf32>,
    return
  }
}

</mosaic_0001>

<bundles_post_ra>
// kernel: encoder_forward.1
= control target key start
LH: loop header
LB: loop body
LE: loop exit
PB: predicated region body
PF: predicated region fallthrough
CT: control target
= control target key end

     0   :  { %18 = vsyncpa [#allocation3], 0  ;;  %s8875_s0 = inlined_call_operand.vmem [shape: f32[8,2,4], index: 0, kind: input, shape index: {}]   ;;  %s8876_s1 = inlined_call_operand.vmem [shape: f32[4,4,32], index: 1, kind: input, shape index: {}]   ;;  %s8877_s2 = inlined_call_operand.hbm [shape: f32[4,32,32], index: 2, kind: input, shape index: {}]   ;;  %s8878_s3 = inlined_call_operand.vmem [shape: f32[4,1,32], index: 3, kind: input, shape index: {}]   ;;  %s8879_s4 = inlined_call_operand.hbm [shape: f32[4,32,32], index: 4, kind: input, shape index: {}]   ;;  %s8880_s5 = inlined_call_operand.hbm [shape: f32[4,32,32], index: 5, kind: input, shape index: {}]   ;;  %s8881_s6 = inlined_call_operand.vmem [shape: f32[4,1,32], index: 6, kind: input, shape index: {}]   ;;  %s8882_s7 = inlined_call_operand.hbm [shape: f32[4,32,32], index: 7, kind: input, shape index: {}]   ;;  %s8883_s8 = inlined_call_operand.hbm [shape: f32[4,32,32], index: 8, kind: input, shape index: {}]   ;;  %s8884_s9 = inlined_call_operand.vmem [shape: f32[4,1,32], index: 9, kind: input, shape index: {}]   ;;  %s8885_s10 = inlined_call_operand.vmem [shape: f32[8,2,32], index: 10, kind: output, shape index: {0}]   ;;  %s8886_s11 = inlined_call_operand.hbm [shape: f32[3,2,32], index: 11, kind: output, shape index: {1}]   ;;  %s8887_s12 = inlined_call_operand.hbm [shape: f32[3,2,32], index: 12, kind: output, shape index: {2}]  }
   0x1   :  { %19 = vsyncpa [#allocation6], 0 }
   0x2   :  { %20 = vsyncpa [#allocation9], 0 }
   0x3   :  { %21 = vsyncpa [#allocation4], 0 }
   0x4   :  { %22 = vsyncpa [#allocation13], 0  ;;  %s46_s23 = sshll.u32 %s8879_s4, 4  ;;  %s6862_s24 = smov [#allocation5]   ;;  %s47_s23 = int_to_ptr.hbm [resolvable:$true] %s46_s23 }
   0x5   :  { %s48_s25 = sshll.u32 %s6862_s24, 4  ;;  %s74_s28 = sshll.u32 %s8882_s7, 4  ;;  %s49_s25 = int_to_ptr.vmem [resolvable:$true] %s48_s25  ;;  %s75_s28 = int_to_ptr.hbm [resolvable:$true] %s74_s28 }
   0x6   :  { %s6863_s29 = smov 128   ;;  %s6864_s30 = smov 8  }
   0x7   :  { %54 = dma.hbm_to_vmem [thread:$0]  %s47_s23, 2048, %s49_s25, [#allocation6], %s6863_s29, %s6863_s29, %s6864_s30  }
   0x8   :  { %s6865_s13 = smov [#allocation8]   ;;  %s31_s17 = sshll.u32 %s8877_s2, 4  ;;  %s32_s17 = int_to_ptr.hbm [resolvable:$true] %s31_s17 }
   0x9   :  { %s76_s14 = sshll.u32 %s6865_s13, 4  ;;  %s59_s19 = sshll.u32 %s8880_s5, 4  ;;  %s77_s14 = int_to_ptr.vmem [resolvable:$true] %s76_s14  ;;  %s60_s19 = int_to_ptr.hbm [resolvable:$true] %s59_s19 }
   0xa   :  { %82 = dma.hbm_to_vmem [thread:$0]  %s75_s28, 2048, %s77_s14, [#allocation9], %s6863_s29, %s6863_s29, %s6864_s30  }
   0xb   :  { %s6866_s20 = smov [#allocation2]   ;;  %s6867_s7 = smov [#allocation7]  }
   0xc   :  { %s33_s21 = sshll.u32 %s6866_s20, 4  ;;  %s61_s22 = sshll.u32 %s6867_s7, 4  ;;  %s34_s21 = int_to_ptr.vmem [resolvable:$true] %s33_s21  ;;  %s62_s22 = int_to_ptr.vmem [resolvable:$true] %s61_s22 }
   0xd   :  { %39 = dma.hbm_to_vmem [thread:$0]  %s32_s17, 2048, %s34_s21, [#allocation3], %s6863_s29, %s6863_s29, %s6864_s30  }
   0xe   :  { %s87_s25 = sshll.u32 %s8883_s8, 4  ;;  %s6868_s2 = smov [#allocation10]   ;;  %s88_s25 = int_to_ptr.hbm [resolvable:$true] %s87_s25 }
   0xf   :  { %67 = dma.hbm_to_vmem [thread:$0]  %s60_s19, 2048, %s62_s22, [#allocation6], %s6863_s29, %s6863_s29, %s6864_s30  }
  0x10   :  { %s89_s26 = sshll.u32 %s6868_s2, 4  ;;  %s90_s26 = int_to_ptr.vmem [resolvable:$true] %s89_s26 }
  0x11   :  { %95 = dma.hbm_to_vmem [thread:$0]  %s88_s25, 2048, %s90_s26, [#allocation9], %s6863_s29, %s6863_s29, %s6864_s30  }
  0x12   :  { %6852 = dma.done.wait [#allocation3], 2048  }
  0x13   :  { %6853 = vsyncadd [#allocation3], 4294965248 }
  0x14   :  { %6854 = dma.done.wait [#allocation6], 4096  }
  0x15   :  { %6855 = vsyncadd [#allocation6], 4294963200 }
  0x16   :  { %6856 = dma.done.wait [#allocation9], 4096  }
  0x17   :  { %6857 = vsyncadd [#allocation9], 4294963200  ;;  %vm173_vm0 = vcmask 1043456   ;;  %vm169_vm1 = vcmask 31744   ;;  %v133_v0 = vld [vmem:[%s8876_s1] sm:$0xf] }
  0x18   :  { %v5920_v1 = vld [vmem:[%s8876_s1 + $0x4] sm:$0xf]  ;;  %v6963_v2 = vld [vmem:[%s8876_s1 + $0x8] sm:$0xf]  ;;  %5926 = vmatpush.msk.msra.mxu0 %vm173_vm0, %v133_v0  ;;  %v5922_v3 = vld [vmem:[%s8876_s1 + $0xc] sm:$0xf] }
  0x19   :  { %5928 = vmatpush.msk.msra.mxu1 %vm173_vm0, %v5920_v1  ;;  %v118_v4 = vld [vmem:[%s8875_s0] sm:$0x3]  ;;  %5930 = vmatpush.msk.msra.mxu2 %vm173_vm0, %v6963_v2  ;;  %v5913_v5 = vld [vmem:[%s8875_s0 + $0x2] sm:$0x3]  ;;  %v5914_v6 = vld [vmem:[%s8875_s0 + $0x4] sm:$0x3] }
  0x1a   :  { %5932 = vmatpush.msk.msra.mxu3 %vm173_vm0, %v5922_v3  ;;  %5927 = vmatmul.msk.f32.vlgmr.msra.gmra.mxu0 %vm169_vm1, %v118_v4  ;;  %v5915_v7 = vld [vmem:[%s8875_s0 + $0x6] sm:$0x3]  ;;  %v5916_v8 = vld [vmem:[%s8875_s0 + $0x8] sm:$0x3]  ;;  %v5917_v9 = vld [vmem:[%s8875_s0 + $0xa] sm:$0x3] }
  0x1b   :  { %5929 = vmatmul.msk.f32.vlgmr.msra.gmra.mxu1 %vm169_vm1, %v118_v4  ;;  %5931 = vmatmul.msk.f32.vlgmr.msra.gmra.mxu2 %vm169_vm1, %v118_v4  ;;  %v5918_v10 = vld [vmem:[%s8875_s0 + $0xc] sm:$0x3]  ;;  %v7053_v11 = vld [vmem:[#allocation2 + $0x18] sm:$0xff]  ;;  %v7065_v15 = vld [vmem:[#allocation2 + $0x10] sm:$0xff]  ;;  %v8888_v28 = vmov 0.0   ;;  %vm856_vm14 = vcmask 261120  }
  0x1c   :  { %5933 = vmatmul.msk.f32.vlgmr.msra.gmra.mxu3 %vm169_vm1, %v118_v4  ;;  %5934 = vmatpush.msk.msrb.mxu0 %vm173_vm0, %v133_v0  ;;  %v7055_v12 = vld [vmem:[#allocation2 + $0x38] sm:$0xff]  ;;  %v7067_v16 = vld [vmem:[#allocation2 + $0x30] sm:$0xff]  ;;  %v7077_v19 = vld [vmem:[#allocation2 + $0x8] sm:$0xff]  ;;  %s6870_s29 = smov [#allocation12]   ;;  %s5891_s1 = sshll.u32 %s8887_s12, 4  ;;  %s5892_s1 = int_to_ptr.hbm [resolvable:$true] %s5891_s1 }
  0x1d   :  { %5936 = vmatpush.msk.msrb.mxu1 %vm173_vm0, %v5920_v1  ;;  %5940 = vmatpush.msk.msrb.mxu3 %vm173_vm0, %v5922_v3  ;;  %v7059_v13 = vld [vmem:[#allocation2 + $0x58] sm:$0xff]  ;;  %v7071_v17 = vld [vmem:[#allocation2 + $0x50] sm:$0xff]  ;;  %v7079_v20 = vld [vmem:[#allocation2 + $0x28] sm:$0xff]  ;;  %s5889_s30 = sshll.u32 %s6870_s29, 4  ;;  %s6871_s17 = smov 32   ;;  %s5890_s30 = int_to_ptr.vmem [resolvable:$true] %s5889_s30 }
  0x1e   :  { %5938 = vmatpush.msk.msrb.mxu2 %vm173_vm0, %v6963_v2  ;;  %5942 = vmatpush.msk.msra.mxu0 %vm173_vm0, %v133_v0  ;;  %v7061_v14 = vld [vmem:[#allocation2 + $0x78] sm:$0xff]  ;;  %v7073_v18 = vld [vmem:[#allocation2 + $0x70] sm:$0xff]  ;;  %v7083_v21 = vld [vmem:[#allocation2 + $0x48] sm:$0xff]  ;;  %s6872_s4 = smov 2   ;;  %s6873_s12 = smov [#allocation11]  }
  0x1f   :  { %5944 = vmatpush.msk.msra.mxu1 %vm173_vm0, %v5920_v1  ;;  %5948 = vmatpush.msk.msra.mxu3 %vm173_vm0, %v5922_v3  ;;  %v7085_v22 = vld [vmem:[#allocation2 + $0x68] sm:$0xff]  ;;  %v7096_v24 = vld [vmem:[#allocation2] sm:$0xff]  ;;  %s5876_s18 = sshll.u32 %s6873_s12, 4  ;;  %s5878_s20 = sshll.u32 %s8886_s11, 4  ;;  %s5877_s18 = int_to_ptr.vmem [resolvable:$true] %s5876_s18  ;;  %s5879_s20 = int_to_ptr.hbm [resolvable:$true] %s5878_s20 }
  0x20   :  { %5946 = vmatpush.msk.msra.mxu2 %vm173_vm0, %v6963_v2  ;;  %v5919_v23 = vld [vmem:[%s8875_s0 + $0xe] sm:$0x3]  ;;  %v7098_v25 = vld [vmem:[#allocation2 + $0x20] sm:$0xff] }
  0x21   :  { %v7102_v26 = vld [vmem:[#allocation2 + $0x40] sm:$0xff] }
  0x22   :  { %5935 = vmatmul.msk.f32.vlgmr.msrb.gmra.mxu0 %vm169_vm1, %v5913_v5  ;;  %v7104_v27 = vld [vmem:[#allocation2 + $0x60] sm:$0xff] }
  0x23   :  { %5937 = vmatmul.msk.f32.vlgmr.msrb.gmra.mxu1 %vm169_vm1, %v5913_v5  ;;  %5939 = vmatmul.msk.f32.vlgmr.msrb.gmra.mxu2 %vm169_vm1, %v5913_v5  ;;  %v7201_v58 = vld [vmem:[%s8878_s3] ss:$0 sm:$0xff]  ;;  %v7206_v59 = vld [vmem:[%s8878_s3 + $0x1] ss:$0 sm:$0xff]  ;;  %v7217_v4 = vld [vmem:[%s8878_s3 + $0x3] ss:$0 sm:$0xff] }
  0x24   :  { %5941 = vmatmul.msk.f32.vlgmr.msrb.gmra.mxu3 %vm169_vm1, %v5913_v5  ;;  %5950 = vmatpush.msk.msrb.mxu0 %vm173_vm0, %v133_v0 }
  0x25   :  { %5952 = vmatpush.msk.msrb.mxu1 %vm173_vm0, %v5920_v1  ;;  %5956 = vmatpush.msk.msrb.mxu3 %vm173_vm0, %v5922_v3 }
  0x26   :  { %5954 = vmatpush.msk.msrb.mxu2 %vm173_vm0, %v6963_v2 }
  0x2a   :  { %5943 = vmatmul.msk.f32.vlgmr.msra.gmra.mxu0 %vm169_vm1, %v5914_v6 }
  0x2b   :  { %5945 = vmatmul.msk.f32.vlgmr.msra.gmra.mxu1 %vm169_vm1, %v5914_v6  ;;  %5947 = vmatmul.msk.f32.vlgmr.msra.gmra.mxu2 %vm169_vm1, %v5914_v6 }
  0x2c   :  { %5949 = vmatmul.msk.f32.vlgmr.msra.gmra.mxu3 %vm169_vm1, %v5914_v6  ;;  %5958 = vmatpush.msk.msra.mxu0 %vm173_vm0, %v133_v0 }
  0x2d   :  { %5960 = vmatpush.msk.msra.mxu1 %vm173_vm0, %v5920_v1  ;;  %5964 = vmatpush.msk.msra.mxu3 %vm173_vm0, %v5922_v3 }
  0x2e   :  { %5962 = vmatpush.msk.msra.mxu2 %vm173_vm0, %v6963_v2 }
  0x32   :  { %5951 = vmatmul.msk.f32.vlgmr.msrb.gmra.mxu0 %vm169_vm1, %v5915_v7 }
  0x33   :  { %5953 = vmatmul.msk.f32.vlgmr.msrb.gmra.mxu1 %vm169_vm1, %v5915_v7  ;;  %5955 = vmatmul.msk.f32.vlgmr.msrb.gmra.mxu2 %vm169_vm1, %v5915_v7 }
  0x34   :  { %5957 = vmatmul.msk.f32.vlgmr.msrb.gmra.mxu3 %vm169_vm1, %v5915_v7  ;;  %5966 = vmatpush.msk.msrb.mxu0 %vm173_vm0, %v133_v0 }
  0x35   :  { %5968 = vmatpush.msk.msrb.mxu1 %vm173_vm0, %v5920_v1  ;;  %5972 = vmatpush.msk.msrb.mxu3 %vm173_vm0, %v5922_v3 }
  0x36   :  { %5970 = vmatpush.msk.msrb.mxu2 %vm173_vm0, %v6963_v2 }
  0x3a   :  { %5959 = vmatmul.msk.f32.vlgmr.msra.gmra.mxu0 %vm169_vm1, %v5916_v8 }
  0x3b   :  { %5961 = vmatmul.msk.f32.vlgmr.msra.gmra.mxu1 %vm169_vm1, %v5916_v8  ;;  %5963 = vmatmul.msk.f32.vlgmr.msra.gmra.mxu2 %vm169_vm1, %v5916_v8 }
  0x3c   :  { %5965 = vmatmul.msk.f32.vlgmr.msra.gmra.mxu3 %vm169_vm1, %v5916_v8  ;;  %5974 = vmatpush.msk.msra.mxu0 %vm173_vm0, %v133_v0 }
  0x3d   :  { %5976 = vmatpush.msk.msra.mxu1 %vm173_vm0, %v5920_v1  ;;  %5980 = vmatpush.msk.msra.mxu3 %vm173_vm0, %v5922_v3 }
  0x3e   :  { %5978 = vmatpush.msk.msra.mxu2 %vm173_vm0, %v6963_v2 }
  0x42   :  { %5967 = vmatmul.msk.f32.vlgmr.msrb.gmra.mxu0 %vm169_vm1, %v5917_v9 }
  0x43   :  { %5969 = vmatmul.msk.f32.vlgmr.msrb.gmra.mxu1 %vm169_vm1, %v5917_v9  ;;  %5971 = vmatmul.msk.f32.vlgmr.msrb.gmra.mxu2 %vm169_vm1, %v5917_v9 }
  0x44   :  { %5973 = vmatmul.msk.f32.vlgmr.msrb.gmra.mxu3 %vm169_vm1, %v5917_v9  ;;  %5982 = vmatpush.msk.msrb.mxu0 %vm173_vm0, %v133_v0 }
  0x45   :  { %5984 = vmatpush.msk.msrb.mxu1 %vm173_vm0, %v5920_v1  ;;  %5988 = vmatpush.msk.msrb.mxu3 %vm173_vm0, %v5922_v3 }
  0x46   :  { %5986 = vmatpush.msk.msrb.mxu2 %vm173_vm0, %v6963_v2 }
  0x4a   :  { %5975 = vmatmul.msk.f32.vlgmr.msra.gmra.mxu0 %vm169_vm1, %v5918_v10 }
  0x4b   :  { %5977 = vmatmul.msk.f32.vlgmr.msra.gmra.mxu1 %vm169_vm1, %v5918_v10  ;;  %5979 = vmatmul.msk.f32.vlgmr.msra.gmra.mxu2 %vm169_vm1, %v5918_v10 }
  0x4c   :  { %5981 = vmatmul.msk.f32.vlgmr.msra.gmra.mxu3 %vm169_vm1, %v5918_v10  ;;  %872 = vmatpush.msra.mxu0 %v7053_v11 }
  0x4d   :  { %893 = vmatpush.msra.mxu1 %v7055_v12  ;;  %914 = vmatpush.msra.mxu2 %v7059_v13 }
  0x4e   :  { %935 = vmatpush.msra.mxu3 %v7061_v14  ;;  %873 = vmatpush.msra.mxu0 %v7065_v15 }
  0x4f   :  { %894 = vmatpush.msra.mxu1 %v7067_v16  ;;  %915 = vmatpush.msra.mxu2 %v7071_v17 }
  0x50   :  { %936 = vmatpush.msra.mxu3 %v7073_v18  ;;  %874 = vmatpush.msra.mxu0 %v7077_v19 }
  0x51   :  { %895 = vmatpush.msra.mxu1 %v7079_v20  ;;  %916 = vmatpush.msra.mxu2 %v7083_v21 }
  0x52   :  { %937 = vmatpush.msra.mxu3 %v7085_v22  ;;  %5983 = vmatmul.msk.f32.vlgmr.msrb.gmra.mxu0 %vm169_vm1, %v5919_v23 }
  0x53   :  { %5985 = vmatmul.msk.f32.vlgmr.msrb.gmra.mxu1 %vm169_vm1, %v5919_v23  ;;  %5987 = vmatmul.msk.f32.vlgmr.msrb.gmra.mxu2 %vm169_vm1, %v5919_v23 }
  0x54   :  { %5989 = vmatmul.msk.f32.vlgmr.msrb.gmra.mxu3 %vm169_vm1, %v5919_v23  ;;  %875 = vmatpush.msra.mxu0 %v7096_v24 }
  0x55   :  { %896 = vmatpush.msra.mxu1 %v7098_v25  ;;  %917 = vmatpush.msra.mxu2 %v7102_v26 }
  0x56   :  { %938 = vmatpush.msra.mxu3 %v7104_v27  ;;  %1022 = vmatpush.msrb.mxu0 %v7053_v11 }
  0x57   :  { %1043 = vmatpush.msrb.mxu1 %v7055_v12  ;;  %1064 = vmatpush.msrb.mxu2 %v7059_v13 }
  0x58   :  { %1085 = vmatpush.msrb.mxu3 %v7061_v14  ;;  %1023 = vmatpush.msrb.mxu0 %v7065_v15 }
  0x59   :  { %1044 = vmatpush.msrb.mxu1 %v7067_v16  ;;  %1065 = vmatpush.msrb.mxu2 %v7071_v17 }
  0x5a   :  { %1086 = vmatpush.msrb.mxu3 %v7073_v18  ;;  %876 = vmatmul.f32.vlgmr.msra.gmra.mxu0 %v8888_v28 }
  0x5b   :  { %897 = vmatmul.f32.vlgmr.msra.gmra.mxu1 %v8888_v28  ;;  %918 = vmatmul.f32.vlgmr.msra.gmra.mxu2 %v8888_v28 }
  0x5c   :  { %939 = vmatmul.f32.vlgmr.msra.gmra.mxu3 %v8888_v28  ;;  %1024 = vmatpush.msrb.mxu0 %v7077_v19 }
  0x5d   :  { %1045 = vmatpush.msrb.mxu1 %v7079_v20  ;;  %1066 = vmatpush.msrb.mxu2 %v7083_v21 }
  0x5e   :  { %1087 = vmatpush.msrb.mxu3 %v7085_v22  ;;  %1025 = vmatpush.msrb.mxu0 %v7096_v24 }
  0x5f   :  { %1046 = vmatpush.msrb.mxu1 %v7098_v25  ;;  %1067 = vmatpush.msrb.mxu2 %v7102_v26 }
  0x60   :  { %1088 = vmatpush.msrb.mxu3 %v7104_v27  ;;  %1172 = vmatpush.msra.mxu0 %v7053_v11 }
  0x61   :  { %1193 = vmatpush.msra.mxu1 %v7055_v12  ;;  %1214 = vmatpush.msra.mxu2 %v7059_v13 }
  0x62   :  { %1235 = vmatpush.msra.mxu3 %v7061_v14  ;;  %1173 = vmatpush.msra.mxu0 %v7065_v15 }
  0x63   :  { %1194 = vmatpush.msra.mxu1 %v7067_v16  ;;  %1215 = vmatpush.msra.mxu2 %v7071_v17 }
  0x64   :  { %1236 = vmatpush.msra.mxu3 %v7073_v18  ;;  %1174 = vmatpush.msra.mxu0 %v7077_v19 }
  0x65   :  { %1195 = vmatpush.msra.mxu1 %v7079_v20  ;;  %1216 = vmatpush.msra.mxu2 %v7083_v21 }
  0x66   :  { %1237 = vmatpush.msra.mxu3 %v7085_v22  ;;  %1175 = vmatpush.msra.mxu0 %v7096_v24 }
  0x67   :  { %1196 = vmatpush.msra.mxu1 %v7098_v25  ;;  %1217 = vmatpush.msra.mxu2 %v7102_v26 }
  0x68   :  { %1238 = vmatpush.msra.mxu3 %v7104_v27 }
  0x97   :  { %v194_v29 = vpop.f32.mrf.mxu0 }
  0x98   :  { %v220_v30 = vpop.f32.mrf.mxu1  ;;  %v195_v61 = vadd.f32 %v7201_v58, %v194_v29 }
  0x99   :  { %v221_v62 = vadd.f32 %v7206_v59, %v220_v30 }
  0x9e   :  { %v246_v31 = vpop.f32.mrf.mxu2 }
  0x9f   :  { %v272_v32 = vpop.f32.mrf.mxu3  ;;  %v7148_v33 = vpop.f32.mrf.mxu0 }
  0xa0   :  { %v7150_v34 = vpop.f32.mrf.mxu1  ;;  %v273_v7 = vadd.f32 %v7217_v4, %v272_v32 }
  0xa6   :  { %v7152_v35 = vpop.f32.mrf.mxu2 }
  0xa7   :  { %v7154_v36 = vpop.f32.mrf.mxu3  ;;  %v7156_v37 = vpop.f32.mrf.mxu0 }
  0xa8   :  { %v7158_v38 = vpop.f32.mrf.mxu1 }
  0xae   :  { %v7160_v39 = vpop.f32.mrf.mxu2 }
  0xaf   :  { %v7162_v40 = vpop.f32.mrf.mxu3  ;;  %v7164_v41 = vpop.f32.mrf.mxu0 }
  0xb0   :  { %v7166_v42 = vpop.f32.mrf.mxu1 }
  0xb6   :  { %v7168_v43 = vpop.f32.mrf.mxu2 }
  0xb7   :  { %v7170_v44 = vpop.f32.mrf.mxu3  ;;  %v7172_v45 = vpop.f32.mrf.mxu0 }
  0xb8   :  { %v7174_v46 = vpop.f32.mrf.mxu1 }
  0xbe   :  { %v7182_v50 = vpop.f32.mrf.mxu2 }
  0xbf   :  { %v7176_v47 = vpop.f32.mrf.mxu3  ;;  %v7178_v48 = vpop.f32.mrf.mxu0 }
  0xc0   :  { %v7180_v49 = vpop.f32.mrf.mxu1 }
  0xc6   :  { %v7190_v54 = vpop.f32.mrf.mxu2 }
  0xc7   :  { %v7184_v51 = vpop.f32.mrf.mxu3  ;;  %v7186_v52 = vpop.f32.mrf.mxu0  ;;  %8894 = vst [vmem:[#allocation22_spill] sm:$0xff] %v7190_v54 }
  0xc8   :  { %8891 = vst [vmem:[#allocation19_spill] sm:$0xff] %v7184_v51  ;;  %v7188_v53 = vpop.f32.mrf.mxu1 }
  0xc9   :  { %8892 = vst [vmem:[#allocation20_spill] sm:$0xff] %v7186_v52 }
  0xca   :  { %8893 = vst [vmem:[#allocation21_spill] sm:$0xff] %v7188_v53 }
  0xce   :  { %v7208_v60 = vpop.f32.mrf.mxu2 }
  0xcf   :  { %v7192_v55 = vpop.f32.mrf.mxu3  ;;  %v7194_v56 = vpop.f32.mrf.mxu0  ;;  %8898 = vst [vmem:[#allocation26_spill] sm:$0xff] %v7208_v60 }
  0xd0   :  { %8895 = vst [vmem:[#allocation23_spill] sm:$0xff] %v7192_v55  ;;  %v7196_v57 = vpop.f32.mrf.mxu1 }
  0xd1   :  { %8896 = vst [vmem:[#allocation24_spill] sm:$0xff] %v7194_v56 }
  0xd2   :  { %8897 = vst [vmem:[#allocation25_spill] sm:$0xff] %v7196_v57 }
  0xd6   :  { %v7220_v8 = vpop.f32.mrf.mxu2 }
  0xd7   :  { %v7212_v63 = vpop.f32.mrf.mxu3  ;;  %v877_v0 = vpop.f32.mrf.mxu0  ;;  %8900 = vst [vmem:[#allocation28_spill] sm:$0xff] %v7220_v8 }
  0xd8   :  { %8899 = vst [vmem:[#allocation27_spill] sm:$0xff] %v7212_v63  ;;  %v898_v1 = vpop.f32.mrf.mxu1  ;;  %v880_v2 = vadd.f32 %v877_v0, %v195_v61  ;;  %v7225_v0 = vld [vmem:[%s8878_s3 + $0x2] ss:$0 sm:$0xff] }
  0xd9   :  { %v901_v3 = vadd.f32 %v898_v1, %v221_v62 }
  0xda   :  { %v5990_v5 = vmul.f32 -1.442695, %v880_v2  ;;  %v247_v2 = vadd.f32 %v7225_v0, %v246_v31 }
  0xdb   :  { %v5991_v6 = vmul.f32 -1.442695, %v901_v3 }
  0xdc   :  { %6240 = vpow2.f32 %v5990_v5 }
  0xdd   :  { %6242 = vpow2.f32 %v5991_v6 }
  0xde   :  { %v919_v1 = vpop.f32.mrf.mxu2 }
  0xdf   :  { %v940_v9 = vpop.f32.mrf.mxu3  ;;  %v922_v6 = vadd.f32 %v919_v1, %v247_v2 }
  0xe0   :  { %v943_v10 = vadd.f32 %v940_v9, %v273_v7 }
  0xe2   :  { %v5992_v23 = vmul.f32 -1.442695, %v943_v10  ;;  %v6241_v29 = vpop.eup %6240 }
  0xe3   :  { %v6243_v30 = vpop.eup %6242  ;;  %v947_v61 = vadd.f32 1.0, %v6241_v29 }
  0xe4   :  { %6244 = vpow2.f32 %v5992_v23  ;;  %v966_v62 = vadd.f32 1.0, %v6243_v30 }
  0xe5   :  { %6246 = vrcp.f32 %v947_v61  ;;  %v959_v30 = vand.u32 2147483648, %v947_v61  ;;  %v957_v63 = vand.u32 2147483647, %v947_v61  ;;  %vm953_vm4 = vweird.f32 %v947_v61 }
  0xe6   :  { %6248 = vrcp.f32 %v966_v62  ;;  %v978_v28 = vand.u32 2147483648, %v966_v62  ;;  %v976_v56 = vand.u32 2147483647, %v966_v62  ;;  %vm972_vm5 = vweird.f32 %v966_v62 }
  0xe7   :  { %v960_v1 = vor.u32 1.1754944e-38, %v959_v30  ;;  %vm958_vm7 = vcmp.eq.f32.partialorder %v957_v63, 8.507059e+37 }
  0xe8   :  { %v979_v55 = vor.u32 1.1754944e-38, %v978_v28  ;;  %vm977_vm9 = vcmp.eq.f32.partialorder %v976_v56, 8.507059e+37 }
  0xea   :  { %v6245_v32 = vpop.eup %6244 }
  0xeb   :  { %v986_v3 = vadd.f32 1.0, %v6245_v32  ;;  %v6247_v5 = vpop.eup %6246 }
  0xec   :  { %v6249_v7 = vpop.eup %6248  ;;  %v949_v9 = vmul.f32 %v6247_v5, %v947_v61  ;;  %vm954_vm2 = vweird.f32 %v6247_v5 }
  0xed   :  { %6250 = vrcp.f32 %v986_v3  ;;  %v968_v10 = vmul.f32 %v6249_v7, %v966_v62  ;;  %vm973_vm3 = vweird.f32 %v6249_v7  ;;  %vm955_vm6 = vmor %vm953_vm4, %vm954_vm2  ;;  %vm992_vm11 = vweird.f32 %v986_v3 }
  0xee   :  { %v950_v23 = vsub.f32 1.0, %v949_v9  ;;  %6252 = vtanh.f32 %v922_v6  ;;  %vm974_vm8 = vmor %vm972_vm5, %vm973_vm3  ;;  %v996_v28 = vand.u32 2147483647, %v986_v3 }
  0xef   :  { %v969_v29 = vsub.f32 1.0, %v968_v10 }
  0xf0   :  { %v951_v8 = vmul.f32 %v6247_v5, %v950_v23  ;;  %vm997_vm13 = vcmp.eq.f32.partialorder %v996_v28, 8.507059e+37 }
  0xf1   :  { %v970_v57 = vmul.f32 %v6249_v7, %v969_v29 }
  0xf2   :  { %v952_v31 = vadd.f32 %v6247_v5, %v951_v8 }
  0xf3   :  { %v6251_v60 = vpop.eup %6250  ;;  %v971_v32 = vadd.f32 %v6249_v7, %v970_v57  ;;  %v998_v57 = vand.u32 2147483648, %v986_v3 }
  0xf4   :  { %v988_v2 = vmul.f32 %v6251_v60, %v986_v3  ;;  %v956_v9 = vsel %vm955_vm6, %v6247_v5, %v952_v31  ;;  %v6253_v6 = vpop.eup %6252  ;;  %vm993_vm10 = vweird.f32 %v6251_v60  ;;  %v356_v31 = vadd.f32 %v7217_v4, %v7154_v36 }
  0xf5   :  { %v961_v10 = vsel %vm958_vm7, %v960_v1, %v956_v9  ;;  %v975_v23 = vsel %vm974_vm8, %v6249_v7, %v971_v32  ;;  %vm994_vm12 = vmor %vm992_vm11, %vm993_vm10  ;;  %v999_v62 = vor.u32 1.1754944e-38, %v998_v57 }
  0xf6   :  { %v989_v53 = vsub.f32 1.0, %v988_v2  ;;  %v980_v29 = vsel %vm977_vm9, %v979_v55, %v975_v23  ;;  %v1003_v52 = vmul.f32 %v6253_v6, %v961_v10 }
  0xf7   :  { %v1002_v54 = vmul.f32 0.0, %v980_v29  ;;  %v336_v29 = vadd.f32 %v7225_v0, %v7152_v35 }
  0xf8   :  { %v990_v51 = vmul.f32 %v6251_v60, %v989_v53 }
  0xf9   :  { %v7228_v8 = vadd.f32 %v1003_v52, %v1002_v54  ;;  %v316_v52 = vadd.f32 %v7206_v59, %v7150_v34 }
  0xfa   :  { %v991_v61 = vadd.f32 %v6251_v60, %v990_v51  ;;  %v296_v51 = vadd.f32 %v7201_v58, %v7148_v33 }
  0xfb   :  { %6254 = vtanh.f32 %v7228_v8 }
  0xfc   :  { %v995_v63 = vsel %vm994_vm12, %v6251_v60, %v991_v61 }
  0xfd   :  { %v1000_v56 = vsel %vm997_vm13, %v999_v62, %v995_v63 }
 0x101   :  { %v6255_v5 = vpop.eup %6254 }
 0x102   :  { %v7231_v55 = vmul.f32 %v6255_v5, %v1000_v56 }
 0x104   :  { %5993 = vmatmul.msk.f32.vlgmr.msrb.gmra.mxu0 %vm856_vm14, %v7231_v55  ;;  %5994 = vmatmul.msk.f32.vlgmr.msrb.gmra.mxu1 %vm856_vm14, %v7231_v55 }
 0x105   :  { %5995 = vmatmul.msk.f32.vlgmr.msrb.gmra.mxu2 %vm856_vm14, %v7231_v55  ;;  %5996 = vmatmul.msk.f32.vlgmr.msrb.gmra.mxu3 %vm856_vm14, %v7231_v55 }
 0x106   :  { %1322 = vmatpush.msrb.mxu0 %v7053_v11  ;;  %1343 = vmatpush.msrb.mxu1 %v7055_v12 }
 0x107   :  { %1364 = vmatpush.msrb.mxu2 %v7059_v13  ;;  %1385 = vmatpush.msrb.mxu3 %v7061_v14 }
 0x108   :  { %1323 = vmatpush.msrb.mxu0 %v7065_v15  ;;  %1344 = vmatpush.msrb.mxu1 %v7067_v16 }
 0x109   :  { %1365 = vmatpush.msrb.mxu2 %v7071_v17  ;;  %1386 = vmatpush.msrb.mxu3 %v7073_v18 }
 0x10a   :  { %1324 = vmatpush.msrb.mxu0 %v7077_v19  ;;  %1345 = vmatpush.msrb.mxu1 %v7079_v20 }
 0x10b   :  { %1366 = vmatpush.msrb.mxu2 %v7083_v21  ;;  %1387 = vmatpush.msrb.mxu3 %v7085_v22 }
 0x10c   :  { %1325 = vmatpush.msrb.mxu0 %v7096_v24  ;;  %1346 = vmatpush.msrb.mxu1 %v7098_v25 }
 0x10d   :  { %1367 = vmatpush.msrb.mxu2 %v7102_v26  ;;  %1388 = vmatpush.msrb.mxu3 %v7104_v27 }
 0x181   :  { %v1027_v53 = vpop.f32.mrf.mxu0  ;;  %v1048_v54 = vpop.f32.mrf.mxu1 }
 0x182   :  { %v1030_v60 = vadd.f32 %v1027_v53, %v296_v51  ;;  %v1051_v3 = vadd.f32 %v1048_v54, %v316_v52 }
 0x184   :  { %v5997_v7 = vmul.f32 -1.442695, %v1030_v60  ;;  %v5998_v30 = vmul.f32 -1.442695, %v1051_v3 }
 0x186   :  { %6256 = vpow2.f32 %v5997_v7 }
 0x187   :  { %6258 = vpow2.f32 %v5998_v30 }
 0x188   :  { %v1090_v1 = vpop.f32.mrf.mxu3  ;;  %v1069_v34 = vpop.f32.mrf.mxu2 }
 0x189   :  { %v1093_v32 = vadd.f32 %v1090_v1, %v356_v31  ;;  %v1072_v28 = vadd.f32 %v1069_v34, %v336_v29 }
 0x18b   :  { %v5999_v2 = vmul.f32 -1.442695, %v1093_v32 }
 0x18c   :  { %v6257_v9 = vpop.eup %6256 }
 0x18d   :  { %v6259_v6 = vpop.eup %6258  ;;  %v1097_v33 = vadd.f32 1.0, %v6257_v9  ;;  %6260 = vpow2.f32 %v5999_v2 }
 0x18e   :  { %v1116_v10 = vadd.f32 1.0, %v6259_v6 }
 0x18f   :  { %6262 = vrcp.f32 %v1097_v33  ;;  %v1109_v51 = vand.u32 2147483648, %v1097_v33  ;;  %v1107_v54 = vand.u32 2147483647, %v1097_v33  ;;  %vm1103_vm1 = vweird.f32 %v1097_v33 }
 0x190   :  { %6264 = vrcp.f32 %v1116_v10  ;;  %v1128_v52 = vand.u32 2147483648, %v1116_v10  ;;  %v1126_v3 = vand.u32 2147483647, %v1116_v10  ;;  %vm1122_vm2 = vweird.f32 %v1116_v10 }
 0x191   :  { %v1110_v30 = vor.u32 1.1754944e-38, %v1109_v51  ;;  %vm1108_vm5 = vcmp.eq.f32.partialorder %v1107_v54, 8.507059e+37 }
 0x192   :  { %v1129_v32 = vor.u32 1.1754944e-38, %v1128_v52  ;;  %vm1127_vm6 = vcmp.eq.f32.partialorder %v1126_v3, 8.507059e+37 }
 0x193   :  { %v6261_v23 = vpop.eup %6260 }
 0x194   :  { %v1136_v61 = vadd.f32 1.0, %v6261_v23 }
 0x195   :  { %v6263_v57 = vpop.eup %6262 }
 0x196   :  { %v6265_v36 = vpop.eup %6264  ;;  %v1099_v63 = vmul.f32 %v6263_v57, %v1097_v33  ;;  %6266 = vrcp.f32 %v1136_v61  ;;  %vm1104_vm15 = vweird.f32 %v6263_v57  ;;  %vm1142_vm8 = vweird.f32 %v1136_v61 }
 0x197   :  { %v1118_v62 = vmul.f32 %v6265_v36, %v1116_v10  ;;  %6268 = vtanh.f32 %v1072_v28  ;;  %vm1123_vm0 = vweird.f32 %v6265_v36  ;;  %vm1105_vm3 = vmor %vm1103_vm1, %vm1104_vm15 }
 0x198   :  { %v1100_v5 = vsub.f32 1.0, %v1099_v63  ;;  %vm1124_vm4 = vmor %vm1122_vm2, %vm1123_vm0 }
 0x199   :  { %v1119_v56 = vsub.f32 1.0, %v1118_v62 }
 0x19a   :  { %v1101_v53 = vmul.f32 %v6263_v57, %v1100_v5  ;;  %v1148_v5 = vand.u32 2147483648, %v1136_v61 }
 0x19b   :  { %v1120_v60 = vmul.f32 %v6265_v36, %v1119_v56 }
 0x19c   :  { %v6267_v7 = vpop.eup %6266  ;;  %v1102_v35 = vadd.f32 %v6263_v57, %v1101_v53  ;;  %v1149_v51 = vor.u32 1.1754944e-38, %v1148_v5 }
 0x19d   :  { %v1121_v31 = vadd.f32 %v6265_v36, %v1120_v60  ;;  %v1138_v1 = vmul.f32 %v6267_v7, %v1136_v61  ;;  %v6269_v9 = vpop.eup %6268  ;;  %vm1143_vm7 = vweird.f32 %v6267_v7 }
 0x19e   :  { %v1106_v2 = vsel %vm1105_vm3, %v6263_v57, %v1102_v35  ;;  %v1146_v57 = vand.u32 2147483647, %v1136_v61  ;;  %vm1144_vm9 = vmor %vm1142_vm8, %vm1143_vm7  ;;  %v399_v61 = vadd.f32 %v7206_v59, %v7158_v38 }
 0x19f   :  { %v1111_v6 = vsel %vm1108_vm5, %v1110_v30, %v1106_v2  ;;  %v1125_v34 = vsel %vm1124_vm4, %v6265_v36, %v1121_v31  ;;  %v1139_v23 = vsub.f32 1.0, %v1138_v1  ;;  %v439_v31 = vadd.f32 %v7217_v4, %v7162_v40 }
 0x1a0   :  { %v1130_v29 = vsel %vm1127_vm6, %v1129_v32, %v1125_v34  ;;  %v1153_v28 = vmul.f32 %v6269_v9, %v1111_v6  ;;  %vm1147_vm10 = vcmp.eq.f32.partialorder %v1146_v57, 8.507059e+37 }
 0x1a1   :  { %v1152_v63 = vmul.f32 %v1130_v29, %v7228_v8  ;;  %v1140_v62 = vmul.f32 %v6267_v7, %v1139_v23  ;;  %v379_v8 = vadd.f32 %v7201_v58, %v7156_v37  ;;  %v419_v29 = vadd.f32 %v7225_v0, %v7160_v39 }
 0x1a3   :  { %v7266_v33 = vadd.f32 %v1153_v28, %v1152_v63  ;;  %v1141_v10 = vadd.f32 %v6267_v7, %v1140_v62 }
 0x1a5   :  { %6270 = vtanh.f32 %v7266_v33  ;;  %v1145_v56 = vsel %vm1144_vm9, %v6267_v7, %v1141_v10 }
 0x1a6   :  { %v1150_v52 = vsel %vm1147_vm10, %v1149_v51, %v1145_v56 }
 0x1ab   :  { %v6271_v36 = vpop.eup %6270 }
 0x1ac   :  { %v7269_v53 = vmul.f32 %v6271_v36, %v1150_v52 }
 0x1ae   :  { %6000 = vmatmul.msk.f32.vlgmr.msra.gmra.mxu0 %vm856_vm14, %v7269_v53  ;;  %6001 = vmatmul.msk.f32.vlgmr.msra.gmra.mxu1 %vm856_vm14, %v7269_v53 }
 0x1af   :  { %6002 = vmatmul.msk.f32.vlgmr.msra.gmra.mxu2 %vm856_vm14, %v7269_v53  ;;  %6003 = vmatmul.msk.f32.vlgmr.msra.gmra.mxu3 %vm856_vm14, %v7269_v53 }
 0x1b0   :  { %1472 = vmatpush.msra.mxu0 %v7053_v11  ;;  %1493 = vmatpush.msra.mxu1 %v7055_v12 }
 0x1b1   :  { %1514 = vmatpush.msra.mxu2 %v7059_v13  ;;  %1535 = vmatpush.msra.mxu3 %v7061_v14 }
 0x1b2   :  { %1473 = vmatpush.msra.mxu0 %v7065_v15  ;;  %1494 = vmatpush.msra.mxu1 %v7067_v16 }
 0x1b3   :  { %1515 = vmatpush.msra.mxu2 %v7071_v17  ;;  %1536 = vmatpush.msra.mxu3 %v7073_v18 }
 0x1b4   :  { %1474 = vmatpush.msra.mxu0 %v7077_v19  ;;  %1495 = vmatpush.msra.mxu1 %v7079_v20 }
 0x1b5   :  { %1516 = vmatpush.msra.mxu2 %v7083_v21  ;;  %1537 = vmatpush.msra.mxu3 %v7085_v22 }
 0x1b6   :  { %1475 = vmatpush.msra.mxu0 %v7096_v24  ;;  %1496 = vmatpush.msra.mxu1 %v7098_v25 }
 0x1b7   :  { %1517 = vmatpush.msra.mxu2 %v7102_v26  ;;  %1538 = vmatpush.msra.mxu3 %v7104_v27 }
 0x22b   :  { %v1177_v54 = vpop.f32.mrf.mxu0  ;;  %v1198_v60 = vpop.f32.mrf.mxu1 }
 0x22c   :  { %v1180_v3 = vadd.f32 %v1177_v54, %v379_v8  ;;  %v1201_v7 = vadd.f32 %v1198_v60, %v399_v61 }
 0x22e   :  { %v6004_v35 = vmul.f32 -1.442695, %v1180_v3  ;;  %v6005_v30 = vmul.f32 -1.442695, %v1201_v7 }
 0x230   :  { %6272 = vpow2.f32 %v6004_v35 }
 0x231   :  { %6274 = vpow2.f32 %v6005_v30 }
 0x232   :  { %v1240_v1 = vpop.f32.mrf.mxu3  ;;  %v1219_v38 = vpop.f32.mrf.mxu2 }
 0x233   :  { %v1243_v32 = vadd.f32 %v1240_v1, %v439_v31  ;;  %v1222_v62 = vadd.f32 %v1219_v38, %v419_v29 }
 0x235   :  { %v6006_v2 = vmul.f32 -1.442695, %v1243_v32 }
 0x236   :  { %v6273_v9 = vpop.eup %6272 }
 0x237   :  { %v6275_v6 = vpop.eup %6274  ;;  %v1247_v37 = vadd.f32 1.0, %v6273_v9  ;;  %6276 = vpow2.f32 %v6006_v2 }
 0x238   :  { %v1266_v34 = vadd.f32 1.0, %v6275_v6 }
 0x239   :  { %6278 = vrcp.f32 %v1247_v37  ;;  %v1259_v51 = vand.u32 2147483648, %v1247_v37  ;;  %v1257_v8 = vand.u32 2147483647, %v1247_v37  ;;  %vm1253_vm13 = vweird.f32 %v1247_v37 }
 0x23a   :  { %6280 = vrcp.f32 %v1266_v34  ;;  %v1278_v36 = vand.u32 2147483648, %v1266_v34  ;;  %v1276_v54 = vand.u32 2147483647, %v1266_v34  ;;  %vm1272_vm15 = vweird.f32 %v1266_v34 }
 0x23b   :  { %v1260_v3 = vor.u32 1.1754944e-38, %v1259_v51  ;;  %vm1258_vm2 = vcmp.eq.f32.partialorder %v1257_v8, 8.507059e+37 }
 0x23c   :  { %v1279_v30 = vor.u32 1.1754944e-38, %v1278_v36  ;;  %vm1277_vm3 = vcmp.eq.f32.partialorder %v1276_v54, 8.507059e+37 }
 0x23d   :  { %v6277_v23 = vpop.eup %6276 }
 0x23e   :  { %v1286_v28 = vadd.f32 1.0, %v6277_v23 }
 0x23f   :  { %v6279_v63 = vpop.eup %6278 }
 0x240   :  { %v6281_v40 = vpop.eup %6280  ;;  %v1249_v10 = vmul.f32 %v6279_v63, %v1247_v37  ;;  %6282 = vrcp.f32 %v1286_v28  ;;  %vm1254_vm11 = vweird.f32 %v6279_v63  ;;  %vm1292_vm5 = vweird.f32 %v1286_v28 }
 0x241   :  { %v1268_v5 = vmul.f32 %v6281_v40, %v1266_v34  ;;  %6284 = vtanh.f32 %v1222_v62  ;;  %vm1273_vm12 = vweird.f32 %v6281_v40  ;;  %vm1255_vm0 = vmor %vm1253_vm13, %vm1254_vm11  ;;  %v1298_v62 = vand.u32 2147483648, %v1286_v28 }
 0x242   :  { %v1250_v57 = vsub.f32 1.0, %v1249_v10  ;;  %vm1274_vm1 = vmor %vm1272_vm15, %vm1273_vm12 }
 0x243   :  { %v1269_v56 = vsub.f32 1.0, %v1268_v5  ;;  %v1299_v5 = vor.u32 1.1754944e-38, %v1298_v62 }
 0x244   :  { %v1251_v52 = vmul.f32 %v6279_v63, %v1250_v57 }
 0x245   :  { %v1270_v61 = vmul.f32 %v6281_v40, %v1269_v56 }
 0x246   :  { %v6283_v60 = vpop.eup %6282  ;;  %v1252_v39 = vadd.f32 %v6279_v63, %v1251_v52 }
 0x247   :  { %v1271_v7 = vadd.f32 %v6281_v40, %v1270_v61  ;;  %v1288_v35 = vmul.f32 %v6283_v60, %v1286_v28  ;;  %v6285_v1 = vpop.eup %6284  ;;  %vm1293_vm4 = vweird.f32 %v6283_v60 }
 0x248   :  { %v1256_v31 = vsel %vm1255_vm0, %v6279_v63, %v1252_v39  ;;  %v1296_v63 = vand.u32 2147483647, %v1286_v28  ;;  %vm1294_vm6 = vmor %vm1292_vm5, %vm1293_vm4  ;;  %v482_v28 = vadd.f32 %v7206_v59, %v7166_v42 }
 0x249   :  { %v1261_v32 = vsel %vm1258_vm2, %v1260_v3, %v1256_v31  ;;  %v1275_v2 = vsel %vm1274_vm1, %v6281_v40, %v1271_v7  ;;  %v1289_v9 = vsub.f32 1.0, %v1288_v35 }
 0x24a   :  { %v1280_v6 = vsel %vm1277_vm3, %v1279_v30, %v1275_v2  ;;  %v1303_v38 = vmul.f32 %v6285_v1, %v1261_v32  ;;  %vm1297_vm7 = vcmp.eq.f32.partialorder %v1296_v63, 8.507059e+37  ;;  %v502_v32 = vadd.f32 %v7225_v0, %v7168_v43 }
 0x24b   :  { %v1302_v23 = vmul.f32 %v1280_v6, %v7266_v33  ;;  %v1290_v29 = vmul.f32 %v6283_v60, %v1289_v9  ;;  %v462_v33 = vadd.f32 %v7201_v58, %v7164_v41 }
 0x24d   :  { %v7304_v37 = vadd.f32 %v1303_v38, %v1302_v23  ;;  %v1291_v34 = vadd.f32 %v6283_v60, %v1290_v29 }
 0x24f   :  { %6286 = vtanh.f32 %v7304_v37  ;;  %v1295_v10 = vsel %vm1294_vm6, %v6283_v60, %v1291_v34  ;;  %v522_v60 = vadd.f32 %v7217_v4, %v7170_v44 }
 0x250   :  { %v1300_v57 = vsel %vm1297_vm7, %v1299_v5, %v1295_v10 }
 0x255   :  { %v6287_v40 = vpop.eup %6286 }
 0x256   :  { %v7307_v56 = vmul.f32 %v6287_v40, %v1300_v57 }
 0x258   :  { %6007 = vmatmul.msk.f32.vlgmr.msrb.gmra.mxu0 %vm856_vm14, %v7307_v56  ;;  %6008 = vmatmul.msk.f32.vlgmr.msrb.gmra.mxu1 %vm856_vm14, %v7307_v56 }
 0x259   :  { %6009 = vmatmul.msk.f32.vlgmr.msrb.gmra.mxu2 %vm856_vm14, %v7307_v56  ;;  %6010 = vmatmul.msk.f32.vlgmr.msrb.gmra.mxu3 %vm856_vm14, %v7307_v56 }
 0x25a   :  { %1622 = vmatpush.msrb.mxu0 %v7053_v11  ;;  %1643 = vmatpush.msrb.mxu1 %v7055_v12 }
 0x25b   :  { %1664 = vmatpush.msrb.mxu2 %v7059_v13  ;;  %1685 = vmatpush.msrb.mxu3 %v7061_v14 }
 0x25c   :  { %1623 = vmatpush.msrb.mxu0 %v7065_v15  ;;  %1644 = vmatpush.msrb.mxu1 %v7067_v16 }
 0x25d   :  { %1665 = vmatpush.msrb.mxu2 %v7071_v17  ;;  %1686 = vmatpush.msrb.mxu3 %v7073_v18 }
 0x25e   :  { %1624 = vmatpush.msrb.mxu0 %v7077_v19  ;;  %1645 = vmatpush.msrb.mxu1 %v7079_v20 }
 0x25f   :  { %1666 = vmatpush.msrb.mxu2 %v7083_v21  ;;  %1687 = vmatpush.msrb.mxu3 %v7085_v22 }
 0x260   :  { %1625 = vmatpush.msrb.mxu0 %v7096_v24  ;;  %1646 = vmatpush.msrb.mxu1 %v7098_v25 }
 0x261   :  { %1667 = vmatpush.msrb.mxu2 %v7102_v26  ;;  %1688 = vmatpush.msrb.mxu3 %v7104_v27 }
 0x2d5   :  { %v1327_v51 = vpop.f32.mrf.mxu0  ;;  %v1348_v36 = vpop.f32.mrf.mxu1 }
 0x2d6   :  { %v1330_v52 = vadd.f32 %v1327_v51, %v462_v33  ;;  %v1351_v8 = vadd.f32 %v1348_v36, %v482_v28 }
 0x2d8   :  { %v6011_v61 = vmul.f32 -1.442695, %v1330_v52  ;;  %v6012_v54 = vmul.f32 -1.442695, %v1351_v8 }
 0x2da   :  { %6288 = vpow2.f32 %v6011_v61 }
 0x2db   :  { %6290 = vpow2.f32 %v6012_v54 }
 0x2dc   :  { %v1390_v39 = vpop.f32.mrf.mxu3  ;;  %v1369_v42 = vpop.f32.mrf.mxu2 }
 0x2dd   :  { %v1393_v3 = vadd.f32 %v1390_v39, %v522_v60  ;;  %v1372_v6 = vadd.f32 %v1369_v42, %v502_v32 }
 0x2df   :  { %v6013_v7 = vmul.f32 -1.442695, %v1393_v3 }
 0x2e0   :  { %v6289_v35 = vpop.eup %6288 }
 0x2e1   :  { %v6291_v30 = vpop.eup %6290  ;;  %v1397_v41 = vadd.f32 1.0, %v6289_v35  ;;  %6292 = vpow2.f32 %v6013_v7 }
 0x2e2   :  { %v1416_v31 = vadd.f32 1.0, %v6291_v30 }
 0x2e3   :  { %6294 = vrcp.f32 %v1397_v41  ;;  %v1409_v62 = vand.u32 2147483648, %v1397_v41  ;;  %v1407_v5 = vand.u32 2147483647, %v1397_v41  ;;  %vm1403_vm10 = vweird.f32 %v1397_v41 }
 0x2e4   :  { %6296 = vrcp.f32 %v1416_v31  ;;  %v1428_v63 = vand.u32 2147483648, %v1416_v31  ;;  %v1426_v57 = vand.u32 2147483647, %v1416_v31  ;;  %vm1422_vm11 = vweird.f32 %v1416_v31 }
 0x2e5   :  { %v1410_v28 = vor.u32 1.1754944e-38, %v1409_v62  ;;  %vm1408_vm15 = vcmp.eq.f32.partialorder %v1407_v5, 8.507059e+37 }
 0x2e6   :  { %v1429_v52 = vor.u32 1.1754944e-38, %v1428_v63  ;;  %vm1427_vm0 = vcmp.eq.f32.partialorder %v1426_v57, 8.507059e+37 }
 0x2e7   :  { %v6293_v1 = vpop.eup %6292 }
 0x2e8   :  { %v1436_v2 = vadd.f32 1.0, %v6293_v1 }
 0x2e9   :  { %v6295_v9 = vpop.eup %6294 }
 0x2ea   :  { %v6297_v44 = vpop.eup %6296  ;;  %v1399_v38 = vmul.f32 %v6295_v9, %v1397_v41  ;;  %6298 = vrcp.f32 %v1436_v2  ;;  %vm1404_vm8 = vweird.f32 %v6295_v9  ;;  %v1448_v42 = vand.u32 2147483648, %v1436_v2 }
 0x2eb   :  { %v1418_v23 = vmul.f32 %v6297_v44, %v1416_v31  ;;  %6300 = vtanh.f32 %v1372_v6  ;;  %vm1423_vm9 = vweird.f32 %v6297_v44  ;;  %vm1405_vm12 = vmor %vm1403_vm10, %vm1404_vm8  ;;  %vm1442_vm2 = vweird.f32 %v1436_v2 }
 0x2ec   :  { %v1400_v29 = vsub.f32 1.0, %v1399_v38  ;;  %vm1424_vm13 = vmor %vm1422_vm11, %vm1423_vm9  ;;  %v1446_v1 = vand.u32 2147483647, %v1436_v2 }
 0x2ed   :  { %v1419_v34 = vsub.f32 1.0, %v1418_v23 }
 0x2ee   :  { %v1401_v10 = vmul.f32 %v6295_v9, %v1400_v29  ;;  %vm1447_vm4 = vcmp.eq.f32.partialorder %v1446_v1, 8.507059e+37 }
 0x2ef   :  { %v1420_v40 = vmul.f32 %v6297_v44, %v1419_v34 }
 0x2f0   :  { %v6299_v33 = vpop.eup %6298  ;;  %v1402_v43 = vadd.f32 %v6295_v9, %v1401_v10 }
 0x2f1   :  { %v1421_v51 = vadd.f32 %v6297_v44, %v1420_v40  ;;  %v1438_v36 = vmul.f32 %v6299_v33, %v1436_v2  ;;  %v6301_v61 = vpop.eup %6300  ;;  %vm1443_vm1 = vweird.f32 %v6299_v33 }
 0x2f2   :  { %v1406_v8 = vsel %vm1405_vm12, %v6295_v9, %v1402_v43  ;;  %vm1444_vm3 = vmor %vm1442_vm2, %vm1443_vm1  ;;  %v1449_v9 = vor.u32 1.1754944e-38, %v1448_v42 }
 0x2f3   :  { %v1411_v54 = vsel %vm1408_vm15, %v1410_v28, %v1406_v8  ;;  %v1425_v60 = vsel %vm1424_vm13, %v6297_v44, %v1421_v51  ;;  %v1439_v39 = vsub.f32 1.0, %v1438_v36 }
 0x2f4   :  { %v1430_v3 = vsel %vm1427_vm0, %v1429_v52, %v1425_v60  ;;  %v1453_v7 = vmul.f32 %v6301_v61, %v1411_v54 }
 0x2f5   :  { %v1452_v35 = vmul.f32 %v1430_v3, %v7304_v37  ;;  %v1440_v30 = vmul.f32 %v6299_v33, %v1439_v39  ;;  %v585_v37 = vadd.f32 %v7225_v0, %v7182_v50 }
 0x2f7   :  { %v7342_v41 = vadd.f32 %v1453_v7, %v1452_v35  ;;  %v1441_v31 = vadd.f32 %v6299_v33, %v1440_v30 }
 0x2f9   :  { %6302 = vtanh.f32 %v7342_v41  ;;  %v1445_v32 = vsel %vm1444_vm3, %v6299_v33, %v1441_v31 }
 0x2fa   :  { %v1450_v44 = vsel %vm1447_vm4, %v1449_v9, %v1445_v32 }
 0x2ff   :  { %v6303_v6 = vpop.eup %6302 }
 0x300   :  { %v7345_v38 = vmul.f32 %v6303_v6, %v1450_v44 }
 0x302   :  { %6014 = vmatmul.msk.f32.vlgmr.msra.gmra.mxu0 %vm856_vm14, %v7345_v38  ;;  %6015 = vmatmul.msk.f32.vlgmr.msra.gmra.mxu1 %vm856_vm14, %v7345_v38 }
 0x303   :  { %6016 = vmatmul.msk.f32.vlgmr.msra.gmra.mxu2 %vm856_vm14, %v7345_v38  ;;  %6017 = vmatmul.msk.f32.vlgmr.msra.gmra.mxu3 %vm856_vm14, %v7345_v38 }
 0x304   :  { %1772 = vmatpush.msra.mxu0 %v7053_v11  ;;  %1793 = vmatpush.msra.mxu1 %v7055_v12  ;;  %v545_v11 = vadd.f32 %v7201_v58, %v7172_v45  ;;  %v565_v12 = vadd.f32 %v7206_v59, %v7174_v46 }
 0x305   :  { %1814 = vmatpush.msra.mxu2 %v7059_v13  ;;  %1835 = vmatpush.msra.mxu3 %v7061_v14 }
 0x306   :  { %1773 = vmatpush.msra.mxu0 %v7065_v15  ;;  %1794 = vmatpush.msra.mxu1 %v7067_v16 }
 0x307   :  { %1815 = vmatpush.msra.mxu2 %v7071_v17  ;;  %1836 = vmatpush.msra.mxu3 %v7073_v18 }
 0x308   :  { %1774 = vmatpush.msra.mxu0 %v7077_v19  ;;  %1795 = vmatpush.msra.mxu1 %v7079_v20  ;;  %v605_v19 = vadd.f32 %v7217_v4, %v7176_v47 }
 0x309   :  { %1816 = vmatpush.msra.mxu2 %v7083_v21  ;;  %1837 = vmatpush.msra.mxu3 %v7085_v22 }
 0x30a   :  { %1775 = vmatpush.msra.mxu0 %v7096_v24  ;;  %1796 = vmatpush.msra.mxu1 %v7098_v25 }
 0x30b   :  { %1817 = vmatpush.msra.mxu2 %v7102_v26  ;;  %1838 = vmatpush.msra.mxu3 %v7104_v27 }
 0x37f   :  { %v1477_v13 = vpop.f32.mrf.mxu0  ;;  %v1498_v14 = vpop.f32.mrf.mxu1 }
 0x380   :  { %v1480_v15 = vadd.f32 %v1477_v13, %v545_v11  ;;  %v1501_v16 = vadd.f32 %v1498_v14, %v565_v12 }
 0x382   :  { %v6018_v17 = vmul.f32 -1.442695, %v1480_v15  ;;  %v6019_v18 = vmul.f32 -1.442695, %v1501_v16  ;;  %v6625_v15 = vld [vmem:[#allocation2 + $0x38] sm:$0xff] }
 0x383   :  { %v6626_v16 = vld [vmem:[#allocation2 + $0x58] sm:$0xff] }
 0x384   :  { %6304 = vpow2.f32 %v6018_v17  ;;  %v6627_v17 = vld [vmem:[#allocation2 + $0x78] sm:$0xff] }
 0x385   :  { %6306 = vpow2.f32 %v6019_v18  ;;  %v6628_v18 = vld [vmem:[#allocation2 + $0x10] sm:$0xff] }
 0x386   :  { %v1540_v20 = vpop.f32.mrf.mxu3  ;;  %v1519_v45 = vpop.f32.mrf.mxu2 }
 0x387   :  { %v1543_v21 = vadd.f32 %v1540_v20, %v605_v19  ;;  %v1522_v29 = vadd.f32 %v1519_v45, %v585_v37  ;;  %v6629_v19 = vld [vmem:[#allocation2 + $0x30] sm:$0xff]  ;;  %v6637_v45 = vld [vmem:[#allocation2 + $0x20] sm:$0xff] }
 0x388   :  { %v6630_v20 = vld [vmem:[#allocation2 + $0x50] sm:$0xff]  ;;  %v6639_v37 = vld [vmem:[#allocation2 + $0x60] sm:$0xff] }
 0x389   :  { %v6020_v22 = vmul.f32 -1.442695, %v1543_v21  ;;  %v6631_v21 = vld [vmem:[#allocation2 + $0x70] sm:$0xff] }
 0x38a   :  { %v6305_v24 = vpop.eup %6304 }
 0x38b   :  { %v6307_v25 = vpop.eup %6306  ;;  %v1547_v26 = vadd.f32 1.0, %v6305_v24  ;;  %6308 = vpow2.f32 %v6020_v22  ;;  %v6632_v22 = vld [vmem:[#allocation2 + $0x8] sm:$0xff] }
 0x38c   :  { %v1566_v27 = vadd.f32 1.0, %v6307_v25  ;;  %v6633_v24 = vld [vmem:[#allocation2 + $0x28] sm:$0xff] }
 0x38d   :  { %6310 = vrcp.f32 %v1547_v26  ;;  %v1559_v5 = vand.u32 2147483648, %v1547_v26  ;;  %v1557_v33 = vand.u32 2147483647, %v1547_v26  ;;  %vm1553_vm7 = vweird.f32 %v1547_v26  ;;  %v6634_v25 = vld [vmem:[#allocation2 + $0x48] sm:$0xff] }
 0x38e   :  { %6312 = vrcp.f32 %v1566_v27  ;;  %v1578_v40 = vand.u32 2147483648, %v1566_v27  ;;  %v1576_v28 = vand.u32 2147483647, %v1566_v27  ;;  %vm1572_vm8 = vweird.f32 %v1566_v27 }
 0x38f   :  { %v1560_v36 = vor.u32 1.1754944e-38, %v1559_v5  ;;  %vm1558_vm11 = vcmp.eq.f32.partialorder %v1557_v33, 8.507059e+37  ;;  %v8901_v5 = vld [vmem:[#allocation19_spill] sm:$0xff] }
 0x390   :  { %v1579_v61 = vor.u32 1.1754944e-38, %v1578_v40  ;;  %vm1577_vm12 = vcmp.eq.f32.partialorder %v1576_v28, 8.507059e+37  ;;  %v688_v40 = vadd.f32 %v7217_v4, %v8901_v5 }
 0x391   :  { %v6309_v46 = vpop.eup %6308 }
 0x392   :  { %v1586_v2 = vadd.f32 1.0, %v6309_v46  ;;  %v6638_v46 = vld [vmem:[#allocation2 + $0x40] sm:$0xff] }
 0x393   :  { %v6311_v23 = vpop.eup %6310 }
 0x394   :  { %v6313_v47 = vpop.eup %6312  ;;  %v1549_v34 = vmul.f32 %v6311_v23, %v1547_v26  ;;  %6314 = vrcp.f32 %v1586_v2  ;;  %vm1554_vm5 = vweird.f32 %v6311_v23  ;;  %v1598_v9 = vand.u32 2147483648, %v1586_v2  ;;  %v6635_v26 = vld [vmem:[#allocation2 + $0x68] sm:$0xff] }
 0x395   :  { %v1568_v62 = vmul.f32 %v6313_v47, %v1566_v27  ;;  %6316 = vtanh.f32 %v1522_v29  ;;  %vm1573_vm6 = vweird.f32 %v6313_v47  ;;  %vm1555_vm9 = vmor %vm1553_vm7, %vm1554_vm5  ;;  %vm1592_vm15 = vweird.f32 %v1586_v2  ;;  %v6636_v27 = vld [vmem:[#allocation2] sm:$0xff] }
 0x396   :  { %v1550_v63 = vsub.f32 1.0, %v1549_v34  ;;  %vm1574_vm10 = vmor %vm1572_vm8, %vm1573_vm6  ;;  %v1596_v6 = vand.u32 2147483647, %v1586_v2  ;;  %v1599_v11 = vor.u32 1.1754944e-38, %v1598_v9 }
 0x397   :  { %v1569_v10 = vsub.f32 1.0, %v1568_v62 }
 0x398   :  { %v1551_v57 = vmul.f32 %v6311_v23, %v1550_v63  ;;  %vm1597_vm1 = vcmp.eq.f32.partialorder %v1596_v6, 8.507059e+37 }
 0x399   :  { %v1570_v43 = vmul.f32 %v6313_v47, %v1569_v10 }
 0x39a   :  { %v6315_v51 = vpop.eup %6314  ;;  %v1552_v50 = vadd.f32 %v6311_v23, %v1551_v57 }
 0x39b   :  { %v1571_v52 = vadd.f32 %v6313_v47, %v1570_v43  ;;  %v1588_v8 = vmul.f32 %v6315_v51, %v1586_v2  ;;  %v6317_v60 = vpop.eup %6316  ;;  %vm1593_vm13 = vweird.f32 %v6315_v51  ;;  %v628_v2 = vadd.f32 %v7201_v58, %v7178_v48 }
 0x39c   :  { %v1556_v54 = vsel %vm1555_vm9, %v6311_v23, %v1552_v50  ;;  %vm1594_vm0 = vmor %vm1592_vm15, %vm1593_vm13  ;;  %v648_v23 = vadd.f32 %v7206_v59, %v7180_v49  ;;  %v8902_v50 = vld [vmem:[#allocation22_spill] sm:$0xff] }
 0x39d   :  { %v1561_v39 = vsel %vm1558_vm11, %v1560_v36, %v1556_v54  ;;  %v1575_v3 = vsel %vm1574_vm10, %v6313_v47, %v1571_v52  ;;  %v1589_v7 = vsub.f32 1.0, %v1588_v8  ;;  %v668_v36 = vadd.f32 %v7225_v0, %v8902_v50 }
 0x39e   :  { %v1580_v35 = vsel %vm1577_vm12, %v1579_v61, %v1575_v3  ;;  %v1603_v30 = vmul.f32 %v6317_v60, %v1561_v39 }
 0x39f   :  { %v1602_v31 = vmul.f32 %v1580_v35, %v7342_v41  ;;  %v1590_v42 = vmul.f32 %v6315_v51, %v1589_v7  ;;  %v6624_v41 = vld [vmem:[#allocation2 + $0x18] sm:$0xff] }
 0x3a1   :  { %v7380_v1 = vadd.f32 %v1603_v30, %v1602_v31  ;;  %v1591_v32 = vadd.f32 %v6315_v51, %v1590_v42 }
 0x3a3   :  { %6318 = vtanh.f32 %v7380_v1  ;;  %v1595_v44 = vsel %vm1594_vm0, %v6315_v51, %v1591_v32 }
 0x3a4   :  { %v1600_v13 = vsel %vm1597_vm1, %v1599_v11, %v1595_v44 }
 0x3a9   :  { %v6319_v12 = vpop.eup %6318 }
 0x3aa   :  { %v7383_v14 = vmul.f32 %v6319_v12, %v1600_v13 }
 0x3ac   :  { %6021 = vmatmul.msk.f32.vlgmr.msrb.gmra.mxu0 %vm856_vm14, %v7383_v14  ;;  %6022 = vmatmul.msk.f32.vlgmr.msrb.gmra.mxu1 %vm856_vm14, %v7383_v14 }
 0x3ad   :  { %6023 = vmatmul.msk.f32.vlgmr.msrb.gmra.mxu2 %vm856_vm14, %v7383_v14  ;;  %6024 = vmatmul.msk.f32.vlgmr.msrb.gmra.mxu3 %vm856_vm14, %v7383_v14 }
 0x3ae   :  { %1922 = vmatpush.msrb.mxu0 %v6624_v41  ;;  %1943 = vmatpush.msrb.mxu1 %v6625_v15 }
 0x3af   :  { %1964 = vmatpush.msrb.mxu2 %v6626_v16  ;;  %1985 = vmatpush.msrb.mxu3 %v6627_v17 }
 0x3b0   :  { %1923 = vmatpush.msrb.mxu0 %v6628_v18  ;;  %1944 = vmatpush.msrb.mxu1 %v6629_v19 }
 0x3b1   :  { %1965 = vmatpush.msrb.mxu2 %v6630_v20  ;;  %1986 = vmatpush.msrb.mxu3 %v6631_v21 }
 0x3b2   :  { %1924 = vmatpush.msrb.mxu0 %v6632_v22  ;;  %1945 = vmatpush.msrb.mxu1 %v6633_v24 }
 0x3b3   :  { %1966 = vmatpush.msrb.mxu2 %v6634_v25  ;;  %1987 = vmatpush.msrb.mxu3 %v6635_v26 }
 0x3b4   :  { %1925 = vmatpush.msrb.mxu0 %v6636_v27  ;;  %1946 = vmatpush.msrb.mxu1 %v6637_v45 }
 0x3b5   :  { %1967 = vmatpush.msrb.mxu2 %v6638_v46  ;;  %1988 = vmatpush.msrb.mxu3 %v6639_v37 }
 0x429   :  { %v1627_v29 = vpop.f32.mrf.mxu0  ;;  %v1648_v47 = vpop.f32.mrf.mxu1 }
 0x42a   :  { %v1630_v34 = vadd.f32 %v1627_v29, %v628_v2  ;;  %v1651_v62 = vadd.f32 %v1648_v47, %v648_v23  ;;  %v8903_v23 = vld [vmem:[#allocation20_spill] sm:$0xff]  ;;  %v7425_v47 = vld [vmem:[%s8878_s3 + $0x1] ss:$0 sm:$0xff] }
 0x42c   :  { %v6025_v63 = vmul.f32 -1.442695, %v1630_v34  ;;  %v6026_v10 = vmul.f32 -1.442695, %v1651_v62  ;;  %v8904_v34 = vld [vmem:[#allocation21_spill] sm:$0xff] }
 0x42d   :  { %v731_v62 = vadd.f32 %v7425_v47, %v8904_v34 }
 0x42e   :  { %6320 = vpow2.f32 %v6025_v63 }
 0x42f   :  { %6322 = vpow2.f32 %v6026_v10 }
 0x430   :  { %v1690_v57 = vpop.f32.mrf.mxu3  ;;  %v1669_v49 = vpop.f32.mrf.mxu2 }
 0x431   :  { %v1693_v33 = vadd.f32 %v1690_v57, %v688_v40  ;;  %v1672_v61 = vadd.f32 %v1669_v49, %v668_v36 }
 0x433   :  { %v6027_v43 = vmul.f32 -1.442695, %v1693_v33 }
 0x434   :  { %v6321_v28 = vpop.eup %6320 }
 0x435   :  { %v6323_v51 = vpop.eup %6322  ;;  %v1697_v48 = vadd.f32 1.0, %v6321_v28  ;;  %6324 = vpow2.f32 %v6027_v43  ;;  %v7432_v43 = vld [vmem:[%s8878_s3 + $0x3] ss:$0 sm:$0xff]  ;;  %v8905_v28 = vld [vmem:[#allocation23_spill] sm:$0xff] }
 0x436   :  { %v1716_v58 = vadd.f32 1.0, %v6323_v51  ;;  %v771_v51 = vadd.f32 %v7432_v43, %v8905_v28 }
 0x437   :  { %6326 = vrcp.f32 %v1697_v48  ;;  %v1709_v7 = vand.u32 2147483648, %v1697_v48  ;;  %v1707_v31 = vand.u32 2147483647, %v1697_v48  ;;  %vm1703_vm4 = vweird.f32 %v1697_v48 }
 0x438   :  { %6328 = vrcp.f32 %v1716_v58  ;;  %v1728_v35 = vand.u32 2147483648, %v1716_v58  ;;  %v1726_v32 = vand.u32 2147483647, %v1716_v58  ;;  %vm1722_vm5 = vweird.f32 %v1716_v58 }
 0x439   :  { %v1710_v6 = vor.u32 1.1754944e-38, %v1709_v7  ;;  %vm1708_vm8 = vcmp.eq.f32.partialorder %v1707_v31, 8.507059e+37  ;;  %v7460_v7 = vld [vmem:[#allocation5 + $0x70] sm:$0xff]  ;;  %v7466_v31 = vld [vmem:[#allocation5 + $0x28] sm:$0xff] }
 0x43a   :  { %v1729_v12 = vor.u32 1.1754944e-38, %v1728_v35  ;;  %vm1727_vm9 = vcmp.eq.f32.partialorder %v1726_v32, 8.507059e+37  ;;  %v7462_v35 = vld [vmem:[#allocation5 + $0x8] sm:$0xff] }
 0x43b   :  { %v6325_v59 = vpop.eup %6324  ;;  %v7470_v32 = vld [vmem:[#allocation5 + $0x68] sm:$0xff] }
 0x43c   :  { %v1736_v52 = vadd.f32 1.0, %v6325_v59 }
 0x43d   :  { %v6327_v8 = vpop.eup %6326 }
 0x43e   :  { %v6329_v4 = vpop.eup %6328  ;;  %v1699_v54 = vmul.f32 %v6327_v8, %v1697_v48  ;;  %6330 = vrcp.f32 %v1736_v52  ;;  %vm1704_vm2 = vweird.f32 %v6327_v8  ;;  %v1748_v25 = vand.u32 2147483648, %v1736_v52 }
 0x43f   :  { %v1718_v60 = vmul.f32 %v6329_v4, %v1716_v58  ;;  %6332 = vtanh.f32 %v1672_v61  ;;  %vm1723_vm3 = vweird.f32 %v6329_v4  ;;  %vm1705_vm6 = vmor %vm1703_vm4, %vm1704_vm2  ;;  %vm1742_vm11 = vweird.f32 %v1736_v52  ;;  %v7443_v61 = vld [vmem:[#allocation5 + $0x38] sm:$0xff] }
 0x440   :  { %v1700_v39 = vsub.f32 1.0, %v1699_v54  ;;  %vm1724_vm7 = vmor %vm1722_vm5, %vm1723_vm3  ;;  %v1746_v26 = vand.u32 2147483647, %v1736_v52  ;;  %v1749_v45 = vor.u32 1.1754944e-38, %v1748_v25  ;;  %v7450_v54 = vld [vmem:[#allocation5 + $0x78] sm:$0xff] }
 0x441   :  { %v1719_v3 = vsub.f32 1.0, %v1718_v60  ;;  %v7452_v60 = vld [vmem:[#allocation5 + $0x10] sm:$0xff] }
 0x442   :  { %v1701_v30 = vmul.f32 %v6327_v8, %v1700_v39  ;;  %vm1747_vm13 = vcmp.eq.f32.partialorder %v1746_v26, 8.507059e+37  ;;  %v7454_v39 = vld [vmem:[#allocation5 + $0x30] sm:$0xff] }
 0x443   :  { %v1720_v42 = vmul.f32 %v6329_v4, %v1719_v3  ;;  %v7458_v3 = vld [vmem:[#allocation5 + $0x50] sm:$0xff] }
 0x444   :  { %v6331_v9 = vpop.eup %6330  ;;  %v1702_v0 = vadd.f32 %v6327_v8, %v1701_v30 }
 0x445   :  { %v1721_v44 = vadd.f32 %v6329_v4, %v1720_v42  ;;  %v1738_v11 = vmul.f32 %v6331_v9, %v1736_v52  ;;  %v6333_v41 = vpop.eup %6332  ;;  %vm1743_vm10 = vweird.f32 %v6331_v9  ;;  %v7468_v42 = vld [vmem:[#allocation5 + $0x48] sm:$0xff] }
 0x446   :  { %v1706_v13 = vsel %vm1705_vm6, %v6327_v8, %v1702_v0  ;;  %vm1744_vm12 = vmor %vm1742_vm11, %vm1743_vm10  ;;  %v7441_v8 = vld [vmem:[#allocation5 + $0x18] sm:$0xff]  ;;  %v7475_v0 = vld [vmem:[%s8878_s3 + $0x2] ss:$0 sm:$0xff] }
 0x447   :  { %v1711_v15 = vsel %vm1708_vm8, %v1710_v6, %v1706_v13  ;;  %v1725_v16 = vsel %vm1724_vm7, %v6329_v4, %v1721_v44  ;;  %v1739_v17 = vsub.f32 1.0, %v1738_v11  ;;  %v7445_v4 = vld [vmem:[#allocation5 + $0x58] sm:$0xff]  ;;  %v8906_v6 = vld [vmem:[#allocation26_spill] sm:$0xff] }
 0x448   :  { %v1730_v18 = vsel %vm1727_vm9, %v1729_v12, %v1725_v16  ;;  %v1753_v19 = vmul.f32 %v6333_v41, %v1711_v15  ;;  %v751_v44 = vadd.f32 %v7475_v0, %v8906_v6  ;;  %v7481_v11 = vld [vmem:[#allocation5] sm:$0xff] }
 0x449   :  { %v1752_v20 = vmul.f32 %v1730_v18, %v7380_v1  ;;  %v1740_v21 = vmul.f32 %v6331_v9, %v1739_v17  ;;  %v7418_v1 = vld [vmem:[%s8878_s3] ss:$0 sm:$0xff] }
 0x44a   :  { %v711_v29 = vadd.f32 %v7418_v1, %v8903_v23  ;;  %v7483_v12 = vld [vmem:[#allocation5 + $0x20] sm:$0xff] }
 0x44b   :  { %v7402_v22 = vadd.f32 %v1753_v19, %v1752_v20  ;;  %v1741_v24 = vadd.f32 %v6331_v9, %v1740_v21  ;;  %v7487_v41 = vld [vmem:[#allocation5 + $0x40] sm:$0xff] }
 0x44c   :  { %v7489_v15 = vld [vmem:[#allocation5 + $0x60] sm:$0xff] }
 0x44d   :  { %6334 = vtanh.f32 %v7402_v22  ;;  %v1745_v27 = vsel %vm1744_vm12, %v6331_v9, %v1741_v24 }
 0x44e   :  { %v1750_v37 = vsel %vm1747_vm13, %v1749_v45, %v1745_v27 }
 0x453   :  { %v6335_v46 = vpop.eup %6334 }
 0x454   :  { %v7405_v2 = vmul.f32 %v6335_v46, %v1750_v37 }
 0x456   :  { %6028 = vmatmul.msk.f32.vlgmr.msra.gmra.mxu0 %vm856_vm14, %v7405_v2  ;;  %6029 = vmatmul.msk.f32.vlgmr.msra.gmra.mxu1 %vm856_vm14, %v7405_v2 }
 0x457   :  { %6030 = vmatmul.msk.f32.vlgmr.msra.gmra.mxu2 %vm856_vm14, %v7405_v2  ;;  %6031 = vmatmul.msk.f32.vlgmr.msra.gmra.mxu3 %vm856_vm14, %v7405_v2 }
 0x458   :  { %2120 = vmatpush.msra.mxu0 %v7441_v8  ;;  %2143 = vmatpush.msra.mxu1 %v7443_v61 }
 0x459   :  { %2166 = vmatpush.msra.mxu2 %v7445_v4  ;;  %2189 = vmatpush.msra.mxu3 %v7450_v54 }
 0x45a   :  { %2121 = vmatpush.msra.mxu0 %v7452_v60  ;;  %2144 = vmatpush.msra.mxu1 %v7454_v39 }
 0x45b   :  { %2167 = vmatpush.msra.mxu2 %v7458_v3  ;;  %2190 = vmatpush.msra.mxu3 %v7460_v7 }
 0x45c   :  { %2122 = vmatpush.msra.mxu0 %v7462_v35  ;;  %2145 = vmatpush.msra.mxu1 %v7466_v31 }
 0x45d   :  { %2168 = vmatpush.msra.mxu2 %v7468_v42  ;;  %2191 = vmatpush.msra.mxu3 %v7470_v32 }
 0x45e   :  { %2123 = vmatpush.msra.mxu0 %v7481_v11  ;;  %2146 = vmatpush.msra.mxu1 %v7483_v12 }
 0x45f   :  { %2169 = vmatpush.msra.mxu2 %v7487_v41  ;;  %2192 = vmatpush.msra.mxu3 %v7489_v15 }
 0x4d3   :  { %v1777_v63 = vpop.f32.mrf.mxu0  ;;  %v1798_v10 = vpop.f32.mrf.mxu1 }
 0x4d4   :  { %v1780_v5 = vadd.f32 %v1777_v63, %v711_v29  ;;  %v1801_v40 = vadd.f32 %v1798_v10, %v731_v62 }
 0x4d6   :  { %v6032_v57 = vmul.f32 -1.442695, %v1780_v5  ;;  %v6033_v33 = vmul.f32 -1.442695, %v1801_v40 }
 0x4d8   :  { %6336 = vpow2.f32 %v6032_v57 }
 0x4d9   :  { %6338 = vpow2.f32 %v6033_v33 }
 0x4da   :  { %v1840_v48 = vpop.f32.mrf.mxu3  ;;  %v1819_v30 = vpop.f32.mrf.mxu2 }
 0x4db   :  { %v1843_v58 = vadd.f32 %v1840_v48, %v771_v51  ;;  %v1822_v17 = vadd.f32 %v1819_v30, %v751_v44 }
 0x4dd   :  { %v6034_v49 = vmul.f32 -1.442695, %v1843_v58 }
 0x4de   :  { %v6337_v59 = vpop.eup %6336 }
 0x4df   :  { %v6339_v50 = vpop.eup %6338  ;;  %v7436_v36 = vadd.f32 1.0, %v6337_v59  ;;  %6340 = vpow2.f32 %v6034_v49 }
 0x4e0   :  { %v7438_v52 = vadd.f32 1.0, %v6339_v50 }
 0x4e1   :  { %6342 = vrcp.f32 %v7436_v36  ;;  %v1859_v25 = vand.u32 2147483648, %v7436_v36  ;;  %v1857_v45 = vand.u32 2147483647, %v7436_v36  ;;  %vm1853_vm1 = vweird.f32 %v7436_v36 }
 0x4e2   :  { %6344 = vrcp.f32 %v7438_v52  ;;  %v1878_v26 = vand.u32 2147483648, %v7438_v52  ;;  %v1876_v37 = vand.u32 2147483647, %v7438_v52  ;;  %vm1872_vm2 = vweird.f32 %v7438_v52 }
 0x4e3   :  { %v1860_v34 = vor.u32 1.1754944e-38, %v1859_v25  ;;  %vm1858_vm5 = vcmp.eq.f32.partialorder %v1857_v45, 8.507059e+37  ;;  %v7731_v45 = vld [vmem:[#allocation7 + $0x28] sm:$0xff] }
 0x4e4   :  { %v1879_v10 = vor.u32 1.1754944e-38, %v1878_v26  ;;  %vm1877_vm6 = vcmp.eq.f32.partialorder %v1876_v37, 8.507059e+37 }
 0x4e5   :  { %v6341_v9 = vpop.eup %6340 }
 0x4e6   :  { %v1886_v13 = vadd.f32 1.0, %v6341_v9 }
 0x4e7   :  { %v6343_v16 = vpop.eup %6342 }
 0x4e8   :  { %v6345_v18 = vpop.eup %6344  ;;  %v1849_v19 = vmul.f32 %v6343_v16, %v7436_v36  ;;  %6346 = vrcp.f32 %v1886_v13  ;;  %vm1854_vm15 = vweird.f32 %v6343_v16  ;;  %v1898_v36 = vand.u32 2147483648, %v1886_v13 }
 0x4e9   :  { %v1868_v20 = vmul.f32 %v6345_v18, %v7438_v52  ;;  %6348 = vtanh.f32 %v1822_v17  ;;  %vm1873_vm0 = vweird.f32 %v6345_v18  ;;  %vm1855_vm3 = vmor %vm1853_vm1, %vm1854_vm15  ;;  %vm1892_vm8 = vweird.f32 %v1886_v13  ;;  %v7713_v17 = vld [vmem:[#allocation7 + $0x10] sm:$0xff] }
 0x4ea   :  { %v1850_v21 = vsub.f32 1.0, %v1849_v19  ;;  %vm1874_vm4 = vmor %vm1872_vm2, %vm1873_vm0  ;;  %v1896_v52 = vand.u32 2147483647, %v1886_v13  ;;  %v1899_v9 = vor.u32 1.1754944e-38, %v1898_v36  ;;  %v7717_v19 = vld [vmem:[#allocation7 + $0x50] sm:$0xff] }
 0x4eb   :  { %v1869_v24 = vsub.f32 1.0, %v1868_v20 }
 0x4ec   :  { %v1851_v27 = vmul.f32 %v6343_v16, %v1850_v21  ;;  %vm1897_vm10 = vcmp.eq.f32.partialorder %v1896_v52, 8.507059e+37  ;;  %v7723_v21 = vld [vmem:[#allocation7 + $0x70] sm:$0xff] }
 0x4ed   :  { %v1870_v46 = vmul.f32 %v6345_v18, %v1869_v24 }
 0x4ee   :  { %v6347_v23 = vpop.eup %6346  ;;  %v1852_v29 = vadd.f32 %v6343_v16, %v1851_v27  ;;  %v7729_v27 = vld [vmem:[#allocation7 + $0x8] sm:$0xff] }
 0x4ef   :  { %v1871_v62 = vadd.f32 %v6345_v18, %v1870_v46  ;;  %v1888_v63 = vmul.f32 %v6347_v23, %v1886_v13  ;;  %v6349_v40 = vpop.eup %6348  ;;  %vm1893_vm7 = vweird.f32 %v6347_v23  ;;  %v7733_v46 = vld [vmem:[#allocation7 + $0x48] sm:$0xff] }
 0x4f0   :  { %v1856_v5 = vsel %vm1855_vm3, %v6343_v16, %v1852_v29  ;;  %vm1894_vm9 = vmor %vm1892_vm8, %vm1893_vm7  ;;  %v7740_v29 = vld [vmem:[#allocation7] sm:$0xff] }
 0x4f1   :  { %v1861_v57 = vsel %vm1858_vm5, %v1860_v34, %v1856_v5  ;;  %v1875_v33 = vsel %vm1874_vm4, %v6345_v18, %v1871_v62  ;;  %v1889_v28 = vsub.f32 1.0, %v1888_v63  ;;  %v7715_v18 = vld [vmem:[#allocation7 + $0x30] sm:$0xff]  ;;  %v7744_v62 = vld [vmem:[#allocation7 + $0x20] sm:$0xff]  ;;  %vm2057_vm4 = vcmask 254976  }
 0x4f2   :  { %v1880_v51 = vsel %vm1877_vm6, %v1879_v10, %v1875_v33  ;;  %v1903_v48 = vmul.f32 %v6349_v40, %v1861_v57  ;;  %v7746_v63 = vld [vmem:[#allocation7 + $0x40] sm:$0xff] }
 0x4f3   :  { %v1902_v58 = vmul.f32 %v1880_v51, %v7402_v22  ;;  %v1890_v49 = vmul.f32 %v6347_v23, %v1889_v28  ;;  %v7751_v40 = vld [vmem:[#allocation7 + $0x60] sm:$0xff] }
 0x4f5   :  { %v7506_v59 = vadd.f32 %v1903_v48, %v1902_v58  ;;  %v1891_v50 = vadd.f32 %v6347_v23, %v1890_v49 }
 0x4f7   :  { %6350 = vtanh.f32 %v7506_v59  ;;  %v1895_v30 = vsel %vm1894_vm9, %v6347_v23, %v1891_v50  ;;  %v7738_v23 = vld [vmem:[#allocation7 + $0x68] sm:$0xff] }
 0x4f8   :  { %v1900_v44 = vsel %vm1897_vm10, %v1899_v9, %v1895_v30 }
 0x4fd   :  { %v6351_v6 = vpop.eup %6350 }
 0x4fe   :  { %v7509_v16 = vmul.f32 %v6351_v6, %v1900_v44 }
 0x500   :  { %6035 = vmatmul.msk.f32.vlgmr.msrb.gmra.mxu0 %vm856_vm14, %v7509_v16  ;;  %6036 = vmatmul.msk.f32.vlgmr.msrb.gmra.mxu1 %vm856_vm14, %v7509_v16 }
 0x501   :  { %6037 = vmatmul.msk.f32.vlgmr.msrb.gmra.mxu2 %vm856_vm14, %v7509_v16  ;;  %6038 = vmatmul.msk.f32.vlgmr.msrb.gmra.mxu3 %vm856_vm14, %v7509_v16 }
 0x502   :  { %2209 = vmatpush.msrb.mxu0 %v7441_v8  ;;  %2229 = vmatpush.msrb.mxu1 %v7443_v61 }
 0x503   :  { %2249 = vmatpush.msrb.mxu2 %v7445_v4  ;;  %2269 = vmatpush.msrb.mxu3 %v7450_v54 }
 0x504   :  { %2210 = vmatpush.msrb.mxu0 %v7452_v60  ;;  %2230 = vmatpush.msrb.mxu1 %v7454_v39 }
 0x505   :  { %2250 = vmatpush.msrb.mxu2 %v7458_v3  ;;  %2270 = vmatpush.msrb.mxu3 %v7460_v7 }
 0x506   :  { %2211 = vmatpush.msrb.mxu0 %v7462_v35  ;;  %2231 = vmatpush.msrb.mxu1 %v7466_v31 }
 0x507   :  { %2251 = vmatpush.msrb.mxu2 %v7468_v42  ;;  %2271 = vmatpush.msrb.mxu3 %v7470_v32 }
 0x508   :  { %6045 = vmatmul.msk.f32.vlgmr.msra.gmra.mxu0 %vm856_vm14, %v7231_v55  ;;  %6046 = vmatmul.msk.f32.vlgmr.msra.gmra.mxu1 %vm856_vm14, %v7231_v55 }
 0x509   :  { %6047 = vmatmul.msk.f32.vlgmr.msra.gmra.mxu2 %vm856_vm14, %v7231_v55  ;;  %6048 = vmatmul.msk.f32.vlgmr.msra.gmra.mxu3 %vm856_vm14, %v7231_v55  ;;  %v8907_v55 = vld [vmem:[#allocation24_spill] sm:$0xff] }
 0x50a   :  { %2212 = vmatpush.msrb.mxu0 %v7481_v11  ;;  %2232 = vmatpush.msrb.mxu1 %v7483_v12 }
 0x50b   :  { %2252 = vmatpush.msrb.mxu2 %v7487_v41  ;;  %2272 = vmatpush.msrb.mxu3 %v7489_v15 }
 0x50c   :  { %2289 = vmatpush.msra.mxu0 %v7441_v8  ;;  %2309 = vmatpush.msra.mxu1 %v7443_v61 }
 0x50d   :  { %2329 = vmatpush.msra.mxu2 %v7445_v4  ;;  %2349 = vmatpush.msra.mxu3 %v7450_v54 }
 0x50e   :  { %2290 = vmatpush.msra.mxu0 %v7452_v60  ;;  %2310 = vmatpush.msra.mxu1 %v7454_v39 }
 0x50f   :  { %2330 = vmatpush.msra.mxu2 %v7458_v3  ;;  %2350 = vmatpush.msra.mxu3 %v7460_v7 }
 0x510   :  { %6049 = vmatmul.msk.f32.vlgmr.msrb.gmra.mxu0 %vm856_vm14, %v7269_v53  ;;  %6050 = vmatmul.msk.f32.vlgmr.msrb.gmra.mxu1 %vm856_vm14, %v7269_v53 }
 0x511   :  { %6051 = vmatmul.msk.f32.vlgmr.msrb.gmra.mxu2 %vm856_vm14, %v7269_v53  ;;  %6052 = vmatmul.msk.f32.vlgmr.msrb.gmra.mxu3 %vm856_vm14, %v7269_v53  ;;  %v794_v53 = vadd.f32 %v7418_v1, %v8907_v55 }
 0x512   :  { %2291 = vmatpush.msra.mxu0 %v7462_v35  ;;  %2311 = vmatpush.msra.mxu1 %v7466_v31 }
 0x513   :  { %2331 = vmatpush.msra.mxu2 %v7468_v42  ;;  %2351 = vmatpush.msra.mxu3 %v7470_v32 }
 0x514   :  { %2292 = vmatpush.msra.mxu0 %v7481_v11  ;;  %2312 = vmatpush.msra.mxu1 %v7483_v12 }
 0x515   :  { %2332 = vmatpush.msra.mxu2 %v7487_v41  ;;  %2352 = vmatpush.msra.mxu3 %v7489_v15 }
 0x516   :  { %2369 = vmatpush.msrb.mxu0 %v7441_v8  ;;  %2389 = vmatpush.msrb.mxu1 %v7443_v61 }
 0x517   :  { %2409 = vmatpush.msrb.mxu2 %v7445_v4  ;;  %2429 = vmatpush.msrb.mxu3 %v7450_v54 }
 0x518   :  { %6053 = vmatmul.msk.f32.vlgmr.msra.gmra.mxu0 %vm856_vm14, %v7307_v56  ;;  %6054 = vmatmul.msk.f32.vlgmr.msra.gmra.mxu1 %vm856_vm14, %v7307_v56 }
 0x519   :  { %6055 = vmatmul.msk.f32.vlgmr.msra.gmra.mxu2 %vm856_vm14, %v7307_v56  ;;  %6056 = vmatmul.msk.f32.vlgmr.msra.gmra.mxu3 %vm856_vm14, %v7307_v56  ;;  %v8908_v56 = vld [vmem:[#allocation25_spill] sm:$0xff] }
 0x51a   :  { %2370 = vmatpush.msrb.mxu0 %v7452_v60  ;;  %2390 = vmatpush.msrb.mxu1 %v7454_v39 }
 0x51b   :  { %2410 = vmatpush.msrb.mxu2 %v7458_v3  ;;  %2430 = vmatpush.msrb.mxu3 %v7460_v7 }
 0x51c   :  { %2371 = vmatpush.msrb.mxu0 %v7462_v35  ;;  %2391 = vmatpush.msrb.mxu1 %v7466_v31 }
 0x51d   :  { %2411 = vmatpush.msrb.mxu2 %v7468_v42  ;;  %2431 = vmatpush.msrb.mxu3 %v7470_v32 }
 0x51e   :  { %2372 = vmatpush.msrb.mxu0 %v7481_v11  ;;  %2392 = vmatpush.msrb.mxu1 %v7483_v12 }
 0x51f   :  { %2412 = vmatpush.msrb.mxu2 %v7487_v41  ;;  %2432 = vmatpush.msrb.mxu3 %v7489_v15 }
 0x520   :  { %6057 = vmatmul.msk.f32.vlgmr.msrb.gmra.mxu0 %vm856_vm14, %v7345_v38  ;;  %6058 = vmatmul.msk.f32.vlgmr.msrb.gmra.mxu1 %vm856_vm14, %v7345_v38 }
 0x521   :  { %6059 = vmatmul.msk.f32.vlgmr.msrb.gmra.mxu2 %vm856_vm14, %v7345_v38  ;;  %6060 = vmatmul.msk.f32.vlgmr.msrb.gmra.mxu3 %vm856_vm14, %v7345_v38  ;;  %v814_v38 = vadd.f32 %v7425_v47, %v8908_v56 }
 0x522   :  { %2449 = vmatpush.msra.mxu0 %v7441_v8  ;;  %2469 = vmatpush.msra.mxu1 %v7443_v61 }
 0x523   :  { %2489 = vmatpush.msra.mxu2 %v7445_v4  ;;  %2509 = vmatpush.msra.mxu3 %v7450_v54 }
 0x524   :  { %2450 = vmatpush.msra.mxu0 %v7452_v60  ;;  %2470 = vmatpush.msra.mxu1 %v7454_v39 }
 0x525   :  { %2490 = vmatpush.msra.mxu2 %v7458_v3  ;;  %2510 = vmatpush.msra.mxu3 %v7460_v7 }
 0x526   :  { %2451 = vmatpush.msra.mxu0 %v7462_v35  ;;  %2471 = vmatpush.msra.mxu1 %v7466_v31 }
 0x527   :  { %2491 = vmatpush.msra.mxu2 %v7468_v42  ;;  %2511 = vmatpush.msra.mxu3 %v7470_v32 }
 0x528   :  { %2452 = vmatpush.msra.mxu0 %v7481_v11  ;;  %2472 = vmatpush.msra.mxu1 %v7483_v12 }
 0x529   :  { %2492 = vmatpush.msra.mxu2 %v7487_v41  ;;  %2512 = vmatpush.msra.mxu3 %v7489_v15 }
 0x52a   :  { %6061 = vmatmul.msk.f32.vlgmr.msra.gmra.mxu0 %vm856_vm14, %v7383_v14  ;;  %6062 = vmatmul.msk.f32.vlgmr.msra.gmra.mxu1 %vm856_vm14, %v7383_v14 }
 0x52b   :  { %6063 = vmatmul.msk.f32.vlgmr.msra.gmra.mxu2 %vm856_vm14, %v7383_v14  ;;  %6064 = vmatmul.msk.f32.vlgmr.msra.gmra.mxu3 %vm856_vm14, %v7383_v14 }
 0x52c   :  { %2529 = vmatpush.msrb.mxu0 %v7441_v8  ;;  %2549 = vmatpush.msrb.mxu1 %v7443_v61 }
 0x52d   :  { %2569 = vmatpush.msrb.mxu2 %v7445_v4  ;;  %2589 = vmatpush.msrb.mxu3 %v7450_v54 }
 0x52e   :  { %2530 = vmatpush.msrb.mxu0 %v7452_v60  ;;  %2550 = vmatpush.msrb.mxu1 %v7454_v39 }
 0x52f   :  { %2570 = vmatpush.msrb.mxu2 %v7458_v3  ;;  %2590 = vmatpush.msrb.mxu3 %v7460_v7 }
 0x530   :  { %2531 = vmatpush.msrb.mxu0 %v7462_v35  ;;  %2551 = vmatpush.msrb.mxu1 %v7466_v31 }
 0x531   :  { %2571 = vmatpush.msrb.mxu2 %v7468_v42  ;;  %2591 = vmatpush.msrb.mxu3 %v7470_v32 }
 0x532   :  { %2532 = vmatpush.msrb.mxu0 %v7481_v11  ;;  %2552 = vmatpush.msrb.mxu1 %v7483_v12 }
 0x533   :  { %2572 = vmatpush.msrb.mxu2 %v7487_v41  ;;  %2592 = vmatpush.msrb.mxu3 %v7489_v15 }
 0x534   :  { %6065 = vmatmul.msk.f32.vlgmr.msrb.gmra.mxu0 %vm856_vm14, %v7405_v2  ;;  %6066 = vmatmul.msk.f32.vlgmr.msrb.gmra.mxu1 %vm856_vm14, %v7405_v2 }
 0x535   :  { %6067 = vmatmul.msk.f32.vlgmr.msrb.gmra.mxu2 %vm856_vm14, %v7405_v2  ;;  %6068 = vmatmul.msk.f32.vlgmr.msrb.gmra.mxu3 %vm856_vm14, %v7405_v2 }
 0x536   :  { %2609 = vmatpush.msra.mxu0 %v7441_v8  ;;  %2629 = vmatpush.msra.mxu1 %v7443_v61 }
 0x537   :  { %2649 = vmatpush.msra.mxu2 %v7445_v4  ;;  %2669 = vmatpush.msra.mxu3 %v7450_v54 }
 0x538   :  { %2610 = vmatpush.msra.mxu0 %v7452_v60  ;;  %2630 = vmatpush.msra.mxu1 %v7454_v39 }
 0x539   :  { %2650 = vmatpush.msra.mxu2 %v7458_v3  ;;  %2670 = vmatpush.msra.mxu3 %v7460_v7 }
 0x53a   :  { %2611 = vmatpush.msra.mxu0 %v7462_v35  ;;  %2631 = vmatpush.msra.mxu1 %v7466_v31 }
 0x53b   :  { %2651 = vmatpush.msra.mxu2 %v7468_v42  ;;  %2671 = vmatpush.msra.mxu3 %v7470_v32 }
 0x53c   :  { %2612 = vmatpush.msra.mxu0 %v7481_v11  ;;  %2632 = vmatpush.msra.mxu1 %v7483_v12 }
 0x53d   :  { %2652 = vmatpush.msra.mxu2 %v7487_v41  ;;  %2672 = vmatpush.msra.mxu3 %v7489_v15 }
 0x53e   :  { %6069 = vmatmul.msk.f32.vlgmr.msra.gmra.mxu0 %vm856_vm14, %v7509_v16  ;;  %6070 = vmatmul.msk.f32.vlgmr.msra.gmra.mxu1 %vm856_vm14, %v7509_v16 }
 0x53f   :  { %6071 = vmatmul.msk.f32.vlgmr.msra.gmra.mxu2 %vm856_vm14, %v7509_v16  ;;  %6072 = vmatmul.msk.f32.vlgmr.msra.gmra.mxu3 %vm856_vm14, %v7509_v16 }
 0x540   :  { %2692 = vmatpush.msrb.mxu0 %v7441_v8  ;;  %2712 = vmatpush.msrb.mxu1 %v7443_v61 }
 0x541   :  { %2732 = vmatpush.msrb.mxu2 %v7445_v4  ;;  %2752 = vmatpush.msrb.mxu3 %v7450_v54  ;;  %v8909_v54 = vld [vmem:[#allocation27_spill] sm:$0xff] }
 0x542   :  { %2693 = vmatpush.msrb.mxu0 %v7452_v60  ;;  %2713 = vmatpush.msrb.mxu1 %v7454_v39  ;;  %v854_v60 = vadd.f32 %v7432_v43, %v8909_v54  ;;  %v7707_v43 = vld [vmem:[#allocation7 + $0x78] sm:$0xff] }
 0x543   :  { %2733 = vmatpush.msrb.mxu2 %v7458_v3  ;;  %2753 = vmatpush.msrb.mxu3 %v7460_v7 }
 0x544   :  { %2694 = vmatpush.msrb.mxu0 %v7462_v35  ;;  %2714 = vmatpush.msrb.mxu1 %v7466_v31 }
 0x545   :  { %2734 = vmatpush.msrb.mxu2 %v7468_v42  ;;  %2754 = vmatpush.msrb.mxu3 %v7470_v32  ;;  %v7698_v42 = vld [vmem:[#allocation7 + $0x18] sm:$0xff] }
 0x546   :  { %2695 = vmatpush.msrb.mxu0 %v7481_v11  ;;  %2715 = vmatpush.msrb.mxu1 %v7483_v12  ;;  %v7700_v32 = vld [vmem:[#allocation7 + $0x38] sm:$0xff] }
 0x547   :  { %2735 = vmatpush.msrb.mxu2 %v7487_v41  ;;  %2755 = vmatpush.msrb.mxu3 %v7489_v15  ;;  %v7702_v11 = vld [vmem:[#allocation7 + $0x58] sm:$0xff] }
 0x548   :  { %2772 = vmatpush.msra.mxu0 %v7698_v42  ;;  %2793 = vmatpush.msra.mxu1 %v7700_v32  ;;  %v8910_v41 = vld [vmem:[#allocation28_spill] sm:$0xff] }
 0x549   :  { %2814 = vmatpush.msra.mxu2 %v7702_v11  ;;  %2835 = vmatpush.msra.mxu3 %v7707_v43  ;;  %v834_v15 = vadd.f32 %v7475_v0, %v8910_v41 }
 0x54a   :  { %2773 = vmatpush.msra.mxu0 %v7713_v17  ;;  %2794 = vmatpush.msra.mxu1 %v7715_v18 }
 0x54b   :  { %2815 = vmatpush.msra.mxu2 %v7717_v19  ;;  %2836 = vmatpush.msra.mxu3 %v7723_v21 }
 0x54c   :  { %2774 = vmatpush.msra.mxu0 %v7729_v27  ;;  %2795 = vmatpush.msra.mxu1 %v7731_v45 }
 0x54d   :  { %2816 = vmatpush.msra.mxu2 %v7733_v46  ;;  %2837 = vmatpush.msra.mxu3 %v7738_v23 }
 0x54e   :  { %2775 = vmatpush.msra.mxu0 %v7740_v29  ;;  %2796 = vmatpush.msra.mxu1 %v7744_v62 }
 0x54f   :  { %2817 = vmatpush.msra.mxu2 %v7746_v63  ;;  %2838 = vmatpush.msra.mxu3 %v7751_v40 }
 0x57d   :  { %v1927_v14 = vpop.f32.mrf.mxu0  ;;  %v1948_v22 = vpop.f32.mrf.mxu1 }
 0x57e   :  { %v1930_v2 = vadd.f32 %v1927_v14, %v794_v53  ;;  %v1951_v8 = vadd.f32 %v1948_v22, %v814_v38 }
 0x580   :  { %v6039_v61 = vmul.f32 -1.442695, %v1930_v2  ;;  %v6040_v4 = vmul.f32 -1.442695, %v1951_v8 }
 0x582   :  { %6352 = vpow2.f32 %v6039_v61 }
 0x583   :  { %6354 = vpow2.f32 %v6040_v4 }
 0x584   :  { %v1990_v39 = vpop.f32.mrf.mxu3  ;;  %v1969_v12 = vpop.f32.mrf.mxu2 }
 0x585   :  { %v1993_v3 = vadd.f32 %v1990_v39, %v854_v60  ;;  %v1972_v25 = vadd.f32 %v1969_v12, %v834_v15 }
 0x587   :  { %v6041_v7 = vmul.f32 -1.442695, %v1993_v3  ;;  %v8911_v3 = vmov 0.0  }
 0x588   :  { %v6353_v35 = vpop.eup %6352 }
 0x589   :  { %v6355_v31 = vpop.eup %6354  ;;  %v7693_v1 = vadd.f32 1.0, %v6353_v35  ;;  %6356 = vpow2.f32 %v6041_v7  ;;  %v2125_v7 = vpop.f32.mrf.mxu0 }
 0x58a   :  { %v7695_v47 = vadd.f32 1.0, %v6355_v31  ;;  %v2148_v35 = vpop.f32.mrf.mxu1 }
 0x58b   :  { %6358 = vrcp.f32 %v7693_v1  ;;  %v2009_v5 = vand.u32 2147483648, %v7693_v1  ;;  %v2007_v28 = vand.u32 2147483647, %v7693_v1  ;;  %vm2003_vm13 = vweird.f32 %v7693_v1 }
 0x58c   :  { %6360 = vrcp.f32 %v7695_v47  ;;  %v2028_v57 = vand.u32 2147483648, %v7695_v47  ;;  %v2026_v48 = vand.u32 2147483647, %v7695_v47  ;;  %vm2022_vm15 = vweird.f32 %v7695_v47  ;;  %v2194_v31 = vpop.f32.mrf.mxu3  ;;  %v2171_v12 = vpop.f32.mrf.mxu2 }
 0x58d   :  { %v2010_v50 = vor.u32 1.1754944e-38, %v2009_v5  ;;  %vm2008_vm2 = vcmp.eq.f32.partialorder %v2007_v28, 8.507059e+37 }
 0x58e   :  { %v2029_v30 = vor.u32 1.1754944e-38, %v2028_v57  ;;  %vm2027_vm3 = vcmp.eq.f32.partialorder %v2026_v48, 8.507059e+37 }
 0x58f   :  { %v6357_v13 = vpop.eup %6356 }
 0x590   :  { %v7719_v20 = vadd.f32 1.0, %v6357_v13 }
 0x591   :  { %v6359_v24 = vpop.eup %6358 }
 0x592   :  { %v6361_v0 = vpop.eup %6360  ;;  %v1999_v26 = vmul.f32 %v6359_v24, %v7693_v1  ;;  %6362 = vrcp.f32 %v7719_v20  ;;  %vm2004_vm11 = vweird.f32 %v6359_v24  ;;  %v2048_v8 = vand.u32 2147483648, %v7719_v20  ;;  %v7807_v1 = vpop.f32.mrf.mxu0 }
 0x593   :  { %v2018_v37 = vmul.f32 %v6361_v0, %v7695_v47  ;;  %6364 = vtanh.f32 %v1972_v25  ;;  %vm2023_vm12 = vweird.f32 %v6361_v0  ;;  %vm2005_vm0 = vmor %vm2003_vm13, %vm2004_vm11  ;;  %vm2042_vm6 = vweird.f32 %v7719_v20  ;;  %v7809_v47 = vpop.f32.mrf.mxu1 }
 0x594   :  { %v2000_v34 = vsub.f32 1.0, %v1999_v26  ;;  %vm2024_vm1 = vmor %vm2022_vm15, %vm2023_vm12  ;;  %v2046_v61 = vand.u32 2147483647, %v7719_v20  ;;  %v2049_v54 = vor.u32 1.1754944e-38, %v2048_v8  ;;  %v7811_v13 = vpop.f32.mrf.mxu3 }
 0x595   :  { %v2019_v10 = vsub.f32 1.0, %v2018_v37 }
 0x596   :  { %v2001_v33 = vmul.f32 %v6359_v24, %v2000_v34  ;;  %vm2047_vm8 = vcmp.eq.f32.partialorder %v2046_v61, 8.507059e+37 }
 0x597   :  { %v2020_v51 = vmul.f32 %v6361_v0, %v2019_v10 }
 0x598   :  { %v6363_v58 = vpop.eup %6362  ;;  %v2002_v49 = vadd.f32 %v6359_v24, %v2001_v33 }
 0x599   :  { %v2021_v36 = vadd.f32 %v6361_v0, %v2020_v51  ;;  %v2038_v52 = vmul.f32 %v6363_v58, %v7719_v20  ;;  %v6365_v6 = vpop.eup %6364  ;;  %vm2043_vm5 = vweird.f32 %v6363_v58  ;;  %v7817_v20 = vpop.f32.mrf.mxu2 }
 0x59a   :  { %v2006_v9 = vsel %vm2005_vm0, %v6359_v24, %v2002_v49  ;;  %vm2044_vm7 = vmor %vm2042_vm6, %vm2043_vm5  ;;  %v7813_v41 = vpop.f32.mrf.mxu0 }
 0x59b   :  { %v2011_v44 = vsel %vm2008_vm2, %v2010_v50, %v2006_v9  ;;  %v2025_v16 = vsel %vm2024_vm1, %v6361_v0, %v2021_v36  ;;  %v2039_v55 = vsub.f32 1.0, %v2038_v52  ;;  %v7815_v15 = vpop.f32.mrf.mxu1  ;;  %v7860_v9 = vld [vmem:[%s8881_s6] ss:$0 sm:$0xff] }
 0x59c   :  { %v2030_v53 = vsel %vm2027_vm3, %v2029_v30, %v2025_v16  ;;  %v2053_v56 = vmul.f32 %v6365_v6, %v2011_v44  ;;  %v7819_v24 = vpop.f32.mrf.mxu3  ;;  %v7865_v6 = vld [vmem:[%s8881_s6 + $0x1] ss:$0 sm:$0xff]  ;;  %v2126_v44 = vadd.f32 %v7860_v9, %v2125_v7 }
 0x59d   :  { %v2052_v38 = vmul.f32 %v2030_v53, %v7506_v59  ;;  %v2040_v14 = vmul.f32 %v6363_v58, %v2039_v55  ;;  %v2149_v16 = vadd.f32 %v7865_v6, %v2148_v35 }
 0x59f   :  { %v2054_v22 = vadd.f32 %v2053_v56, %v2052_v38  ;;  %v2041_v2 = vadd.f32 %v6363_v58, %v2040_v14 }
 0x5a1   :  { %6366 = vtanh.f32 %v2054_v22  ;;  %2059 = vst.msk [vmem:[#allocation12] sm:$0x3] %vm2057_vm4, %v2054_v22  ;;  %v2045_v4 = vsel %vm2044_vm7, %v6363_v58, %v2041_v2  ;;  %v7825_v26 = vpop.f32.mrf.mxu2  ;;  %v7876_v2 = vld [vmem:[%s8881_s6 + $0x3] ss:$0 sm:$0xff] }
 0x5a2   :  { %v2050_v59 = vsel %vm2047_vm8, %v2049_v54, %v2045_v4  ;;  %v7821_v25 = vpop.f32.mrf.mxu0  ;;  %v2195_v4 = vadd.f32 %v7876_v2, %v2194_v31 }
 0x5a3   :  { %v7823_v0 = vpop.f32.mrf.mxu1 }
 0x5a4   :  { %v7827_v37 = vpop.f32.mrf.mxu3 }
 0x5a7   :  { %v6367_v60 = vpop.eup %6366 }
 0x5a8   :  { %v2056_v39 = vmul.f32 %v6367_v60, %v2050_v59 }
 0x5a9   :  { %v7833_v5 = vpop.f32.mrf.mxu2 }
 0x5aa   :  { %6073 = vmatmul.msk.f32.vlgmr.msrb.gmra.mxu0 %vm856_vm14, %v2056_v39  ;;  %6074 = vmatmul.msk.f32.vlgmr.msrb.gmra.mxu1 %vm856_vm14, %v2056_v39  ;;  %2058 = vst.msk [vmem:[#allocation11] sm:$0x3] %vm2057_vm4, %v2056_v39  ;;  %v7829_v34 = vpop.f32.mrf.mxu0 }
 0x5ab   :  { %6075 = vmatmul.msk.f32.vlgmr.msrb.gmra.mxu2 %vm856_vm14, %v2056_v39  ;;  %6076 = vmatmul.msk.f32.vlgmr.msrb.gmra.mxu3 %vm856_vm14, %v2056_v39  ;;  %v7831_v10 = vpop.f32.mrf.mxu1 }
 0x5ac   :  { %2922 = vmatpush.msrb.mxu0 %v7698_v42  ;;  %2943 = vmatpush.msrb.mxu1 %v7700_v32 }
 0x5ad   :  { %2964 = vmatpush.msrb.mxu2 %v7702_v11  ;;  %2985 = vmatpush.msrb.mxu3 %v7707_v43 }
 0x5ae   :  { %2923 = vmatpush.msrb.mxu0 %v7713_v17  ;;  %2944 = vmatpush.msrb.mxu1 %v7715_v18  ;;  %v7835_v57 = vpop.f32.mrf.mxu3 }
 0x5af   :  { %2965 = vmatpush.msrb.mxu2 %v7717_v19  ;;  %2986 = vmatpush.msrb.mxu3 %v7723_v21 }
 0x5b0   :  { %2924 = vmatpush.msrb.mxu0 %v7729_v27  ;;  %2945 = vmatpush.msrb.mxu1 %v7731_v45 }
 0x5b1   :  { %2966 = vmatpush.msrb.mxu2 %v7733_v46  ;;  %2987 = vmatpush.msrb.mxu3 %v7738_v23  ;;  %v7841_v51 = vpop.f32.mrf.mxu2 }
 0x5b2   :  { %2776 = vmatmul.f32.vlgmr.msra.gmra.mxu0 %v8911_v3  ;;  %2797 = vmatmul.f32.vlgmr.msra.gmra.mxu1 %v8911_v3  ;;  %v7837_v33 = vpop.f32.mrf.mxu0 }
 0x5b3   :  { %2818 = vmatmul.f32.vlgmr.msra.gmra.mxu2 %v8911_v3  ;;  %2839 = vmatmul.f32.vlgmr.msra.gmra.mxu3 %v8911_v3  ;;  %v7839_v28 = vpop.f32.mrf.mxu1 }
 0x5b4   :  { %2925 = vmatpush.msrb.mxu0 %v7740_v29  ;;  %2946 = vmatpush.msrb.mxu1 %v7744_v62 }
 0x5b5   :  { %2967 = vmatpush.msrb.mxu2 %v7746_v63  ;;  %2988 = vmatpush.msrb.mxu3 %v7751_v40 }
 0x5b6   :  { %3072 = vmatpush.msra.mxu0 %v7698_v42  ;;  %3093 = vmatpush.msra.mxu1 %v7700_v32 }
 0x5b7   :  { %3114 = vmatpush.msra.mxu2 %v7702_v11  ;;  %3135 = vmatpush.msra.mxu3 %v7707_v43 }
 0x5b8   :  { %3073 = vmatpush.msra.mxu0 %v7713_v17  ;;  %3094 = vmatpush.msra.mxu1 %v7715_v18  ;;  %v7843_v48 = vpop.f32.mrf.mxu3 }
 0x5b9   :  { %3115 = vmatpush.msra.mxu2 %v7717_v19  ;;  %3136 = vmatpush.msra.mxu3 %v7723_v21  ;;  %8912 = vst [vmem:[#allocation19_spill] sm:$0xff] %v7843_v48  ;;  %v7849_v50 = vpop.f32.mrf.mxu2 }
 0x5ba   :  { %3074 = vmatpush.msra.mxu0 %v7729_v27  ;;  %3095 = vmatpush.msra.mxu1 %v7731_v45  ;;  %8915 = vst [vmem:[#allocation21_spill] sm:$0xff] %v7849_v50 }
 0x5bb   :  { %3116 = vmatpush.msra.mxu2 %v7733_v46  ;;  %3137 = vmatpush.msra.mxu3 %v7738_v23  ;;  %v7845_v58 = vpop.f32.mrf.mxu0  ;;  %v7847_v49 = vpop.f32.mrf.mxu1 }
 0x5bc   :  { %3075 = vmatpush.msra.mxu0 %v7740_v29  ;;  %3096 = vmatpush.msra.mxu1 %v7744_v62  ;;  %8913 = vst [vmem:[#allocation22_spill] sm:$0xff] %v7845_v58 }
 0x5bd   :  { %3117 = vmatpush.msra.mxu2 %v7746_v63  ;;  %3138 = vmatpush.msra.mxu3 %v7751_v40  ;;  %8914 = vst [vmem:[#allocation20_spill] sm:$0xff] %v7847_v49 }
 0x5c2   :  { %v7851_v36 = vpop.f32.mrf.mxu3  ;;  %v7869_v55 = vpop.f32.mrf.mxu2 }
 0x5c3   :  { %8916 = vst [vmem:[#allocation23_spill] sm:$0xff] %v7851_v36 }
 0x5c4   :  { %8919 = vst [vmem:[#allocation25_spill] sm:$0xff] %v7869_v55 }
 0x627   :  { %v7853_v52 = vpop.f32.mrf.mxu0  ;;  %v7855_v30 = vpop.f32.mrf.mxu1 }
 0x628   :  { %8917 = vst [vmem:[#allocation26_spill] sm:$0xff] %v7853_v52 }
 0x629   :  { %8918 = vst [vmem:[#allocation24_spill] sm:$0xff] %v7855_v30 }
 0x62e   :  { %v7871_v53 = vpop.f32.mrf.mxu3  ;;  %v7879_v54 = vpop.f32.mrf.mxu2 }
 0x62f   :  { %8920 = vst [vmem:[#allocation27_spill] sm:$0xff] %v7871_v53  ;;  %v2777_v56 = vpop.f32.mrf.mxu0  ;;  %v2798_v38 = vpop.f32.mrf.mxu1 }
 0x630   :  { %v2780_v14 = vadd.f32 %v2777_v56, %v2126_v44  ;;  %v2801_v22 = vadd.f32 %v2798_v38, %v2149_v16  ;;  %8921 = vst [vmem:[#allocation28_spill] sm:$0xff] %v7879_v54  ;;  %v7884_v56 = vld [vmem:[%s8881_s6 + $0x2] ss:$0 sm:$0xff] }
 0x632   :  { %v6077_v8 = vmul.f32 -1.442695, %v2780_v14  ;;  %v6078_v61 = vmul.f32 -1.442695, %v2801_v22  ;;  %v2172_v14 = vadd.f32 %v7884_v56, %v2171_v12 }
 0x634   :  { %6368 = vpow2.f32 %v6077_v8 }
 0x635   :  { %6370 = vpow2.f32 %v6078_v61 }
 0x636   :  { %v2840_v60 = vpop.f32.mrf.mxu3  ;;  %v2819_v38 = vpop.f32.mrf.mxu2 }
 0x637   :  { %v2843_v59 = vadd.f32 %v2840_v60, %v2195_v4  ;;  %v2822_v61 = vadd.f32 %v2819_v38, %v2172_v14 }
 0x639   :  { %v6079_v39 = vmul.f32 -1.442695, %v2843_v59 }
 0x63a   :  { %v6369_v7 = vpop.eup %6368 }
 0x63b   :  { %v6371_v35 = vpop.eup %6370  ;;  %v2847_v44 = vadd.f32 1.0, %v6369_v7  ;;  %6372 = vpow2.f32 %v6079_v39 }
 0x63c   :  { %v2866_v16 = vadd.f32 1.0, %v6371_v35 }
 0x63d   :  { %6374 = vrcp.f32 %v2847_v44  ;;  %v2859_v35 = vand.u32 2147483648, %v2847_v44  ;;  %v2857_v53 = vand.u32 2147483647, %v2847_v44  ;;  %vm2853_vm11 = vweird.f32 %v2847_v44 }
 0x63e   :  { %6376 = vrcp.f32 %v2866_v16  ;;  %v2878_v3 = vand.u32 2147483648, %v2866_v16  ;;  %v2876_v52 = vand.u32 2147483647, %v2866_v16  ;;  %vm2872_vm12 = vweird.f32 %v2866_v16 }
 0x63f   :  { %v2860_v38 = vor.u32 1.1754944e-38, %v2859_v35  ;;  %vm2858_vm15 = vcmp.eq.f32.partialorder %v2857_v53, 8.507059e+37 }
 0x640   :  { %v2879_v36 = vor.u32 1.1754944e-38, %v2878_v3  ;;  %vm2877_vm1 = vcmp.eq.f32.partialorder %v2876_v52, 8.507059e+37 }
 0x641   :  { %v6373_v31 = vpop.eup %6372 }
 0x642   :  { %v2886_v22 = vadd.f32 1.0, %v6373_v31 }
 0x643   :  { %v6375_v8 = vpop.eup %6374 }
 0x644   :  { %v6377_v4 = vpop.eup %6376  ;;  %v2849_v60 = vmul.f32 %v6375_v8, %v2847_v44  ;;  %6378 = vrcp.f32 %v2886_v22  ;;  %vm2854_vm9 = vweird.f32 %v6375_v8  ;;  %vm2892_vm3 = vweird.f32 %v2886_v22 }
 0x645   :  { %v2868_v59 = vmul.f32 %v6377_v4, %v2866_v16  ;;  %6380 = vtanh.f32 %v2822_v61  ;;  %vm2873_vm10 = vweird.f32 %v6377_v4  ;;  %vm2855_vm13 = vmor %vm2853_vm11, %vm2854_vm9  ;;  %v2896_v3 = vand.u32 2147483647, %v2886_v22 }
 0x646   :  { %v2850_v39 = vsub.f32 1.0, %v2849_v60  ;;  %vm2874_vm0 = vmor %vm2872_vm12, %vm2873_vm10 }
 0x647   :  { %v2869_v7 = vsub.f32 1.0, %v2868_v59  ;;  %vm2897_vm6 = vcmp.eq.f32.partialorder %v2896_v3, 8.507059e+37 }
 0x648   :  { %v2851_v54 = vmul.f32 %v6375_v8, %v2850_v39 }
 0x649   :  { %v2870_v30 = vmul.f32 %v6377_v4, %v2869_v7 }
 0x64a   :  { %v6379_v55 = vpop.eup %6378  ;;  %v2852_v12 = vadd.f32 %v6375_v8, %v2851_v54 }
 0x64b   :  { %v2871_v31 = vadd.f32 %v6377_v4, %v2870_v30  ;;  %v2888_v14 = vmul.f32 %v6379_v55, %v2886_v22  ;;  %v6381_v61 = vpop.eup %6380  ;;  %vm2893_vm2 = vweird.f32 %v6379_v55  ;;  %v2898_v30 = vand.u32 2147483648, %v2886_v22 }
 0x64c   :  { %v2856_v60 = vsel %vm2855_vm13, %v6375_v8, %v2852_v12  ;;  %vm2894_vm5 = vmor %vm2892_vm3, %vm2893_vm2  ;;  %v2275_v12 = vadd.f32 %v7876_v2, %v7811_v13 }
 0x64d   :  { %v2861_v59 = vsel %vm2858_vm15, %v2860_v38, %v2856_v60  ;;  %v2875_v39 = vsel %vm2874_vm0, %v6377_v4, %v2871_v31  ;;  %v2889_v49 = vsub.f32 1.0, %v2888_v14  ;;  %v2899_v16 = vor.u32 1.1754944e-38, %v2898_v30 }
 0x64e   :  { %v2880_v7 = vsel %vm2877_vm1, %v2879_v36, %v2875_v39  ;;  %v2903_v58 = vmul.f32 %v6381_v61, %v2861_v59 }
 0x64f   :  { %v2902_v50 = vmul.f32 0.0, %v2880_v7  ;;  %v2890_v48 = vmul.f32 %v6379_v55, %v2889_v49  ;;  %v2255_v7 = vadd.f32 %v7884_v56, %v7817_v20 }
 0x651   :  { %v7887_v54 = vadd.f32 %v2903_v58, %v2902_v50  ;;  %v2891_v44 = vadd.f32 %v6379_v55, %v2890_v48  ;;  %v2215_v48 = vadd.f32 %v7860_v9, %v7807_v1  ;;  %v2235_v58 = vadd.f32 %v7865_v6, %v7809_v47 }
 0x653   :  { %6382 = vtanh.f32 %v7887_v54  ;;  %v2895_v53 = vsel %vm2894_vm5, %v6379_v55, %v2891_v44 }
 0x654   :  { %v2900_v52 = vsel %vm2897_vm6, %v2899_v16, %v2895_v53 }
 0x659   :  { %v6383_v8 = vpop.eup %6382 }
 0x65a   :  { %v7890_v4 = vmul.f32 %v6383_v8, %v2900_v52 }
 0x65c   :  { %6080 = vmatmul.msk.f32.vlgmr.msrb.gmra.mxu0 %vm856_vm14, %v7890_v4  ;;  %6081 = vmatmul.msk.f32.vlgmr.msrb.gmra.mxu1 %vm856_vm14, %v7890_v4 }
 0x65d   :  { %6082 = vmatmul.msk.f32.vlgmr.msrb.gmra.mxu2 %vm856_vm14, %v7890_v4  ;;  %6083 = vmatmul.msk.f32.vlgmr.msrb.gmra.mxu3 %vm856_vm14, %v7890_v4 }
 0x65e   :  { %3222 = vmatpush.msrb.mxu0 %v7698_v42  ;;  %3243 = vmatpush.msrb.mxu1 %v7700_v32 }
 0x65f   :  { %3264 = vmatpush.msrb.mxu2 %v7702_v11  ;;  %3285 = vmatpush.msrb.mxu3 %v7707_v43 }
 0x660   :  { %3223 = vmatpush.msrb.mxu0 %v7713_v17  ;;  %3244 = vmatpush.msrb.mxu1 %v7715_v18 }
 0x661   :  { %3265 = vmatpush.msrb.mxu2 %v7717_v19  ;;  %3286 = vmatpush.msrb.mxu3 %v7723_v21 }
 0x662   :  { %3224 = vmatpush.msrb.mxu0 %v7729_v27  ;;  %3245 = vmatpush.msrb.mxu1 %v7731_v45 }
 0x663   :  { %3266 = vmatpush.msrb.mxu2 %v7733_v46  ;;  %3287 = vmatpush.msrb.mxu3 %v7738_v23 }
 0x664   :  { %3225 = vmatpush.msrb.mxu0 %v7740_v29  ;;  %3246 = vmatpush.msrb.mxu1 %v7744_v62 }
 0x665   :  { %3267 = vmatpush.msrb.mxu2 %v7746_v63  ;;  %3288 = vmatpush.msrb.mxu3 %v7751_v40 }
 0x6d9   :  { %v2927_v49 = vpop.f32.mrf.mxu0  ;;  %v2948_v50 = vpop.f32.mrf.mxu1 }
 0x6da   :  { %v2930_v36 = vadd.f32 %v2927_v49, %v2215_v48  ;;  %v2951_v55 = vadd.f32 %v2948_v50, %v2235_v58 }
 0x6dc   :  { %v6084_v22 = vmul.f32 -1.442695, %v2930_v36  ;;  %v6085_v35 = vmul.f32 -1.442695, %v2951_v55 }
 0x6de   :  { %6384 = vpow2.f32 %v6084_v22 }
 0x6df   :  { %6386 = vpow2.f32 %v6085_v35 }
 0x6e0   :  { %v2990_v38 = vpop.f32.mrf.mxu3  ;;  %v2969_v47 = vpop.f32.mrf.mxu2 }
 0x6e1   :  { %v2993_v31 = vadd.f32 %v2990_v38, %v2275_v12  ;;  %v2972_v3 = vadd.f32 %v2969_v47, %v2255_v7 }
 0x6e3   :  { %v6086_v14 = vmul.f32 -1.442695, %v2993_v31 }
 0x6e4   :  { %v6385_v60 = vpop.eup %6384 }
 0x6e5   :  { %v6387_v61 = vpop.eup %6386  ;;  %v2997_v1 = vadd.f32 1.0, %v6385_v60  ;;  %6388 = vpow2.f32 %v6086_v14 }
 0x6e6   :  { %v3016_v59 = vadd.f32 1.0, %v6387_v61 }
 0x6e7   :  { %6390 = vrcp.f32 %v2997_v1  ;;  %v3009_v48 = vand.u32 2147483648, %v2997_v1  ;;  %v3007_v50 = vand.u32 2147483647, %v2997_v1  ;;  %vm3003_vm9 = vweird.f32 %v2997_v1 }
 0x6e8   :  { %6392 = vrcp.f32 %v3016_v59  ;;  %v3028_v58 = vand.u32 2147483648, %v3016_v59  ;;  %v3026_v55 = vand.u32 2147483647, %v3016_v59  ;;  %vm3022_vm10 = vweird.f32 %v3016_v59 }
 0x6e9   :  { %v3010_v35 = vor.u32 1.1754944e-38, %v3009_v48  ;;  %vm3008_vm13 = vcmp.eq.f32.partialorder %v3007_v50, 8.507059e+37 }
 0x6ea   :  { %v3029_v31 = vor.u32 1.1754944e-38, %v3028_v58  ;;  %vm3027_vm15 = vcmp.eq.f32.partialorder %v3026_v55, 8.507059e+37 }
 0x6eb   :  { %v6389_v39 = vpop.eup %6388 }
 0x6ec   :  { %v3036_v44 = vadd.f32 1.0, %v6389_v39 }
 0x6ed   :  { %v6391_v30 = vpop.eup %6390 }
 0x6ee   :  { %v6393_v13 = vpop.eup %6392  ;;  %v2999_v53 = vmul.f32 %v6391_v30, %v2997_v1  ;;  %6394 = vrcp.f32 %v3036_v44  ;;  %vm3004_vm7 = vweird.f32 %v6391_v30  ;;  %vm3042_vm1 = vweird.f32 %v3036_v44 }
 0x6ef   :  { %v3018_v16 = vmul.f32 %v6393_v13, %v3016_v59  ;;  %6396 = vtanh.f32 %v2972_v3  ;;  %vm3023_vm8 = vweird.f32 %v6393_v13  ;;  %vm3005_vm11 = vmor %vm3003_vm9, %vm3004_vm7 }
 0x6f0   :  { %v3000_v8 = vsub.f32 1.0, %v2999_v53  ;;  %vm3024_vm12 = vmor %vm3022_vm10, %vm3023_vm8 }
 0x6f1   :  { %v3019_v52 = vsub.f32 1.0, %v3018_v16 }
 0x6f2   :  { %v3001_v49 = vmul.f32 %v6391_v30, %v3000_v8  ;;  %v3048_v8 = vand.u32 2147483648, %v3036_v44 }
 0x6f3   :  { %v3020_v36 = vmul.f32 %v6393_v13, %v3019_v52 }
 0x6f4   :  { %v6395_v22 = vpop.eup %6394  ;;  %v3002_v20 = vadd.f32 %v6391_v30, %v3001_v49  ;;  %v3049_v48 = vor.u32 1.1754944e-38, %v3048_v8 }
 0x6f5   :  { %v3021_v12 = vadd.f32 %v6393_v13, %v3020_v36  ;;  %v3038_v38 = vmul.f32 %v6395_v22, %v3036_v44  ;;  %v6397_v60 = vpop.eup %6396  ;;  %vm3043_vm0 = vweird.f32 %v6395_v22 }
 0x6f6   :  { %v3006_v14 = vsel %vm3005_vm11, %v6391_v30, %v3002_v20  ;;  %v3046_v30 = vand.u32 2147483647, %v3036_v44  ;;  %vm3044_vm2 = vmor %vm3042_vm1, %vm3043_vm0  ;;  %v2315_v44 = vadd.f32 %v7865_v6, %v7815_v15 }
 0x6f7   :  { %v3011_v61 = vsel %vm3008_vm13, %v3010_v35, %v3006_v14  ;;  %v3025_v47 = vsel %vm3024_vm12, %v6393_v13, %v3021_v12  ;;  %v3039_v39 = vsub.f32 1.0, %v3038_v38  ;;  %v2355_v12 = vadd.f32 %v7876_v2, %v7819_v24 }
 0x6f8   :  { %v3030_v7 = vsel %vm3027_vm15, %v3029_v31, %v3025_v47  ;;  %v3053_v3 = vmul.f32 %v6397_v60, %v3011_v61  ;;  %vm3047_vm3 = vcmp.eq.f32.partialorder %v3046_v30, 8.507059e+37 }
 0x6f9   :  { %v3052_v53 = vmul.f32 %v3030_v7, %v7887_v54  ;;  %v3040_v16 = vmul.f32 %v6395_v22, %v3039_v39  ;;  %v2295_v54 = vadd.f32 %v7860_v9, %v7813_v41  ;;  %v2335_v7 = vadd.f32 %v7884_v56, %v7825_v26 }
 0x6fb   :  { %v7925_v1 = vadd.f32 %v3053_v3, %v3052_v53  ;;  %v3041_v59 = vadd.f32 %v6395_v22, %v3040_v16 }
 0x6fd   :  { %6398 = vtanh.f32 %v7925_v1  ;;  %v3045_v52 = vsel %vm3044_vm2, %v6395_v22, %v3041_v59 }
 0x6fe   :  { %v3050_v58 = vsel %vm3047_vm3, %v3049_v48, %v3045_v52 }
 0x703   :  { %v6399_v13 = vpop.eup %6398 }
 0x704   :  { %v7928_v49 = vmul.f32 %v6399_v13, %v3050_v58 }
 0x706   :  { %6087 = vmatmul.msk.f32.vlgmr.msra.gmra.mxu0 %vm856_vm14, %v7928_v49  ;;  %6088 = vmatmul.msk.f32.vlgmr.msra.gmra.mxu1 %vm856_vm14, %v7928_v49 }
 0x707   :  { %6089 = vmatmul.msk.f32.vlgmr.msra.gmra.mxu2 %vm856_vm14, %v7928_v49  ;;  %6090 = vmatmul.msk.f32.vlgmr.msra.gmra.mxu3 %vm856_vm14, %v7928_v49 }
 0x708   :  { %3372 = vmatpush.msra.mxu0 %v7698_v42  ;;  %3393 = vmatpush.msra.mxu1 %v7700_v32 }
 0x709   :  { %3414 = vmatpush.msra.mxu2 %v7702_v11  ;;  %3435 = vmatpush.msra.mxu3 %v7707_v43 }
 0x70a   :  { %3373 = vmatpush.msra.mxu0 %v7713_v17  ;;  %3394 = vmatpush.msra.mxu1 %v7715_v18 }
 0x70b   :  { %3415 = vmatpush.msra.mxu2 %v7717_v19  ;;  %3436 = vmatpush.msra.mxu3 %v7723_v21 }
 0x70c   :  { %3374 = vmatpush.msra.mxu0 %v7729_v27  ;;  %3395 = vmatpush.msra.mxu1 %v7731_v45 }
 0x70d   :  { %3416 = vmatpush.msra.mxu2 %v7733_v46  ;;  %3437 = vmatpush.msra.mxu3 %v7738_v23 }
 0x70e   :  { %3375 = vmatpush.msra.mxu0 %v7740_v29  ;;  %3396 = vmatpush.msra.mxu1 %v7744_v62 }
 0x70f   :  { %3417 = vmatpush.msra.mxu2 %v7746_v63  ;;  %3438 = vmatpush.msra.mxu3 %v7751_v40 }
 0x783   :  { %v3077_v50 = vpop.f32.mrf.mxu0  ;;  %v3098_v36 = vpop.f32.mrf.mxu1 }
 0x784   :  { %v3080_v55 = vadd.f32 %v3077_v50, %v2295_v54  ;;  %v3101_v22 = vadd.f32 %v3098_v36, %v2315_v44 }
 0x786   :  { %v6091_v20 = vmul.f32 -1.442695, %v3080_v55  ;;  %v6092_v35 = vmul.f32 -1.442695, %v3101_v22 }
 0x788   :  { %6400 = vpow2.f32 %v6091_v20 }
 0x789   :  { %6402 = vpow2.f32 %v6092_v35 }
 0x78a   :  { %v3140_v38 = vpop.f32.mrf.mxu3  ;;  %v3119_v15 = vpop.f32.mrf.mxu2 }
 0x78b   :  { %v3143_v31 = vadd.f32 %v3140_v38, %v2355_v12  ;;  %v3122_v16 = vadd.f32 %v3119_v15, %v2335_v7 }
 0x78d   :  { %v6093_v14 = vmul.f32 -1.442695, %v3143_v31 }
 0x78e   :  { %v6401_v60 = vpop.eup %6400 }
 0x78f   :  { %v6403_v61 = vpop.eup %6402  ;;  %v3147_v41 = vadd.f32 1.0, %v6401_v60  ;;  %6404 = vpow2.f32 %v6093_v14 }
 0x790   :  { %v3166_v47 = vadd.f32 1.0, %v6403_v61 }
 0x791   :  { %6406 = vrcp.f32 %v3147_v41  ;;  %v3159_v48 = vand.u32 2147483648, %v3147_v41  ;;  %v3157_v54 = vand.u32 2147483647, %v3147_v41  ;;  %vm3153_vm7 = vweird.f32 %v3147_v41 }
 0x792   :  { %6408 = vrcp.f32 %v3166_v47  ;;  %v3178_v13 = vand.u32 2147483648, %v3166_v47  ;;  %v3176_v50 = vand.u32 2147483647, %v3166_v47  ;;  %vm3172_vm8 = vweird.f32 %v3166_v47 }
 0x793   :  { %v3160_v55 = vor.u32 1.1754944e-38, %v3159_v48  ;;  %vm3158_vm11 = vcmp.eq.f32.partialorder %v3157_v54, 8.507059e+37 }
 0x794   :  { %v3179_v35 = vor.u32 1.1754944e-38, %v3178_v13  ;;  %vm3177_vm12 = vcmp.eq.f32.partialorder %v3176_v50, 8.507059e+37 }
 0x795   :  { %v6405_v39 = vpop.eup %6404 }
 0x796   :  { %v3186_v3 = vadd.f32 1.0, %v6405_v39 }
 0x797   :  { %v6407_v53 = vpop.eup %6406 }
 0x798   :  { %v6409_v24 = vpop.eup %6408  ;;  %v3149_v59 = vmul.f32 %v6407_v53, %v3147_v41  ;;  %6410 = vrcp.f32 %v3186_v3  ;;  %vm3154_vm5 = vweird.f32 %v6407_v53  ;;  %vm3192_vm15 = vweird.f32 %v3186_v3 }
 0x799   :  { %v3168_v8 = vmul.f32 %v6409_v24, %v3166_v47  ;;  %6412 = vtanh.f32 %v3122_v16  ;;  %vm3173_vm6 = vweird.f32 %v6409_v24  ;;  %vm3155_vm9 = vmor %vm3153_vm7, %vm3154_vm5  ;;  %v3198_v16 = vand.u32 2147483648, %v3186_v3 }
 0x79a   :  { %v3150_v30 = vsub.f32 1.0, %v3149_v59  ;;  %vm3174_vm10 = vmor %vm3172_vm8, %vm3173_vm6 }
 0x79b   :  { %v3169_v52 = vsub.f32 1.0, %v3168_v8  ;;  %v3199_v8 = vor.u32 1.1754944e-38, %v3198_v16 }
 0x79c   :  { %v3151_v58 = vmul.f32 %v6407_v53, %v3150_v30 }
 0x79d   :  { %v3170_v44 = vmul.f32 %v6409_v24, %v3169_v52 }
 0x79e   :  { %v6411_v36 = vpop.eup %6410  ;;  %v3152_v26 = vadd.f32 %v6407_v53, %v3151_v58 }
 0x79f   :  { %v3171_v22 = vadd.f32 %v6409_v24, %v3170_v44  ;;  %v3188_v20 = vmul.f32 %v6411_v36, %v3186_v3  ;;  %v6413_v38 = vpop.eup %6412  ;;  %vm3193_vm13 = vweird.f32 %v6411_v36 }
 0x7a0   :  { %v3156_v12 = vsel %vm3155_vm9, %v6407_v53, %v3152_v26  ;;  %v3196_v53 = vand.u32 2147483647, %v3186_v3  ;;  %vm3194_vm0 = vmor %vm3192_vm15, %vm3193_vm13  ;;  %v2415_v3 = vadd.f32 %v7884_v56, %v7833_v5 }
 0x7a1   :  { %v3161_v31 = vsel %vm3158_vm11, %v3160_v55, %v3156_v12  ;;  %v3175_v14 = vsel %vm3174_vm10, %v6409_v24, %v3171_v22  ;;  %v3189_v60 = vsub.f32 1.0, %v3188_v20 }
 0x7a2   :  { %v3180_v61 = vsel %vm3177_vm12, %v3179_v35, %v3175_v14  ;;  %v3203_v15 = vmul.f32 %v6413_v38, %v3161_v31  ;;  %vm3197_vm1 = vcmp.eq.f32.partialorder %v3196_v53, 8.507059e+37 }
 0x7a3   :  { %v3202_v39 = vmul.f32 %v3180_v61, %v7925_v1  ;;  %v3190_v7 = vmul.f32 %v6411_v36, %v3189_v60 }
 0x7a5   :  { %v7963_v41 = vadd.f32 %v3203_v15, %v3202_v39  ;;  %v3191_v47 = vadd.f32 %v6411_v36, %v3190_v7 }
 0x7a7   :  { %6414 = vtanh.f32 %v7963_v41  ;;  %v3195_v59 = vsel %vm3194_vm0, %v6411_v36, %v3191_v47 }
 0x7a8   :  { %v3200_v30 = vsel %vm3197_vm1, %v3199_v8, %v3195_v59 }
 0x7ad   :  { %v6415_v24 = vpop.eup %6414 }
 0x7ae   :  { %v7966_v52 = vmul.f32 %v6415_v24, %v3200_v30 }
 0x7b0   :  { %6094 = vmatmul.msk.f32.vlgmr.msrb.gmra.mxu0 %vm856_vm14, %v7966_v52  ;;  %6095 = vmatmul.msk.f32.vlgmr.msrb.gmra.mxu1 %vm856_vm14, %v7966_v52 }
 0x7b1   :  { %6096 = vmatmul.msk.f32.vlgmr.msrb.gmra.mxu2 %vm856_vm14, %v7966_v52  ;;  %6097 = vmatmul.msk.f32.vlgmr.msrb.gmra.mxu3 %vm856_vm14, %v7966_v52 }
 0x7b2   :  { %3522 = vmatpush.msrb.mxu0 %v7698_v42  ;;  %3543 = vmatpush.msrb.mxu1 %v7700_v32  ;;  %v2375_v42 = vadd.f32 %v7860_v9, %v7821_v25  ;;  %v2395_v32 = vadd.f32 %v7865_v6, %v7823_v0 }
 0x7b3   :  { %3564 = vmatpush.msrb.mxu2 %v7702_v11  ;;  %3585 = vmatpush.msrb.mxu3 %v7707_v43 }
 0x7b4   :  { %3523 = vmatpush.msrb.mxu0 %v7713_v17  ;;  %3544 = vmatpush.msrb.mxu1 %v7715_v18 }
 0x7b5   :  { %3565 = vmatpush.msrb.mxu2 %v7717_v19  ;;  %3586 = vmatpush.msrb.mxu3 %v7723_v21 }
 0x7b6   :  { %3524 = vmatpush.msrb.mxu0 %v7729_v27  ;;  %3545 = vmatpush.msrb.mxu1 %v7731_v45  ;;  %v2435_v27 = vadd.f32 %v7876_v2, %v7827_v37 }
 0x7b7   :  { %3566 = vmatpush.msrb.mxu2 %v7733_v46  ;;  %3587 = vmatpush.msrb.mxu3 %v7738_v23 }
 0x7b8   :  { %3525 = vmatpush.msrb.mxu0 %v7740_v29  ;;  %3546 = vmatpush.msrb.mxu1 %v7744_v62 }
 0x7b9   :  { %3567 = vmatpush.msrb.mxu2 %v7746_v63  ;;  %3588 = vmatpush.msrb.mxu3 %v7751_v40 }
 0x82d   :  { %v3227_v11 = vpop.f32.mrf.mxu0  ;;  %v3248_v43 = vpop.f32.mrf.mxu1 }
 0x82e   :  { %v3230_v17 = vadd.f32 %v3227_v11, %v2375_v42  ;;  %v3251_v18 = vadd.f32 %v3248_v43, %v2395_v32 }
 0x830   :  { %v6098_v19 = vmul.f32 -1.442695, %v3230_v17  ;;  %v6099_v21 = vmul.f32 -1.442695, %v3251_v18 }
 0x832   :  { %6416 = vpow2.f32 %v6098_v19 }
 0x833   :  { %6418 = vpow2.f32 %v6099_v21 }
 0x834   :  { %v3290_v45 = vpop.f32.mrf.mxu3  ;;  %v3269_v0 = vpop.f32.mrf.mxu2 }
 0x835   :  { %v3293_v46 = vadd.f32 %v3290_v45, %v2435_v27  ;;  %v3272_v58 = vadd.f32 %v3269_v0, %v2415_v3  ;;  %v8017_v27 = vld [vmem:[#allocation7 + $0x38] sm:$0xff]  ;;  %v8041_v0 = vld [vmem:[#allocation7 + $0x28] sm:$0xff] }
 0x836   :  { %v8020_v45 = vld [vmem:[#allocation7 + $0x58] sm:$0xff]  ;;  %v8047_v3 = vld [vmem:[#allocation7 + $0x68] sm:$0xff] }
 0x837   :  { %v6100_v23 = vmul.f32 -1.442695, %v3293_v46  ;;  %v8023_v46 = vld [vmem:[#allocation7 + $0x78] sm:$0xff] }
 0x838   :  { %v6417_v29 = vpop.eup %6416 }
 0x839   :  { %v6419_v62 = vpop.eup %6418  ;;  %v3297_v63 = vadd.f32 1.0, %v6417_v29  ;;  %6420 = vpow2.f32 %v6100_v23  ;;  %v8026_v23 = vld [vmem:[#allocation7 + $0x10] sm:$0xff] }
 0x83a   :  { %v3316_v25 = vadd.f32 1.0, %v6419_v62  ;;  %v8029_v29 = vld [vmem:[#allocation7 + $0x30] sm:$0xff] }
 0x83b   :  { %6422 = vrcp.f32 %v3297_v63  ;;  %v3309_v26 = vand.u32 2147483648, %v3297_v63  ;;  %v3307_v20 = vand.u32 2147483647, %v3297_v63  ;;  %vm3303_vm5 = vweird.f32 %v3297_v63  ;;  %v8032_v62 = vld [vmem:[#allocation7 + $0x50] sm:$0xff] }
 0x83c   :  { %6424 = vrcp.f32 %v3316_v25  ;;  %v3328_v55 = vand.u32 2147483648, %v3316_v25  ;;  %v3326_v12 = vand.u32 2147483647, %v3316_v25  ;;  %vm3322_vm6 = vweird.f32 %v3316_v25 }
 0x83d   :  { %v3310_v31 = vor.u32 1.1754944e-38, %v3309_v26  ;;  %vm3308_vm9 = vcmp.eq.f32.partialorder %v3307_v20, 8.507059e+37  ;;  %v2515_v20 = vadd.f32 %v7876_v2, %v7835_v57 }
 0x83e   :  { %v3329_v61 = vor.u32 1.1754944e-38, %v3328_v55  ;;  %vm3327_vm10 = vcmp.eq.f32.partialorder %v3326_v12, 8.507059e+37 }
 0x83f   :  { %v6421_v1 = vpop.eup %6420 }
 0x840   :  { %v3336_v48 = vadd.f32 1.0, %v6421_v1  ;;  %v8044_v1 = vld [vmem:[#allocation7 + $0x48] sm:$0xff] }
 0x841   :  { %v6423_v13 = vpop.eup %6422 }
 0x842   :  { %v6425_v37 = vpop.eup %6424  ;;  %v3299_v54 = vmul.f32 %v6423_v13, %v3297_v63  ;;  %6426 = vrcp.f32 %v3336_v48  ;;  %vm3304_vm2 = vweird.f32 %v6423_v13  ;;  %v3348_v32 = vand.u32 2147483648, %v3336_v48  ;;  %v8035_v63 = vld [vmem:[#allocation7 + $0x70] sm:$0xff] }
 0x843   :  { %v3318_v44 = vmul.f32 %v6425_v37, %v3316_v25  ;;  %6428 = vtanh.f32 %v3272_v58  ;;  %vm3323_vm3 = vweird.f32 %v6425_v37  ;;  %vm3305_vm7 = vmor %vm3303_vm5, %vm3304_vm2  ;;  %vm3342_vm12 = vweird.f32 %v3336_v48  ;;  %v8038_v25 = vld [vmem:[#allocation7 + $0x8] sm:$0xff]  ;;  %v8056_v58 = vld [vmem:[#allocation7 + $0x40] sm:$0xff] }
 0x844   :  { %v3300_v50 = vsub.f32 1.0, %v3299_v54  ;;  %vm3324_vm8 = vmor %vm3322_vm6, %vm3323_vm3  ;;  %v3346_v11 = vand.u32 2147483647, %v3336_v48  ;;  %v3349_v17 = vor.u32 1.1754944e-38, %v3348_v32  ;;  %v2475_v54 = vadd.f32 %v7865_v6, %v7831_v10 }
 0x845   :  { %v3319_v36 = vsub.f32 1.0, %v3318_v44 }
 0x846   :  { %v3301_v22 = vmul.f32 %v6423_v13, %v3300_v50  ;;  %vm3347_vm15 = vcmp.eq.f32.partialorder %v3346_v11, 8.507059e+37 }
 0x847   :  { %v3320_v35 = vmul.f32 %v6425_v37, %v3319_v36 }
 0x848   :  { %v6427_v38 = vpop.eup %6426  ;;  %v3302_v5 = vadd.f32 %v6423_v13, %v3301_v22 }
 0x849   :  { %v3321_v14 = vadd.f32 %v6425_v37, %v3320_v35  ;;  %v3338_v60 = vmul.f32 %v6427_v38, %v3336_v48  ;;  %v6429_v39 = vpop.eup %6428  ;;  %vm3343_vm11 = vweird.f32 %v6427_v38  ;;  %v8050_v48 = vld [vmem:[#allocation7] sm:$0xff] }
 0x84a   :  { %v3306_v15 = vsel %vm3305_vm7, %v6423_v13, %v3302_v5  ;;  %vm3344_vm13 = vmor %vm3342_vm12, %vm3343_vm11  ;;  %v8053_v13 = vld [vmem:[#allocation7 + $0x20] sm:$0xff] }
 0x84b   :  { %v3311_v7 = vsel %vm3308_vm9, %v3310_v31, %v3306_v15  ;;  %v3325_v47 = vsel %vm3324_vm8, %v6425_v37, %v3321_v14  ;;  %v3339_v16 = vsub.f32 1.0, %v3338_v60  ;;  %v2455_v37 = vadd.f32 %v7860_v9, %v7829_v34 }
 0x84c   :  { %v3330_v53 = vsel %vm3327_vm10, %v3329_v61, %v3325_v47  ;;  %v3353_v59 = vmul.f32 %v6429_v39, %v3311_v7  ;;  %v2495_v60 = vadd.f32 %v7884_v56, %v7841_v51 }
 0x84d   :  { %v3352_v8 = vmul.f32 %v3330_v53, %v7963_v41  ;;  %v3340_v24 = vmul.f32 %v6427_v38, %v3339_v16  ;;  %v8014_v41 = vld [vmem:[#allocation7 + $0x18] sm:$0xff] }
 0x84f   :  { %v8001_v30 = vadd.f32 %v3353_v59, %v3352_v8  ;;  %v3341_v42 = vadd.f32 %v6427_v38, %v3340_v24 }
 0x851   :  { %6430 = vtanh.f32 %v8001_v30  ;;  %v3345_v43 = vsel %vm3344_vm13, %v6427_v38, %v3341_v42 }
 0x852   :  { %v3350_v19 = vsel %vm3347_vm15, %v3349_v17, %v3345_v43 }
 0x857   :  { %v6431_v18 = vpop.eup %6430 }
 0x858   :  { %v8004_v21 = vmul.f32 %v6431_v18, %v3350_v19 }
 0x85a   :  { %6101 = vmatmul.msk.f32.vlgmr.msra.gmra.mxu0 %vm856_vm14, %v8004_v21  ;;  %6102 = vmatmul.msk.f32.vlgmr.msra.gmra.mxu1 %vm856_vm14, %v8004_v21 }
 0x85b   :  { %6103 = vmatmul.msk.f32.vlgmr.msra.gmra.mxu2 %vm856_vm14, %v8004_v21  ;;  %6104 = vmatmul.msk.f32.vlgmr.msra.gmra.mxu3 %vm856_vm14, %v8004_v21 }
 0x85c   :  { %3672 = vmatpush.msra.mxu0 %v8014_v41  ;;  %3693 = vmatpush.msra.mxu1 %v8017_v27 }
 0x85d   :  { %3714 = vmatpush.msra.mxu2 %v8020_v45  ;;  %3735 = vmatpush.msra.mxu3 %v8023_v46 }
 0x85e   :  { %3673 = vmatpush.msra.mxu0 %v8026_v23  ;;  %3694 = vmatpush.msra.mxu1 %v8029_v29 }
 0x85f   :  { %3715 = vmatpush.msra.mxu2 %v8032_v62  ;;  %3736 = vmatpush.msra.mxu3 %v8035_v63 }
 0x860   :  { %3674 = vmatpush.msra.mxu0 %v8038_v25  ;;  %3695 = vmatpush.msra.mxu1 %v8041_v0 }
 0x861   :  { %3716 = vmatpush.msra.mxu2 %v8044_v1  ;;  %3737 = vmatpush.msra.mxu3 %v8047_v3 }
 0x862   :  { %3675 = vmatpush.msra.mxu0 %v8050_v48  ;;  %3696 = vmatpush.msra.mxu1 %v8053_v13 }
 0x863   :  { %3717 = vmatpush.msra.mxu2 %v8056_v58  ;;  %3738 = vmatpush.msra.mxu3 %v7751_v40 }
 0x8d7   :  { %v3377_v44 = vpop.f32.mrf.mxu0  ;;  %v3398_v50 = vpop.f32.mrf.mxu1 }
 0x8d8   :  { %v3380_v36 = vadd.f32 %v3377_v44, %v2455_v37  ;;  %v3401_v26 = vadd.f32 %v3398_v50, %v2475_v54 }
 0x8da   :  { %v6105_v55 = vmul.f32 -1.442695, %v3380_v36  ;;  %v6106_v22 = vmul.f32 -1.442695, %v3401_v26 }
 0x8dc   :  { %6432 = vpow2.f32 %v6105_v55 }
 0x8dd   :  { %6434 = vpow2.f32 %v6106_v22 }
 0x8de   :  { %v3440_v35 = vpop.f32.mrf.mxu3  ;;  %v3419_v10 = vpop.f32.mrf.mxu2 }
 0x8df   :  { %v3443_v12 = vadd.f32 %v3440_v35, %v2515_v20  ;;  %v3422_v39 = vadd.f32 %v3419_v10, %v2495_v60 }
 0x8e1   :  { %v6107_v40 = vmul.f32 -1.442695, %v3443_v12 }
 0x8e2   :  { %v6433_v38 = vpop.eup %6432 }
 0x8e3   :  { %v6435_v5 = vpop.eup %6434  ;;  %v3447_v34 = vadd.f32 1.0, %v6433_v38  ;;  %6436 = vpow2.f32 %v6107_v40 }
 0x8e4   :  { %v3466_v31 = vadd.f32 1.0, %v6435_v5 }
 0x8e5   :  { %6438 = vrcp.f32 %v3447_v34  ;;  %v3459_v59 = vand.u32 2147483648, %v3447_v34  ;;  %v3457_v42 = vand.u32 2147483647, %v3447_v34  ;;  %vm3453_vm2 = vweird.f32 %v3447_v34 }
 0x8e6   :  { %6440 = vrcp.f32 %v3466_v31  ;;  %v3478_v8 = vand.u32 2147483648, %v3466_v31  ;;  %v3476_v11 = vand.u32 2147483647, %v3466_v31  ;;  %vm3472_vm3 = vweird.f32 %v3466_v31 }
 0x8e7   :  { %v3460_v17 = vor.u32 1.1754944e-38, %v3459_v59  ;;  %vm3458_vm7 = vcmp.eq.f32.partialorder %v3457_v42, 8.507059e+37 }
 0x8e8   :  { %v3479_v37 = vor.u32 1.1754944e-38, %v3478_v8  ;;  %vm3477_vm8 = vcmp.eq.f32.partialorder %v3476_v11, 8.507059e+37 }
 0x8e9   :  { %v6437_v14 = vpop.eup %6436 }
 0x8ea   :  { %v3486_v61 = vadd.f32 1.0, %v6437_v14 }
 0x8eb   :  { %v6439_v15 = vpop.eup %6438 }
 0x8ec   :  { %v6441_v57 = vpop.eup %6440  ;;  %v3449_v7 = vmul.f32 %v6439_v15, %v3447_v34  ;;  %6442 = vrcp.f32 %v3486_v61  ;;  %vm3454_vm0 = vweird.f32 %v6439_v15  ;;  %v3498_v38 = vand.u32 2147483648, %v3486_v61 }
 0x8ed   :  { %v3468_v47 = vmul.f32 %v6441_v57, %v3466_v31  ;;  %6444 = vtanh.f32 %v3422_v39  ;;  %vm3473_vm1 = vweird.f32 %v6441_v57  ;;  %vm3455_vm5 = vmor %vm3453_vm2, %vm3454_vm0  ;;  %vm3492_vm10 = vweird.f32 %v3486_v61 }
 0x8ee   :  { %v3450_v16 = vsub.f32 1.0, %v3449_v7  ;;  %vm3474_vm6 = vmor %vm3472_vm3, %vm3473_vm1  ;;  %v3496_v5 = vand.u32 2147483647, %v3486_v61  ;;  %v3499_v31 = vor.u32 1.1754944e-38, %v3498_v38 }
 0x8ef   :  { %v3469_v53 = vsub.f32 1.0, %v3468_v47 }
 0x8f0   :  { %v3451_v24 = vmul.f32 %v6439_v15, %v3450_v16  ;;  %vm3497_vm12 = vcmp.eq.f32.partialorder %v3496_v5, 8.507059e+37 }
 0x8f1   :  { %v3470_v32 = vmul.f32 %v6441_v57, %v3469_v53 }
 0x8f2   :  { %v6443_v43 = vpop.eup %6442  ;;  %v3452_v51 = vadd.f32 %v6439_v15, %v3451_v24 }
 0x8f3   :  { %v3471_v18 = vadd.f32 %v6441_v57, %v3470_v32  ;;  %v3488_v19 = vmul.f32 %v6443_v43, %v3486_v61  ;;  %v6445_v44 = vpop.eup %6444  ;;  %vm3493_vm9 = vweird.f32 %v6443_v43  ;;  %v8923_v61 = vld [vmem:[#allocation21_spill] sm:$0xff] }
 0x8f4   :  { %v3456_v54 = vsel %vm3455_vm5, %v6439_v15, %v3452_v51  ;;  %vm3494_vm11 = vmor %vm3492_vm10, %vm3493_vm9  ;;  %v2575_v15 = vadd.f32 %v7884_v56, %v8923_v61 }
 0x8f5   :  { %v3461_v50 = vsel %vm3458_vm7, %v3460_v17, %v3456_v54  ;;  %v3475_v36 = vsel %vm3474_vm6, %v6441_v57, %v3471_v18  ;;  %v3489_v26 = vsub.f32 1.0, %v3488_v19 }
 0x8f6   :  { %v3480_v55 = vsel %vm3477_vm8, %v3479_v37, %v3475_v36  ;;  %v3503_v22 = vmul.f32 %v6445_v44, %v3461_v50 }
 0x8f7   :  { %v3502_v20 = vmul.f32 %v3480_v55, %v8001_v30  ;;  %v3490_v35 = vmul.f32 %v6443_v43, %v3489_v26  ;;  %v6659_v30 = vld [vmem:[#allocation7 + $0x60] sm:$0xff] }
 0x8f9   :  { %v8069_v12 = vadd.f32 %v3503_v22, %v3502_v20  ;;  %v3491_v40 = vadd.f32 %v6443_v43, %v3490_v35 }
 0x8fb   :  { %6446 = vtanh.f32 %v8069_v12  ;;  %v3495_v34 = vsel %vm3494_vm11, %v6443_v43, %v3491_v40 }
 0x8fc   :  { %v3500_v14 = vsel %vm3497_vm12, %v3499_v31, %v3495_v34 }
 0x901   :  { %v6447_v10 = vpop.eup %6446 }
 0x902   :  { %v8072_v60 = vmul.f32 %v6447_v10, %v3500_v14 }
 0x904   :  { %6108 = vmatmul.msk.f32.vlgmr.msrb.gmra.mxu0 %vm856_vm14, %v8072_v60  ;;  %6109 = vmatmul.msk.f32.vlgmr.msrb.gmra.mxu1 %vm856_vm14, %v8072_v60 }
 0x905   :  { %6110 = vmatmul.msk.f32.vlgmr.msrb.gmra.mxu2 %vm856_vm14, %v8072_v60  ;;  %6111 = vmatmul.msk.f32.vlgmr.msrb.gmra.mxu3 %vm856_vm14, %v8072_v60 }
 0x906   :  { %3822 = vmatpush.msrb.mxu0 %v8014_v41  ;;  %3843 = vmatpush.msrb.mxu1 %v8017_v27  ;;  %v2535_v41 = vadd.f32 %v7860_v9, %v7837_v33  ;;  %v2555_v27 = vadd.f32 %v7865_v6, %v7839_v28 }
 0x907   :  { %3864 = vmatpush.msrb.mxu2 %v8020_v45  ;;  %3885 = vmatpush.msrb.mxu3 %v8023_v46 }
 0x908   :  { %3823 = vmatpush.msrb.mxu0 %v8026_v23  ;;  %3844 = vmatpush.msrb.mxu1 %v8029_v29 }
 0x909   :  { %3865 = vmatpush.msrb.mxu2 %v8032_v62  ;;  %3886 = vmatpush.msrb.mxu3 %v8035_v63 }
 0x90a   :  { %3824 = vmatpush.msrb.mxu0 %v8038_v25  ;;  %3845 = vmatpush.msrb.mxu1 %v8041_v0  ;;  %v8922_v25 = vld [vmem:[#allocation19_spill] sm:$0xff] }
 0x90b   :  { %3866 = vmatpush.msrb.mxu2 %v8044_v1  ;;  %3887 = vmatpush.msrb.mxu3 %v8047_v3  ;;  %v2595_v0 = vadd.f32 %v7876_v2, %v8922_v25 }
 0x90c   :  { %3825 = vmatpush.msrb.mxu0 %v8050_v48  ;;  %3846 = vmatpush.msrb.mxu1 %v8053_v13 }
 0x90d   :  { %3867 = vmatpush.msrb.mxu2 %v8056_v58  ;;  %3888 = vmatpush.msrb.mxu3 %v6659_v30 }
 0x981   :  { %v3527_v45 = vpop.f32.mrf.mxu0  ;;  %v3548_v46 = vpop.f32.mrf.mxu1 }
 0x982   :  { %v3530_v23 = vadd.f32 %v3527_v45, %v2535_v41  ;;  %v3551_v29 = vadd.f32 %v3548_v46, %v2555_v27  ;;  %v8924_v27 = vld [vmem:[#allocation22_spill] sm:$0xff]  ;;  %v8129_v46 = vld [vmem:[%s8881_s6 + $0x1] ss:$0 sm:$0xff] }
 0x984   :  { %v6112_v62 = vmul.f32 -1.442695, %v3530_v23  ;;  %v6113_v63 = vmul.f32 -1.442695, %v3551_v29  ;;  %v8925_v23 = vld [vmem:[#allocation20_spill] sm:$0xff] }
 0x985   :  { %v2635_v29 = vadd.f32 %v8129_v46, %v8925_v23 }
 0x986   :  { %6448 = vpow2.f32 %v6112_v62 }
 0x987   :  { %6450 = vpow2.f32 %v6113_v63 }
 0x988   :  { %v3590_v1 = vpop.f32.mrf.mxu3  ;;  %v3569_v28 = vpop.f32.mrf.mxu2 }
 0x989   :  { %v3593_v3 = vadd.f32 %v3590_v1, %v2595_v0  ;;  %v3572_v7 = vadd.f32 %v3569_v28, %v2575_v15 }
 0x98b   :  { %v6114_v48 = vmul.f32 -1.442695, %v3593_v3 }
 0x98c   :  { %v6449_v13 = vpop.eup %6448 }
 0x98d   :  { %v6451_v58 = vpop.eup %6450  ;;  %v3597_v33 = vadd.f32 1.0, %v6449_v13  ;;  %6452 = vpow2.f32 %v6114_v48  ;;  %v8136_v48 = vld [vmem:[%s8881_s6 + $0x3] ss:$0 sm:$0xff]  ;;  %v8926_v13 = vld [vmem:[#allocation23_spill] sm:$0xff] }
 0x98e   :  { %v3616_v9 = vadd.f32 1.0, %v6451_v58  ;;  %v2675_v58 = vadd.f32 %v8136_v48, %v8926_v13 }
 0x98f   :  { %6454 = vrcp.f32 %v3597_v33  ;;  %v3609_v8 = vand.u32 2147483648, %v3597_v33  ;;  %v3607_v32 = vand.u32 2147483647, %v3597_v33  ;;  %vm3603_vm0 = vweird.f32 %v3597_v33 }
 0x990   :  { %6456 = vrcp.f32 %v3616_v9  ;;  %v3628_v24 = vand.u32 2147483648, %v3616_v9  ;;  %v3626_v43 = vand.u32 2147483647, %v3616_v9  ;;  %vm3622_vm1 = vweird.f32 %v3616_v9 }
 0x991   :  { %v3610_v17 = vor.u32 1.1754944e-38, %v3609_v8  ;;  %vm3608_vm5 = vcmp.eq.f32.partialorder %v3607_v32, 8.507059e+37  ;;  %v8164_v8 = vld [vmem:[#allocation8 + $0x70] sm:$0xff]  ;;  %v8170_v32 = vld [vmem:[#allocation8 + $0x28] sm:$0xff] }
 0x992   :  { %v3629_v37 = vor.u32 1.1754944e-38, %v3628_v24  ;;  %vm3627_vm6 = vcmp.eq.f32.partialorder %v3626_v43, 8.507059e+37  ;;  %v8166_v24 = vld [vmem:[#allocation8 + $0x8] sm:$0xff] }
 0x993   :  { %v6453_v6 = vpop.eup %6452  ;;  %v8174_v43 = vld [vmem:[#allocation8 + $0x68] sm:$0xff] }
 0x994   :  { %v3636_v39 = vadd.f32 1.0, %v6453_v6 }
 0x995   :  { %v6455_v57 = vpop.eup %6454 }
 0x996   :  { %v6457_v2 = vpop.eup %6456  ;;  %v3599_v47 = vmul.f32 %v6455_v57, %v3597_v33  ;;  %6458 = vrcp.f32 %v3636_v39  ;;  %vm3604_vm13 = vweird.f32 %v6455_v57  ;;  %v3648_v5 = vand.u32 2147483648, %v3636_v39 }
 0x997   :  { %v3618_v16 = vmul.f32 %v6457_v2, %v3616_v9  ;;  %6460 = vtanh.f32 %v3572_v7  ;;  %vm3623_vm15 = vweird.f32 %v6457_v2  ;;  %vm3605_vm2 = vmor %vm3603_vm0, %vm3604_vm13  ;;  %vm3642_vm8 = vweird.f32 %v3636_v39  ;;  %v8147_v7 = vld [vmem:[#allocation8 + $0x38] sm:$0xff] }
 0x998   :  { %v3600_v53 = vsub.f32 1.0, %v3599_v47  ;;  %vm3624_vm3 = vmor %vm3622_vm1, %vm3623_vm15  ;;  %v3646_v34 = vand.u32 2147483647, %v3636_v39  ;;  %v3649_v10 = vor.u32 1.1754944e-38, %v3648_v5  ;;  %v8154_v47 = vld [vmem:[#allocation8 + $0x78] sm:$0xff] }
 0x999   :  { %v3619_v59 = vsub.f32 1.0, %v3618_v16  ;;  %v8156_v16 = vld [vmem:[#allocation8 + $0x10] sm:$0xff] }
 0x99a   :  { %v3601_v42 = vmul.f32 %v6455_v57, %v3600_v53  ;;  %vm3647_vm10 = vcmp.eq.f32.partialorder %v3646_v34, 8.507059e+37  ;;  %v8158_v53 = vld [vmem:[#allocation8 + $0x30] sm:$0xff] }
 0x99b   :  { %v3620_v11 = vmul.f32 %v6457_v2, %v3619_v59  ;;  %v8162_v59 = vld [vmem:[#allocation8 + $0x50] sm:$0xff] }
 0x99c   :  { %v6459_v51 = vpop.eup %6458  ;;  %v3602_v56 = vadd.f32 %v6455_v57, %v3601_v42 }
 0x99d   :  { %v3621_v18 = vadd.f32 %v6457_v2, %v3620_v11  ;;  %v3638_v19 = vmul.f32 %v6459_v51, %v3636_v39  ;;  %v6461_v44 = vpop.eup %6460  ;;  %vm3643_vm7 = vweird.f32 %v6459_v51  ;;  %v8172_v11 = vld [vmem:[#allocation8 + $0x48] sm:$0xff] }
 0x99e   :  { %v3606_v54 = vsel %vm3605_vm2, %v6455_v57, %v3602_v56  ;;  %vm3644_vm9 = vmor %vm3642_vm8, %vm3643_vm7  ;;  %v8145_v57 = vld [vmem:[#allocation8 + $0x18] sm:$0xff]  ;;  %v8179_v56 = vld [vmem:[%s8881_s6 + $0x2] ss:$0 sm:$0xff] }
 0x99f   :  { %v3611_v50 = vsel %vm3608_vm5, %v3610_v17, %v3606_v54  ;;  %v3625_v36 = vsel %vm3624_vm3, %v6457_v2, %v3621_v18  ;;  %v3639_v26 = vsub.f32 1.0, %v3638_v19  ;;  %v8149_v2 = vld [vmem:[#allocation8 + $0x58] sm:$0xff]  ;;  %v8185_v19 = vld [vmem:[#allocation8] sm:$0xff] }
 0x9a0   :  { %v3630_v55 = vsel %vm3627_vm6, %v3629_v37, %v3625_v36  ;;  %v3653_v22 = vmul.f32 %v6461_v44, %v3611_v50  ;;  %v8927_v17 = vld [vmem:[#allocation25_spill] sm:$0xff] }
 0x9a1   :  { %v3652_v20 = vmul.f32 %v3630_v55, %v8069_v12  ;;  %v3640_v35 = vmul.f32 %v6459_v51, %v3639_v26  ;;  %v8122_v12 = vld [vmem:[%s8881_s6] ss:$0 sm:$0xff]  ;;  %v2655_v18 = vadd.f32 %v8179_v56, %v8927_v17 }
 0x9a2   :  { %v2615_v45 = vadd.f32 %v8122_v12, %v8924_v27  ;;  %v8187_v37 = vld [vmem:[#allocation8 + $0x20] sm:$0xff] }
 0x9a3   :  { %v8106_v40 = vadd.f32 %v3653_v22, %v3652_v20  ;;  %v3641_v38 = vadd.f32 %v6459_v51, %v3640_v35  ;;  %v8191_v44 = vld [vmem:[#allocation8 + $0x40] sm:$0xff] }
 0x9a4   :  { %v8193_v50 = vld [vmem:[#allocation8 + $0x60] sm:$0xff] }
 0x9a5   :  { %6462 = vtanh.f32 %v8106_v40  ;;  %v3645_v31 = vsel %vm3644_vm9, %v6459_v51, %v3641_v38 }
 0x9a6   :  { %v3650_v30 = vsel %vm3647_vm10, %v3649_v10, %v3645_v31 }
 0x9ab   :  { %v6463_v14 = vpop.eup %6462 }
 0x9ac   :  { %v8109_v41 = vmul.f32 %v6463_v14, %v3650_v30 }
 0x9ae   :  { %6115 = vmatmul.msk.f32.vlgmr.msra.gmra.mxu0 %vm856_vm14, %v8109_v41  ;;  %6116 = vmatmul.msk.f32.vlgmr.msra.gmra.mxu1 %vm856_vm14, %v8109_v41 }
 0x9af   :  { %6117 = vmatmul.msk.f32.vlgmr.msra.gmra.mxu2 %vm856_vm14, %v8109_v41  ;;  %6118 = vmatmul.msk.f32.vlgmr.msra.gmra.mxu3 %vm856_vm14, %v8109_v41 }
 0x9b0   :  { %4021 = vmatpush.msra.mxu0 %v8145_v57  ;;  %4044 = vmatpush.msra.mxu1 %v8147_v7 }
 0x9b1   :  { %4067 = vmatpush.msra.mxu2 %v8149_v2  ;;  %4090 = vmatpush.msra.mxu3 %v8154_v47 }
 0x9b2   :  { %4022 = vmatpush.msra.mxu0 %v8156_v16  ;;  %4045 = vmatpush.msra.mxu1 %v8158_v53 }
 0x9b3   :  { %4068 = vmatpush.msra.mxu2 %v8162_v59  ;;  %4091 = vmatpush.msra.mxu3 %v8164_v8 }
 0x9b4   :  { %4023 = vmatpush.msra.mxu0 %v8166_v24  ;;  %4046 = vmatpush.msra.mxu1 %v8170_v32 }
 0x9b5   :  { %4069 = vmatpush.msra.mxu2 %v8172_v11  ;;  %4092 = vmatpush.msra.mxu3 %v8174_v43 }
 0x9b6   :  { %4024 = vmatpush.msra.mxu0 %v8185_v19  ;;  %4047 = vmatpush.msra.mxu1 %v8187_v37 }
 0x9b7   :  { %4070 = vmatpush.msra.mxu2 %v8191_v44  ;;  %4093 = vmatpush.msra.mxu3 %v8193_v50 }
 0xa2b   :  { %v3677_v62 = vpop.f32.mrf.mxu0  ;;  %v3698_v63 = vpop.f32.mrf.mxu1 }
 0xa2c   :  { %v3680_v25 = vadd.f32 %v3677_v62, %v2615_v45  ;;  %v3701_v0 = vadd.f32 %v3698_v63, %v2635_v29 }
 0xa2e   :  { %v6119_v1 = vmul.f32 -1.442695, %v3680_v25  ;;  %v6120_v3 = vmul.f32 -1.442695, %v3701_v0 }
 0xa30   :  { %6464 = vpow2.f32 %v6119_v1 }
 0xa31   :  { %6466 = vpow2.f32 %v6120_v3 }
 0xa32   :  { %v3740_v33 = vpop.f32.mrf.mxu3  ;;  %v3719_v42 = vpop.f32.mrf.mxu2 }
 0xa33   :  { %v3743_v9 = vadd.f32 %v3740_v33, %v2675_v58  ;;  %v3722_v26 = vadd.f32 %v3719_v42, %v2655_v18 }
 0xa35   :  { %v6121_v28 = vmul.f32 -1.442695, %v3743_v9 }
 0xa36   :  { %v6465_v6 = vpop.eup %6464 }
 0xa37   :  { %v6467_v61 = vpop.eup %6466  ;;  %v8140_v15 = vadd.f32 1.0, %v6465_v6  ;;  %6468 = vpow2.f32 %v6121_v28 }
 0xa38   :  { %v8142_v39 = vadd.f32 1.0, %v6467_v61 }
 0xa39   :  { %6470 = vrcp.f32 %v8140_v15  ;;  %v3759_v5 = vand.u32 2147483648, %v8140_v15  ;;  %v3757_v10 = vand.u32 2147483647, %v8140_v15  ;;  %vm3753_vm13 = vweird.f32 %v8140_v15 }
 0xa3a   :  { %6472 = vrcp.f32 %v8142_v39  ;;  %v3778_v34 = vand.u32 2147483648, %v8142_v39  ;;  %v3776_v30 = vand.u32 2147483647, %v8142_v39  ;;  %vm3772_vm15 = vweird.f32 %v8142_v39 }
 0xa3b   :  { %v3760_v23 = vor.u32 1.1754944e-38, %v3759_v5  ;;  %vm3758_vm2 = vcmp.eq.f32.partialorder %v3757_v10, 8.507059e+37  ;;  %v8435_v10 = vld [vmem:[#allocation10 + $0x28] sm:$0xff] }
 0xa3c   :  { %v3779_v63 = vor.u32 1.1754944e-38, %v3778_v34  ;;  %vm3777_vm3 = vcmp.eq.f32.partialorder %v3776_v30, 8.507059e+37 }
 0xa3d   :  { %v6469_v51 = vpop.eup %6468 }
 0xa3e   :  { %v3786_v54 = vadd.f32 1.0, %v6469_v51 }
 0xa3f   :  { %v6471_v36 = vpop.eup %6470 }
 0xa40   :  { %v6473_v55 = vpop.eup %6472  ;;  %v3749_v22 = vmul.f32 %v6471_v36, %v8140_v15  ;;  %6474 = vrcp.f32 %v3786_v54  ;;  %vm3754_vm11 = vweird.f32 %v6471_v36  ;;  %v3798_v15 = vand.u32 2147483648, %v3786_v54 }
 0xa41   :  { %v3768_v20 = vmul.f32 %v6473_v55, %v8142_v39  ;;  %6476 = vtanh.f32 %v3722_v26  ;;  %vm3773_vm12 = vweird.f32 %v6473_v55  ;;  %vm3755_vm0 = vmor %vm3753_vm13, %vm3754_vm11  ;;  %vm3792_vm6 = vweird.f32 %v3786_v54  ;;  %v8417_v26 = vld [vmem:[#allocation10 + $0x10] sm:$0xff] }
 0xa42   :  { %v3750_v35 = vsub.f32 1.0, %v3749_v22  ;;  %vm3774_vm1 = vmor %vm3772_vm15, %vm3773_vm12  ;;  %v3796_v39 = vand.u32 2147483647, %v3786_v54  ;;  %v3799_v51 = vor.u32 1.1754944e-38, %v3798_v15  ;;  %v8421_v22 = vld [vmem:[#allocation10 + $0x50] sm:$0xff] }
 0xa43   :  { %v3769_v38 = vsub.f32 1.0, %v3768_v20 }
 0xa44   :  { %v3751_v31 = vmul.f32 %v6471_v36, %v3750_v35  ;;  %vm3797_vm8 = vcmp.eq.f32.partialorder %v3796_v39, 8.507059e+37  ;;  %v8427_v35 = vld [vmem:[#allocation10 + $0x70] sm:$0xff] }
 0xa45   :  { %v3770_v14 = vmul.f32 %v6473_v55, %v3769_v38 }
 0xa46   :  { %v6475_v27 = vpop.eup %6474  ;;  %v3752_v45 = vadd.f32 %v6471_v36, %v3751_v31  ;;  %v8433_v31 = vld [vmem:[#allocation10 + $0x8] sm:$0xff] }
 0xa47   :  { %v3771_v29 = vadd.f32 %v6473_v55, %v3770_v14  ;;  %v3788_v62 = vmul.f32 %v6475_v27, %v3786_v54  ;;  %v6477_v0 = vpop.eup %6476  ;;  %vm3793_vm5 = vweird.f32 %v6475_v27  ;;  %v8437_v14 = vld [vmem:[#allocation10 + $0x48] sm:$0xff] }
 0xa48   :  { %v3756_v25 = vsel %vm3755_vm0, %v6471_v36, %v3752_v45  ;;  %vm3794_vm7 = vmor %vm3792_vm6, %vm3793_vm5  ;;  %v8444_v45 = vld [vmem:[#allocation10] sm:$0xff] }
 0xa49   :  { %v3761_v1 = vsel %vm3758_vm2, %v3760_v23, %v3756_v25  ;;  %v3775_v3 = vsel %vm3774_vm1, %v6473_v55, %v3771_v29  ;;  %v3789_v13 = vsub.f32 1.0, %v3788_v62  ;;  %v8419_v55 = vld [vmem:[#allocation10 + $0x30] sm:$0xff]  ;;  %v8448_v29 = vld [vmem:[#allocation10 + $0x20] sm:$0xff] }
 0xa4a   :  { %v3780_v58 = vsel %vm3777_vm3, %v3779_v63, %v3775_v3  ;;  %v3803_v33 = vmul.f32 %v6477_v0, %v3761_v1  ;;  %v8450_v62 = vld [vmem:[#allocation10 + $0x40] sm:$0xff] }
 0xa4b   :  { %v3802_v9 = vmul.f32 %v3780_v58, %v8106_v40  ;;  %v3790_v28 = vmul.f32 %v6475_v27, %v3789_v13  ;;  %v8455_v0 = vld [vmem:[#allocation10 + $0x60] sm:$0xff] }
 0xa4d   :  { %v8210_v6 = vadd.f32 %v3803_v33, %v3802_v9  ;;  %v3791_v61 = vadd.f32 %v6475_v27, %v3790_v28 }
 0xa4f   :  { %6478 = vtanh.f32 %v8210_v6  ;;  %v3795_v42 = vsel %vm3794_vm7, %v6475_v27, %v3791_v61  ;;  %v8442_v27 = vld [vmem:[#allocation10 + $0x68] sm:$0xff] }
 0xa50   :  { %v3800_v18 = vsel %vm3797_vm8, %v3799_v51, %v3795_v42 }
 0xa55   :  { %v6479_v17 = vpop.eup %6478 }
 0xa56   :  { %v8213_v36 = vmul.f32 %v6479_v17, %v3800_v18 }
 0xa58   :  { %6122 = vmatmul.msk.f32.vlgmr.msrb.gmra.mxu0 %vm856_vm14, %v8213_v36  ;;  %6123 = vmatmul.msk.f32.vlgmr.msrb.gmra.mxu1 %vm856_vm14, %v8213_v36 }
 0xa59   :  { %6124 = vmatmul.msk.f32.vlgmr.msrb.gmra.mxu2 %vm856_vm14, %v8213_v36  ;;  %6125 = vmatmul.msk.f32.vlgmr.msrb.gmra.mxu3 %vm856_vm14, %v8213_v36 }
 0xa5a   :  { %4110 = vmatpush.msrb.mxu0 %v8145_v57  ;;  %4130 = vmatpush.msrb.mxu1 %v8147_v7 }
 0xa5b   :  { %4150 = vmatpush.msrb.mxu2 %v8149_v2  ;;  %4170 = vmatpush.msrb.mxu3 %v8154_v47 }
 0xa5c   :  { %4111 = vmatpush.msrb.mxu0 %v8156_v16  ;;  %4131 = vmatpush.msrb.mxu1 %v8158_v53 }
 0xa5d   :  { %4151 = vmatpush.msrb.mxu2 %v8162_v59  ;;  %4171 = vmatpush.msrb.mxu3 %v8164_v8 }
 0xa5e   :  { %4112 = vmatpush.msrb.mxu0 %v8166_v24  ;;  %4132 = vmatpush.msrb.mxu1 %v8170_v32 }
 0xa5f   :  { %4152 = vmatpush.msrb.mxu2 %v8172_v11  ;;  %4172 = vmatpush.msrb.mxu3 %v8174_v43 }
 0xa60   :  { %6132 = vmatmul.msk.f32.vlgmr.msra.gmra.mxu0 %vm856_vm14, %v7890_v4  ;;  %6133 = vmatmul.msk.f32.vlgmr.msra.gmra.mxu1 %vm856_vm14, %v7890_v4 }
 0xa61   :  { %6134 = vmatmul.msk.f32.vlgmr.msra.gmra.mxu2 %vm856_vm14, %v7890_v4  ;;  %6135 = vmatmul.msk.f32.vlgmr.msra.gmra.mxu3 %vm856_vm14, %v7890_v4  ;;  %v8928_v4 = vld [vmem:[#allocation26_spill] sm:$0xff] }
 0xa62   :  { %4113 = vmatpush.msrb.mxu0 %v8185_v19  ;;  %4133 = vmatpush.msrb.mxu1 %v8187_v37 }
 0xa63   :  { %4153 = vmatpush.msrb.mxu2 %v8191_v44  ;;  %4173 = vmatpush.msrb.mxu3 %v8193_v50 }
 0xa64   :  { %4190 = vmatpush.msra.mxu0 %v8145_v57  ;;  %4210 = vmatpush.msra.mxu1 %v8147_v7 }
 0xa65   :  { %4230 = vmatpush.msra.mxu2 %v8149_v2  ;;  %4250 = vmatpush.msra.mxu3 %v8154_v47 }
 0xa66   :  { %4191 = vmatpush.msra.mxu0 %v8156_v16  ;;  %4211 = vmatpush.msra.mxu1 %v8158_v53 }
 0xa67   :  { %4231 = vmatpush.msra.mxu2 %v8162_v59  ;;  %4251 = vmatpush.msra.mxu3 %v8164_v8 }
 0xa68   :  { %6136 = vmatmul.msk.f32.vlgmr.msrb.gmra.mxu0 %vm856_vm14, %v7928_v49  ;;  %6137 = vmatmul.msk.f32.vlgmr.msrb.gmra.mxu1 %vm856_vm14, %v7928_v49 }
 0xa69   :  { %6138 = vmatmul.msk.f32.vlgmr.msrb.gmra.mxu2 %vm856_vm14, %v7928_v49  ;;  %6139 = vmatmul.msk.f32.vlgmr.msrb.gmra.mxu3 %vm856_vm14, %v7928_v49  ;;  %v2698_v49 = vadd.f32 %v8122_v12, %v8928_v4 }
 0xa6a   :  { %4192 = vmatpush.msra.mxu0 %v8166_v24  ;;  %4212 = vmatpush.msra.mxu1 %v8170_v32 }
 0xa6b   :  { %4232 = vmatpush.msra.mxu2 %v8172_v11  ;;  %4252 = vmatpush.msra.mxu3 %v8174_v43 }
 0xa6c   :  { %4193 = vmatpush.msra.mxu0 %v8185_v19  ;;  %4213 = vmatpush.msra.mxu1 %v8187_v37 }
 0xa6d   :  { %4233 = vmatpush.msra.mxu2 %v8191_v44  ;;  %4253 = vmatpush.msra.mxu3 %v8193_v50 }
 0xa6e   :  { %4270 = vmatpush.msrb.mxu0 %v8145_v57  ;;  %4290 = vmatpush.msrb.mxu1 %v8147_v7 }
 0xa6f   :  { %4310 = vmatpush.msrb.mxu2 %v8149_v2  ;;  %4330 = vmatpush.msrb.mxu3 %v8154_v47 }
 0xa70   :  { %6140 = vmatmul.msk.f32.vlgmr.msra.gmra.mxu0 %vm856_vm14, %v7966_v52  ;;  %6141 = vmatmul.msk.f32.vlgmr.msra.gmra.mxu1 %vm856_vm14, %v7966_v52 }
 0xa71   :  { %6142 = vmatmul.msk.f32.vlgmr.msra.gmra.mxu2 %vm856_vm14, %v7966_v52  ;;  %6143 = vmatmul.msk.f32.vlgmr.msra.gmra.mxu3 %vm856_vm14, %v7966_v52  ;;  %v8929_v52 = vld [vmem:[#allocation24_spill] sm:$0xff] }
 0xa72   :  { %4271 = vmatpush.msrb.mxu0 %v8156_v16  ;;  %4291 = vmatpush.msrb.mxu1 %v8158_v53 }
 0xa73   :  { %4311 = vmatpush.msrb.mxu2 %v8162_v59  ;;  %4331 = vmatpush.msrb.mxu3 %v8164_v8 }
 0xa74   :  { %4272 = vmatpush.msrb.mxu0 %v8166_v24  ;;  %4292 = vmatpush.msrb.mxu1 %v8170_v32 }
 0xa75   :  { %4312 = vmatpush.msrb.mxu2 %v8172_v11  ;;  %4332 = vmatpush.msrb.mxu3 %v8174_v43 }
 0xa76   :  { %4273 = vmatpush.msrb.mxu0 %v8185_v19  ;;  %4293 = vmatpush.msrb.mxu1 %v8187_v37 }
 0xa77   :  { %4313 = vmatpush.msrb.mxu2 %v8191_v44  ;;  %4333 = vmatpush.msrb.mxu3 %v8193_v50 }
 0xa78   :  { %6144 = vmatmul.msk.f32.vlgmr.msrb.gmra.mxu0 %vm856_vm14, %v8004_v21  ;;  %6145 = vmatmul.msk.f32.vlgmr.msrb.gmra.mxu1 %vm856_vm14, %v8004_v21 }
 0xa79   :  { %6146 = vmatmul.msk.f32.vlgmr.msrb.gmra.mxu2 %vm856_vm14, %v8004_v21  ;;  %6147 = vmatmul.msk.f32.vlgmr.msrb.gmra.mxu3 %vm856_vm14, %v8004_v21  ;;  %v2718_v21 = vadd.f32 %v8129_v46, %v8929_v52 }
 0xa7a   :  { %4350 = vmatpush.msra.mxu0 %v8145_v57  ;;  %4370 = vmatpush.msra.mxu1 %v8147_v7 }
 0xa7b   :  { %4390 = vmatpush.msra.mxu2 %v8149_v2  ;;  %4410 = vmatpush.msra.mxu3 %v8154_v47 }
 0xa7c   :  { %4351 = vmatpush.msra.mxu0 %v8156_v16  ;;  %4371 = vmatpush.msra.mxu1 %v8158_v53 }
 0xa7d   :  { %4391 = vmatpush.msra.mxu2 %v8162_v59  ;;  %4411 = vmatpush.msra.mxu3 %v8164_v8 }
 0xa7e   :  { %4352 = vmatpush.msra.mxu0 %v8166_v24  ;;  %4372 = vmatpush.msra.mxu1 %v8170_v32 }
 0xa7f   :  { %4392 = vmatpush.msra.mxu2 %v8172_v11  ;;  %4412 = vmatpush.msra.mxu3 %v8174_v43 }
 0xa80   :  { %4353 = vmatpush.msra.mxu0 %v8185_v19  ;;  %4373 = vmatpush.msra.mxu1 %v8187_v37 }
 0xa81   :  { %4393 = vmatpush.msra.mxu2 %v8191_v44  ;;  %4413 = vmatpush.msra.mxu3 %v8193_v50 }
 0xa82   :  { %6148 = vmatmul.msk.f32.vlgmr.msra.gmra.mxu0 %vm856_vm14, %v8072_v60  ;;  %6149 = vmatmul.msk.f32.vlgmr.msra.gmra.mxu1 %vm856_vm14, %v8072_v60 }
 0xa83   :  { %6150 = vmatmul.msk.f32.vlgmr.msra.gmra.mxu2 %vm856_vm14, %v8072_v60  ;;  %6151 = vmatmul.msk.f32.vlgmr.msra.gmra.mxu3 %vm856_vm14, %v8072_v60 }
 0xa84   :  { %4430 = vmatpush.msrb.mxu0 %v8145_v57  ;;  %4450 = vmatpush.msrb.mxu1 %v8147_v7 }
 0xa85   :  { %4470 = vmatpush.msrb.mxu2 %v8149_v2  ;;  %4490 = vmatpush.msrb.mxu3 %v8154_v47 }
 0xa86   :  { %4431 = vmatpush.msrb.mxu0 %v8156_v16  ;;  %4451 = vmatpush.msrb.mxu1 %v8158_v53 }
 0xa87   :  { %4471 = vmatpush.msrb.mxu2 %v8162_v59  ;;  %4491 = vmatpush.msrb.mxu3 %v8164_v8 }
 0xa88   :  { %4432 = vmatpush.msrb.mxu0 %v8166_v24  ;;  %4452 = vmatpush.msrb.mxu1 %v8170_v32 }
 0xa89   :  { %4472 = vmatpush.msrb.mxu2 %v8172_v11  ;;  %4492 = vmatpush.msrb.mxu3 %v8174_v43 }
 0xa8a   :  { %4433 = vmatpush.msrb.mxu0 %v8185_v19  ;;  %4453 = vmatpush.msrb.mxu1 %v8187_v37 }
 0xa8b   :  { %4473 = vmatpush.msrb.mxu2 %v8191_v44  ;;  %4493 = vmatpush.msrb.mxu3 %v8193_v50 }
 0xa8c   :  { %6152 = vmatmul.msk.f32.vlgmr.msrb.gmra.mxu0 %vm856_vm14, %v8109_v41  ;;  %6153 = vmatmul.msk.f32.vlgmr.msrb.gmra.mxu1 %vm856_vm14, %v8109_v41 }
 0xa8d   :  { %6154 = vmatmul.msk.f32.vlgmr.msrb.gmra.mxu2 %vm856_vm14, %v8109_v41  ;;  %6155 = vmatmul.msk.f32.vlgmr.msrb.gmra.mxu3 %vm856_vm14, %v8109_v41 }
 0xa8e   :  { %4510 = vmatpush.msra.mxu0 %v8145_v57  ;;  %4530 = vmatpush.msra.mxu1 %v8147_v7 }
 0xa8f   :  { %4550 = vmatpush.msra.mxu2 %v8149_v2  ;;  %4570 = vmatpush.msra.mxu3 %v8154_v47 }
 0xa90   :  { %4511 = vmatpush.msra.mxu0 %v8156_v16  ;;  %4531 = vmatpush.msra.mxu1 %v8158_v53 }
 0xa91   :  { %4551 = vmatpush.msra.mxu2 %v8162_v59  ;;  %4571 = vmatpush.msra.mxu3 %v8164_v8 }
 0xa92   :  { %4512 = vmatpush.msra.mxu0 %v8166_v24  ;;  %4532 = vmatpush.msra.mxu1 %v8170_v32 }
 0xa93   :  { %4552 = vmatpush.msra.mxu2 %v8172_v11  ;;  %4572 = vmatpush.msra.mxu3 %v8174_v43 }
 0xa94   :  { %4513 = vmatpush.msra.mxu0 %v8185_v19  ;;  %4533 = vmatpush.msra.mxu1 %v8187_v37 }
 0xa95   :  { %4553 = vmatpush.msra.mxu2 %v8191_v44  ;;  %4573 = vmatpush.msra.mxu3 %v8193_v50 }
 0xa96   :  { %6156 = vmatmul.msk.f32.vlgmr.msra.gmra.mxu0 %vm856_vm14, %v8213_v36  ;;  %6157 = vmatmul.msk.f32.vlgmr.msra.gmra.mxu1 %vm856_vm14, %v8213_v36 }
 0xa97   :  { %6158 = vmatmul.msk.f32.vlgmr.msra.gmra.mxu2 %vm856_vm14, %v8213_v36  ;;  %6159 = vmatmul.msk.f32.vlgmr.msra.gmra.mxu3 %vm856_vm14, %v8213_v36 }
 0xa98   :  { %4593 = vmatpush.msrb.mxu0 %v8145_v57  ;;  %4613 = vmatpush.msrb.mxu1 %v8147_v7 }
 0xa99   :  { %4633 = vmatpush.msrb.mxu2 %v8149_v2  ;;  %4653 = vmatpush.msrb.mxu3 %v8154_v47  ;;  %v8930_v47 = vld [vmem:[#allocation27_spill] sm:$0xff] }
 0xa9a   :  { %4594 = vmatpush.msrb.mxu0 %v8156_v16  ;;  %4614 = vmatpush.msrb.mxu1 %v8158_v53  ;;  %v2758_v16 = vadd.f32 %v8136_v48, %v8930_v47  ;;  %v8411_v48 = vld [vmem:[#allocation10 + $0x78] sm:$0xff] }
 0xa9b   :  { %4634 = vmatpush.msrb.mxu2 %v8162_v59  ;;  %4654 = vmatpush.msrb.mxu3 %v8164_v8 }
 0xa9c   :  { %4595 = vmatpush.msrb.mxu0 %v8166_v24  ;;  %4615 = vmatpush.msrb.mxu1 %v8170_v32 }
 0xa9d   :  { %4635 = vmatpush.msrb.mxu2 %v8172_v11  ;;  %4655 = vmatpush.msrb.mxu3 %v8174_v43  ;;  %v8402_v11 = vld [vmem:[#allocation10 + $0x18] sm:$0xff] }
 0xa9e   :  { %4596 = vmatpush.msrb.mxu0 %v8185_v19  ;;  %4616 = vmatpush.msrb.mxu1 %v8187_v37  ;;  %v8404_v43 = vld [vmem:[#allocation10 + $0x38] sm:$0xff] }
 0xa9f   :  { %4636 = vmatpush.msrb.mxu2 %v8191_v44  ;;  %4656 = vmatpush.msrb.mxu3 %v8193_v50  ;;  %v8406_v19 = vld [vmem:[#allocation10 + $0x58] sm:$0xff] }
 0xaa0   :  { %4673 = vmatpush.msra.mxu0 %v8402_v11  ;;  %4694 = vmatpush.msra.mxu1 %v8404_v43  ;;  %v8931_v44 = vld [vmem:[#allocation28_spill] sm:$0xff] }
 0xaa1   :  { %4715 = vmatpush.msra.mxu2 %v8406_v19  ;;  %4736 = vmatpush.msra.mxu3 %v8411_v48  ;;  %v2738_v50 = vadd.f32 %v8179_v56, %v8931_v44 }
 0xaa2   :  { %4674 = vmatpush.msra.mxu0 %v8417_v26  ;;  %4695 = vmatpush.msra.mxu1 %v8419_v55 }
 0xaa3   :  { %4716 = vmatpush.msra.mxu2 %v8421_v22  ;;  %4737 = vmatpush.msra.mxu3 %v8427_v35 }
 0xaa4   :  { %4675 = vmatpush.msra.mxu0 %v8433_v31  ;;  %4696 = vmatpush.msra.mxu1 %v8435_v10 }
 0xaa5   :  { %4717 = vmatpush.msra.mxu2 %v8437_v14  ;;  %4738 = vmatpush.msra.mxu3 %v8442_v27 }
 0xaa6   :  { %4676 = vmatpush.msra.mxu0 %v8444_v45  ;;  %4697 = vmatpush.msra.mxu1 %v8448_v29 }
 0xaa7   :  { %4718 = vmatpush.msra.mxu2 %v8450_v62  ;;  %4739 = vmatpush.msra.mxu3 %v8455_v0 }
 0xad5   :  { %v3827_v60 = vpop.f32.mrf.mxu0  ;;  %v3848_v40 = vpop.f32.mrf.mxu1 }
 0xad6   :  { %v3830_v41 = vadd.f32 %v3827_v60, %v2698_v49  ;;  %v3851_v57 = vadd.f32 %v3848_v40, %v2718_v21 }
 0xad8   :  { %v6126_v7 = vmul.f32 -1.442695, %v3830_v41  ;;  %v6127_v2 = vmul.f32 -1.442695, %v3851_v57 }
 0xada   :  { %6480 = vpow2.f32 %v6126_v7 }
 0xadb   :  { %6482 = vpow2.f32 %v6127_v2 }
 0xadc   :  { %v3890_v53 = vpop.f32.mrf.mxu3  ;;  %v3869_v37 = vpop.f32.mrf.mxu2 }
 0xadd   :  { %v3893_v59 = vadd.f32 %v3890_v53, %v2758_v16  ;;  %v3872_v5 = vadd.f32 %v3869_v37, %v2738_v50 }
 0xadf   :  { %v6128_v8 = vmul.f32 -1.442695, %v3893_v59  ;;  %v8932_v59 = vmov 0.0  }
 0xae0   :  { %v6481_v24 = vpop.eup %6480 }
 0xae1   :  { %v6483_v32 = vpop.eup %6482  ;;  %v8397_v12 = vadd.f32 1.0, %v6481_v24  ;;  %6484 = vpow2.f32 %v6128_v8  ;;  %v4026_v8 = vpop.f32.mrf.mxu0 }
 0xae2   :  { %v8399_v46 = vadd.f32 1.0, %v6483_v32  ;;  %v4049_v24 = vpop.f32.mrf.mxu1 }
 0xae3   :  { %6486 = vrcp.f32 %v8397_v12  ;;  %v3909_v25 = vand.u32 2147483648, %v8397_v12  ;;  %v3907_v13 = vand.u32 2147483647, %v8397_v12  ;;  %vm3903_vm11 = vweird.f32 %v8397_v12 }
 0xae4   :  { %6488 = vrcp.f32 %v8399_v46  ;;  %v3928_v1 = vand.u32 2147483648, %v8399_v46  ;;  %v3926_v33 = vand.u32 2147483647, %v8399_v46  ;;  %vm3922_vm12 = vweird.f32 %v8399_v46  ;;  %v4095_v32 = vpop.f32.mrf.mxu3  ;;  %v4072_v37 = vpop.f32.mrf.mxu2 }
 0xae5   :  { %v3910_v61 = vor.u32 1.1754944e-38, %v3909_v25  ;;  %vm3908_vm0 = vcmp.eq.f32.partialorder %v3907_v13, 8.507059e+37 }
 0xae6   :  { %v3929_v42 = vor.u32 1.1754944e-38, %v3928_v1  ;;  %vm3927_vm1 = vcmp.eq.f32.partialorder %v3926_v33, 8.507059e+37 }
 0xae7   :  { %v6485_v54 = vpop.eup %6484 }
 0xae8   :  { %v8423_v20 = vadd.f32 1.0, %v6485_v54 }
 0xae9   :  { %v6487_v38 = vpop.eup %6486 }
 0xaea   :  { %v6489_v56 = vpop.eup %6488  ;;  %v3899_v34 = vmul.f32 %v6487_v38, %v8397_v12  ;;  %6490 = vrcp.f32 %v8423_v20  ;;  %vm3904_vm9 = vweird.f32 %v6487_v38  ;;  %v3948_v57 = vand.u32 2147483648, %v8423_v20  ;;  %v8511_v12 = vpop.f32.mrf.mxu0 }
 0xaeb   :  { %v3918_v30 = vmul.f32 %v6489_v56, %v8399_v46  ;;  %6492 = vtanh.f32 %v3872_v5  ;;  %vm3923_vm10 = vweird.f32 %v6489_v56  ;;  %vm3905_vm13 = vmor %vm3903_vm11, %vm3904_vm9  ;;  %vm3942_vm3 = vweird.f32 %v8423_v20  ;;  %v8513_v46 = vpop.f32.mrf.mxu1 }
 0xaec   :  { %v3900_v23 = vsub.f32 1.0, %v3899_v34  ;;  %vm3924_vm15 = vmor %vm3922_vm12, %vm3923_vm10  ;;  %v3946_v7 = vand.u32 2147483647, %v8423_v20  ;;  %v3949_v47 = vor.u32 1.1754944e-38, %v3948_v57  ;;  %v8515_v54 = vpop.f32.mrf.mxu3 }
 0xaed   :  { %v3919_v63 = vsub.f32 1.0, %v3918_v30 }
 0xaee   :  { %v3901_v3 = vmul.f32 %v6487_v38, %v3900_v23  ;;  %vm3947_vm6 = vcmp.eq.f32.partialorder %v3946_v7, 8.507059e+37 }
 0xaef   :  { %v3920_v58 = vmul.f32 %v6489_v56, %v3919_v63 }
 0xaf0   :  { %v6491_v9 = vpop.eup %6490  ;;  %v3902_v28 = vadd.f32 %v6487_v38, %v3901_v3 }
 0xaf1   :  { %v3921_v15 = vadd.f32 %v6489_v56, %v3920_v58  ;;  %v3938_v39 = vmul.f32 %v6491_v9, %v8423_v20  ;;  %v6493_v17 = vpop.eup %6492  ;;  %vm3943_vm2 = vweird.f32 %v6491_v9  ;;  %v8521_v20 = vpop.f32.mrf.mxu2 }
 0xaf2   :  { %v3906_v51 = vsel %vm3905_vm13, %v6487_v38, %v3902_v28  ;;  %vm3944_vm5 = vmor %vm3942_vm3, %vm3943_vm2  ;;  %v8517_v44 = vpop.f32.mrf.mxu0 }
 0xaf3   :  { %v3911_v18 = vsel %vm3908_vm0, %v3910_v61, %v3906_v51  ;;  %v3925_v36 = vsel %vm3924_vm15, %v6489_v56, %v3921_v15  ;;  %v3939_v4 = vsub.f32 1.0, %v3938_v39  ;;  %v8519_v50 = vpop.f32.mrf.mxu1  ;;  %v8564_v51 = vld [vmem:[%s8884_s9] ss:$0 sm:$0xff] }
 0xaf4   :  { %v3930_v49 = vsel %vm3927_vm1, %v3929_v42, %v3925_v36  ;;  %v3953_v52 = vmul.f32 %v6493_v17, %v3911_v18  ;;  %v8523_v38 = vpop.f32.mrf.mxu3  ;;  %v8569_v17 = vld [vmem:[%s8884_s9 + $0x1] ss:$0 sm:$0xff]  ;;  %v4027_v18 = vadd.f32 %v8564_v51, %v4026_v8 }
 0xaf5   :  { %v3952_v21 = vmul.f32 %v3930_v49, %v8210_v6  ;;  %v3940_v60 = vmul.f32 %v6491_v9, %v3939_v4  ;;  %v4050_v36 = vadd.f32 %v8569_v17, %v4049_v24 }
 0xaf7   :  { %v3954_v40 = vadd.f32 %v3953_v52, %v3952_v21  ;;  %v3941_v41 = vadd.f32 %v6491_v9, %v3940_v60 }
 0xaf9   :  { %6494 = vtanh.f32 %v3954_v40  ;;  %3960 = vst.msk [vmem:[#allocation12 + $0x2] sm:$0x3] %vm2057_vm4, %v3954_v40  ;;  %v3945_v2 = vsel %vm3944_vm5, %v6491_v9, %v3941_v41  ;;  %v8529_v34 = vpop.f32.mrf.mxu2  ;;  %v8580_v41 = vld [vmem:[%s8884_s9 + $0x3] ss:$0 sm:$0xff] }
 0xafa   :  { %v3950_v53 = vsel %vm3947_vm6, %v3949_v47, %v3945_v2  ;;  %v8525_v5 = vpop.f32.mrf.mxu0  ;;  %v4096_v2 = vadd.f32 %v8580_v41, %v4095_v32 }
 0xafb   :  { %v8527_v56 = vpop.f32.mrf.mxu1 }
 0xafc   :  { %v8531_v30 = vpop.f32.mrf.mxu3 }
 0xaff   :  { %v6495_v16 = vpop.eup %6494 }
 0xb00   :  { %v3956_v6 = vmul.f32 %v6495_v16, %v3950_v53 }
 0xb01   :  { %v8537_v25 = vpop.f32.mrf.mxu2 }
 0xb02   :  { %6160 = vmatmul.msk.f32.vlgmr.msrb.gmra.mxu0 %vm856_vm14, %v3956_v6  ;;  %3958 = vst.msk [vmem:[#allocation11 + $0x2] sm:$0x3] %vm2057_vm4, %v3956_v6  ;;  %6161 = vmatmul.msk.f32.vlgmr.msrb.gmra.mxu1 %vm856_vm14, %v3956_v6  ;;  %v8533_v23 = vpop.f32.mrf.mxu0 }
 0xb03   :  { %6162 = vmatmul.msk.f32.vlgmr.msrb.gmra.mxu2 %vm856_vm14, %v3956_v6  ;;  %6163 = vmatmul.msk.f32.vlgmr.msrb.gmra.mxu3 %vm856_vm14, %v3956_v6  ;;  %v8535_v63 = vpop.f32.mrf.mxu1 }
 0xb04   :  { %4823 = vmatpush.msrb.mxu0 %v8402_v11  ;;  %4844 = vmatpush.msrb.mxu1 %v8404_v43 }
 0xb05   :  { %4865 = vmatpush.msrb.mxu2 %v8406_v19  ;;  %4886 = vmatpush.msrb.mxu3 %v8411_v48 }
 0xb06   :  { %4824 = vmatpush.msrb.mxu0 %v8417_v26  ;;  %4845 = vmatpush.msrb.mxu1 %v8419_v55  ;;  %v8539_v1 = vpop.f32.mrf.mxu3 }
 0xb07   :  { %4866 = vmatpush.msrb.mxu2 %v8421_v22  ;;  %4887 = vmatpush.msrb.mxu3 %v8427_v35 }
 0xb08   :  { %4825 = vmatpush.msrb.mxu0 %v8433_v31  ;;  %4846 = vmatpush.msrb.mxu1 %v8435_v10 }
 0xb09   :  { %4867 = vmatpush.msrb.mxu2 %v8437_v14  ;;  %4888 = vmatpush.msrb.mxu3 %v8442_v27  ;;  %v8545_v58 = vpop.f32.mrf.mxu2 }
 0xb0a   :  { %4677 = vmatmul.f32.vlgmr.msra.gmra.mxu0 %v8932_v59  ;;  %4698 = vmatmul.f32.vlgmr.msra.gmra.mxu1 %v8932_v59  ;;  %v8541_v3 = vpop.f32.mrf.mxu0 }
 0xb0b   :  { %4719 = vmatmul.f32.vlgmr.msra.gmra.mxu2 %v8932_v59  ;;  %4740 = vmatmul.f32.vlgmr.msra.gmra.mxu3 %v8932_v59  ;;  %v8543_v13 = vpop.f32.mrf.mxu1 }
 0xb0c   :  { %4826 = vmatpush.msrb.mxu0 %v8444_v45  ;;  %4847 = vmatpush.msrb.mxu1 %v8448_v29 }
 0xb0d   :  { %4868 = vmatpush.msrb.mxu2 %v8450_v62  ;;  %4889 = vmatpush.msrb.mxu3 %v8455_v0 }
 0xb0e   :  { %4973 = vmatpush.msra.mxu0 %v8402_v11  ;;  %4994 = vmatpush.msra.mxu1 %v8404_v43 }
 0xb0f   :  { %5015 = vmatpush.msra.mxu2 %v8406_v19  ;;  %5036 = vmatpush.msra.mxu3 %v8411_v48 }
 0xb10   :  { %4974 = vmatpush.msra.mxu0 %v8417_v26  ;;  %4995 = vmatpush.msra.mxu1 %v8419_v55  ;;  %v8547_v33 = vpop.f32.mrf.mxu3 }
 0xb11   :  { %5016 = vmatpush.msra.mxu2 %v8421_v22  ;;  %5037 = vmatpush.msra.mxu3 %v8427_v35  ;;  %8933 = vst [vmem:[#allocation19_spill] sm:$0xff] %v8547_v33  ;;  %v8553_v61 = vpop.f32.mrf.mxu2 }
 0xb12   :  { %4975 = vmatpush.msra.mxu0 %v8433_v31  ;;  %4996 = vmatpush.msra.mxu1 %v8435_v10  ;;  %8936 = vst [vmem:[#allocation20_spill] sm:$0xff] %v8553_v61 }
 0xb13   :  { %5017 = vmatpush.msra.mxu2 %v8437_v14  ;;  %5038 = vmatpush.msra.mxu3 %v8442_v27  ;;  %v8549_v9 = vpop.f32.mrf.mxu0  ;;  %v8551_v28 = vpop.f32.mrf.mxu1 }
 0xb14   :  { %4976 = vmatpush.msra.mxu0 %v8444_v45  ;;  %4997 = vmatpush.msra.mxu1 %v8448_v29  ;;  %8934 = vst [vmem:[#allocation21_spill] sm:$0xff] %v8549_v9 }
 0xb15   :  { %5018 = vmatpush.msra.mxu2 %v8450_v62  ;;  %5039 = vmatpush.msra.mxu3 %v8455_v0  ;;  %8935 = vst [vmem:[#allocation22_spill] sm:$0xff] %v8551_v28 }
 0xb1a   :  { %v8555_v15 = vpop.f32.mrf.mxu3  ;;  %v8573_v4 = vpop.f32.mrf.mxu2 }
 0xb1b   :  { %8937 = vst [vmem:[#allocation23_spill] sm:$0xff] %v8555_v15 }
 0xb1c   :  { %8940 = vst [vmem:[#allocation24_spill] sm:$0xff] %v8573_v4 }
 0xb7f   :  { %v8557_v39 = vpop.f32.mrf.mxu0  ;;  %v8559_v42 = vpop.f32.mrf.mxu1 }
 0xb80   :  { %8938 = vst [vmem:[#allocation25_spill] sm:$0xff] %v8557_v39 }
 0xb81   :  { %8939 = vst [vmem:[#allocation26_spill] sm:$0xff] %v8559_v42 }
 0xb86   :  { %v8575_v49 = vpop.f32.mrf.mxu3  ;;  %v8583_v47 = vpop.f32.mrf.mxu2 }
 0xb87   :  { %8941 = vst [vmem:[#allocation27_spill] sm:$0xff] %v8575_v49  ;;  %v4678_v52 = vpop.f32.mrf.mxu0  ;;  %v4699_v21 = vpop.f32.mrf.mxu1 }
 0xb88   :  { %v4681_v60 = vadd.f32 %v4678_v52, %v4027_v18  ;;  %v4702_v40 = vadd.f32 %v4699_v21, %v4050_v36  ;;  %8942 = vst [vmem:[#allocation28_spill] sm:$0xff] %v8583_v47  ;;  %v8588_v36 = vld [vmem:[%s8884_s9 + $0x2] ss:$0 sm:$0xff] }
 0xb89   :  { %v4073_v21 = vadd.f32 %v8588_v36, %v4072_v37 }
 0xb8a   :  { %v6164_v57 = vmul.f32 -1.442695, %v4681_v60  ;;  %v6165_v7 = vmul.f32 -1.442695, %v4702_v40 }
 0xb8c   :  { %6496 = vpow2.f32 %v6164_v57 }
 0xb8d   :  { %6498 = vpow2.f32 %v6165_v7 }
 0xb8e   :  { %v4741_v16 = vpop.f32.mrf.mxu3  ;;  %v4720_v52 = vpop.f32.mrf.mxu2 }
 0xb8f   :  { %v4744_v53 = vadd.f32 %v4741_v16, %v4096_v2  ;;  %v4723_v57 = vadd.f32 %v4720_v52, %v4073_v21 }
 0xb91   :  { %v6166_v6 = vmul.f32 -1.442695, %v4744_v53 }
 0xb92   :  { %v6497_v59 = vpop.eup %6496 }
 0xb93   :  { %v6499_v8 = vpop.eup %6498  ;;  %v4748_v24 = vadd.f32 1.0, %v6497_v59  ;;  %6500 = vpow2.f32 %v6166_v6 }
 0xb94   :  { %v4767_v18 = vadd.f32 1.0, %v6499_v8 }
 0xb95   :  { %6502 = vrcp.f32 %v4748_v24  ;;  %v4760_v59 = vand.u32 2147483648, %v4748_v24  ;;  %v4758_v49 = vand.u32 2147483647, %v4748_v24  ;;  %vm4754_vm9 = vweird.f32 %v4748_v24 }
 0xb96   :  { %6504 = vrcp.f32 %v4767_v18  ;;  %v4779_v8 = vand.u32 2147483648, %v4767_v18  ;;  %v4777_v39 = vand.u32 2147483647, %v4767_v18  ;;  %vm4773_vm10 = vweird.f32 %v4767_v18 }
 0xb97   :  { %v4761_v52 = vor.u32 1.1754944e-38, %v4760_v59  ;;  %vm4759_vm12 = vcmp.eq.f32.partialorder %v4758_v49, 8.507059e+37 }
 0xb98   :  { %v4780_v15 = vor.u32 1.1754944e-38, %v4779_v8  ;;  %vm4778_vm15 = vcmp.eq.f32.partialorder %v4777_v39, 8.507059e+37 }
 0xb99   :  { %v6501_v32 = vpop.eup %6500 }
 0xb9a   :  { %v4787_v60 = vadd.f32 1.0, %v6501_v32 }
 0xb9b   :  { %v6503_v40 = vpop.eup %6502 }
 0xb9c   :  { %v6505_v7 = vpop.eup %6504  ;;  %v4750_v2 = vmul.f32 %v6503_v40, %v4748_v24  ;;  %6506 = vrcp.f32 %v4787_v60  ;;  %vm4755_vm7 = vweird.f32 %v6503_v40  ;;  %vm4793_vm1 = vweird.f32 %v4787_v60 }
 0xb9d   :  { %v4769_v16 = vmul.f32 %v6505_v7, %v4767_v18  ;;  %6508 = vtanh.f32 %v4723_v57  ;;  %vm4774_vm8 = vweird.f32 %v6505_v7  ;;  %vm4756_vm11 = vmor %vm4754_vm9, %vm4755_vm7  ;;  %v4797_v18 = vand.u32 2147483647, %v4787_v60 }
 0xb9e   :  { %v4751_v53 = vsub.f32 1.0, %v4750_v2  ;;  %vm4775_vm13 = vmor %vm4773_vm10, %vm4774_vm8 }
 0xb9f   :  { %v4770_v6 = vsub.f32 1.0, %v4769_v16  ;;  %vm4798_vm3 = vcmp.eq.f32.partialorder %v4797_v18, 8.507059e+37 }
 0xba0   :  { %v4752_v47 = vmul.f32 %v6503_v40, %v4751_v53 }
 0xba1   :  { %v4771_v42 = vmul.f32 %v6505_v7, %v4770_v6 }
 0xba2   :  { %v6507_v4 = vpop.eup %6506  ;;  %v4753_v37 = vadd.f32 %v6503_v40, %v4752_v47 }
 0xba3   :  { %v4772_v32 = vadd.f32 %v6505_v7, %v4771_v42  ;;  %v4789_v21 = vmul.f32 %v6507_v4, %v4787_v60  ;;  %v6509_v57 = vpop.eup %6508  ;;  %vm4794_vm0 = vweird.f32 %v6507_v4  ;;  %v4799_v42 = vand.u32 2147483648, %v4787_v60 }
 0xba4   :  { %v4757_v2 = vsel %vm4756_vm11, %v6503_v40, %v4753_v37  ;;  %vm4795_vm2 = vmor %vm4793_vm1, %vm4794_vm0  ;;  %v4176_v37 = vadd.f32 %v8580_v41, %v8515_v54 }
 0xba5   :  { %v4762_v16 = vsel %vm4759_vm12, %v4761_v52, %v4757_v2  ;;  %v4776_v53 = vsel %vm4775_vm13, %v6505_v7, %v4772_v32  ;;  %v4790_v28 = vsub.f32 1.0, %v4789_v21  ;;  %v4800_v40 = vor.u32 1.1754944e-38, %v4799_v42 }
 0xba6   :  { %v4781_v6 = vsel %vm4778_vm15, %v4780_v15, %v4776_v53  ;;  %v4804_v9 = vmul.f32 %v6509_v57, %v4762_v16 }
 0xba7   :  { %v4803_v61 = vmul.f32 0.0, %v4781_v6  ;;  %v4791_v33 = vmul.f32 %v6507_v4, %v4790_v28  ;;  %v4156_v6 = vadd.f32 %v8588_v36, %v8521_v20 }
 0xba9   :  { %v8591_v47 = vadd.f32 %v4804_v9, %v4803_v61  ;;  %v4792_v24 = vadd.f32 %v6507_v4, %v4791_v33  ;;  %v4116_v33 = vadd.f32 %v8564_v51, %v8511_v12  ;;  %v4136_v9 = vadd.f32 %v8569_v17, %v8513_v46 }
 0xbab   :  { %6510 = vtanh.f32 %v8591_v47  ;;  %v4796_v49 = vsel %vm4795_vm2, %v6507_v4, %v4792_v24 }
 0xbac   :  { %v4801_v39 = vsel %vm4798_vm3, %v4800_v40, %v4796_v49 }
 0xbb1   :  { %v6511_v7 = vpop.eup %6510 }
 0xbb2   :  { %v4807_v59 = vmul.f32 %v6511_v7, %v4801_v39 }
 0xbb4   :  { %6167 = vmatmul.msk.f32.vlgmr.msrb.gmra.mxu0 %vm856_vm14, %v4807_v59  ;;  %5862 = vst.msk [vmem:[%s8885_s10] sm:$0x3] %vm2057_vm4, %v4807_v59  ;;  %6168 = vmatmul.msk.f32.vlgmr.msrb.gmra.mxu1 %vm856_vm14, %v4807_v59 }
 0xbb5   :  { %6169 = vmatmul.msk.f32.vlgmr.msrb.gmra.mxu2 %vm856_vm14, %v4807_v59  ;;  %6170 = vmatmul.msk.f32.vlgmr.msrb.gmra.mxu3 %vm856_vm14, %v4807_v59 }
 0xbb6   :  { %5123 = vmatpush.msrb.mxu0 %v8402_v11  ;;  %5144 = vmatpush.msrb.mxu1 %v8404_v43 }
 0xbb7   :  { %5165 = vmatpush.msrb.mxu2 %v8406_v19  ;;  %5186 = vmatpush.msrb.mxu3 %v8411_v48 }
 0xbb8   :  { %5124 = vmatpush.msrb.mxu0 %v8417_v26  ;;  %5145 = vmatpush.msrb.mxu1 %v8419_v55 }
 0xbb9   :  { %5166 = vmatpush.msrb.mxu2 %v8421_v22  ;;  %5187 = vmatpush.msrb.mxu3 %v8427_v35 }
 0xbba   :  { %5125 = vmatpush.msrb.mxu0 %v8433_v31  ;;  %5146 = vmatpush.msrb.mxu1 %v8435_v10 }
 0xbbb   :  { %5167 = vmatpush.msrb.mxu2 %v8437_v14  ;;  %5188 = vmatpush.msrb.mxu3 %v8442_v27 }
 0xbbc   :  { %5126 = vmatpush.msrb.mxu0 %v8444_v45  ;;  %5147 = vmatpush.msrb.mxu1 %v8448_v29 }
 0xbbd   :  { %5168 = vmatpush.msrb.mxu2 %v8450_v62  ;;  %5189 = vmatpush.msrb.mxu3 %v8455_v0 }
 0xc31   :  { %v4828_v28 = vpop.f32.mrf.mxu0  ;;  %v4849_v61 = vpop.f32.mrf.mxu1 }
 0xc32   :  { %v4831_v15 = vadd.f32 %v4828_v28, %v4116_v33  ;;  %v4852_v4 = vadd.f32 %v4849_v61, %v4136_v9 }
 0xc34   :  { %v6171_v60 = vmul.f32 -1.442695, %v4831_v15  ;;  %v6172_v8 = vmul.f32 -1.442695, %v4852_v4 }
 0xc36   :  { %6512 = vpow2.f32 %v6171_v60 }
 0xc37   :  { %6514 = vpow2.f32 %v6172_v8 }
 0xc38   :  { %v4891_v52 = vpop.f32.mrf.mxu3  ;;  %v4870_v46 = vpop.f32.mrf.mxu2 }
 0xc39   :  { %v4894_v32 = vadd.f32 %v4891_v52, %v4176_v37  ;;  %v4873_v18 = vadd.f32 %v4870_v46, %v4156_v6 }
 0xc3b   :  { %v6173_v21 = vmul.f32 -1.442695, %v4894_v32 }
 0xc3c   :  { %v6513_v2 = vpop.eup %6512 }
 0xc3d   :  { %v6515_v57 = vpop.eup %6514  ;;  %v4898_v12 = vadd.f32 1.0, %v6513_v2  ;;  %6516 = vpow2.f32 %v6173_v21 }
 0xc3e   :  { %v4917_v16 = vadd.f32 1.0, %v6515_v57 }
 0xc3f   :  { %6518 = vrcp.f32 %v4898_v12  ;;  %v4910_v59 = vand.u32 2147483648, %v4898_v12  ;;  %v4908_v28 = vand.u32 2147483647, %v4898_v12  ;;  %vm4904_vm7 = vweird.f32 %v4898_v12 }
 0xc40   :  { %6520 = vrcp.f32 %v4917_v16  ;;  %v4929_v33 = vand.u32 2147483648, %v4917_v16  ;;  %v4927_v15 = vand.u32 2147483647, %v4917_v16  ;;  %vm4923_vm8 = vweird.f32 %v4917_v16 }
 0xc41   :  { %v4911_v60 = vor.u32 1.1754944e-38, %v4910_v59  ;;  %vm4909_vm11 = vcmp.eq.f32.partialorder %v4908_v28, 8.507059e+37 }
 0xc42   :  { %v4930_v52 = vor.u32 1.1754944e-38, %v4929_v33  ;;  %vm4928_vm12 = vcmp.eq.f32.partialorder %v4927_v15, 8.507059e+37 }
 0xc43   :  { %v6517_v53 = vpop.eup %6516 }
 0xc44   :  { %v4937_v24 = vadd.f32 1.0, %v6517_v53 }
 0xc45   :  { %v6519_v42 = vpop.eup %6518 }
 0xc46   :  { %v6521_v54 = vpop.eup %6520  ;;  %v4900_v49 = vmul.f32 %v6519_v42, %v4898_v12  ;;  %6522 = vrcp.f32 %v4937_v24  ;;  %vm4905_vm5 = vweird.f32 %v6519_v42  ;;  %vm4943_vm15 = vweird.f32 %v4937_v24 }
 0xc47   :  { %v4919_v40 = vmul.f32 %v6521_v54, %v4917_v16  ;;  %6524 = vtanh.f32 %v4873_v18  ;;  %vm4924_vm6 = vweird.f32 %v6521_v54  ;;  %vm4906_vm9 = vmor %vm4904_vm7, %vm4905_vm5 }
 0xc48   :  { %v4901_v7 = vsub.f32 1.0, %v4900_v49  ;;  %vm4925_vm10 = vmor %vm4923_vm8, %vm4924_vm6 }
 0xc49   :  { %v4920_v39 = vsub.f32 1.0, %v4919_v40  ;;  %v4949_v40 = vand.u32 2147483648, %v4937_v24 }
 0xc4a   :  { %v4902_v9 = vmul.f32 %v6519_v42, %v4901_v7 }
 0xc4b   :  { %v4921_v61 = vmul.f32 %v6521_v54, %v4920_v39  ;;  %v4950_v39 = vor.u32 1.1754944e-38, %v4949_v40 }
 0xc4c   :  { %v6523_v4 = vpop.eup %6522  ;;  %v4903_v20 = vadd.f32 %v6519_v42, %v4902_v9 }
 0xc4d   :  { %v4922_v8 = vadd.f32 %v6521_v54, %v4921_v61  ;;  %v4939_v37 = vmul.f32 %v6523_v4, %v4937_v24  ;;  %v6525_v21 = vpop.eup %6524  ;;  %vm4944_vm13 = vweird.f32 %v6523_v4 }
 0xc4e   :  { %v4907_v32 = vsel %vm4906_vm9, %v6519_v42, %v4903_v20  ;;  %v4947_v42 = vand.u32 2147483647, %v4937_v24  ;;  %vm4945_vm0 = vmor %vm4943_vm15, %vm4944_vm13  ;;  %v4216_v24 = vadd.f32 %v8569_v17, %v8519_v50 }
 0xc4f   :  { %v4912_v2 = vsel %vm4909_vm11, %v4911_v60, %v4907_v32  ;;  %v4926_v57 = vsel %vm4925_vm10, %v6521_v54, %v4922_v8  ;;  %v4940_v46 = vsub.f32 1.0, %v4939_v37  ;;  %v4256_v60 = vadd.f32 %v8580_v41, %v8523_v38 }
 0xc50   :  { %v4931_v53 = vsel %vm4928_vm12, %v4930_v52, %v4926_v57  ;;  %v4954_v6 = vmul.f32 %v6525_v21, %v4912_v2  ;;  %vm4948_vm1 = vcmp.eq.f32.partialorder %v4947_v42, 8.507059e+37 }
 0xc51   :  { %v4953_v18 = vmul.f32 %v4931_v53, %v8591_v47  ;;  %v4941_v49 = vmul.f32 %v6523_v4, %v4940_v46  ;;  %v4196_v47 = vadd.f32 %v8564_v51, %v8517_v44  ;;  %v4236_v46 = vadd.f32 %v8588_v36, %v8529_v34 }
 0xc53   :  { %v8627_v12 = vadd.f32 %v4954_v6, %v4953_v18  ;;  %v4942_v16 = vadd.f32 %v6523_v4, %v4941_v49 }
 0xc55   :  { %6526 = vtanh.f32 %v8627_v12  ;;  %v4946_v7 = vsel %vm4945_vm0, %v6523_v4, %v4942_v16 }
 0xc56   :  { %v4951_v59 = vsel %vm4948_vm1, %v4950_v39, %v4946_v7 }
 0xc5b   :  { %v6527_v54 = vpop.eup %6526 }
 0xc5c   :  { %v4957_v33 = vmul.f32 %v6527_v54, %v4951_v59 }
 0xc5e   :  { %6174 = vmatmul.msk.f32.vlgmr.msra.gmra.mxu0 %vm856_vm14, %v4957_v33  ;;  %5863 = vst.msk [vmem:[%s8885_s10 + $0x2] sm:$0x3] %vm2057_vm4, %v4957_v33  ;;  %6175 = vmatmul.msk.f32.vlgmr.msra.gmra.mxu1 %vm856_vm14, %v4957_v33 }
 0xc5f   :  { %6176 = vmatmul.msk.f32.vlgmr.msra.gmra.mxu2 %vm856_vm14, %v4957_v33  ;;  %6177 = vmatmul.msk.f32.vlgmr.msra.gmra.mxu3 %vm856_vm14, %v4957_v33 }
 0xc60   :  { %5273 = vmatpush.msra.mxu0 %v8402_v11  ;;  %5294 = vmatpush.msra.mxu1 %v8404_v43 }
 0xc61   :  { %5315 = vmatpush.msra.mxu2 %v8406_v19  ;;  %5336 = vmatpush.msra.mxu3 %v8411_v48 }
 0xc62   :  { %5274 = vmatpush.msra.mxu0 %v8417_v26  ;;  %5295 = vmatpush.msra.mxu1 %v8419_v55 }
 0xc63   :  { %5316 = vmatpush.msra.mxu2 %v8421_v22  ;;  %5337 = vmatpush.msra.mxu3 %v8427_v35 }
 0xc64   :  { %5275 = vmatpush.msra.mxu0 %v8433_v31  ;;  %5296 = vmatpush.msra.mxu1 %v8435_v10 }
 0xc65   :  { %5317 = vmatpush.msra.mxu2 %v8437_v14  ;;  %5338 = vmatpush.msra.mxu3 %v8442_v27 }
 0xc66   :  { %5276 = vmatpush.msra.mxu0 %v8444_v45  ;;  %5297 = vmatpush.msra.mxu1 %v8448_v29 }
 0xc67   :  { %5318 = vmatpush.msra.mxu2 %v8450_v62  ;;  %5339 = vmatpush.msra.mxu3 %v8455_v0 }
 0xcdb   :  { %v4978_v9 = vpop.f32.mrf.mxu0  ;;  %v4999_v28 = vpop.f32.mrf.mxu1 }
 0xcdc   :  { %v4981_v61 = vadd.f32 %v4978_v9, %v4196_v47  ;;  %v5002_v15 = vadd.f32 %v4999_v28, %v4216_v24 }
 0xcde   :  { %v6178_v4 = vmul.f32 -1.442695, %v4981_v61  ;;  %v6179_v20 = vmul.f32 -1.442695, %v5002_v15 }
 0xce0   :  { %6528 = vpow2.f32 %v6178_v4 }
 0xce1   :  { %6530 = vpow2.f32 %v6179_v20 }
 0xce2   :  { %v5041_v8 = vpop.f32.mrf.mxu3  ;;  %v5020_v50 = vpop.f32.mrf.mxu2 }
 0xce3   :  { %v5044_v37 = vadd.f32 %v5041_v8, %v4256_v60  ;;  %v5023_v18 = vadd.f32 %v5020_v50, %v4236_v46 }
 0xce5   :  { %v6180_v52 = vmul.f32 -1.442695, %v5044_v37 }
 0xce6   :  { %v6529_v32 = vpop.eup %6528 }
 0xce7   :  { %v6531_v21 = vpop.eup %6530  ;;  %v5048_v44 = vadd.f32 1.0, %v6529_v32  ;;  %6532 = vpow2.f32 %v6180_v52 }
 0xce8   :  { %v5067_v2 = vadd.f32 1.0, %v6531_v21 }
 0xce9   :  { %6534 = vrcp.f32 %v5048_v44  ;;  %v5060_v7 = vand.u32 2147483648, %v5048_v44  ;;  %v5058_v59 = vand.u32 2147483647, %v5048_v44  ;;  %vm5054_vm5 = vweird.f32 %v5048_v44 }
 0xcea   :  { %6536 = vrcp.f32 %v5067_v2  ;;  %v5079_v39 = vand.u32 2147483648, %v5067_v2  ;;  %v5077_v47 = vand.u32 2147483647, %v5067_v2  ;;  %vm5073_vm6 = vweird.f32 %v5067_v2 }
 0xceb   :  { %v5061_v9 = vor.u32 1.1754944e-38, %v5060_v7  ;;  %vm5059_vm9 = vcmp.eq.f32.partialorder %v5058_v59, 8.507059e+37 }
 0xcec   :  { %v5080_v15 = vor.u32 1.1754944e-38, %v5079_v39  ;;  %vm5078_vm10 = vcmp.eq.f32.partialorder %v5077_v47, 8.507059e+37 }
 0xced   :  { %v6533_v57 = vpop.eup %6532 }
 0xcee   :  { %v5087_v53 = vadd.f32 1.0, %v6533_v57 }
 0xcef   :  { %v6535_v6 = vpop.eup %6534 }
 0xcf0   :  { %v6537_v38 = vpop.eup %6536  ;;  %v5050_v49 = vmul.f32 %v6535_v6, %v5048_v44  ;;  %6538 = vrcp.f32 %v5087_v53  ;;  %vm5055_vm2 = vweird.f32 %v6535_v6  ;;  %v5099_v57 = vand.u32 2147483648, %v5087_v53 }
 0xcf1   :  { %v5069_v16 = vmul.f32 %v6537_v38, %v5067_v2  ;;  %6540 = vtanh.f32 %v5023_v18  ;;  %vm5074_vm3 = vweird.f32 %v6537_v38  ;;  %vm5056_vm7 = vmor %vm5054_vm5, %vm5055_vm2  ;;  %vm5093_vm12 = vweird.f32 %v5087_v53 }
 0xcf2   :  { %v5051_v40 = vsub.f32 1.0, %v5050_v49  ;;  %vm5075_vm8 = vmor %vm5073_vm6, %vm5074_vm3  ;;  %v5097_v46 = vand.u32 2147483647, %v5087_v53  ;;  %v5100_v18 = vor.u32 1.1754944e-38, %v5099_v57 }
 0xcf3   :  { %v5070_v42 = vsub.f32 1.0, %v5069_v16 }
 0xcf4   :  { %v5052_v54 = vmul.f32 %v6535_v6, %v5051_v40  ;;  %vm5098_vm15 = vcmp.eq.f32.partialorder %v5097_v46, 8.507059e+37 }
 0xcf5   :  { %v5071_v33 = vmul.f32 %v6537_v38, %v5070_v42 }
 0xcf6   :  { %v6539_v24 = vpop.eup %6538  ;;  %v5053_v34 = vadd.f32 %v6535_v6, %v5052_v54 }
 0xcf7   :  { %v5072_v28 = vadd.f32 %v6537_v38, %v5071_v33  ;;  %v5089_v61 = vmul.f32 %v6539_v24, %v5087_v53  ;;  %v6541_v20 = vpop.eup %6540  ;;  %vm5094_vm11 = vweird.f32 %v6539_v24 }
 0xcf8   :  { %v5057_v4 = vsel %vm5056_vm7, %v6535_v6, %v5053_v34  ;;  %vm5095_vm13 = vmor %vm5093_vm12, %vm5094_vm11 }
 0xcf9   :  { %v5062_v60 = vsel %vm5059_vm9, %v5061_v9, %v5057_v4  ;;  %v5076_v8 = vsel %vm5075_vm8, %v6537_v38, %v5072_v28  ;;  %v5090_v37 = vsub.f32 1.0, %v5089_v61 }
 0xcfa   :  { %v5081_v52 = vsel %vm5078_vm10, %v5080_v15, %v5076_v8  ;;  %v5104_v32 = vmul.f32 %v6541_v20, %v5062_v60 }
 0xcfb   :  { %v5103_v21 = vmul.f32 %v5081_v52, %v8627_v12  ;;  %v5091_v50 = vmul.f32 %v6539_v24, %v5090_v37  ;;  %v4316_v12 = vadd.f32 %v8588_v36, %v8537_v25 }
 0xcfd   :  { %v8663_v44 = vadd.f32 %v5104_v32, %v5103_v21  ;;  %v5092_v2 = vadd.f32 %v6539_v24, %v5091_v50 }
 0xcff   :  { %6542 = vtanh.f32 %v8663_v44  ;;  %v5096_v6 = vsel %vm5095_vm13, %v6539_v24, %v5092_v2 }
 0xd00   :  { %v5101_v49 = vsel %vm5098_vm15, %v5100_v18, %v5096_v6 }
 0xd05   :  { %v6543_v38 = vpop.eup %6542 }
 0xd06   :  { %v5107_v16 = vmul.f32 %v6543_v38, %v5101_v49 }
 0xd08   :  { %6181 = vmatmul.msk.f32.vlgmr.msrb.gmra.mxu0 %vm856_vm14, %v5107_v16  ;;  %5864 = vst.msk [vmem:[%s8885_s10 + $0x4] sm:$0x3] %vm2057_vm4, %v5107_v16  ;;  %6182 = vmatmul.msk.f32.vlgmr.msrb.gmra.mxu1 %vm856_vm14, %v5107_v16 }
 0xd09   :  { %6183 = vmatmul.msk.f32.vlgmr.msrb.gmra.mxu2 %vm856_vm14, %v5107_v16  ;;  %6184 = vmatmul.msk.f32.vlgmr.msrb.gmra.mxu3 %vm856_vm14, %v5107_v16 }
 0xd0a   :  { %5423 = vmatpush.msrb.mxu0 %v8402_v11  ;;  %5444 = vmatpush.msrb.mxu1 %v8404_v43  ;;  %v4276_v11 = vadd.f32 %v8564_v51, %v8525_v5  ;;  %v4296_v43 = vadd.f32 %v8569_v17, %v8527_v56 }
 0xd0b   :  { %5465 = vmatpush.msrb.mxu2 %v8406_v19  ;;  %5486 = vmatpush.msrb.mxu3 %v8411_v48 }
 0xd0c   :  { %5424 = vmatpush.msrb.mxu0 %v8417_v26  ;;  %5445 = vmatpush.msrb.mxu1 %v8419_v55 }
 0xd0d   :  { %5466 = vmatpush.msrb.mxu2 %v8421_v22  ;;  %5487 = vmatpush.msrb.mxu3 %v8427_v35 }
 0xd0e   :  { %5425 = vmatpush.msrb.mxu0 %v8433_v31  ;;  %5446 = vmatpush.msrb.mxu1 %v8435_v10  ;;  %v4336_v31 = vadd.f32 %v8580_v41, %v8531_v30 }
 0xd0f   :  { %5467 = vmatpush.msrb.mxu2 %v8437_v14  ;;  %5488 = vmatpush.msrb.mxu3 %v8442_v27 }
 0xd10   :  { %5426 = vmatpush.msrb.mxu0 %v8444_v45  ;;  %5447 = vmatpush.msrb.mxu1 %v8448_v29 }
 0xd11   :  { %5468 = vmatpush.msrb.mxu2 %v8450_v62  ;;  %5489 = vmatpush.msrb.mxu3 %v8455_v0 }
 0xd85   :  { %v5128_v19 = vpop.f32.mrf.mxu0  ;;  %v5149_v48 = vpop.f32.mrf.mxu1 }
 0xd86   :  { %v5131_v26 = vadd.f32 %v5128_v19, %v4276_v11  ;;  %v5152_v55 = vadd.f32 %v5149_v48, %v4296_v43 }
 0xd88   :  { %v6185_v22 = vmul.f32 -1.442695, %v5131_v26  ;;  %v6186_v35 = vmul.f32 -1.442695, %v5152_v55  ;;  %v8713_v26 = vld [vmem:[#allocation10 + $0x38] sm:$0xff] }
 0xd89   :  { %v8716_v55 = vld [vmem:[#allocation10 + $0x58] sm:$0xff] }
 0xd8a   :  { %6544 = vpow2.f32 %v6185_v22  ;;  %v8719_v22 = vld [vmem:[#allocation10 + $0x78] sm:$0xff] }
 0xd8b   :  { %6546 = vpow2.f32 %v6186_v35  ;;  %v8722_v35 = vld [vmem:[#allocation10 + $0x10] sm:$0xff] }
 0xd8c   :  { %v5191_v10 = vpop.f32.mrf.mxu3  ;;  %v5170_v5 = vpop.f32.mrf.mxu2 }
 0xd8d   :  { %v5194_v14 = vadd.f32 %v5191_v10, %v4336_v31  ;;  %v5173_v42 = vadd.f32 %v5170_v5, %v4316_v12  ;;  %v8725_v31 = vld [vmem:[#allocation10 + $0x30] sm:$0xff]  ;;  %v8749_v5 = vld [vmem:[#allocation10 + $0x20] sm:$0xff] }
 0xd8e   :  { %v8728_v10 = vld [vmem:[#allocation10 + $0x50] sm:$0xff]  ;;  %v8755_v12 = vld [vmem:[#allocation10 + $0x60] sm:$0xff] }
 0xd8f   :  { %v6187_v27 = vmul.f32 -1.442695, %v5194_v14  ;;  %v8731_v14 = vld [vmem:[#allocation10 + $0x70] sm:$0xff] }
 0xd90   :  { %v6545_v45 = vpop.eup %6544 }
 0xd91   :  { %v6547_v29 = vpop.eup %6546  ;;  %v5198_v62 = vadd.f32 1.0, %v6545_v45  ;;  %6548 = vpow2.f32 %v6187_v27  ;;  %v8734_v27 = vld [vmem:[#allocation10 + $0x8] sm:$0xff] }
 0xd92   :  { %v5217_v0 = vadd.f32 1.0, %v6547_v29  ;;  %v8737_v45 = vld [vmem:[#allocation10 + $0x28] sm:$0xff] }
 0xd93   :  { %6550 = vrcp.f32 %v5198_v62  ;;  %v5210_v33 = vand.u32 2147483648, %v5198_v62  ;;  %v5208_v34 = vand.u32 2147483647, %v5198_v62  ;;  %vm5204_vm2 = vweird.f32 %v5198_v62  ;;  %v8740_v29 = vld [vmem:[#allocation10 + $0x48] sm:$0xff] }
 0xd94   :  { %6552 = vrcp.f32 %v5217_v0  ;;  %v5229_v47 = vand.u32 2147483648, %v5217_v0  ;;  %v5227_v28 = vand.u32 2147483647, %v5217_v0  ;;  %vm5223_vm3 = vweird.f32 %v5217_v0 }
 0xd95   :  { %v5211_v15 = vor.u32 1.1754944e-38, %v5210_v33  ;;  %vm5209_vm7 = vcmp.eq.f32.partialorder %v5208_v34, 8.507059e+37  ;;  %v4416_v33 = vadd.f32 %v8580_v41, %v8539_v1 }
 0xd96   :  { %v5230_v60 = vor.u32 1.1754944e-38, %v5229_v47  ;;  %vm5228_vm8 = vcmp.eq.f32.partialorder %v5227_v28, 8.507059e+37 }
 0xd97   :  { %v6549_v56 = vpop.eup %6548 }
 0xd98   :  { %v5237_v53 = vadd.f32 1.0, %v6549_v56  ;;  %v8752_v56 = vld [vmem:[#allocation10 + $0x40] sm:$0xff] }
 0xd99   :  { %v6551_v40 = vpop.eup %6550 }
 0xd9a   :  { %v6553_v30 = vpop.eup %6552  ;;  %v5200_v7 = vmul.f32 %v6551_v40, %v5198_v62  ;;  %6554 = vrcp.f32 %v5237_v53  ;;  %vm5205_vm0 = vweird.f32 %v6551_v40  ;;  %v5249_v38 = vand.u32 2147483648, %v5237_v53  ;;  %v8743_v62 = vld [vmem:[#allocation10 + $0x68] sm:$0xff] }
 0xd9b   :  { %v5219_v39 = vmul.f32 %v6553_v30, %v5217_v0  ;;  %6556 = vtanh.f32 %v5173_v42  ;;  %vm5224_vm1 = vweird.f32 %v6553_v30  ;;  %vm5206_vm5 = vmor %vm5204_vm2, %vm5205_vm0  ;;  %vm5243_vm10 = vweird.f32 %v5237_v53  ;;  %v8746_v0 = vld [vmem:[#allocation10] sm:$0xff] }
 0xd9c   :  { %v5201_v54 = vsub.f32 1.0, %v5200_v7  ;;  %vm5225_vm6 = vmor %vm5223_vm3, %vm5224_vm1  ;;  %v5247_v49 = vand.u32 2147483647, %v5237_v53  ;;  %v5250_v11 = vor.u32 1.1754944e-38, %v5249_v38 }
 0xd9d   :  { %v5220_v59 = vsub.f32 1.0, %v5219_v39 }
 0xd9e   :  { %v5202_v24 = vmul.f32 %v6551_v40, %v5201_v54  ;;  %vm5248_vm12 = vcmp.eq.f32.partialorder %v5247_v49, 8.507059e+37 }
 0xd9f   :  { %v5221_v9 = vmul.f32 %v6553_v30, %v5220_v59 }
 0xda0   :  { %v6555_v61 = vpop.eup %6554  ;;  %v5203_v25 = vadd.f32 %v6551_v40, %v5202_v24 }
 0xda1   :  { %v5222_v4 = vadd.f32 %v6553_v30, %v5221_v9  ;;  %v5239_v20 = vmul.f32 %v6555_v61, %v5237_v53  ;;  %v6557_v37 = vpop.eup %6556  ;;  %vm5244_vm9 = vweird.f32 %v6555_v61  ;;  %v4356_v53 = vadd.f32 %v8564_v51, %v8533_v23 }
 0xda2   :  { %v5207_v8 = vsel %vm5206_vm5, %v6551_v40, %v5203_v25  ;;  %vm5245_vm11 = vmor %vm5243_vm10, %vm5244_vm9  ;;  %v4376_v40 = vadd.f32 %v8569_v17, %v8535_v63 }
 0xda3   :  { %v5212_v52 = vsel %vm5209_vm7, %v5211_v15, %v5207_v8  ;;  %v5226_v32 = vsel %vm5225_vm6, %v6553_v30, %v5222_v4  ;;  %v5240_v21 = vsub.f32 1.0, %v5239_v20  ;;  %v4396_v15 = vadd.f32 %v8588_v36, %v8545_v58 }
 0xda4   :  { %v5231_v50 = vsel %vm5228_vm8, %v5230_v60, %v5226_v32  ;;  %v5254_v2 = vmul.f32 %v6557_v37, %v5212_v52 }
 0xda5   :  { %v5253_v57 = vmul.f32 %v5231_v50, %v8663_v44  ;;  %v5241_v46 = vmul.f32 %v6555_v61, %v5240_v21  ;;  %v8710_v44 = vld [vmem:[#allocation10 + $0x18] sm:$0xff] }
 0xda7   :  { %v8699_v6 = vadd.f32 %v5254_v2, %v5253_v57  ;;  %v5242_v18 = vadd.f32 %v6555_v61, %v5241_v46 }
 0xda9   :  { %6558 = vtanh.f32 %v8699_v6  ;;  %v5246_v16 = vsel %vm5245_vm11, %v6555_v61, %v5242_v18 }
 0xdaa   :  { %v5251_v19 = vsel %vm5248_vm12, %v5250_v11, %v5246_v16 }
 0xdaf   :  { %v6559_v43 = vpop.eup %6558 }
 0xdb0   :  { %v5257_v48 = vmul.f32 %v6559_v43, %v5251_v19 }
 0xdb2   :  { %6188 = vmatmul.msk.f32.vlgmr.msra.gmra.mxu0 %vm856_vm14, %v5257_v48  ;;  %5865 = vst.msk [vmem:[%s8885_s10 + $0x6] sm:$0x3] %vm2057_vm4, %v5257_v48  ;;  %6189 = vmatmul.msk.f32.vlgmr.msra.gmra.mxu1 %vm856_vm14, %v5257_v48 }
 0xdb3   :  { %6190 = vmatmul.msk.f32.vlgmr.msra.gmra.mxu2 %vm856_vm14, %v5257_v48  ;;  %6191 = vmatmul.msk.f32.vlgmr.msra.gmra.mxu3 %vm856_vm14, %v5257_v48 }
 0xdb4   :  { %5573 = vmatpush.msra.mxu0 %v8710_v44  ;;  %5594 = vmatpush.msra.mxu1 %v8713_v26 }
 0xdb5   :  { %5615 = vmatpush.msra.mxu2 %v8716_v55  ;;  %5636 = vmatpush.msra.mxu3 %v8719_v22 }
 0xdb6   :  { %5574 = vmatpush.msra.mxu0 %v8722_v35  ;;  %5595 = vmatpush.msra.mxu1 %v8725_v31 }
 0xdb7   :  { %5616 = vmatpush.msra.mxu2 %v8728_v10  ;;  %5637 = vmatpush.msra.mxu3 %v8731_v14 }
 0xdb8   :  { %5575 = vmatpush.msra.mxu0 %v8734_v27  ;;  %5596 = vmatpush.msra.mxu1 %v8737_v45 }
 0xdb9   :  { %5617 = vmatpush.msra.mxu2 %v8740_v29  ;;  %5638 = vmatpush.msra.mxu3 %v8743_v62 }
 0xdba   :  { %5576 = vmatpush.msra.mxu0 %v8746_v0  ;;  %5597 = vmatpush.msra.mxu1 %v8749_v5 }
 0xdbb   :  { %5618 = vmatpush.msra.mxu2 %v8752_v56  ;;  %5639 = vmatpush.msra.mxu3 %v8755_v12 }
 0xe2f   :  { %v5278_v42 = vpop.f32.mrf.mxu0  ;;  %v5299_v30 = vpop.f32.mrf.mxu1 }
 0xe30   :  { %v5281_v7 = vadd.f32 %v5278_v42, %v4356_v53  ;;  %v5302_v39 = vadd.f32 %v5299_v30, %v4376_v40 }
 0xe32   :  { %v6192_v54 = vmul.f32 -1.442695, %v5281_v7  ;;  %v6193_v59 = vmul.f32 -1.442695, %v5302_v39 }
 0xe34   :  { %6560 = vpow2.f32 %v6192_v54 }
 0xe35   :  { %6562 = vpow2.f32 %v6193_v59 }
 0xe36   :  { %v5341_v47 = vpop.f32.mrf.mxu3  ;;  %v5320_v63 = vpop.f32.mrf.mxu2 }
 0xe37   :  { %v5344_v24 = vadd.f32 %v5341_v47, %v4416_v33  ;;  %v5323_v60 = vadd.f32 %v5320_v63, %v4396_v15 }
 0xe39   :  { %v6194_v34 = vmul.f32 -1.442695, %v5344_v24 }
 0xe3a   :  { %v6561_v9 = vpop.eup %6560 }
 0xe3b   :  { %v6563_v28 = vpop.eup %6562  ;;  %v5348_v23 = vadd.f32 1.0, %v6561_v9  ;;  %6564 = vpow2.f32 %v6194_v34 }
 0xe3c   :  { %v5367_v61 = vadd.f32 1.0, %v6563_v28 }
 0xe3d   :  { %6566 = vrcp.f32 %v5348_v23  ;;  %v5360_v21 = vand.u32 2147483648, %v5348_v23  ;;  %v5358_v57 = vand.u32 2147483647, %v5348_v23  ;;  %vm5354_vm0 = vweird.f32 %v5348_v23 }
 0xe3e   :  { %6568 = vrcp.f32 %v5367_v61  ;;  %v5379_v50 = vand.u32 2147483648, %v5367_v61  ;;  %v5377_v18 = vand.u32 2147483647, %v5367_v61  ;;  %vm5373_vm1 = vweird.f32 %v5367_v61 }
 0xe3f   :  { %v5361_v49 = vor.u32 1.1754944e-38, %v5360_v21  ;;  %vm5359_vm5 = vcmp.eq.f32.partialorder %v5358_v57, 8.507059e+37 }
 0xe40   :  { %v5380_v43 = vor.u32 1.1754944e-38, %v5379_v50  ;;  %vm5378_vm6 = vcmp.eq.f32.partialorder %v5377_v18, 8.507059e+37 }
 0xe41   :  { %v6565_v25 = vpop.eup %6564 }
 0xe42   :  { %v5387_v4 = vadd.f32 1.0, %v6565_v25 }
 0xe43   :  { %v6567_v20 = vpop.eup %6566 }
 0xe44   :  { %v6569_v1 = vpop.eup %6568  ;;  %v5350_v8 = vmul.f32 %v6567_v20, %v5348_v23  ;;  %6570 = vrcp.f32 %v5387_v4  ;;  %vm5355_vm13 = vweird.f32 %v6567_v20  ;;  %v5399_v47 = vand.u32 2147483648, %v5387_v4 }
 0xe45   :  { %v5369_v37 = vmul.f32 %v6569_v1, %v5367_v61  ;;  %6572 = vtanh.f32 %v5323_v60  ;;  %vm5374_vm15 = vweird.f32 %v6569_v1  ;;  %vm5356_vm2 = vmor %vm5354_vm0, %vm5355_vm13  ;;  %vm5393_vm8 = vweird.f32 %v5387_v4 }
 0xe46   :  { %v5351_v52 = vsub.f32 1.0, %v5350_v8  ;;  %vm5375_vm3 = vmor %vm5373_vm1, %vm5374_vm15  ;;  %v5397_v24 = vand.u32 2147483647, %v5387_v4  ;;  %v5400_v9 = vor.u32 1.1754944e-38, %v5399_v47 }
 0xe47   :  { %v5370_v32 = vsub.f32 1.0, %v5369_v37 }
 0xe48   :  { %v5352_v2 = vmul.f32 %v6567_v20, %v5351_v52  ;;  %vm5398_vm10 = vcmp.eq.f32.partialorder %v5397_v24, 8.507059e+37 }
 0xe49   :  { %v5371_v46 = vmul.f32 %v6569_v1, %v5370_v32 }
 0xe4a   :  { %v6571_v38 = vpop.eup %6570  ;;  %v5353_v58 = vadd.f32 %v6567_v20, %v5352_v2 }
 0xe4b   :  { %v5372_v16 = vadd.f32 %v6569_v1, %v5371_v46  ;;  %v5389_v11 = vmul.f32 %v6571_v38, %v5387_v4  ;;  %v6573_v48 = vpop.eup %6572  ;;  %vm5394_vm7 = vweird.f32 %v6571_v38 }
 0xe4c   :  { %v5357_v19 = vsel %vm5356_vm2, %v6567_v20, %v5353_v58  ;;  %vm5395_vm9 = vmor %vm5393_vm8, %vm5394_vm7 }
 0xe4d   :  { %v5362_v53 = vsel %vm5359_vm5, %v5361_v49, %v5357_v19  ;;  %v5376_v40 = vsel %vm5375_vm3, %v6569_v1, %v5372_v16  ;;  %v5390_v42 = vsub.f32 1.0, %v5389_v11 }
 0xe4e   :  { %v5381_v30 = vsel %vm5378_vm6, %v5380_v43, %v5376_v40  ;;  %v5404_v7 = vmul.f32 %v6573_v48, %v5362_v53 }
 0xe4f   :  { %v5403_v39 = vmul.f32 %v5381_v30, %v8699_v6  ;;  %v5391_v54 = vmul.f32 %v6571_v38, %v5390_v42  ;;  %v4436_v6 = vadd.f32 %v8564_v51, %v8541_v3 }
 0xe51   :  { %v8767_v59 = vadd.f32 %v5404_v7, %v5403_v39  ;;  %v5392_v33 = vadd.f32 %v6571_v38, %v5391_v54 }
 0xe53   :  { %6574 = vtanh.f32 %v8767_v59  ;;  %v5396_v34 = vsel %vm5395_vm9, %v6571_v38, %v5392_v33 }
 0xe54   :  { %v5401_v23 = vsel %vm5398_vm10, %v5400_v9, %v5396_v34  ;;  %v8945_v9 = vld [vmem:[#allocation21_spill] sm:$0xff] }
 0xe59   :  { %v6575_v28 = vpop.eup %6574 }
 0xe5a   :  { %v5407_v61 = vmul.f32 %v6575_v28, %v5401_v23  ;;  %v8824_v23 = vld [vmem:[%s8884_s9 + $0x1] ss:$0 sm:$0xff] }
 0xe5c   :  { %6195 = vmatmul.msk.f32.vlgmr.msrb.gmra.mxu0 %vm856_vm14, %v5407_v61  ;;  %5866 = vst.msk [vmem:[%s8885_s10 + $0x8] sm:$0x3] %vm2057_vm4, %v5407_v61  ;;  %6196 = vmatmul.msk.f32.vlgmr.msrb.gmra.mxu1 %vm856_vm14, %v5407_v61 }
 0xe5d   :  { %6197 = vmatmul.msk.f32.vlgmr.msrb.gmra.mxu2 %vm856_vm14, %v5407_v61  ;;  %6198 = vmatmul.msk.f32.vlgmr.msrb.gmra.mxu3 %vm856_vm14, %v5407_v61  ;;  %v8946_v61 = vld [vmem:[#allocation22_spill] sm:$0xff] }
 0xe5e   :  { %5723 = vmatpush.msrb.mxu0 %v8710_v44  ;;  %5744 = vmatpush.msrb.mxu1 %v8713_v26  ;;  %v4456_v44 = vadd.f32 %v8569_v17, %v8543_v13 }
 0xe5f   :  { %5765 = vmatpush.msrb.mxu2 %v8716_v55  ;;  %5786 = vmatpush.msrb.mxu3 %v8719_v22 }
 0xe60   :  { %5724 = vmatpush.msrb.mxu0 %v8722_v35  ;;  %5745 = vmatpush.msrb.mxu1 %v8725_v31 }
 0xe61   :  { %5766 = vmatpush.msrb.mxu2 %v8728_v10  ;;  %5787 = vmatpush.msrb.mxu3 %v8731_v14  ;;  %v8943_v14 = vld [vmem:[#allocation19_spill] sm:$0xff] }
 0xe62   :  { %5725 = vmatpush.msrb.mxu0 %v8734_v27  ;;  %5746 = vmatpush.msrb.mxu1 %v8737_v45  ;;  %v4496_v27 = vadd.f32 %v8580_v41, %v8943_v14  ;;  %v8947_v14 = vld [vmem:[#allocation23_spill] sm:$0xff] }
 0xe63   :  { %5767 = vmatpush.msrb.mxu2 %v8740_v29  ;;  %5788 = vmatpush.msrb.mxu3 %v8743_v62 }
 0xe64   :  { %5726 = vmatpush.msrb.mxu0 %v8746_v0  ;;  %5747 = vmatpush.msrb.mxu1 %v8749_v5 }
 0xe65   :  { %5768 = vmatpush.msrb.mxu2 %v8752_v56  ;;  %5789 = vmatpush.msrb.mxu3 %v8755_v12  ;;  %v8944_v56 = vld [vmem:[#allocation20_spill] sm:$0xff] }
 0xe66   :  { %v4476_v12 = vadd.f32 %v8588_v36, %v8944_v56  ;;  %v8838_v56 = vld [vmem:[%s8884_s9 + $0x2] ss:$0 sm:$0xff] }
 0xed9   :  { %v5428_v26 = vpop.f32.mrf.mxu0  ;;  %v5449_v55 = vpop.f32.mrf.mxu1 }
 0xeda   :  { %v5431_v22 = vadd.f32 %v5428_v26, %v4436_v6  ;;  %v5452_v35 = vadd.f32 %v5449_v55, %v4456_v44  ;;  %v4536_v6 = vadd.f32 %v8824_v23, %v8946_v61 }
 0xedc   :  { %v6199_v31 = vmul.f32 -1.442695, %v5431_v22  ;;  %v6200_v10 = vmul.f32 -1.442695, %v5452_v35 }
 0xede   :  { %6576 = vpow2.f32 %v6199_v31 }
 0xedf   :  { %6578 = vpow2.f32 %v6200_v10  ;;  %v8831_v10 = vld [vmem:[%s8884_s9 + $0x3] ss:$0 sm:$0xff] }
 0xee0   :  { %v5491_v45 = vpop.f32.mrf.mxu3  ;;  %v5470_v13 = vpop.f32.mrf.mxu2 }
 0xee1   :  { %v5494_v29 = vadd.f32 %v5491_v45, %v4496_v27  ;;  %v5473_v15 = vadd.f32 %v5470_v13, %v4476_v12  ;;  %v4576_v27 = vadd.f32 %v8831_v10, %v8947_v14  ;;  %v8948_v12 = vld [vmem:[#allocation24_spill] sm:$0xff] }
 0xee3   :  { %v6201_v62 = vmul.f32 -1.442695, %v5494_v29 }
 0xee4   :  { %v6577_v0 = vpop.eup %6576 }
 0xee5   :  { %v6579_v5 = vpop.eup %6578  ;;  %v5498_v3 = vadd.f32 1.0, %v6577_v0  ;;  %6580 = vpow2.f32 %v6201_v62 }
 0xee6   :  { %v5517_v51 = vadd.f32 1.0, %v6579_v5 }
 0xee7   :  { %6582 = vrcp.f32 %v5498_v3  ;;  %v5510_v8 = vand.u32 2147483648, %v5498_v3  ;;  %v5508_v32 = vand.u32 2147483647, %v5498_v3  ;;  %vm5504_vm13 = vweird.f32 %v5498_v3 }
 0xee8   :  { %6584 = vrcp.f32 %v5517_v51  ;;  %v5529_v37 = vand.u32 2147483648, %v5517_v51  ;;  %v5527_v50 = vand.u32 2147483647, %v5517_v51  ;;  %vm5523_vm15 = vweird.f32 %v5517_v51 }
 0xee9   :  { %v5511_v57 = vor.u32 1.1754944e-38, %v5510_v8  ;;  %vm5509_vm2 = vcmp.eq.f32.partialorder %v5508_v32, 8.507059e+37 }
 0xeea   :  { %v5530_v38 = vor.u32 1.1754944e-38, %v5529_v37  ;;  %vm5528_vm3 = vcmp.eq.f32.partialorder %v5527_v50, 8.507059e+37 }
 0xeeb   :  { %v6581_v17 = vpop.eup %6580 }
 0xeec   :  { %v5537_v63 = vadd.f32 1.0, %v6581_v17 }
 0xeed   :  { %v6583_v25 = vpop.eup %6582 }
 0xeee   :  { %v6585_v41 = vpop.eup %6584  ;;  %v5500_v4 = vmul.f32 %v6583_v25, %v5498_v3  ;;  %6586 = vrcp.f32 %v5537_v63  ;;  %vm5505_vm11 = vweird.f32 %v6583_v25  ;;  %v5549_v7 = vand.u32 2147483648, %v5537_v63 }
 0xeef   :  { %v5519_v20 = vmul.f32 %v6585_v41, %v5517_v51  ;;  %6588 = vtanh.f32 %v5473_v15  ;;  %vm5524_vm12 = vweird.f32 %v6585_v41  ;;  %vm5506_vm0 = vmor %vm5504_vm13, %vm5505_vm11  ;;  %vm5543_vm6 = vweird.f32 %v5537_v63 }
 0xef0   :  { %v5501_v60 = vsub.f32 1.0, %v5500_v4  ;;  %vm5525_vm1 = vmor %vm5523_vm15, %vm5524_vm12  ;;  %v5547_v39 = vand.u32 2147483647, %v5537_v63  ;;  %v5550_v33 = vor.u32 1.1754944e-38, %v5549_v7 }
 0xef1   :  { %v5520_v1 = vsub.f32 1.0, %v5519_v20 }
 0xef2   :  { %v5502_v52 = vmul.f32 %v6583_v25, %v5501_v60  ;;  %vm5548_vm8 = vcmp.eq.f32.partialorder %v5547_v39, 8.507059e+37 }
 0xef3   :  { %v5521_v21 = vmul.f32 %v6585_v41, %v5520_v1 }
 0xef4   :  { %v6587_v2 = vpop.eup %6586  ;;  %v5503_v36 = vadd.f32 %v6583_v25, %v5502_v52 }
 0xef5   :  { %v5522_v46 = vadd.f32 %v6585_v41, %v5521_v21  ;;  %v5539_v18 = vmul.f32 %v6587_v2, %v5537_v63  ;;  %v6589_v49 = vpop.eup %6588  ;;  %vm5544_vm5 = vweird.f32 %v6587_v2  ;;  %v4556_v63 = vadd.f32 %v8838_v56, %v8948_v12 }
 0xef6   :  { %v5507_v58 = vsel %vm5506_vm0, %v6583_v25, %v5503_v36  ;;  %vm5545_vm7 = vmor %vm5543_vm6, %vm5544_vm5 }
 0xef7   :  { %v5512_v16 = vsel %vm5509_vm2, %v5511_v57, %v5507_v58  ;;  %v5526_v11 = vsel %vm5525_vm1, %v6585_v41, %v5522_v46  ;;  %v5540_v43 = vsub.f32 1.0, %v5539_v18 }
 0xef8   :  { %v5531_v19 = vsel %vm5528_vm3, %v5530_v38, %v5526_v11  ;;  %v5554_v48 = vmul.f32 %v6589_v49, %v5512_v16 }
 0xef9   :  { %v5553_v53 = vmul.f32 %v5531_v19, %v8767_v59  ;;  %v5541_v40 = vmul.f32 %v6587_v2, %v5540_v43  ;;  %v8817_v59 = vld [vmem:[%s8884_s9] ss:$0 sm:$0xff] }
 0xefa   :  { %v4516_v28 = vadd.f32 %v8817_v59, %v8945_v9 }
 0xefb   :  { %v8803_v42 = vadd.f32 %v5554_v48, %v5553_v53  ;;  %v5542_v30 = vadd.f32 %v6587_v2, %v5541_v40 }
 0xefd   :  { %6590 = vtanh.f32 %v8803_v42  ;;  %v5546_v54 = vsel %vm5545_vm7, %v6587_v2, %v5542_v30 }
 0xefe   :  { %v5551_v24 = vsel %vm5548_vm8, %v5550_v33, %v5546_v54 }
 0xf03   :  { %v6591_v47 = vpop.eup %6590 }
 0xf04   :  { %v5557_v34 = vmul.f32 %v6591_v47, %v5551_v24 }
 0xf06   :  { %6202 = vmatmul.msk.f32.vlgmr.msra.gmra.mxu0 %vm856_vm14, %v5557_v34  ;;  %5867 = vst.msk [vmem:[%s8885_s10 + $0xa] sm:$0x3] %vm2057_vm4, %v5557_v34  ;;  %6203 = vmatmul.msk.f32.vlgmr.msra.gmra.mxu1 %vm856_vm14, %v5557_v34 }
 0xf07   :  { %6204 = vmatmul.msk.f32.vlgmr.msra.gmra.mxu2 %vm856_vm14, %v5557_v34  ;;  %6205 = vmatmul.msk.f32.vlgmr.msra.gmra.mxu3 %vm856_vm14, %v5557_v34 }
 0xf83   :  { %v5578_v44 = vpop.f32.mrf.mxu0  ;;  %v5599_v26 = vpop.f32.mrf.mxu1 }
 0xf84   :  { %v5581_v55 = vadd.f32 %v5578_v44, %v4516_v28  ;;  %v5602_v22 = vadd.f32 %v5599_v26, %v4536_v6  ;;  %v8950_v6 = vld [vmem:[#allocation26_spill] sm:$0xff] }
 0xf85   :  { %v4619_v44 = vadd.f32 %v8824_v23, %v8950_v6 }
 0xf86   :  { %v6206_v35 = vmul.f32 -1.442695, %v5581_v55  ;;  %v6207_v31 = vmul.f32 -1.442695, %v5602_v22 }
 0xf88   :  { %6592 = vpow2.f32 %v6206_v35 }
 0xf89   :  { %6594 = vpow2.f32 %v6207_v31 }
 0xf8a   :  { %v5641_v45 = vpop.f32.mrf.mxu3  ;;  %v5620_v13 = vpop.f32.mrf.mxu2 }
 0xf8b   :  { %v5644_v29 = vadd.f32 %v5641_v45, %v4576_v27  ;;  %v5623_v41 = vadd.f32 %v5620_v13, %v4556_v63  ;;  %v8951_v27 = vld [vmem:[#allocation27_spill] sm:$0xff] }
 0xf8c   :  { %v4659_v45 = vadd.f32 %v8831_v10, %v8951_v27 }
 0xf8d   :  { %v6208_v62 = vmul.f32 -1.442695, %v5644_v29 }
 0xf8e   :  { %v6593_v0 = vpop.eup %6592 }
 0xf8f   :  { %v6595_v5 = vpop.eup %6594  ;;  %v5648_v3 = vadd.f32 1.0, %v6593_v0  ;;  %6596 = vpow2.f32 %v6208_v62 }
 0xf90   :  { %v5667_v51 = vadd.f32 1.0, %v6595_v5 }
 0xf91   :  { %6598 = vrcp.f32 %v5648_v3  ;;  %v5660_v37 = vand.u32 2147483648, %v5648_v3  ;;  %v5658_v21 = vand.u32 2147483647, %v5648_v3  ;;  %vm5654_vm11 = vweird.f32 %v5648_v3 }
 0xf92   :  { %6600 = vrcp.f32 %v5667_v51  ;;  %v5679_v52 = vand.u32 2147483648, %v5667_v51  ;;  %v5677_v2 = vand.u32 2147483647, %v5667_v51  ;;  %vm5673_vm12 = vweird.f32 %v5667_v51 }
 0xf93   :  { %v5661_v46 = vor.u32 1.1754944e-38, %v5660_v37  ;;  %vm5659_vm0 = vcmp.eq.f32.partialorder %v5658_v21, 8.507059e+37 }
 0xf94   :  { %v5680_v58 = vor.u32 1.1754944e-38, %v5679_v52  ;;  %vm5678_vm1 = vcmp.eq.f32.partialorder %v5677_v2, 8.507059e+37 }
 0xf95   :  { %v6597_v17 = vpop.eup %6596 }
 0xf96   :  { %v5687_v25 = vadd.f32 1.0, %v6597_v17  ;;  %v8952_v17 = vld [vmem:[#allocation28_spill] sm:$0xff] }
 0xf97   :  { %v6599_v15 = vpop.eup %6598  ;;  %v4639_v12 = vadd.f32 %v8838_v56, %v8952_v17 }
 0xf98   :  { %v6601_v4 = vpop.eup %6600  ;;  %v5650_v20 = vmul.f32 %v6599_v15, %v5648_v3  ;;  %6602 = vrcp.f32 %v5687_v25  ;;  %vm5655_vm9 = vweird.f32 %v6599_v15  ;;  %v5699_v54 = vand.u32 2147483648, %v5687_v25 }
 0xf99   :  { %v5669_v60 = vmul.f32 %v6601_v4, %v5667_v51  ;;  %6604 = vtanh.f32 %v5623_v41  ;;  %vm5674_vm10 = vweird.f32 %v6601_v4  ;;  %vm5656_vm13 = vmor %vm5654_vm11, %vm5655_vm9  ;;  %vm5693_vm3 = vweird.f32 %v5687_v25 }
 0xf9a   :  { %v5651_v1 = vsub.f32 1.0, %v5650_v20  ;;  %vm5675_vm15 = vmor %vm5673_vm12, %vm5674_vm10  ;;  %v5697_v33 = vand.u32 2147483647, %v5687_v25  ;;  %v5700_v24 = vor.u32 1.1754944e-38, %v5699_v54 }
 0xf9b   :  { %v5670_v8 = vsub.f32 1.0, %v5669_v60 }
 0xf9c   :  { %v5652_v32 = vmul.f32 %v6599_v15, %v5651_v1  ;;  %vm5698_vm6 = vcmp.eq.f32.partialorder %v5697_v33, 8.507059e+37 }
 0xf9d   :  { %v5671_v50 = vmul.f32 %v6601_v4, %v5670_v8 }
 0xf9e   :  { %v6603_v36 = vpop.eup %6602  ;;  %v5653_v57 = vadd.f32 %v6599_v15, %v5652_v32 }
 0xf9f   :  { %v5672_v18 = vadd.f32 %v6601_v4, %v5671_v50  ;;  %v5689_v38 = vmul.f32 %v6603_v36, %v5687_v25  ;;  %v6605_v16 = vpop.eup %6604  ;;  %vm5694_vm2 = vweird.f32 %v6603_v36 }
 0xfa0   :  { %v5657_v49 = vsel %vm5656_vm13, %v6599_v15, %v5653_v57  ;;  %vm5695_vm5 = vmor %vm5693_vm3, %vm5694_vm2 }
 0xfa1   :  { %v5662_v11 = vsel %vm5659_vm0, %v5661_v46, %v5657_v49  ;;  %v5676_v43 = vsel %vm5675_vm15, %v6601_v4, %v5672_v18  ;;  %v5690_v19 = vsub.f32 1.0, %v5689_v38 }
 0xfa2   :  { %v5681_v48 = vsel %vm5678_vm1, %v5680_v58, %v5676_v43  ;;  %v5704_v53 = vmul.f32 %v6605_v16, %v5662_v11 }
 0xfa3   :  { %v5703_v40 = vmul.f32 %v5681_v48, %v8803_v42  ;;  %v5691_v30 = vmul.f32 %v6603_v36, %v5690_v19  ;;  %v8949_v42 = vld [vmem:[#allocation25_spill] sm:$0xff] }
 0xfa4   :  { %v4599_v61 = vadd.f32 %v8817_v59, %v8949_v42 }
 0xfa5   :  { %v8843_v7 = vadd.f32 %v5704_v53, %v5703_v40  ;;  %v5692_v39 = vadd.f32 %v6603_v36, %v5691_v30 }
 0xfa7   :  { %6606 = vtanh.f32 %v8843_v7  ;;  %v5696_v47 = vsel %vm5695_vm5, %v6603_v36, %v5692_v39 }
 0xfa8   :  { %v5701_v9 = vsel %vm5698_vm6, %v5700_v24, %v5696_v47 }
 0xfad   :  { %v6607_v34 = vpop.eup %6606 }
 0xfae   :  { %v5707_v28 = vmul.f32 %v6607_v34, %v5701_v9 }
 0xfb0   :  { %6209 = vmatmul.msk.f32.vlgmr.msrb.gmra.mxu0 %vm856_vm14, %v5707_v28  ;;  %5868 = vst.msk [vmem:[%s8885_s10 + $0xc] sm:$0x3] %vm2057_vm4, %v5707_v28  ;;  %6210 = vmatmul.msk.f32.vlgmr.msrb.gmra.mxu1 %vm856_vm14, %v5707_v28 }
 0xfb1   :  { %6211 = vmatmul.msk.f32.vlgmr.msrb.gmra.mxu2 %vm856_vm14, %v5707_v28  ;;  %6212 = vmatmul.msk.f32.vlgmr.msrb.gmra.mxu3 %vm856_vm14, %v5707_v28 }
0x102d   :  { %v5728_v26 = vpop.f32.mrf.mxu0  ;;  %v5749_v55 = vpop.f32.mrf.mxu1 }
0x102e   :  { %v5731_v22 = vadd.f32 %v5728_v26, %v4599_v61  ;;  %v5752_v35 = vadd.f32 %v5749_v55, %v4619_v44 }
0x1030   :  { %v6213_v31 = vmul.f32 -1.442695, %v5731_v22  ;;  %v6214_v14 = vmul.f32 -1.442695, %v5752_v35 }
0x1032   :  { %6608 = vpow2.f32 %v6213_v31 }
0x1033   :  { %6610 = vpow2.f32 %v6214_v14 }
0x1034   :  { %v5791_v29 = vpop.f32.mrf.mxu3  ;;  %v5770_v23 = vpop.f32.mrf.mxu2 }
0x1035   :  { %v5794_v62 = vadd.f32 %v5791_v29, %v4659_v45  ;;  %v5773_v15 = vadd.f32 %v5770_v23, %v4639_v12 }
0x1037   :  { %v6215_v0 = vmul.f32 -1.442695, %v5794_v62 }
0x1038   :  { %v6609_v5 = vpop.eup %6608 }
0x1039   :  { %v6611_v3 = vpop.eup %6610  ;;  %v5798_v59 = vadd.f32 1.0, %v6609_v5  ;;  %6612 = vpow2.f32 %v6215_v0 }
0x103a   :  { %v5817_v51 = vadd.f32 1.0, %v6611_v3 }
0x103b   :  { %6614 = vrcp.f32 %v5798_v59  ;;  %v5810_v1 = vand.u32 2147483648, %v5798_v59  ;;  %v5808_v52 = vand.u32 2147483647, %v5798_v59  ;;  %vm5804_vm8 = vweird.f32 %v5798_v59 }
0x103c   :  { %6616 = vrcp.f32 %v5817_v51  ;;  %v5829_v8 = vand.u32 2147483648, %v5817_v51  ;;  %v5827_v21 = vand.u32 2147483647, %v5817_v51  ;;  %vm5823_vm9 = vweird.f32 %v5817_v51 }
0x103d   :  { %v5811_v2 = vor.u32 1.1754944e-38, %v5810_v1  ;;  %vm5809_vm12 = vcmp.eq.f32.partialorder %v5808_v52, 8.507059e+37 }
0x103e   :  { %v5830_v46 = vor.u32 1.1754944e-38, %v5829_v8  ;;  %vm5828_vm13 = vcmp.eq.f32.partialorder %v5827_v21, 8.507059e+37 }
0x103f   :  { %v6613_v13 = vpop.eup %6612 }
0x1040   :  { %v5837_v63 = vadd.f32 1.0, %v6613_v13 }
0x1041   :  { %v6615_v25 = vpop.eup %6614 }
0x1042   :  { %v6617_v10 = vpop.eup %6616  ;;  %v5800_v41 = vmul.f32 %v6615_v25, %v5798_v59  ;;  %6618 = vrcp.f32 %v5837_v63  ;;  %vm5805_vm14 = vweird.f32 %v6615_v25  ;;  %v5849_v30 = vand.u32 2147483648, %v5837_v63 }
0x1043   :  { %v5819_v4 = vmul.f32 %v6617_v10, %v5817_v51  ;;  %6620 = vtanh.f32 %v5773_v15  ;;  %vm5824_vm7 = vweird.f32 %v6617_v10  ;;  %vm5806_vm10 = vmor %vm5804_vm8, %vm5805_vm14  ;;  %vm5843_vm0 = vweird.f32 %v5837_v63 }
0x1044   :  { %v5801_v20 = vsub.f32 1.0, %v5800_v41  ;;  %vm5825_vm11 = vmor %vm5823_vm9, %vm5824_vm7  ;;  %v5847_v39 = vand.u32 2147483647, %v5837_v63  ;;  %v5850_v33 = vor.u32 1.1754944e-38, %v5849_v30 }
0x1045   :  { %v5820_v60 = vsub.f32 1.0, %v5819_v4 }
0x1046   :  { %v5802_v37 = vmul.f32 %v6615_v25, %v5801_v20  ;;  %vm5848_vm2 = vcmp.eq.f32.partialorder %v5847_v39, 8.507059e+37 }
0x1047   :  { %v5821_v32 = vmul.f32 %v6617_v10, %v5820_v60 }
0x1048   :  { %v6619_v50 = vpop.eup %6618  ;;  %v5803_v56 = vadd.f32 %v6615_v25, %v5802_v37 }
0x1049   :  { %v5822_v36 = vadd.f32 %v6617_v10, %v5821_v32  ;;  %v5839_v57 = vmul.f32 %v6619_v50, %v5837_v63  ;;  %v6621_v38 = vpop.eup %6620  ;;  %vm5844_vm15 = vweird.f32 %v6619_v50 }
0x104a   :  { %v5807_v18 = vsel %vm5806_vm10, %v6615_v25, %v5803_v56  ;;  %vm5845_vm1 = vmor %vm5843_vm0, %vm5844_vm15 }
0x104b   :  { %v5812_v58 = vsel %vm5809_vm12, %v5811_v2, %v5807_v18  ;;  %v5826_v49 = vsel %vm5825_vm11, %v6617_v10, %v5822_v36  ;;  %v5840_v16 = vsub.f32 1.0, %v5839_v57 }
0x104c   :  { %v5831_v11 = vsel %vm5828_vm13, %v5830_v46, %v5826_v49  ;;  %v5854_v43 = vmul.f32 %v6621_v38, %v5812_v58 }
0x104d   :  { %v5853_v19 = vmul.f32 %v5831_v11, %v8843_v7  ;;  %v5841_v48 = vmul.f32 %v6619_v50, %v5840_v16 }
0x104f   :  { %v5855_v53 = vadd.f32 %v5854_v43, %v5853_v19  ;;  %v5842_v40 = vadd.f32 %v6619_v50, %v5841_v48 }
0x1051   :  { %6622 = vtanh.f32 %v5855_v53  ;;  %5861 = vst.msk [vmem:[#allocation12 + $0x4] sm:$0x3] %vm2057_vm4, %v5855_v53  ;;  %v5846_v54 = vsel %vm5845_vm1, %v6619_v50, %v5842_v40 }
0x1052   :  { %5897 = dma.vmem_to_hbm [thread:$0]  %s5890_s30, 96, %s5892_s1, [#allocation13], %s6871_s17, %s6871_s17, %s6872_s4   ;;  %v5851_v47 = vsel %vm5848_vm2, %v5850_v33, %v5846_v54 }
0x1057   :  { %v6623_v7 = vpop.eup %6622 }
0x1058   :  { %v5857_v24 = vmul.f32 %v6623_v7, %v5851_v47 }
0x105a   :  { %5869 = vst.msk [vmem:[%s8885_s10 + $0xe] sm:$0x3] %vm2057_vm4, %v5857_v24 }
0x105b   :  { %5859 = vst.msk [vmem:[#allocation11 + $0x4] sm:$0x3] %vm2057_vm4, %v5857_v24 }
0x105c   :  { %5884 = dma.vmem_to_hbm [thread:$0]  %s5877_s18, 96, %s5879_s20, [#allocation4], %s6871_s17, %s6871_s17, %s6872_s4  }
0x105d   :  { %6858 = dma.done.wait [#allocation4], 96  }
0x105e   :  { %6859 = vsyncadd [#allocation4], 4294967200 }
0x105f   :  { %6860 = dma.done.wait [#allocation13], 96  }
0x1060   :  { %6861 = vsyncadd [#allocation13], 4294967200 }
0x1061   :  { %5908 = vsyncpa [#allocation3], 1 }
0x1062   :  { %5909 = vsyncpa [#allocation6], 1 }
0x1063   :  { %5910 = vsyncpa [#allocation9], 1 }
0x1064   :  { %5911 = vsyncpa [#allocation4], 1 }
0x1065   :  { %5912 = vsyncpa [#allocation13], 1 }

</bundles_post_ra>
